<compile_context>
chip_gen: v7x
topology: tpu7x:2x2x1
jax: 0.10.0
libtpu: 0.0.40
codegen_flags: <defaults>
</compile_context>

<pallas_src>
import numpy as np
import jax
import jax.numpy as jnp
from jax import lax
from jax.experimental import pallas as pl
from jax.experimental.pallas import tpu as pltpu

EPS = 1e-5  # PyTorch BatchNorm2d default eps


# ---------------------------------------------------------------------------
# Row-tile selection: TRC coarse rows per grid step -> TRF = 2*TRC fine output rows.
# Aim for an MXU M dimension (TRF * 2W) of at least 256 while keeping tile VMEM modest.
# ---------------------------------------------------------------------------
def _pick_coarse_row_tile(h, fine_w, cd, cx, cout):
    divisors = [t for t in range(1, h + 1) if h % t == 0]

    def tile_bytes(trc):
        trf = 2 * trc
        halo = (trf + 2) * (fine_w + 2)
        return (halo * (cd + cx) * 2                 # db + fb padded tile scratch (bf16)
                + 2 * trf * fine_w * cd * 2          # double-buffered D block (bf16)
                + 2 * trf * fine_w * cout * 4        # double-buffered output block (f32)
                + trf * fine_w * cout * 4)           # f32 accumulator

    budget = 8 * 1024 * 1024
    good = [t for t in divisors if 2 * t * fine_w >= 256 and tile_bytes(t) <= budget]
    if good:
        return good[0]
    fitting = [t for t in divisors if tile_bytes(t) <= budget]
    return fitting[-1] if fitting else 1


# ---------------------------------------------------------------------------
# Fused kernel: bilinear x2 upsample of x (in VMEM) + 3x3 conv over [D, F_up] + folded BN + ReLU.
# One grid step = one batch element x one row tile of TRF output rows.
# ---------------------------------------------------------------------------
def _make_fused_kernel(h, w, trc, cd, cx, cout):
    trf = 2 * trc          # fine output rows per tile
    w2 = 2 * w             # fine width
    fh = 2 * h             # fine height

    def kernel(x_ref, d_ref, d_hbm, wd_ref, wx_ref, bias_ref, o_ref, db, fb, hs, sem):
        b = pl.program_id(0)
        t = pl.program_id(1)
        c0 = t * trc                         # first coarse row of this tile
        r0 = t * trf                         # first fine (output) row of this tile

        # ---- D halo rows (fine rows r0-1 and r0+trf): async DMA, overlapped with the upsample ----
        top_row = jnp.maximum(r0 - 1, 0)               # clamped; out-of-image rows are masked later
        bot_row = jnp.minimum(r0 + trf, fh - 1)
        cp_top = pltpu.make_async_copy(d_hbm.at[b, pl.ds(top_row, 1)], hs.at[pl.ds(0, 1)], sem.at[0])
        cp_bot = pltpu.make_async_copy(d_hbm.at[b, pl.ds(bot_row, 1)], hs.at[pl.ds(1, 1)], sem.at[1])
        cp_top.start()
        cp_bot.start()

        # ---- fused bilinear x2 upsample (exact align_corners=False weights, f32 VPU lerps) ----
        # coarse window rows c0-1 .. c0+trc, edge-clamped
        top = x_ref[pl.ds(jnp.maximum(c0 - 1, 0), 1)]
        mid = x_ref[pl.ds(c0, trc)]
        bot = x_ref[pl.ds(jnp.minimum(c0 + trc, h - 1), 1)]
        xw = jnp.concatenate([top, mid, bot], axis=0)                       # (trc+2, w, cx)

        xl = jnp.concatenate([xw[:, :1], xw[:, :-1]], axis=1)               # left neighbor (clamped)
        xr = jnp.concatenate([xw[:, 1:], xw[:, -1:]], axis=1)               # right neighbor (clamped)
        col_e = 0.25 * xl + 0.75 * xw                                       # fine col 2k
        col_o = 0.75 * xw + 0.25 * xr                                       # fine col 2k+1
        ci = jnp.stack([col_e, col_o], axis=2).reshape(trc + 2, w2, cx)     # interleaved fine cols

        u = ci[:-1]                                                         # coarse row i-1 plane
        v = ci[1:]                                                          # coarse row i   plane
        e_rows = 0.25 * u + 0.75 * v                                        # fine rows 2i   (i = c0..c0+trc)
        o_rows = 0.75 * u + 0.25 * v                                        # fine rows 2i+1 (i = c0-1..c0+trc-1)
        # buffer row k holds fine row (r0-1+k); odd row first, then even, alternating
        fup = jnp.stack([o_rows, e_rows], axis=1).reshape(trf + 2, w2, cx)
        fine_row = lax.broadcasted_iota(jnp.int32, (trf + 2, 1, 1), 0) + (r0 - 1)
        fup = jnp.where((fine_row >= 0) & (fine_row < fh), fup, 0.0)        # conv zero-pad rows

        # F_up tile buffer with 1-px zero halo columns (never materialized in HBM)
        fb[:, 1:w2 + 1, :] = fup.astype(jnp.bfloat16)
        fb[:, 0:1, :] = jnp.zeros((trf + 2, 1, cx), jnp.bfloat16)
        fb[:, w2 + 1:w2 + 2, :] = jnp.zeros((trf + 2, 1, cx), jnp.bfloat16)

        # ---- D tile buffer: bulk rows from the auto-pipelined block, halo rows from the DMA ----
        db[1:trf + 1, 1:w2 + 1, :] = d_ref[...]
        db[:, 0:1, :] = jnp.zeros((trf + 2, 1, cd), jnp.bfloat16)
        db[:, w2 + 1:w2 + 2, :] = jnp.zeros((trf + 2, 1, cd), jnp.bfloat16)

        cp_top.wait()
        cp_bot.wait()
        db[0:1, 1:w2 + 1, :] = hs[0:1]
        db[trf + 1:trf + 2, 1:w2 + 1, :] = hs[1:2]

        # ---- 9-tap conv accumulation on the MXU: M = trf*w2 rows per dot, f32 accumulator ----
        m = trf * w2
        acc = jnp.zeros((m, cout), jnp.float32)
        for kh in range(3):
            if kh == 1:
                ok = None
            else:
                # only the kh=0 tap of the first tile / kh=2 tap of the last tile can touch a row
                # outside the image; zero those rows (conv zero padding).
                rid = lax.broadcasted_iota(jnp.int32, (trf, 1, 1), 0) + (r0 - 1 + kh)
                ok = (rid >= 0) & (rid < fh)
            for kw in range(3):
                dsl = db[kh:kh + trf, kw:kw + w2, :]
                if ok is not None:
                    dsl = jnp.where(ok, dsl, jnp.zeros_like(dsl))
                fsl = fb[kh:kh + trf, kw:kw + w2, :]
                acc = acc + jnp.dot(dsl.reshape(m, cd), wd_ref[kh * 3 + kw],
                                    preferred_element_type=jnp.float32)
                acc = acc + jnp.dot(fsl.reshape(m, cx), wx_ref[kh * 3 + kw],
                                    preferred_element_type=jnp.float32)

        # ---- epilogue (once per tile): BN bias (scale already folded into weights) + ReLU ----
        y = jnp.maximum(acc + bias_ref[...], 0.0)
        o_ref[...] = y.reshape(trf, w2, cout).astype(o_ref.dtype)

    return kernel


def fused_upsample_conv_bn_relu(x, d, wd, wx, bias):
    """x: (N, H, W, Cx) f32 coarse feature; d: (N, 2H, 2W, Cd) bf16 detail feature."""
    n, h, w, cx = x.shape
    n2, fh, fw, cd = d.shape
    assert n2 == n and fh == 2 * h and fw == 2 * w, (x.shape, d.shape)
    cout = wd.shape[-1]

    trc = _pick_coarse_row_tile(h, fw, cd, cx, cout)
    trf = 2 * trc
    n_tiles = h // trc
    kernel = _make_fused_kernel(h, w, trc, cd, cx, cout)

    return pl.pallas_call(
        kernel,
        out_shape=jax.ShapeDtypeStruct((n, fh, fw, cout), jnp.float32),
        grid=(n, n_tiles),
        in_specs=[
            pl.BlockSpec((None, h, w, cx), lambda b, t: (b, 0, 0, 0)),      # coarse x, resident per batch
            pl.BlockSpec((None, trf, fw, cd), lambda b, t: (b, t, 0, 0)),   # D bulk rows, auto-pipelined
            pl.BlockSpec(memory_space=pl.ANY),                              # D in HBM (halo-row DMA source)
            pl.BlockSpec((9, cd, cout), lambda b, t: (0, 0, 0)),            # folded conv weight, D part
            pl.BlockSpec((9, cx, cout), lambda b, t: (0, 0, 0)),            # folded conv weight, F_up part
            pl.BlockSpec((1, cout), lambda b, t: (0, 0)),                   # folded BN bias
        ],
        out_specs=pl.BlockSpec((None, trf, fw, cout), lambda b, t: (b, t, 0, 0)),
        scratch_shapes=[
            pltpu.VMEM((trf + 2, fw + 2, cd), jnp.bfloat16),   # padded D tile (+1 px halo)
            pltpu.VMEM((trf + 2, fw + 2, cx), jnp.bfloat16),   # padded F_up tile (+1 px halo)
            pltpu.VMEM((2, fw, cd), jnp.bfloat16),             # D halo-row DMA landing buffer
            pltpu.SemaphoreType.DMA((2,)),
        ],
        compiler_params=pltpu.CompilerParams(
            dimension_semantics=("parallel", "parallel"),
            vmem_limit_bytes=48 * 1024 * 1024,
        ),
    )(x, d, d, wd, wx, bias)


# ---------------------------------------------------------------------------
# Parameter handling (PyTorch-style params -> kernel-ready layout, BN folded once, in f32)
# ---------------------------------------------------------------------------
def init_fusion_block_params(key, *, d_chans, x_chans, out_chans):
    """PyTorch-style Fusion_Block params: Conv2d(out, d+x, 3, bias=False) + BatchNorm2d (eval)."""
    cin = d_chans + x_chans
    ks = jax.random.split(key, 5)
    return {
        "conv_w": jax.random.normal(ks[0], (out_chans, cin, 3, 3), jnp.float32) / np.sqrt(9.0 * cin),
        "gamma": 1.0 + 0.1 * jax.random.normal(ks[1], (out_chans,), jnp.float32),
        "beta": 0.1 * jax.random.normal(ks[2], (out_chans,), jnp.float32),
        "mean": 0.1 * jax.random.normal(ks[3], (out_chans,), jnp.float32),
        "var": 0.5 + jax.random.uniform(ks[4], (out_chans,), jnp.float32),
        "d_chans": d_chans,
    }


def prepare_fusion_params(p):
    """Fold BN (eval) scale into the conv weight in f32, split D / F_up channels, cast to bf16."""
    cd = p["d_chans"]
    w_hwio = jnp.transpose(p["conv_w"], (2, 3, 1, 0))                 # (3, 3, cin, cout)
    cout = w_hwio.shape[-1]
    scale = p["gamma"] / jnp.sqrt(p["var"] + EPS)                     # (cout,)
    bias = p["beta"] - p["mean"] * scale
    w_folded = w_hwio * scale                                         # fold in f32 BEFORE bf16 cast
    return {
        "wd": w_folded[:, :, :cd, :].reshape(9, cd, cout).astype(jnp.bfloat16),
        "wx": w_folded[:, :, cd:, :].reshape(9, -1, cout).astype(jnp.bfloat16),
        "bias": bias.reshape(1, cout).astype(jnp.float32),
    }


# ---------------------------------------------------------------------------
# Fusion_Block forward (NCHW in / NCHW out, like the PyTorch module)
# ---------------------------------------------------------------------------
def fusion_block_forward(prepared, x_nchw, d_nchw):
    x = jnp.transpose(x_nchw, (0, 2, 3, 1)).astype(jnp.float32)       # coarse feature, kept f32
    d = jnp.transpose(d_nchw, (0, 2, 3, 1)).astype(jnp.bfloat16)      # bf16 cast fuses with transpose
    out = fused_upsample_conv_bn_relu(d=d, x=x, wd=prepared["wd"], wx=prepared["wx"],
                                      bias=prepared["bias"])
    return jnp.transpose(out, (0, 3, 1, 2))                           # NHWC -> NCHW


# ---------------------------------------------------------------------------
# Pure-JAX reference (independent math path; bf16 matmul inputs, f32 accumulation)
# ---------------------------------------------------------------------------
def _upsample2x_matrix(n):
    a = np.zeros((2 * n, n), np.float32)
    for i in range(2 * n):
        src = (i + 0.5) / 2.0 - 0.5
        i0 = int(np.floor(src))
        w1 = src - i0
        a[i, min(max(i0, 0), n - 1)] += 1.0 - w1
        a[i, min(max(i0 + 1, 0), n - 1)] += w1
    return jnp.asarray(a)


def _ref_upsample2x(x):
    n, h, w, c = x.shape
    ah = _upsample2x_matrix(h)
    aw = _upsample2x_matrix(w)
    y = jnp.einsum("ph,nhwc->npwc", ah, x, precision=lax.Precision.HIGHEST)
    return jnp.einsum("qw,npwc->npqc", aw, y, precision=lax.Precision.HIGHEST)


def ref_fusion_block(p, x_nchw, d_nchw):
    x = jnp.transpose(x_nchw, (0, 2, 3, 1)).astype(jnp.float32)
    d = jnp.transpose(d_nchw, (0, 2, 3, 1)).astype(jnp.float32)
    f_up = _ref_upsample2x(x)
    cat = jnp.concatenate([d, f_up], axis=-1)
    w_hwio = jnp.transpose(p["conv_w"], (2, 3, 1, 0))
    y = lax.conv_general_dilated(
        cat.astype(jnp.bfloat16), w_hwio.astype(jnp.bfloat16),
        (1, 1), ((1, 1), (1, 1)),
        dimension_numbers=("NHWC", "HWIO", "NHWC"),
        preferred_element_type=jnp.float32)
    scale = p["gamma"] / jnp.sqrt(p["var"] + EPS)
    bias = p["beta"] - p["mean"] * scale
    y = jnp.maximum(y * scale + bias, 0.0)
    return jnp.transpose(y, (0, 3, 1, 2))


# ---------------------------------------------------------------------------
if __name__ == "__main__":
    key = jax.random.PRNGKey(0)
    kp, kx, kd = jax.random.split(key, 3)

    # x: coarse (ViT) feature to upsample; D: detail feature at 2x resolution.  NCHW.
    # NOTE: toy shapes (channels << 128) leave lanes idle; production ViT-Matte channel counts
    # should be used for real tuning.
    N, CX, H, W = 2, 32, 8, 8
    CD, COUT = 16, 16
    params = init_fusion_block_params(kp, d_chans=CD, x_chans=CX, out_chans=COUT)
    prepared = prepare_fusion_params(params)

    x = jax.random.normal(kx, (N, CX, H, W), jnp.float32)
    d = jax.random.normal(kd, (N, CD, 2 * H, 2 * W), jnp.float32)

    fwd = jax.jit(lambda xx, dd: fusion_block_forward(prepared, xx, dd))
    out = jax.block_until_ready(fwd(x, d))
    assert out.shape == (N, COUT, 2 * H, 2 * W), out.shape

    # Kernel folds the BN scale into bf16 weights, the reference scales the f32 accumulation:
    # the two bf16 roundings differ slightly, hence the 1e-2 tolerances.
    ref = ref_fusion_block(params, x, d)
    np.testing.assert_allclose(np.asarray(out), np.asarray(ref), rtol=1e-2, atol=1e-2)

    print("KERNEL_OK")
</pallas_src>

<mosaic_0001>
module attributes {stable_mosaic.version = 11 : i64} {
  func.func @kernel(%arg0: i32, %arg1: i32, %arg2: memref<1x8x8x32xf32, #tpu.memory_space<vmem>>, %arg3: memref<1x16x16x16xbf16, #tpu.memory_space<vmem>>, %arg4: memref<2x16x16x16xbf16, #tpu.memory_space<any>>, %arg5: memref<9x16x16xbf16, #tpu.memory_space<vmem>>, %arg6: memref<9x32x16xbf16, #tpu.memory_space<vmem>>, %arg7: memref<1x16xf32, #tpu.memory_space<vmem>>, %arg8: memref<1x16x16x16xf32, #tpu.memory_space<vmem>>, %arg9: memref<18x18x16xbf16, #tpu.memory_space<vmem>>, %arg10: memref<18x18x32xbf16, #tpu.memory_space<vmem>>, %arg11: memref<2x16x16xbf16, #tpu.memory_space<vmem>>, %arg12: memref<2x!tpu.dma_semaphore, #tpu.memory_space<semaphore_mem>>) attributes {dimension_semantics = [#tpu.dimension_semantics<parallel>, #tpu.dimension_semantics<parallel>], iteration_bounds = array<i64: 2, 1>, scalar_prefetch = 0 : i64, scratch_operands = 4 : i64, tpu.core_type = #tpu.core_type<tc>, window_params = [{transform_indices = @transform_0, window_bounds = array<i64: 1, 8, 8, 32>}, {transform_indices = @transform_1, window_bounds = array<i64: 1, 16, 16, 16>}, {}, {pipeline_mode = #tpu.pipeline_mode<synchronous>, transform_indices = @transform_3, window_bounds = array<i64: 9, 16, 16>}, {pipeline_mode = #tpu.pipeline_mode<synchronous>, transform_indices = @transform_4, window_bounds = array<i64: 9, 32, 16>}, {pipeline_mode = #tpu.pipeline_mode<synchronous>, transform_indices = @transform_5, window_bounds = array<i64: 1, 16>}, {transform_indices = @transform_6, window_bounds = array<i64: 1, 16, 16, 16>}]} {
    %c8_i32 = arith.constant 8 : i32
    %0 = arith.muli %arg1, %c8_i32 : i32
    %c16_i32 = arith.constant 16 : i32
    %1 = arith.muli %arg1, %c16_i32 : i32
    %c1_i32 = arith.constant 1 : i32
    %2 = arith.subi %1, %c1_i32 : i32
    %c0_i32 = arith.constant 0 : i32
    %3 = arith.maxsi %2, %c0_i32 : i32
    %c16_i32_0 = arith.constant 16 : i32
    %4 = arith.addi %1, %c16_i32_0 : i32
    %c15_i32 = arith.constant 15 : i32
    %5 = arith.minsi %4, %c15_i32 : i32
    %c0_i32_1 = arith.constant 0 : i32
    %c0_i32_2 = arith.constant 0 : i32
    %c0_i32_3 = arith.constant 0 : i32
    %6 = tpu.memref_slice %arg4[%arg0, %3, %c0_i32_2, %c0_i32_3] : memref<2x16x16x16xbf16, #tpu.memory_space<any>> -> memref<1x1x16x16xbf16, #tpu.memory_space<any>>
    %7 = tpu.memref_squeeze %6 : memref<1x1x16x16xbf16, #tpu.memory_space<any>> -> memref<1x16x16xbf16, #tpu.memory_space<any>>
    %c0_i32_4 = arith.constant 0 : i32
    %c0_i32_5 = arith.constant 0 : i32
    %c0_i32_6 = arith.constant 0 : i32
    %8 = tpu.memref_slice %arg11[%c0_i32_4, %c0_i32_5, %c0_i32_6] : memref<2x16x16xbf16, #tpu.memory_space<vmem>> -> memref<1x16x16xbf16, #tpu.memory_space<vmem>>
    %9 = tpu.memref_slice %arg12[%c0_i32_1] : memref<2x!tpu.dma_semaphore, #tpu.memory_space<semaphore_mem>> -> memref<1x!tpu.dma_semaphore, #tpu.memory_space<semaphore_mem>>
    %10 = tpu.memref_squeeze %9 : memref<1x!tpu.dma_semaphore, #tpu.memory_space<semaphore_mem>> -> memref<!tpu.dma_semaphore, #tpu.memory_space<semaphore_mem>>
    tpu.enqueue_dma source(%7 : memref<1x16x16xbf16, #tpu.memory_space<any>>) target(%8 : memref<1x16x16xbf16, #tpu.memory_space<vmem>>) target_semaphore(%10 : memref<!tpu.dma_semaphore, #tpu.memory_space<semaphore_mem>>)
    %c1_i32_7 = arith.constant 1 : i32
    %c0_i32_8 = arith.constant 0 : i32
    %c0_i32_9 = arith.constant 0 : i32
    %11 = tpu.memref_slice %arg4[%arg0, %5, %c0_i32_8, %c0_i32_9] : memref<2x16x16x16xbf16, #tpu.memory_space<any>> -> memref<1x1x16x16xbf16, #tpu.memory_space<any>>
    %12 = tpu.memref_squeeze %11 : memref<1x1x16x16xbf16, #tpu.memory_space<any>> -> memref<1x16x16xbf16, #tpu.memory_space<any>>
    %c1_i32_10 = arith.constant 1 : i32
    %c0_i32_11 = arith.constant 0 : i32
    %c0_i32_12 = arith.constant 0 : i32
    %13 = tpu.memref_slice %arg11[%c1_i32_10, %c0_i32_11, %c0_i32_12] : memref<2x16x16xbf16, #tpu.memory_space<vmem>> -> memref<1x16x16xbf16, #tpu.memory_space<vmem>>
    %14 = tpu.memref_slice %arg12[%c1_i32_7] : memref<2x!tpu.dma_semaphore, #tpu.memory_space<semaphore_mem>> -> memref<1x!tpu.dma_semaphore, #tpu.memory_space<semaphore_mem>>
    %15 = tpu.memref_squeeze %14 : memref<1x!tpu.dma_semaphore, #tpu.memory_space<semaphore_mem>> -> memref<!tpu.dma_semaphore, #tpu.memory_space<semaphore_mem>>
    tpu.enqueue_dma source(%12 : memref<1x16x16xbf16, #tpu.memory_space<any>>) target(%13 : memref<1x16x16xbf16, #tpu.memory_space<vmem>>) target_semaphore(%15 : memref<!tpu.dma_semaphore, #tpu.memory_space<semaphore_mem>>)
    %c1_i32_13 = arith.constant 1 : i32
    %16 = arith.subi %0, %c1_i32_13 : i32
    %c0_i32_14 = arith.constant 0 : i32
    %17 = arith.maxsi %16, %c0_i32_14 : i32
    %c0 = arith.constant 0 : index
    %18 = arith.index_cast %17 : i32 to index
    %c0_15 = arith.constant 0 : index
    %c0_16 = arith.constant 0 : index
    %19 = vector.load %arg2[%c0, %18, %c0_15, %c0_16] : memref<1x8x8x32xf32, #tpu.memory_space<vmem>>, vector<1x1x8x32xf32>
    %20 = vector.shape_cast %19 : vector<1x1x8x32xf32> to vector<1x8x32xf32>
    %c0_17 = arith.constant 0 : index
    %21 = arith.index_cast %0 : i32 to index
    %c0_18 = arith.constant 0 : index
    %c0_19 = arith.constant 0 : index
    %22 = vector.load %arg2[%c0_17, %21, %c0_18, %c0_19] : memref<1x8x8x32xf32, #tpu.memory_space<vmem>>, vector<1x8x8x32xf32>
    %23 = vector.shape_cast %22 : vector<1x8x8x32xf32> to vector<8x8x32xf32>
    %c8_i32_20 = arith.constant 8 : i32
    %24 = arith.addi %0, %c8_i32_20 : i32
    %c7_i32 = arith.constant 7 : i32
    %25 = arith.minsi %24, %c7_i32 : i32
    %c0_21 = arith.constant 0 : index
    %26 = arith.index_cast %25 : i32 to index
    %c0_22 = arith.constant 0 : index
    %c0_23 = arith.constant 0 : index
    %27 = vector.load %arg2[%c0_21, %26, %c0_22, %c0_23] : memref<1x8x8x32xf32, #tpu.memory_space<vmem>>, vector<1x1x8x32xf32>
    %28 = vector.shape_cast %27 : vector<1x1x8x32xf32> to vector<1x8x32xf32>
    %29 = tpu.concatenate %20, %23, %28 in 0 : vector<1x8x32xf32>, vector<8x8x32xf32>, vector<1x8x32xf32> -> vector<10x8x32xf32>
    %30 = vector.extract_strided_slice %29 {offsets = [0, 0, 0], sizes = [10, 1, 32], strides = [1, 1, 1]} : vector<10x8x32xf32> to vector<10x1x32xf32>
    %31 = vector.extract_strided_slice %29 {offsets = [0, 0, 0], sizes = [10, 7, 32], strides = [1, 1, 1]} : vector<10x8x32xf32> to vector<10x7x32xf32>
    %32 = tpu.concatenate %30, %31 in 1 : vector<10x1x32xf32>, vector<10x7x32xf32> -> vector<10x8x32xf32>
    %33 = vector.extract_strided_slice %29 {offsets = [0, 1, 0], sizes = [10, 7, 32], strides = [1, 1, 1]} : vector<10x8x32xf32> to vector<10x7x32xf32>
    %34 = vector.extract_strided_slice %29 {offsets = [0, 7, 0], sizes = [10, 1, 32], strides = [1, 1, 1]} : vector<10x8x32xf32> to vector<10x1x32xf32>
    %35 = tpu.concatenate %33, %34 in 1 : vector<10x7x32xf32>, vector<10x1x32xf32> -> vector<10x8x32xf32>
    %cst = arith.constant 2.500000e-01 : f32
    %36 = vector.broadcast %cst : f32 to vector<10x8x32xf32>
    %37 = arith.mulf %36, %32 : vector<10x8x32xf32>
    %cst_24 = arith.constant 7.500000e-01 : f32
    %38 = vector.broadcast %cst_24 : f32 to vector<10x8x32xf32>
    %39 = arith.mulf %38, %29 : vector<10x8x32xf32>
    %40 = arith.addf %37, %39 : vector<10x8x32xf32>
    %cst_25 = arith.constant 7.500000e-01 : f32
    %41 = vector.broadcast %cst_25 : f32 to vector<10x8x32xf32>
    %42 = arith.mulf %41, %29 : vector<10x8x32xf32>
    %cst_26 = arith.constant 2.500000e-01 : f32
    %43 = vector.broadcast %cst_26 : f32 to vector<10x8x32xf32>
    %44 = arith.mulf %43, %35 : vector<10x8x32xf32>
    %45 = arith.addf %42, %44 : vector<10x8x32xf32>
    %46 = vector.shape_cast %40 : vector<10x8x32xf32> to vector<10x8x1x32xf32>
    %47 = vector.shape_cast %45 : vector<10x8x32xf32> to vector<10x8x1x32xf32>
    %48 = tpu.concatenate %46, %47 in 2 : vector<10x8x1x32xf32>, vector<10x8x1x32xf32> -> vector<10x8x2x32xf32>
    %49 = vector.shape_cast %48 : vector<10x8x2x32xf32> to vector<10x16x32xf32>
    %50 = vector.extract_strided_slice %49 {offsets = [0, 0, 0], sizes = [9, 16, 32], strides = [1, 1, 1]} : vector<10x16x32xf32> to vector<9x16x32xf32>
    %51 = vector.extract_strided_slice %49 {offsets = [1, 0, 0], sizes = [9, 16, 32], strides = [1, 1, 1]} : vector<10x16x32xf32> to vector<9x16x32xf32>
    %cst_27 = arith.constant 2.500000e-01 : f32
    %52 = vector.broadcast %cst_27 : f32 to vector<9x16x32xf32>
    %53 = arith.mulf %52, %50 : vector<9x16x32xf32>
    %cst_28 = arith.constant 7.500000e-01 : f32
    %54 = vector.broadcast %cst_28 : f32 to vector<9x16x32xf32>
    %55 = arith.mulf %54, %51 : vector<9x16x32xf32>
    %56 = arith.addf %53, %55 : vector<9x16x32xf32>
    %cst_29 = arith.constant 7.500000e-01 : f32
    %57 = vector.broadcast %cst_29 : f32 to vector<9x16x32xf32>
    %58 = arith.mulf %57, %50 : vector<9x16x32xf32>
    %cst_30 = arith.constant 2.500000e-01 : f32
    %59 = vector.broadcast %cst_30 : f32 to vector<9x16x32xf32>
    %60 = arith.mulf %59, %51 : vector<9x16x32xf32>
    %61 = arith.addf %58, %60 : vector<9x16x32xf32>
    %62 = vector.shape_cast %61 : vector<9x16x32xf32> to vector<9x1x16x32xf32>
    %63 = vector.shape_cast %56 : vector<9x16x32xf32> to vector<9x1x16x32xf32>
    %64 = tpu.concatenate %62, %63 in 1 : vector<9x1x16x32xf32>, vector<9x1x16x32xf32> -> vector<9x2x16x32xf32>
    %65 = vector.shape_cast %64 : vector<9x2x16x32xf32> to vector<18x16x32xf32>
    %66 = tpu.iota {dimensions = array<i32: 0>} : vector<18x1x1xi32>
    %c1_i32_31 = arith.constant 1 : i32
    %67 = arith.subi %1, %c1_i32_31 : i32
    %68 = vector.broadcast %67 : i32 to vector<18x1x1xi32>
    %69 = arith.addi %66, %68 : vector<18x1x1xi32>
    %c0_i32_32 = arith.constant 0 : i32
    %70 = vector.broadcast %c0_i32_32 : i32 to vector<18x1x1xi32>
    %71 = arith.cmpi sge, %69, %70 : vector<18x1x1xi32>
    %c16_i32_33 = arith.constant 16 : i32
    %72 = vector.broadcast %c16_i32_33 : i32 to vector<18x1x1xi32>
    %73 = arith.cmpi slt, %69, %72 : vector<18x1x1xi32>
    %74 = arith.andi %71, %73 : vector<18x1x1xi1>
    %cst_34 = arith.constant 0.000000e+00 : f32
    %75 = vector.shape_cast %74 : vector<18x1x1xi1> to vector<18x1x1xi1>
    %76 = vector.broadcast %75 : vector<18x1x1xi1> to vector<18x16x32xi1>
    %77 = vector.broadcast %cst_34 : f32 to vector<18x16x32xf32>
    %78 = arith.select %76, %65, %77 : vector<18x16x32xi1>, vector<18x16x32xf32>
    %79 = arith.truncf %78 : vector<18x16x32xf32> to vector<18x16x32xbf16>
    %c0_35 = arith.constant 0 : index
    %c1 = arith.constant 1 : index
    %c0_36 = arith.constant 0 : index
    %80 = vector.load %arg10[%c0_35, %c1, %c0_36] : memref<18x18x32xbf16, #tpu.memory_space<vmem>>, vector<18x16x32xbf16>
    tpu.vector_store %arg10[%c0_35, %c1, %c0_36], %79 {strides = array<i32>} : memref<18x18x32xbf16, #tpu.memory_space<vmem>>, vector<18x16x32xbf16>,
    %cst_37 = arith.constant 0.000000e+00 : bf16
    %81 = vector.broadcast %cst_37 : bf16 to vector<18x1x32xbf16>
    %c0_38 = arith.constant 0 : index
    %c0_39 = arith.constant 0 : index
    %c0_40 = arith.constant 0 : index
    %82 = vector.load %arg10[%c0_38, %c0_39, %c0_40] : memref<18x18x32xbf16, #tpu.memory_space<vmem>>, vector<18x1x32xbf16>
    tpu.vector_store %arg10[%c0_38, %c0_39, %c0_40], %81 {strides = array<i32>} : memref<18x18x32xbf16, #tpu.memory_space<vmem>>, vector<18x1x32xbf16>,
    %cst_41 = arith.constant 0.000000e+00 : bf16
    %83 = vector.broadcast %cst_41 : bf16 to vector<18x1x32xbf16>
    %c0_42 = arith.constant 0 : index
    %c17 = arith.constant 17 : index
    %c0_43 = arith.constant 0 : index
    %84 = vector.load %arg10[%c0_42, %c17, %c0_43] : memref<18x18x32xbf16, #tpu.memory_space<vmem>>, vector<18x1x32xbf16>
    tpu.vector_store %arg10[%c0_42, %c17, %c0_43], %83 {strides = array<i32>} : memref<18x18x32xbf16, #tpu.memory_space<vmem>>, vector<18x1x32xbf16>,
    %c0_44 = arith.constant 0 : index
    %c0_45 = arith.constant 0 : index
    %c0_46 = arith.constant 0 : index
    %c0_47 = arith.constant 0 : index
    %85 = vector.load %arg3[%c0_44, %c0_45, %c0_46, %c0_47] : memref<1x16x16x16xbf16, #tpu.memory_space<vmem>>, vector<1x16x16x16xbf16>
    %86 = vector.shape_cast %85 : vector<1x16x16x16xbf16> to vector<16x16x16xbf16>
    %c1_48 = arith.constant 1 : index
    %c1_49 = arith.constant 1 : index
    %c0_50 = arith.constant 0 : index
    %87 = vector.load %arg9[%c1_48, %c1_49, %c0_50] : memref<18x18x16xbf16, #tpu.memory_space<vmem>>, vector<16x16x16xbf16>
    tpu.vector_store %arg9[%c1_48, %c1_49, %c0_50], %86 {strides = array<i32>} : memref<18x18x16xbf16, #tpu.memory_space<vmem>>, vector<16x16x16xbf16>,
    %cst_51 = arith.constant 0.000000e+00 : bf16
    %88 = vector.broadcast %cst_51 : bf16 to vector<18x1x16xbf16>
    %c0_52 = arith.constant 0 : index
    %c0_53 = arith.constant 0 : index
    %c0_54 = arith.constant 0 : index
    %89 = vector.load %arg9[%c0_52, %c0_53, %c0_54] : memref<18x18x16xbf16, #tpu.memory_space<vmem>>, vector<18x1x16xbf16>
    tpu.vector_store %arg9[%c0_52, %c0_53, %c0_54], %88 {strides = array<i32>} : memref<18x18x16xbf16, #tpu.memory_space<vmem>>, vector<18x1x16xbf16>,
    %cst_55 = arith.constant 0.000000e+00 : bf16
    %90 = vector.broadcast %cst_55 : bf16 to vector<18x1x16xbf16>
    %c0_56 = arith.constant 0 : index
    %c17_57 = arith.constant 17 : index
    %c0_58 = arith.constant 0 : index
    %91 = vector.load %arg9[%c0_56, %c17_57, %c0_58] : memref<18x18x16xbf16, #tpu.memory_space<vmem>>, vector<18x1x16xbf16>
    tpu.vector_store %arg9[%c0_56, %c17_57, %c0_58], %90 {strides = array<i32>} : memref<18x18x16xbf16, #tpu.memory_space<vmem>>, vector<18x1x16xbf16>,
    %c0_i32_59 = arith.constant 0 : i32
    %c0_i32_60 = arith.constant 0 : i32
    %c0_i32_61 = arith.constant 0 : i32
    %92 = tpu.memref_slice %arg4[%arg0, %3, %c0_i32_60, %c0_i32_61] : memref<2x16x16x16xbf16, #tpu.memory_space<any>> -> memref<1x1x16x16xbf16, #tpu.memory_space<any>>
    %93 = tpu.memref_squeeze %92 : memref<1x1x16x16xbf16, #tpu.memory_space<any>> -> memref<1x16x16xbf16, #tpu.memory_space<any>>
    %c0_i32_62 = arith.constant 0 : i32
    %c0_i32_63 = arith.constant 0 : i32
    %c0_i32_64 = arith.constant 0 : i32
    %94 = tpu.memref_slice %arg11[%c0_i32_62, %c0_i32_63, %c0_i32_64] : memref<2x16x16xbf16, #tpu.memory_space<vmem>> -> memref<1x16x16xbf16, #tpu.memory_space<vmem>>
    %95 = tpu.memref_slice %arg12[%c0_i32_59] : memref<2x!tpu.dma_semaphore, #tpu.memory_space<semaphore_mem>> -> memref<1x!tpu.dma_semaphore, #tpu.memory_space<semaphore_mem>>
    %96 = tpu.memref_squeeze %95 : memref<1x!tpu.dma_semaphore, #tpu.memory_space<semaphore_mem>> -> memref<!tpu.dma_semaphore, #tpu.memory_space<semaphore_mem>>
    tpu.wait_dma2 semaphore(%96 : memref<!tpu.dma_semaphore, #tpu.memory_space<semaphore_mem>>) src(%93 : memref<1x16x16xbf16, #tpu.memory_space<any>>) dst(%94 : memref<1x16x16xbf16, #tpu.memory_space<vmem>>)
    %c1_i32_65 = arith.constant 1 : i32
    %c0_i32_66 = arith.constant 0 : i32
    %c0_i32_67 = arith.constant 0 : i32
    %97 = tpu.memref_slice %arg4[%arg0, %5, %c0_i32_66, %c0_i32_67] : memref<2x16x16x16xbf16, #tpu.memory_space<any>> -> memref<1x1x16x16xbf16, #tpu.memory_space<any>>
    %98 = tpu.memref_squeeze %97 : memref<1x1x16x16xbf16, #tpu.memory_space<any>> -> memref<1x16x16xbf16, #tpu.memory_space<any>>
    %c1_i32_68 = arith.constant 1 : i32
    %c0_i32_69 = arith.constant 0 : i32
    %c0_i32_70 = arith.constant 0 : i32
    %99 = tpu.memref_slice %arg11[%c1_i32_68, %c0_i32_69, %c0_i32_70] : memref<2x16x16xbf16, #tpu.memory_space<vmem>> -> memref<1x16x16xbf16, #tpu.memory_space<vmem>>
    %100 = tpu.memref_slice %arg12[%c1_i32_65] : memref<2x!tpu.dma_semaphore, #tpu.memory_space<semaphore_mem>> -> memref<1x!tpu.dma_semaphore, #tpu.memory_space<semaphore_mem>>
    %101 = tpu.memref_squeeze %100 : memref<1x!tpu.dma_semaphore, #tpu.memory_space<semaphore_mem>> -> memref<!tpu.dma_semaphore, #tpu.memory_space<semaphore_mem>>
    tpu.wait_dma2 semaphore(%101 : memref<!tpu.dma_semaphore, #tpu.memory_space<semaphore_mem>>) src(%98 : memref<1x16x16xbf16, #tpu.memory_space<any>>) dst(%99 : memref<1x16x16xbf16, #tpu.memory_space<vmem>>)
    %c0_71 = arith.constant 0 : index
    %c0_72 = arith.constant 0 : index
    %c0_73 = arith.constant 0 : index
    %102 = vector.load %arg11[%c0_71, %c0_72, %c0_73] : memref<2x16x16xbf16, #tpu.memory_space<vmem>>, vector<1x16x16xbf16>
    %c0_74 = arith.constant 0 : index
    %c1_75 = arith.constant 1 : index
    %c0_76 = arith.constant 0 : index
    %103 = vector.load %arg9[%c0_74, %c1_75, %c0_76] : memref<18x18x16xbf16, #tpu.memory_space<vmem>>, vector<1x16x16xbf16>
    tpu.vector_store %arg9[%c0_74, %c1_75, %c0_76], %102 {strides = array<i32>} : memref<18x18x16xbf16, #tpu.memory_space<vmem>>, vector<1x16x16xbf16>,
    %c1_77 = arith.constant 1 : index
    %c0_78 = arith.constant 0 : index
    %c0_79 = arith.constant 0 : index
    %104 = vector.load %arg11[%c1_77, %c0_78, %c0_79] : memref<2x16x16xbf16, #tpu.memory_space<vmem>>, vector<1x16x16xbf16>
    %c17_80 = arith.constant 17 : index
    %c1_81 = arith.constant 1 : index
    %c0_82 = arith.constant 0 : index
    %105 = vector.load %arg9[%c17_80, %c1_81, %c0_82] : memref<18x18x16xbf16, #tpu.memory_space<vmem>>, vector<1x16x16xbf16>
    tpu.vector_store %arg9[%c17_80, %c1_81, %c0_82], %104 {strides = array<i32>} : memref<18x18x16xbf16, #tpu.memory_space<vmem>>, vector<1x16x16xbf16>,
    %cst_83 = arith.constant 0.000000e+00 : f32
    %106 = vector.broadcast %cst_83 : f32 to vector<256x16xf32>
    %107 = tpu.iota {dimensions = array<i32: 0>} : vector<16x1x1xi32>
    %c1_i32_84 = arith.constant 1 : i32
    %108 = arith.subi %1, %c1_i32_84 : i32
    %c0_i32_85 = arith.constant 0 : i32
    %109 = arith.addi %108, %c0_i32_85 : i32
    %110 = vector.broadcast %109 : i32 to vector<16x1x1xi32>
    %111 = arith.addi %107, %110 : vector<16x1x1xi32>
    %c0_i32_86 = arith.constant 0 : i32
    %112 = vector.broadcast %c0_i32_86 : i32 to vector<16x1x1xi32>
    %113 = arith.cmpi sge, %111, %112 : vector<16x1x1xi32>
    %c16_i32_87 = arith.constant 16 : i32
    %114 = vector.broadcast %c16_i32_87 : i32 to vector<16x1x1xi32>
    %115 = arith.cmpi slt, %111, %114 : vector<16x1x1xi32>
    %116 = arith.andi %113, %115 : vector<16x1x1xi1>
    %c0_88 = arith.constant 0 : index
    %c0_89 = arith.constant 0 : index
    %c0_90 = arith.constant 0 : index
    %117 = vector.load %arg9[%c0_88, %c0_89, %c0_90] : memref<18x18x16xbf16, #tpu.memory_space<vmem>>, vector<16x16x16xbf16>
    %cst_91 = arith.constant 0.000000e+00 : bf16
    %118 = vector.broadcast %cst_91 : bf16 to vector<16x16x16xbf16>
    %119 = vector.shape_cast %116 : vector<16x1x1xi1> to vector<16x1x1xi1>
    %120 = vector.broadcast %119 : vector<16x1x1xi1> to vector<16x16x16xi1>
    %121 = arith.select %120, %117, %118 : vector<16x16x16xi1>, vector<16x16x16xbf16>
    %c0_92 = arith.constant 0 : index
    %c0_93 = arith.constant 0 : index
    %c0_94 = arith.constant 0 : index
    %122 = vector.load %arg10[%c0_92, %c0_93, %c0_94] : memref<18x18x32xbf16, #tpu.memory_space<vmem>>, vector<16x16x32xbf16>
    %123 = vector.shape_cast %121 : vector<16x16x16xbf16> to vector<256x16xbf16>
    %c0_95 = arith.constant 0 : index
    %c0_96 = arith.constant 0 : index
    %c0_97 = arith.constant 0 : index
    %124 = vector.load %arg5[%c0_95, %c0_96, %c0_97] : memref<9x16x16xbf16, #tpu.memory_space<vmem>>, vector<1x16x16xbf16>
    %125 = vector.shape_cast %124 : vector<1x16x16xbf16> to vector<16x16xbf16>
    %cst_98 = arith.constant dense<0.000000e+00> : vector<256x16xf32>
    %126 = tpu.matmul %123, %125, %cst_98 {dimension_numbers = #tpu.dot_dimension_numbers<[1], [0], [0], [1], [0, 0, 1, 1], [], []>} : vector<256x16xbf16>, vector<16x16xbf16>, vector<256x16xf32> -> vector<256x16xf32>
    %127 = arith.addf %106, %126 : vector<256x16xf32>
    %128 = vector.shape_cast %122 : vector<16x16x32xbf16> to vector<256x32xbf16>
    %c0_99 = arith.constant 0 : index
    %c0_100 = arith.constant 0 : index
    %c0_101 = arith.constant 0 : index
    %129 = vector.load %arg6[%c0_99, %c0_100, %c0_101] : memref<9x32x16xbf16, #tpu.memory_space<vmem>>, vector<1x32x16xbf16>
    %130 = vector.shape_cast %129 : vector<1x32x16xbf16> to vector<32x16xbf16>
    %cst_102 = arith.constant dense<0.000000e+00> : vector<256x16xf32>
    %131 = tpu.matmul %128, %130, %cst_102 {dimension_numbers = #tpu.dot_dimension_numbers<[1], [0], [0], [1], [0, 0, 1, 1], [], []>} : vector<256x32xbf16>, vector<32x16xbf16>, vector<256x16xf32> -> vector<256x16xf32>
    %132 = arith.addf %127, %131 : vector<256x16xf32>
    %c0_103 = arith.constant 0 : index
    %c1_104 = arith.constant 1 : index
    %c0_105 = arith.constant 0 : index
    %133 = vector.load %arg9[%c0_103, %c1_104, %c0_105] : memref<18x18x16xbf16, #tpu.memory_space<vmem>>, vector<16x16x16xbf16>
    %cst_106 = arith.constant 0.000000e+00 : bf16
    %134 = vector.broadcast %cst_106 : bf16 to vector<16x16x16xbf16>
    %135 = vector.shape_cast %116 : vector<16x1x1xi1> to vector<16x1x1xi1>
    %136 = vector.broadcast %135 : vector<16x1x1xi1> to vector<16x16x16xi1>
    %137 = arith.select %136, %133, %134 : vector<16x16x16xi1>, vector<16x16x16xbf16>
    %c0_107 = arith.constant 0 : index
    %c1_108 = arith.constant 1 : index
    %c0_109 = arith.constant 0 : index
    %138 = vector.load %arg10[%c0_107, %c1_108, %c0_109] : memref<18x18x32xbf16, #tpu.memory_space<vmem>>, vector<16x16x32xbf16>
    %139 = vector.shape_cast %137 : vector<16x16x16xbf16> to vector<256x16xbf16>
    %c1_110 = arith.constant 1 : index
    %c0_111 = arith.constant 0 : index
    %c0_112 = arith.constant 0 : index
    %140 = vector.load %arg5[%c1_110, %c0_111, %c0_112] : memref<9x16x16xbf16, #tpu.memory_space<vmem>>, vector<1x16x16xbf16>
    %141 = vector.shape_cast %140 : vector<1x16x16xbf16> to vector<16x16xbf16>
    %cst_113 = arith.constant dense<0.000000e+00> : vector<256x16xf32>
    %142 = tpu.matmul %139, %141, %cst_113 {dimension_numbers = #tpu.dot_dimension_numbers<[1], [0], [0], [1], [0, 0, 1, 1], [], []>} : vector<256x16xbf16>, vector<16x16xbf16>, vector<256x16xf32> -> vector<256x16xf32>
    %143 = arith.addf %132, %142 : vector<256x16xf32>
    %144 = vector.shape_cast %138 : vector<16x16x32xbf16> to vector<256x32xbf16>
    %c1_114 = arith.constant 1 : index
    %c0_115 = arith.constant 0 : index
    %c0_116 = arith.constant 0 : index
    %145 = vector.load %arg6[%c1_114, %c0_115, %c0_116] : memref<9x32x16xbf16, #tpu.memory_space<vmem>>, vector<1x32x16xbf16>
    %146 = vector.shape_cast %145 : vector<1x32x16xbf16> to vector<32x16xbf16>
    %cst_117 = arith.constant dense<0.000000e+00> : vector<256x16xf32>
    %147 = tpu.matmul %144, %146, %cst_117 {dimension_numbers = #tpu.dot_dimension_numbers<[1], [0], [0], [1], [0, 0, 1, 1], [], []>} : vector<256x32xbf16>, vector<32x16xbf16>, vector<256x16xf32> -> vector<256x16xf32>
    %148 = arith.addf %143, %147 : vector<256x16xf32>
    %c0_118 = arith.constant 0 : index
    %c2 = arith.constant 2 : index
    %c0_119 = arith.constant 0 : index
    %149 = vector.load %arg9[%c0_118, %c2, %c0_119] : memref<18x18x16xbf16, #tpu.memory_space<vmem>>, vector<16x16x16xbf16>
    %cst_120 = arith.constant 0.000000e+00 : bf16
    %150 = vector.broadcast %cst_120 : bf16 to vector<16x16x16xbf16>
    %151 = vector.shape_cast %116 : vector<16x1x1xi1> to vector<16x1x1xi1>
    %152 = vector.broadcast %151 : vector<16x1x1xi1> to vector<16x16x16xi1>
    %153 = arith.select %152, %149, %150 : vector<16x16x16xi1>, vector<16x16x16xbf16>
    %c0_121 = arith.constant 0 : index
    %c2_122 = arith.constant 2 : index
    %c0_123 = arith.constant 0 : index
    %154 = vector.load %arg10[%c0_121, %c2_122, %c0_123] : memref<18x18x32xbf16, #tpu.memory_space<vmem>>, vector<16x16x32xbf16>
    %155 = vector.shape_cast %153 : vector<16x16x16xbf16> to vector<256x16xbf16>
    %c2_124 = arith.constant 2 : index
    %c0_125 = arith.constant 0 : index
    %c0_126 = arith.constant 0 : index
    %156 = vector.load %arg5[%c2_124, %c0_125, %c0_126] : memref<9x16x16xbf16, #tpu.memory_space<vmem>>, vector<1x16x16xbf16>
    %157 = vector.shape_cast %156 : vector<1x16x16xbf16> to vector<16x16xbf16>
    %cst_127 = arith.constant dense<0.000000e+00> : vector<256x16xf32>
    %158 = tpu.matmul %155, %157, %cst_127 {dimension_numbers = #tpu.dot_dimension_numbers<[1], [0], [0], [1], [0, 0, 1, 1], [], []>} : vector<256x16xbf16>, vector<16x16xbf16>, vector<256x16xf32> -> vector<256x16xf32>
    %159 = arith.addf %148, %158 : vector<256x16xf32>
    %160 = vector.shape_cast %154 : vector<16x16x32xbf16> to vector<256x32xbf16>
    %c2_128 = arith.constant 2 : index
    %c0_129 = arith.constant 0 : index
    %c0_130 = arith.constant 0 : index
    %161 = vector.load %arg6[%c2_128, %c0_129, %c0_130] : memref<9x32x16xbf16, #tpu.memory_space<vmem>>, vector<1x32x16xbf16>
    %162 = vector.shape_cast %161 : vector<1x32x16xbf16> to vector<32x16xbf16>
    %cst_131 = arith.constant dense<0.000000e+00> : vector<256x16xf32>
    %163 = tpu.matmul %160, %162, %cst_131 {dimension_numbers = #tpu.dot_dimension_numbers<[1], [0], [0], [1], [0, 0, 1, 1], [], []>} : vector<256x32xbf16>, vector<32x16xbf16>, vector<256x16xf32> -> vector<256x16xf32>
    %164 = arith.addf %159, %163 : vector<256x16xf32>
    %c1_132 = arith.constant 1 : index
    %c0_133 = arith.constant 0 : index
    %c0_134 = arith.constant 0 : index
    %165 = vector.load %arg9[%c1_132, %c0_133, %c0_134] : memref<18x18x16xbf16, #tpu.memory_space<vmem>>, vector<16x16x16xbf16>
    %c1_135 = arith.constant 1 : index
    %c0_136 = arith.constant 0 : index
    %c0_137 = arith.constant 0 : index
    %166 = vector.load %arg10[%c1_135, %c0_136, %c0_137] : memref<18x18x32xbf16, #tpu.memory_space<vmem>>, vector<16x16x32xbf16>
    %167 = vector.shape_cast %165 : vector<16x16x16xbf16> to vector<256x16xbf16>
    %c3 = arith.constant 3 : index
    %c0_138 = arith.constant 0 : index
    %c0_139 = arith.constant 0 : index
    %168 = vector.load %arg5[%c3, %c0_138, %c0_139] : memref<9x16x16xbf16, #tpu.memory_space<vmem>>, vector<1x16x16xbf16>
    %169 = vector.shape_cast %168 : vector<1x16x16xbf16> to vector<16x16xbf16>
    %cst_140 = arith.constant dense<0.000000e+00> : vector<256x16xf32>
    %170 = tpu.matmul %167, %169, %cst_140 {dimension_numbers = #tpu.dot_dimension_numbers<[1], [0], [0], [1], [0, 0, 1, 1], [], []>} : vector<256x16xbf16>, vector<16x16xbf16>, vector<256x16xf32> -> vector<256x16xf32>
    %171 = arith.addf %164, %170 : vector<256x16xf32>
    %172 = vector.shape_cast %166 : vector<16x16x32xbf16> to vector<256x32xbf16>
    %c3_141 = arith.constant 3 : index
    %c0_142 = arith.constant 0 : index
    %c0_143 = arith.constant 0 : index
    %173 = vector.load %arg6[%c3_141, %c0_142, %c0_143] : memref<9x32x16xbf16, #tpu.memory_space<vmem>>, vector<1x32x16xbf16>
    %174 = vector.shape_cast %173 : vector<1x32x16xbf16> to vector<32x16xbf16>
    %cst_144 = arith.constant dense<0.000000e+00> : vector<256x16xf32>
    %175 = tpu.matmul %172, %174, %cst_144 {dimension_numbers = #tpu.dot_dimension_numbers<[1], [0], [0], [1], [0, 0, 1, 1], [], []>} : vector<256x32xbf16>, vector<32x16xbf16>, vector<256x16xf32> -> vector<256x16xf32>
    %176 = arith.addf %171, %175 : vector<256x16xf32>
    %c1_145 = arith.constant 1 : index
    %c1_146 = arith.constant 1 : index
    %c0_147 = arith.constant 0 : index
    %177 = vector.load %arg9[%c1_145, %c1_146, %c0_147] : memref<18x18x16xbf16, #tpu.memory_space<vmem>>, vector<16x16x16xbf16>
    %c1_148 = arith.constant 1 : index
    %c1_149 = arith.constant 1 : index
    %c0_150 = arith.constant 0 : index
    %178 = vector.load %arg10[%c1_148, %c1_149, %c0_150] : memref<18x18x32xbf16, #tpu.memory_space<vmem>>, vector<16x16x32xbf16>
    %179 = vector.shape_cast %177 : vector<16x16x16xbf16> to vector<256x16xbf16>
    %c4 = arith.constant 4 : index
    %c0_151 = arith.constant 0 : index
    %c0_152 = arith.constant 0 : index
    %180 = vector.load %arg5[%c4, %c0_151, %c0_152] : memref<9x16x16xbf16, #tpu.memory_space<vmem>>, vector<1x16x16xbf16>
    %181 = vector.shape_cast %180 : vector<1x16x16xbf16> to vector<16x16xbf16>
    %cst_153 = arith.constant dense<0.000000e+00> : vector<256x16xf32>
    %182 = tpu.matmul %179, %181, %cst_153 {dimension_numbers = #tpu.dot_dimension_numbers<[1], [0], [0], [1], [0, 0, 1, 1], [], []>} : vector<256x16xbf16>, vector<16x16xbf16>, vector<256x16xf32> -> vector<256x16xf32>
    %183 = arith.addf %176, %182 : vector<256x16xf32>
    %184 = vector.shape_cast %178 : vector<16x16x32xbf16> to vector<256x32xbf16>
    %c4_154 = arith.constant 4 : index
    %c0_155 = arith.constant 0 : index
    %c0_156 = arith.constant 0 : index
    %185 = vector.load %arg6[%c4_154, %c0_155, %c0_156] : memref<9x32x16xbf16, #tpu.memory_space<vmem>>, vector<1x32x16xbf16>
    %186 = vector.shape_cast %185 : vector<1x32x16xbf16> to vector<32x16xbf16>
    %cst_157 = arith.constant dense<0.000000e+00> : vector<256x16xf32>
    %187 = tpu.matmul %184, %186, %cst_157 {dimension_numbers = #tpu.dot_dimension_numbers<[1], [0], [0], [1], [0, 0, 1, 1], [], []>} : vector<256x32xbf16>, vector<32x16xbf16>, vector<256x16xf32> -> vector<256x16xf32>
    %188 = arith.addf %183, %187 : vector<256x16xf32>
    %c1_158 = arith.constant 1 : index
    %c2_159 = arith.constant 2 : index
    %c0_160 = arith.constant 0 : index
    %189 = vector.load %arg9[%c1_158, %c2_159, %c0_160] : memref<18x18x16xbf16, #tpu.memory_space<vmem>>, vector<16x16x16xbf16>
    %c1_161 = arith.constant 1 : index
    %c2_162 = arith.constant 2 : index
    %c0_163 = arith.constant 0 : index
    %190 = vector.load %arg10[%c1_161, %c2_162, %c0_163] : memref<18x18x32xbf16, #tpu.memory_space<vmem>>, vector<16x16x32xbf16>
    %191 = vector.shape_cast %189 : vector<16x16x16xbf16> to vector<256x16xbf16>
    %c5 = arith.constant 5 : index
    %c0_164 = arith.constant 0 : index
    %c0_165 = arith.constant 0 : index
    %192 = vector.load %arg5[%c5, %c0_164, %c0_165] : memref<9x16x16xbf16, #tpu.memory_space<vmem>>, vector<1x16x16xbf16>
    %193 = vector.shape_cast %192 : vector<1x16x16xbf16> to vector<16x16xbf16>
    %cst_166 = arith.constant dense<0.000000e+00> : vector<256x16xf32>
    %194 = tpu.matmul %191, %193, %cst_166 {dimension_numbers = #tpu.dot_dimension_numbers<[1], [0], [0], [1], [0, 0, 1, 1], [], []>} : vector<256x16xbf16>, vector<16x16xbf16>, vector<256x16xf32> -> vector<256x16xf32>
    %195 = arith.addf %188, %194 : vector<256x16xf32>
    %196 = vector.shape_cast %190 : vector<16x16x32xbf16> to vector<256x32xbf16>
    %c5_167 = arith.constant 5 : index
    %c0_168 = arith.constant 0 : index
    %c0_169 = arith.constant 0 : index
    %197 = vector.load %arg6[%c5_167, %c0_168, %c0_169] : memref<9x32x16xbf16, #tpu.memory_space<vmem>>, vector<1x32x16xbf16>
    %198 = vector.shape_cast %197 : vector<1x32x16xbf16> to vector<32x16xbf16>
    %cst_170 = arith.constant dense<0.000000e+00> : vector<256x16xf32>
    %199 = tpu.matmul %196, %198, %cst_170 {dimension_numbers = #tpu.dot_dimension_numbers<[1], [0], [0], [1], [0, 0, 1, 1], [], []>} : vector<256x32xbf16>, vector<32x16xbf16>, vector<256x16xf32> -> vector<256x16xf32>
    %200 = arith.addf %195, %199 : vector<256x16xf32>
    %201 = tpu.iota {dimensions = array<i32: 0>} : vector<16x1x1xi32>
    %c1_i32_171 = arith.constant 1 : i32
    %202 = arith.subi %1, %c1_i32_171 : i32
    %c2_i32 = arith.constant 2 : i32
    %203 = arith.addi %202, %c2_i32 : i32
    %204 = vector.broadcast %203 : i32 to vector<16x1x1xi32>
    %205 = arith.addi %201, %204 : vector<16x1x1xi32>
    %c0_i32_172 = arith.constant 0 : i32
    %206 = vector.broadcast %c0_i32_172 : i32 to vector<16x1x1xi32>
    %207 = arith.cmpi sge, %205, %206 : vector<16x1x1xi32>
    %c16_i32_173 = arith.constant 16 : i32
    %208 = vector.broadcast %c16_i32_173 : i32 to vector<16x1x1xi32>
    %209 = arith.cmpi slt, %205, %208 : vector<16x1x1xi32>
    %210 = arith.andi %207, %209 : vector<16x1x1xi1>
    %c2_174 = arith.constant 2 : index
    %c0_175 = arith.constant 0 : index
    %c0_176 = arith.constant 0 : index
    %211 = vector.load %arg9[%c2_174, %c0_175, %c0_176] : memref<18x18x16xbf16, #tpu.memory_space<vmem>>, vector<16x16x16xbf16>
    %cst_177 = arith.constant 0.000000e+00 : bf16
    %212 = vector.broadcast %cst_177 : bf16 to vector<16x16x16xbf16>
    %213 = vector.shape_cast %210 : vector<16x1x1xi1> to vector<16x1x1xi1>
    %214 = vector.broadcast %213 : vector<16x1x1xi1> to vector<16x16x16xi1>
    %215 = arith.select %214, %211, %212 : vector<16x16x16xi1>, vector<16x16x16xbf16>
    %c2_178 = arith.constant 2 : index
    %c0_179 = arith.constant 0 : index
    %c0_180 = arith.constant 0 : index
    %216 = vector.load %arg10[%c2_178, %c0_179, %c0_180] : memref<18x18x32xbf16, #tpu.memory_space<vmem>>, vector<16x16x32xbf16>
    %217 = vector.shape_cast %215 : vector<16x16x16xbf16> to vector<256x16xbf16>
    %c6 = arith.constant 6 : index
    %c0_181 = arith.constant 0 : index
    %c0_182 = arith.constant 0 : index
    %218 = vector.load %arg5[%c6, %c0_181, %c0_182] : memref<9x16x16xbf16, #tpu.memory_space<vmem>>, vector<1x16x16xbf16>
    %219 = vector.shape_cast %218 : vector<1x16x16xbf16> to vector<16x16xbf16>
    %cst_183 = arith.constant dense<0.000000e+00> : vector<256x16xf32>
    %220 = tpu.matmul %217, %219, %cst_183 {dimension_numbers = #tpu.dot_dimension_numbers<[1], [0], [0], [1], [0, 0, 1, 1], [], []>} : vector<256x16xbf16>, vector<16x16xbf16>, vector<256x16xf32> -> vector<256x16xf32>
    %221 = arith.addf %200, %220 : vector<256x16xf32>
    %222 = vector.shape_cast %216 : vector<16x16x32xbf16> to vector<256x32xbf16>
    %c6_184 = arith.constant 6 : index
    %c0_185 = arith.constant 0 : index
    %c0_186 = arith.constant 0 : index
    %223 = vector.load %arg6[%c6_184, %c0_185, %c0_186] : memref<9x32x16xbf16, #tpu.memory_space<vmem>>, vector<1x32x16xbf16>
    %224 = vector.shape_cast %223 : vector<1x32x16xbf16> to vector<32x16xbf16>
    %cst_187 = arith.constant dense<0.000000e+00> : vector<256x16xf32>
    %225 = tpu.matmul %222, %224, %cst_187 {dimension_numbers = #tpu.dot_dimension_numbers<[1], [0], [0], [1], [0, 0, 1, 1], [], []>} : vector<256x32xbf16>, vector<32x16xbf16>, vector<256x16xf32> -> vector<256x16xf32>
    %226 = arith.addf %221, %225 : vector<256x16xf32>
    %c2_188 = arith.constant 2 : index
    %c1_189 = arith.constant 1 : index
    %c0_190 = arith.constant 0 : index
    %227 = vector.load %arg9[%c2_188, %c1_189, %c0_190] : memref<18x18x16xbf16, #tpu.memory_space<vmem>>, vector<16x16x16xbf16>
    %cst_191 = arith.constant 0.000000e+00 : bf16
    %228 = vector.broadcast %cst_191 : bf16 to vector<16x16x16xbf16>
    %229 = vector.shape_cast %210 : vector<16x1x1xi1> to vector<16x1x1xi1>
    %230 = vector.broadcast %229 : vector<16x1x1xi1> to vector<16x16x16xi1>
    %231 = arith.select %230, %227, %228 : vector<16x16x16xi1>, vector<16x16x16xbf16>
    %c2_192 = arith.constant 2 : index
    %c1_193 = arith.constant 1 : index
    %c0_194 = arith.constant 0 : index
    %232 = vector.load %arg10[%c2_192, %c1_193, %c0_194] : memref<18x18x32xbf16, #tpu.memory_space<vmem>>, vector<16x16x32xbf16>
    %233 = vector.shape_cast %231 : vector<16x16x16xbf16> to vector<256x16xbf16>
    %c7 = arith.constant 7 : index
    %c0_195 = arith.constant 0 : index
    %c0_196 = arith.constant 0 : index
    %234 = vector.load %arg5[%c7, %c0_195, %c0_196] : memref<9x16x16xbf16, #tpu.memory_space<vmem>>, vector<1x16x16xbf16>
    %235 = vector.shape_cast %234 : vector<1x16x16xbf16> to vector<16x16xbf16>
    %cst_197 = arith.constant dense<0.000000e+00> : vector<256x16xf32>
    %236 = tpu.matmul %233, %235, %cst_197 {dimension_numbers = #tpu.dot_dimension_numbers<[1], [0], [0], [1], [0, 0, 1, 1], [], []>} : vector<256x16xbf16>, vector<16x16xbf16>, vector<256x16xf32> -> vector<256x16xf32>
    %237 = arith.addf %226, %236 : vector<256x16xf32>
    %238 = vector.shape_cast %232 : vector<16x16x32xbf16> to vector<256x32xbf16>
    %c7_198 = arith.constant 7 : index
    %c0_199 = arith.constant 0 : index
    %c0_200 = arith.constant 0 : index
    %239 = vector.load %arg6[%c7_198, %c0_199, %c0_200] : memref<9x32x16xbf16, #tpu.memory_space<vmem>>, vector<1x32x16xbf16>
    %240 = vector.shape_cast %239 : vector<1x32x16xbf16> to vector<32x16xbf16>
    %cst_201 = arith.constant dense<0.000000e+00> : vector<256x16xf32>
    %241 = tpu.matmul %238, %240, %cst_201 {dimension_numbers = #tpu.dot_dimension_numbers<[1], [0], [0], [1], [0, 0, 1, 1], [], []>} : vector<256x32xbf16>, vector<32x16xbf16>, vector<256x16xf32> -> vector<256x16xf32>
    %242 = arith.addf %237, %241 : vector<256x16xf32>
    %c2_202 = arith.constant 2 : index
    %c2_203 = arith.constant 2 : index
    %c0_204 = arith.constant 0 : index
    %243 = vector.load %arg9[%c2_202, %c2_203, %c0_204] : memref<18x18x16xbf16, #tpu.memory_space<vmem>>, vector<16x16x16xbf16>
    %cst_205 = arith.constant 0.000000e+00 : bf16
    %244 = vector.broadcast %cst_205 : bf16 to vector<16x16x16xbf16>
    %245 = vector.shape_cast %210 : vector<16x1x1xi1> to vector<16x1x1xi1>
    %246 = vector.broadcast %245 : vector<16x1x1xi1> to vector<16x16x16xi1>
    %247 = arith.select %246, %243, %244 : vector<16x16x16xi1>, vector<16x16x16xbf16>
    %c2_206 = arith.constant 2 : index
    %c2_207 = arith.constant 2 : index
    %c0_208 = arith.constant 0 : index
    %248 = vector.load %arg10[%c2_206, %c2_207, %c0_208] : memref<18x18x32xbf16, #tpu.memory_space<vmem>>, vector<16x16x32xbf16>
    %249 = vector.shape_cast %247 : vector<16x16x16xbf16> to vector<256x16xbf16>
    %c8 = arith.constant 8 : index
    %c0_209 = arith.constant 0 : index
    %c0_210 = arith.constant 0 : index
    %250 = vector.load %arg5[%c8, %c0_209, %c0_210] : memref<9x16x16xbf16, #tpu.memory_space<vmem>>, vector<1x16x16xbf16>
    %251 = vector.shape_cast %250 : vector<1x16x16xbf16> to vector<16x16xbf16>
    %cst_211 = arith.constant dense<0.000000e+00> : vector<256x16xf32>
    %252 = tpu.matmul %249, %251, %cst_211 {dimension_numbers = #tpu.dot_dimension_numbers<[1], [0], [0], [1], [0, 0, 1, 1], [], []>} : vector<256x16xbf16>, vector<16x16xbf16>, vector<256x16xf32> -> vector<256x16xf32>
    %253 = arith.addf %242, %252 : vector<256x16xf32>
    %254 = vector.shape_cast %248 : vector<16x16x32xbf16> to vector<256x32xbf16>
    %c8_212 = arith.constant 8 : index
    %c0_213 = arith.constant 0 : index
    %c0_214 = arith.constant 0 : index
    %255 = vector.load %arg6[%c8_212, %c0_213, %c0_214] : memref<9x32x16xbf16, #tpu.memory_space<vmem>>, vector<1x32x16xbf16>
    %256 = vector.shape_cast %255 : vector<1x32x16xbf16> to vector<32x16xbf16>
    %cst_215 = arith.constant dense<0.000000e+00> : vector<256x16xf32>
    %257 = tpu.matmul %254, %256, %cst_215 {dimension_numbers = #tpu.dot_dimension_numbers<[1], [0], [0], [1], [0, 0, 1, 1], [], []>} : vector<256x32xbf16>, vector<32x16xbf16>, vector<256x16xf32> -> vector<256x16xf32>
    %258 = arith.addf %253, %257 : vector<256x16xf32>
    %c0_216 = arith.constant 0 : index
    %c0_217 = arith.constant 0 : index
    %259 = vector.load %arg7[%c0_216, %c0_217] : memref<1x16xf32, #tpu.memory_space<vmem>>, vector<1x16xf32>
    %260 = vector.broadcast %259 : vector<1x16xf32> to vector<256x16xf32>
    %261 = arith.addf %258, %260 : vector<256x16xf32>
    %cst_218 = arith.constant 0.000000e+00 : f32
    %262 = vector.broadcast %cst_218 : f32 to vector<256x16xf32>
    %263 = arith.maximumf %261, %262 : vector<256x16xf32>
    %264 = vector.shape_cast %263 : vector<256x16xf32> to vector<16x16x16xf32>
    %c0_219 = arith.constant 0 : index
    %c0_220 = arith.constant 0 : index
    %c0_221 = arith.constant 0 : index
    %c0_222 = arith.constant 0 : index
    %265 = vector.load %arg8[%c0_219, %c0_220, %c0_221, %c0_222] : memref<1x16x16x16xf32, #tpu.memory_space<vmem>>, vector<1x16x16x16xf32>
    %266 = vector.shape_cast %265 : vector<1x16x16x16xf32> to vector<16x16x16xf32>
    %267 = vector.shape_cast %264 : vector<16x16x16xf32> to vector<1x16x16x16xf32>
    tpu.vector_store %arg8[%c0_219, %c0_220, %c0_221, %c0_222], %267 {strides = array<i32>} : memref<1x16x16x16xf32, #tpu.memory_space<vmem>>, vector<1x16x16x16xf32>,
    return
  }
  func.func @transform_0(%arg0: i32, %arg1: i32) -> (i32, i32, i32, i32) {
    %c0_i32 = arith.constant 0 : i32
    %c0_i32_0 = arith.constant 0 : i32
    %c0_i32_1 = arith.constant 0 : i32
    %c0_i32_2 = arith.constant 0 : i32
    return %arg0, %c0_i32, %c0_i32_0, %c0_i32_1 : i32, i32, i32, i32
  }
  func.func @transform_1(%arg0: i32, %arg1: i32) -> (i32, i32, i32, i32) {
    %c0_i32 = arith.constant 0 : i32
    %c0_i32_0 = arith.constant 0 : i32
    %c0_i32_1 = arith.constant 0 : i32
    return %arg0, %arg1, %c0_i32, %c0_i32_0 : i32, i32, i32, i32
  }
  func.func @transform_3(%arg0: i32, %arg1: i32) -> (i32, i32, i32) {
    %c0_i32 = arith.constant 0 : i32
    %c0_i32_0 = arith.constant 0 : i32
    %c0_i32_1 = arith.constant 0 : i32
    %c0_i32_2 = arith.constant 0 : i32
    return %c0_i32, %c0_i32_0, %c0_i32_1 : i32, i32, i32
  }
  func.func @transform_4(%arg0: i32, %arg1: i32) -> (i32, i32, i32) {
    %c0_i32 = arith.constant 0 : i32
    %c0_i32_0 = arith.constant 0 : i32
    %c0_i32_1 = arith.constant 0 : i32
    %c0_i32_2 = arith.constant 0 : i32
    return %c0_i32, %c0_i32_0, %c0_i32_1 : i32, i32, i32
  }
  func.func @transform_5(%arg0: i32, %arg1: i32) -> (i32, i32) {
    %c0_i32 = arith.constant 0 : i32
    %c0_i32_0 = arith.constant 0 : i32
    %c0_i32_1 = arith.constant 0 : i32
    return %c0_i32, %c0_i32_0 : i32, i32
  }
  func.func @transform_6(%arg0: i32, %arg1: i32) -> (i32, i32, i32, i32) {
    %c0_i32 = arith.constant 0 : i32
    %c0_i32_0 = arith.constant 0 : i32
    %c0_i32_1 = arith.constant 0 : i32
    return %arg0, %arg1, %c0_i32, %c0_i32_0 : i32, i32, i32, i32
  }
}

</mosaic_0001>

<bundles_post_ra>
// kernel: _lambda_.1
= control target key start
LH: loop header
LB: loop body
LE: loop exit
PB: predicated region body
PF: predicated region fallthrough
CT: control target
= control target key end

     0   :  { %s17506_s21 = smov 0   ;;  %s17508_s22 = smov 0   ;;  %s21514_s0 = inlined_call_operand.vmem [shape: f32[2,8,8,32], index: 0, kind: input, shape index: {}]   ;;  %s21515_s1 = inlined_call_operand.vmem [shape: bf16[2,16,16,16], index: 1, kind: input, shape index: {}, may-alias: {1,2}]   ;;  %s21516_s2 = inlined_call_operand.vmem [shape: bf16[2,16,16,16], index: 2, kind: input, shape index: {}, may-alias: {1,2}]   ;;  %s21517_s3 = inlined_call_operand.vmem [shape: bf16[9,16,16], index: 3, kind: input, shape index: {}]   ;;  %s21518_s4 = inlined_call_operand.vmem [shape: bf16[9,32,16], index: 4, kind: input, shape index: {}]   ;;  %s21519_s5 = inlined_call_operand.vmem [shape: f32[1,16], index: 5, kind: input, shape index: {}]   ;;  %s21520_s6 = inlined_call_operand.vmem [shape: f32[2,16,16,16], index: 6, kind: output, shape index: {}]  }
   0x1   :  { %s17510_s23 = smov 0  }
   0x2 LB: > { %s28_s24 = sadd.s32 1, %s17461_s22  ;;  %p14773_p0 = scmp.ge.s32.totalorder %s17465_s23, 1  ;;  %s17465_s23 = sphi %s17510_s23, %s16_s23   ;;  %s17461_s22 = sphi %s17508_s22, %s21713_s22   ;;  %s17457_s21 = sphi %s17506_s21, %s21712_s21  }
   0x3   : > { %p30_p1 = scmp.ge.s32.totalorder %s28_s24, 2  ;;  %p220_p2 = scmp.lt.s32.totalorder %s17465_s23, 3 }
   0x5   : > { %s21715_s24 = smov (%p30_p1, %s28_s24), 0  ;;  %p221_p3 = pnand %p14773_p0, %p220_p2 }
   0x7   : > { %224 = sbr.rel (%p221_p3) target bundleno = 1249 (0x4e1), region = 40 }
   0xe   : > { %p263_p4 = scmp.lt.s32.totalorder %s17457_s21, 1  ;;  %s15579_s25 = sshll.u32 %s17457_s21, 7 }
   0xf   : > { %s303_s28 = scalar_lea.vmem %s21516_s2, %s15579_s25 }
  0x10   : > { %s21717_s21 = smov (!%p263_p4, %s17457_s21), 1  ;;  %v17527_v0 = vld [vmem:[%s303_s28] sm:$0xff] }
  0x11   : > { %21577 = vst [vmem:[#allocation10_spill] sm:$0xff] %v17527_v0  ;;  %s15576_s29 = sshll.u32 %s21717_s21, 6  ;;  %s15577_s30 = sshll.u32 %s21717_s21, 7 }
  0x12   : > { %s17532_s9 = scalar_lea.vmem %s21514_s0, %s15576_s29  ;;  %s17537_s12 = scalar_lea.vmem %s21515_s1, %s15577_s30 }
  0x13   : > { %s15578_s13 = sshll.u32 %s21717_s21, 8 }
  0x14   : > { %s17542_s16 = scalar_lea.vmem %s21520_s6, %s15578_s13 }
  0x15   : > { %345 = vsyncadd [#allocation5], 128  ;;  %s15581_s17 = sadd.s32 120, %s15579_s25 }
  0x16   : > { %s349_s20 = scalar_lea.vmem %s21516_s2, %s15581_s17 }
  0x17   : > { %v17547_v1 = vld [vmem:[%s349_s20] sm:$0xff] }
  0x18   : > { %21578 = vst [vmem:[#allocation11_spill] sm:$0xff] %v17547_v1 }
  0x19   : > { %393 = vsyncadd [#allocation5 + $0x1], 128  ;;  %v552_v2 = vlaneseq  ;;  %v17467_v3 = vmov 1966171168   ;;  %v17468_v6 = vmov 1983009808  }
  0x1a   : > { %v550_v4 = vunpack.c.l.s4 %v17467_v3  ;;  %v2801_v7 = vunpack.c.l.s4 %v17468_v6  ;;  %v17469_v9 = vmov 0.0   ;;  %v399_v11 = vld [vmem:[%s17532_s9] sm:$0xff]  ;;  %vm446_vm0 = vcmask 1040384   ;;  %v403_v16 = vld [vmem:[%s17532_s9 + $0x8] sm:$0xff]  ;;  %v17560_v25 = vld [vmem:[%s17532_s9 + $0x10] sm:$0xff] }
  0x1b   : > { %v553_v5 = vshrl.u32 %v552_v2, 7  ;;  %v2798_v10 = vcombine.low %v17469_v9, %v17469_v9  ;;  %vm477_vm1 = vcmask 1046528   ;;  %v426_v14 = vrot.slane %v399_v11, 7 }
  0x1c   : > { %v551_v8 = vunpack.c.0.s8 %v550_v4  ;;  %v2802_v13 = vunpack.c.0.s8 %v2801_v7  ;;  %v457_v15 = vrot.slane %v399_v11, 1  ;;  %vm3917_vm2 = vcmask 257024   ;;  %v3927_v7 = vld [vmem:[#allocation3 + $0x8] sm:$0x1] }
  0x1d   : > { %v17550_v12 = vsub.s32 0, %v553_v5  ;;  %vm3918_vm3 = vsmask.f32 7938  ;;  %v498_v18 = vmul.f32 0.75, %v399_v11  ;;  %v428_v19 = vrot.slane %v403_v16, 7 }
  0x1e   : > { %v17553_v17 = vsub.s32 %v551_v8, %v553_v5  ;;  %v459_v20 = vrot.slane %v403_v16, 1  ;;  %v17555_v21 = vsub.s32 %v2802_v13, %v553_v5  ;;  %vm3554_vm4 = vsmask.f32 256  ;;  %vm17598_vm6 = vmand %vm3917_vm2, %vm3918_vm3  ;;  %v3920_v5 = vld [vmem:[#allocation3] sm:$0xf] }
  0x1f   : > { %vm3925_vm5 = vcmask 253952   ;;  %v447_v22 = vsel %vm446_vm0, %v399_v11, %v426_v14  ;;  %v478_v23 = vsel %vm477_vm1, %v457_v15, %v399_v11  ;;  %v500_v24 = vmul.f32 0.75, %v403_v16 }
  0x20   : > { %v488_v26 = vmul.f32 0.25, %v447_v22  ;;  %v518_v27 = vmul.f32 0.25, %v478_v23  ;;  %v449_v28 = vsel %vm446_vm0, %v403_v16, %v428_v19  ;;  %v480_v29 = vsel %vm477_vm1, %v459_v20, %v403_v16  ;;  %vm17606_vm7 = vmand %vm3925_vm5, %vm3554_vm4 }
  0x21   : > { %v2806_v30 = vrot.slane %v2798_v10, %v17555_v21  ;;  %v490_v31 = vmul.f32 0.25, %v449_v28  ;;  %v520_v32 = vmul.f32 0.25, %v480_v29  ;;  %v429_v33 = vrot.slane %v17560_v25, 7  ;;  %vm19035_vm14 = vmand %vm3925_vm5, %vm3918_vm3 }
  0x22   : > { %v508_v34 = vadd.f32 %v498_v18, %v488_v26  ;;  %v528_v35 = vadd.f32 %v518_v27, %v498_v18  ;;  %v460_v36 = vrot.slane %v17560_v25, 1  ;;  %v17568_v37 = vmul.f32 0.75, %v17560_v25 }
  0x23   : > { %v2814_v38 = vcombine.low %v2806_v30, %v2806_v30  ;;  %v17570_v39 = vadd.f32 %v500_v24, %v490_v31  ;;  %v17572_v40 = vadd.f32 %v520_v32, %v500_v24  ;;  %v17576_v41 = vsel %vm446_vm0, %v17560_v25, %v429_v33 }
  0x24   : > { %v555_v42 = vrot.slane %v508_v34, %v17553_v17  ;;  %v1135_v43 = vrot.slane %v528_v35, %v17553_v17  ;;  %v548_v44 = vcombine.high %v508_v34, %v508_v34  ;;  %v1128_v45 = vcombine.high %v528_v35, %v528_v35 }
  0x25   : > { %v15582_v46 = vpack.c.bf16 %v2814_v38, %v2814_v38  ;;  %v17582_v47 = vrot.slane %v17570_v39, %v17553_v17  ;;  %v17586_v48 = vrot.slane %v17572_v40, %v17553_v17  ;;  %v646_v49 = vcombine.high %v17570_v39, %v17570_v39 }
  0x26   : > { %v563_v50 = vcombine.high %v555_v42, %v555_v42  ;;  %v571_v51 = vrot.slane %v555_v42, %v17553_v17  ;;  %v1143_v52 = vcombine.high %v1135_v43, %v1135_v43  ;;  %v1151_v53 = vrot.slane %v1135_v43, %v17553_v17 }
  0x27   : > { %v3558_v54 = vshrl.u32 %v15582_v46, 16  ;;  %v3561_v55 = vshll.u32 %v15582_v46, 16  ;;  %v562_v56 = vrot.slane %v548_v44, %v17553_v17  ;;  %v1142_v57 = vrot.slane %v1128_v45, %v17553_v17 }
  0x28   : > { %v585_v58 = vrot.slane %v563_v50, %v17553_v17  ;;  %v593_v59 = vcombine.high %v571_v51, %v571_v51  ;;  %v1165_v60 = vrot.slane %v1143_v52, %v17553_v17  ;;  %v1173_v61 = vcombine.high %v1151_v53, %v1151_v53 }
  0x29   : > { %v3560_v62 = vrot.slane %v3558_v54, 7  ;;  %v1621_v2 = vrot.slane %v1151_v53, %v17550_v12  ;;  %v564_v3 = vcombine.high %v562_v56, %v562_v56  ;;  %v578_v4 = vrot.slane %v562_v56, %v17553_v17 }
  0x2a   : > { %v595_v8 = vcombine.high %v585_v58, %v585_v58  ;;  %v1175_v9 = vcombine.high %v1165_v60, %v1165_v60  ;;  %v1625_v10 = vrot.slane %v1165_v60, %v17550_v12  ;;  %v1629_v11 = vrot.slane %v1173_v61, %v17550_v12 }
  0x2b   : > { %v17612_v13 = vor.u32 %v3561_v55, %v3560_v62  ;;  %v17614_v14 = vrot.slane %v3560_v62, 4  ;;  %v2018_v15 = vsel %vm446_vm0, %v571_v51, %v1621_v2  ;;  %v592_v16 = vrot.slane %v564_v3, %v17553_v17 }
  0x2c   : > { %v1633_v18 = vrot.slane %v1175_v9, %v17550_v12  ;;  %v2019_v19 = vsel %vm446_vm0, %v585_v58, %v1625_v10  ;;  %v2020_v20 = vsel %vm446_vm0, %v593_v59, %v1629_v11  ;;  %v17621_v22 = vmul.f32 0.25, %v2018_v15 }
  0x2d   : > { %v3921_v23 = vsel %vm17598_vm6, %v17612_v13, %v3920_v5  ;;  %v3928_v24 = vsel %vm17606_vm7, %v17614_v14, %v3927_v7  ;;  %v17629_v26 = vmul.f32 0.25, %v2019_v19  ;;  %v17631_v27 = vmul.f32 0.25, %v2020_v20 }
  0x2e   : > { %3922 = vst [vmem:[#allocation3] sm:$0xf] %v3921_v23  ;;  %3929 = vst [vmem:[#allocation3 + $0x8] sm:$0x1] %v3928_v24  ;;  %v2021_v28 = vsel %vm446_vm0, %v595_v8, %v1633_v18  ;;  %v17634_v29 = vmul.f32 0.75, %v2018_v15  ;;  %v17636_v30 = vmul.f32 0.75, %v2019_v19  ;;  %v594_v34 = vcombine.high %v578_v4, %v578_v4 }
  0x2f   : > { %v17638_v31 = vmul.f32 0.75, %v2020_v20  ;;  %v17640_v32 = vmul.f32 0.25, %v2021_v28  ;;  %v17642_v33 = vmul.f32 0.75, %v2021_v28  ;;  %v596_v35 = vcombine.high %v592_v16, %v592_v16 }
  0x30   : > { %v2242_v38 = vadd.f32 %v17634_v29, %v17621_v22  ;;  %v2243_v42 = vadd.f32 %v17636_v30, %v17629_v26  ;;  %v1144_v44 = vcombine.high %v1142_v57, %v1142_v57  ;;  %v1158_v46 = vrot.slane %v1142_v57, %v17553_v17 }
  0x31   : > { %v2244_v43 = vadd.f32 %v17638_v31, %v17631_v27  ;;  %v2245_v45 = vadd.f32 %v17642_v33, %v17640_v32  ;;  %v661_v50 = vcombine.high %v17582_v47, %v17582_v47  ;;  %v669_v51 = vrot.slane %v17582_v47, %v17553_v17 }
  0x32   : > { %v2832_v52 = vcombine.low %v2242_v38, %v2243_v42  ;;  %v1172_v53 = vrot.slane %v1144_v44, %v17553_v17  ;;  %v1241_v54 = vcombine.high %v17586_v48, %v17586_v48  ;;  %v1249_v55 = vrot.slane %v17586_v48, %v17553_v17 }
  0x33   : > { %v2833_v56 = vcombine.low %v2244_v43, %v2245_v45  ;;  %v1174_v58 = vcombine.high %v1158_v46, %v1158_v46  ;;  %v1637_v59 = vrot.slane %v1158_v46, %v17550_v12  ;;  %v683_v57 = vrot.slane %v661_v50, %v17553_v17 }
  0x34   : > { %v2840_v60 = vrot.slane %v2832_v52, %v17555_v21  ;;  %v1176_v61 = vcombine.high %v1172_v53, %v1172_v53  ;;  %v1641_v47 = vrot.slane %v1172_v53, %v17550_v12  ;;  %v691_v62 = vcombine.high %v669_v51, %v669_v51 }
  0x35   : > { %v2847_v2 = vrot.slane %v2833_v56, %v17555_v21  ;;  %v1645_v3 = vrot.slane %v1174_v58, %v17550_v12  ;;  %v2022_v5 = vsel %vm446_vm0, %v578_v4, %v1637_v59  ;;  %v693_v7 = vcombine.high %v683_v57, %v683_v57 }
  0x36   : > { %v1649_v48 = vrot.slane %v1176_v61, %v17550_v12  ;;  %v2023_v8 = vsel %vm446_vm0, %v592_v16, %v1641_v47  ;;  %v17671_v9 = vmul.f32 0.25, %v2022_v5  ;;  %v17673_v10 = vmul.f32 0.75, %v2022_v5 }
  0x37   : > { %v2848_v11 = vcombine.low %v2840_v60, %v2847_v2  ;;  %v2024_v15 = vsel %vm446_vm0, %v594_v34, %v1645_v3  ;;  %v17676_v18 = vmul.f32 0.25, %v2023_v8  ;;  %v17678_v19 = vmul.f32 0.75, %v2023_v8 }
  0x38   : > { %v2025_v20 = vsel %vm446_vm0, %v596_v35, %v1649_v48  ;;  %v17681_v23 = vmul.f32 0.25, %v2024_v15  ;;  %v17683_v4 = vmul.f32 0.75, %v2024_v15  ;;  %v2246_v16 = vadd.f32 %v17673_v10, %v17671_v9 }
  0x39   : > { %v15584_v24 = vpack.c.bf16 %v2848_v11, %v2848_v11  ;;  %v17687_v28 = vmul.f32 0.25, %v2025_v20  ;;  %v17689_v38 = vmul.f32 0.75, %v2025_v20  ;;  %v2247_v34 = vadd.f32 %v17678_v19, %v17676_v18 }
  0x3a   : > { %v2248_v42 = vadd.f32 %v17683_v4, %v17681_v23  ;;  %v1263_v35 = vrot.slane %v1241_v54, %v17553_v17  ;;  %v1271_v43 = vcombine.high %v1249_v55, %v1249_v55  ;;  %v1685_v44 = vrot.slane %v1249_v55, %v17550_v12  ;;  %v3930_v55 = vld [vmem:[#allocation3 + $0xc] sm:$0xf] }
  0x3b   : > { %v3575_v45 = vshrl.u32 %v15584_v24, 16  ;;  %v3578_v46 = vshll.u32 %v15584_v24, 16  ;;  %v2249_v50 = vadd.f32 %v17689_v38, %v17687_v28  ;;  %v2849_v52 = vcombine.low %v2246_v16, %v2247_v34 }
  0x3c   : > { %v1273_v53 = vcombine.high %v1263_v35, %v1263_v35  ;;  %v1689_v56 = vrot.slane %v1263_v35, %v17550_v12  ;;  %v1693_v58 = vrot.slane %v1271_v43, %v17550_v12  ;;  %v2034_v59 = vsel %vm446_vm0, %v669_v51, %v1685_v44 }
  0x3d   : > { %v17702_v60 = vrot.slane %v3575_v45, 7  ;;  %v2850_v61 = vcombine.low %v2248_v42, %v2249_v50  ;;  %v2857_v54 = vrot.slane %v2849_v52, %v17555_v21  ;;  %v17705_v47 = vmul.f32 0.25, %v2034_v59 }
  0x3e   : > { %v1697_v2 = vrot.slane %v1273_v53, %v17550_v12  ;;  %v2035_v3 = vsel %vm446_vm0, %v683_v57, %v1689_v56  ;;  %v2036_v5 = vsel %vm446_vm0, %v691_v62, %v1693_v58  ;;  %v660_v48 = vrot.slane %v646_v49, %v17553_v17 }
  0x3f   : > { %v3580_v51 = vor.u32 %v3578_v46, %v17702_v60  ;;  %v2864_v8 = vrot.slane %v2850_v61, %v17555_v21  ;;  %v17716_v11 = vmul.f32 0.25, %v2035_v3  ;;  %v17718_v15 = vmul.f32 0.25, %v2036_v5 }
  0x40   : > { %v2037_v20 = vsel %vm446_vm0, %v693_v7, %v1697_v2  ;;  %v2338_v57 = vadd.f32 %v17634_v29, %v17705_v47  ;;  %v662_v16 = vcombine.high %v660_v48, %v660_v48  ;;  %v676_v62 = vrot.slane %v660_v48, %v17553_v17  ;;  %v3934_v48 = vld [vmem:[#allocation3 + $0x14] sm:$0x1] }
  0x41   : > { %v3931_v39 = vsel %vm17598_vm6, %v3580_v51, %v3930_v55  ;;  %v2865_v49 = vcombine.low %v2857_v54, %v2864_v8  ;;  %v17726_v24 = vmul.f32 0.25, %v2037_v20  ;;  %v2339_v34 = vadd.f32 %v17636_v30, %v17716_v11 }
  0x42   : > { %3932 = vst [vmem:[#allocation3 + $0xc] sm:$0xf] %v3931_v39  ;;  %v2340_v42 = vadd.f32 %v17638_v31, %v17718_v15  ;;  %v690_v7 = vrot.slane %v662_v16, %v17553_v17  ;;  %v692_v35 = vcombine.high %v676_v62, %v676_v62  ;;  %v1226_v29 = vcombine.high %v17572_v40, %v17572_v40 }
  0x43   : > { %v17735_v43 = vpack.c.bf16 %v2865_v49, %v2865_v49  ;;  %v2341_v44 = vadd.f32 %v17642_v33, %v17726_v24  ;;  %v2866_v45 = vcombine.low %v2338_v57, %v2339_v34  ;;  %v17739_v46 = vmul.f32 0.75, %v2034_v59 }
  0x44   : > { %v694_v50 = vcombine.high %v690_v7, %v690_v7  ;;  %v1240_v30 = vrot.slane %v1226_v29, %v17553_v17  ;;  %v17742_v52 = vmul.f32 0.75, %v2035_v3  ;;  %v17744_v31 = vmul.f32 0.75, %v2036_v5 }
  0x45   : > { %v3583_v53 = vshrl.u32 %v17735_v43, 16  ;;  %v2867_v56 = vcombine.low %v2340_v42, %v2341_v44  ;;  %v2874_v40 = vrot.slane %v2866_v45, %v17555_v21  ;;  %v17748_v58 = vmul.f32 0.75, %v2037_v20 }
  0x46   : > { %v1242_v61 = vcombine.high %v1240_v30, %v1240_v30  ;;  %v1256_v33 = vrot.slane %v1240_v30, %v17553_v17  ;;  %v2250_v59 = vadd.f32 %v17739_v46, %v17621_v22  ;;  %v2251_v54 = vadd.f32 %v17742_v52, %v17629_v26 }
  0x47   : > { %v17755_v55 = vrot.slane %v3583_v53, 7  ;;  %v2881_v2 = vrot.slane %v2867_v56, %v17555_v21  ;;  %v2252_v3 = vadd.f32 %v17744_v31, %v17631_v27  ;;  %v2253_v5 = vadd.f32 %v17748_v58, %v17640_v32 }
  0x48   : > { %v1270_v51 = vrot.slane %v1242_v61, %v17553_v17  ;;  %v1272_v8 = vcombine.high %v1256_v33, %v1256_v33  ;;  %v1701_v20 = vrot.slane %v1256_v33, %v17550_v12  ;;  %v2900_v22 = vcombine.low %v2250_v59, %v2251_v54 }
  0x49   : > { %v3590_v57 = vrot.slane %v17755_v55, 4  ;;  %v2882_v26 = vcombine.low %v2874_v40, %v2881_v2  ;;  %v2901_v16 = vcombine.low %v2252_v3, %v2253_v5  ;;  %v481_v39 = vsel %vm477_vm1, %v460_v36, %v17560_v25 }
  0x4a   : > { %v1274_v27 = vcombine.high %v1270_v51, %v1270_v51  ;;  %v1705_v49 = vrot.slane %v1270_v51, %v17550_v12  ;;  %v1709_v32 = vrot.slane %v1272_v8, %v17550_v12  ;;  %v2038_v34 = vsel %vm446_vm0, %v676_v62, %v1701_v20 }
  0x4b   : > { %v3935_v42 = vsel %vm17606_vm7, %v3590_v57, %v3934_v48  ;;  %v15586_v29 = vpack.c.bf16 %v2882_v26, %v2882_v26  ;;  %v17774_v44 = vmul.f32 0.25, %v2038_v34  ;;  %v2908_v45 = vrot.slane %v2900_v22, %v17555_v21  ;;  %v3937_v48 = vld [vmem:[#allocation3 + $0x18] sm:$0xf] }
  0x4c   : > { %3936 = vst [vmem:[#allocation3 + $0x14] sm:$0x1] %v3935_v42  ;;  %v1713_v30 = vrot.slane %v1274_v27, %v17550_v12  ;;  %v2039_v25 = vsel %vm446_vm0, %v690_v7, %v1705_v49  ;;  %v2040_v36 = vsel %vm446_vm0, %v692_v35, %v1709_v32  ;;  %v2915_v53 = vrot.slane %v2901_v16, %v17555_v21  ;;  %v17814_v49 = vld [vmem:[%s17532_s9 + $0x18] sm:$0xff] }
  0x4d   : > { %v3592_v56 = vshrl.u32 %v15586_v29, 16  ;;  %v3595_v40 = vshll.u32 %v15586_v29, 16  ;;  %v17781_v62 = vmul.f32 0.25, %v2039_v25  ;;  %v17783_v61 = vmul.f32 0.25, %v2040_v36 }
  0x4e   : > { %v2041_v33 = vsel %vm446_vm0, %v694_v50, %v1713_v30  ;;  %v2342_v59 = vadd.f32 %v17673_v10, %v17774_v44  ;;  %v2916_v54 = vcombine.low %v2908_v45, %v2915_v53  ;;  %v17788_v2 = vmul.f32 0.75, %v2038_v34  ;;  %v3944_v30 = vld [vmem:[#allocation3 + $0x24] sm:$0xf] }
  0x4f   : > { %v17790_v3 = vrot.slane %v3592_v56, 7  ;;  %v17792_v7 = vmul.f32 0.25, %v2041_v33  ;;  %v2343_v35 = vadd.f32 %v17678_v19, %v17781_v62  ;;  %v2344_v5 = vadd.f32 %v17683_v4, %v17783_v61 }
  0x50   : > { %v15588_v51 = vpack.c.bf16 %v2916_v54, %v2916_v54  ;;  %v17798_v50 = vmul.f32 0.75, %v2039_v25  ;;  %v17800_v8 = vmul.f32 0.75, %v2040_v36  ;;  %v17802_v10 = vmul.f32 0.75, %v2041_v33 }
  0x51   : > { %v3597_v20 = vor.u32 %v3595_v40, %v17790_v3  ;;  %v2345_v22 = vadd.f32 %v17689_v38, %v17792_v7  ;;  %v2883_v57 = vcombine.low %v2342_v59, %v2343_v35  ;;  %v2254_v19 = vadd.f32 %v17788_v2, %v17671_v9 }
  0x52   : > { %v3609_v26 = vshrl.u32 %v15588_v51, 16  ;;  %v3612_v16 = vshll.u32 %v15588_v51, 16  ;;  %v2255_v4 = vadd.f32 %v17798_v50, %v17676_v18  ;;  %v2256_v27 = vadd.f32 %v17800_v8, %v17681_v23 }
  0x53   : > { %v3938_v32 = vsel %vm17598_vm6, %v3597_v20, %v3937_v48  ;;  %v2884_v34 = vcombine.low %v2344_v5, %v2345_v22  ;;  %v2891_v38 = vrot.slane %v2883_v57, %v17555_v21  ;;  %v2257_v42 = vadd.f32 %v17802_v10, %v17687_v28 }
  0x54   : > { %3939 = vst [vmem:[#allocation3 + $0x18] sm:$0xf] %v3938_v32  ;;  %v17821_v9 = vrot.slane %v3609_v26, 7  ;;  %v2917_v29 = vcombine.low %v2254_v19, %v2255_v4  ;;  %v491_v18 = vmul.f32 0.25, %v17576_v41  ;;  %v521_v45 = vmul.f32 0.25, %v481_v39 }
  0x55   : > { %v2898_v23 = vrot.slane %v2884_v34, %v17555_v21  ;;  %v2918_v25 = vcombine.low %v2256_v27, %v2257_v42  ;;  %v430_v36 = vrot.slane %v17814_v49, 7  ;;  %v461_v53 = vrot.slane %v17814_v49, 1 }
  0x56   : > { %v3614_v56 = vor.u32 %v3612_v16, %v17821_v9  ;;  %v2925_v40 = vrot.slane %v2917_v29, %v17555_v21  ;;  %v511_v28 = vadd.f32 %v17568_v37, %v491_v18  ;;  %v531_v33 = vadd.f32 %v521_v45, %v17568_v37 }
  0x57   : > { %v2899_v59 = vcombine.low %v2891_v38, %v2898_v23  ;;  %v2932_v41 = vrot.slane %v2918_v25, %v17555_v21  ;;  %v451_v39 = vsel %vm446_vm0, %v17814_v49, %v430_v36  ;;  %v17836_v54 = vsel %vm477_vm1, %v461_v53, %v17814_v49  ;;  %v3941_v53 = vld [vmem:[#allocation3 + $0x20] sm:$0x1] }
  0x58   : > { %v3945_v35 = vsel %vm17598_vm6, %v3614_v56, %v3944_v30  ;;  %v702_v5 = vrot.slane %v511_v28, %v17553_v17  ;;  %v1282_v48 = vrot.slane %v531_v33, %v17553_v17  ;;  %v695_v51 = vcombine.high %v511_v28, %v511_v28 }
  0x59   : > { %v17842_v20 = vpack.c.bf16 %v2899_v59, %v2899_v59  ;;  %3946 = vst [vmem:[#allocation3 + $0x24] sm:$0xf] %v3945_v35  ;;  %v2933_v37 = vcombine.low %v2925_v40, %v2932_v41  ;;  %v1275_v22 = vcombine.high %v531_v33, %v531_v33  ;;  %v17844_v57 = vmul.f32 0.25, %v451_v39 }
  0x5a   : > { %v710_v19 = vcombine.high %v702_v5, %v702_v5  ;;  %v718_v26 = vrot.slane %v702_v5, %v17553_v17  ;;  %v1290_v16 = vcombine.high %v1282_v48, %v1282_v48  ;;  %v1298_v4 = vrot.slane %v1282_v48, %v17553_v17  ;;  %v3948_v5 = vld [vmem:[#allocation3 + $0x2c] sm:$0x1] }
  0x5b   : > { %v3600_v27 = vshrl.u32 %v17842_v20, 16  ;;  %v17849_v32 = vpack.c.bf16 %v2933_v37, %v2933_v37  ;;  %v709_v34 = vrot.slane %v695_v51, %v17553_v17  ;;  %v1289_v38 = vrot.slane %v1275_v22, %v17553_v17 }
  0x5c   : > { %v732_v42 = vrot.slane %v710_v19, %v17553_v17  ;;  %v740_v29 = vcombine.high %v718_v26, %v718_v26  ;;  %v1312_v18 = vrot.slane %v1290_v16, %v17553_v17  ;;  %v1320_v45 = vcombine.high %v1298_v4, %v1298_v4 }
  0x5d   : > { %v17855_v23 = vrot.slane %v3600_v27, 7  ;;  %v3617_v30 = vshrl.u32 %v17849_v32, 16  ;;  %v1717_v25 = vrot.slane %v1298_v4, %v17550_v12  ;;  %v711_v36 = vcombine.high %v709_v34, %v709_v34 }
  0x5e   : > { %v742_v56 = vcombine.high %v732_v42, %v732_v42  ;;  %v1322_v40 = vcombine.high %v1312_v18, %v1312_v18  ;;  %v1721_v28 = vrot.slane %v1312_v18, %v17550_v12  ;;  %v1725_v33 = vrot.slane %v1320_v45, %v17550_v12 }
  0x5f   : > { %v3607_v59 = vrot.slane %v17855_v23, 4  ;;  %v17862_v41 = vrot.slane %v3617_v30, 7  ;;  %v2042_v39 = vsel %vm446_vm0, %v718_v26, %v1717_v25  ;;  %v725_v35 = vrot.slane %v709_v34, %v17553_v17 }
  0x60   : > { %v1729_v48 = vrot.slane %v1322_v40, %v17550_v12  ;;  %v2043_v51 = vsel %vm446_vm0, %v732_v42, %v1721_v28  ;;  %v2044_v37 = vsel %vm446_vm0, %v740_v29, %v1725_v33  ;;  %v17869_v22 = vmul.f32 0.25, %v2042_v39 }
  0x61   : > { %21583 = vst [vmem:[#allocation12_spill] sm:$0xff] %v17862_v41  ;;  %v3942_v19 = vsel %vm17606_vm7, %v3607_v59, %v3941_v53  ;;  %v3624_v16 = vrot.slane %v17862_v41, 4  ;;  %v17874_v4 = vmul.f32 0.25, %v2043_v51  ;;  %v17876_v27 = vmul.f32 0.25, %v2044_v37 }
  0x62   : > { %3943 = vst [vmem:[#allocation3 + $0x20] sm:$0x1] %v3942_v19  ;;  %v2045_v26 = vsel %vm446_vm0, %v742_v56, %v1729_v48  ;;  %v2346_v34 = vadd.f32 %v17739_v46, %v17869_v22  ;;  %v739_v42 = vrot.slane %v711_v36, %v17553_v17  ;;  %v741_v29 = vcombine.high %v725_v35, %v725_v35 }
  0x63   : > { %v3949_v18 = vsel %vm17606_vm7, %v3624_v16, %v3948_v5  ;;  %v17884_v45 = vmul.f32 0.25, %v2045_v26  ;;  %v2347_v30 = vadd.f32 %v17742_v52, %v17874_v4  ;;  %v2348_v25 = vadd.f32 %v17744_v31, %v17876_v27 }
  0x64   : > { %3950 = vst [vmem:[#allocation3 + $0x2c] sm:$0x1] %v3949_v18  ;;  %v743_v53 = vcombine.high %v739_v42, %v739_v42  ;;  %v1291_v56 = vcombine.high %v1289_v38, %v1289_v38  ;;  %v1305_v40 = vrot.slane %v1289_v38, %v17553_v17  ;;  %v17891_v46 = vmul.f32 0.75, %v2042_v39 }
  0x65   : > { %v2349_v36 = vadd.f32 %v17748_v58, %v17884_v45  ;;  %v2934_v28 = vcombine.low %v2346_v34, %v2347_v30  ;;  %v17895_v33 = vmul.f32 0.75, %v2043_v51  ;;  %v17897_v59 = vmul.f32 0.75, %v2044_v37 }
  0x66   : > { %v1319_v52 = vrot.slane %v1291_v56, %v17553_v17  ;;  %v1321_v5 = vcombine.high %v1305_v40, %v1305_v40  ;;  %v1733_v31 = vrot.slane %v1305_v40, %v17550_v12  ;;  %v17901_v48 = vmul.f32 0.75, %v2045_v26 }
  0x67   : > { %v2935_v19 = vcombine.low %v2348_v25, %v2349_v36  ;;  %v2942_v38 = vrot.slane %v2934_v28, %v17555_v21  ;;  %v2258_v39 = vadd.f32 %v17891_v46, %v17705_v47  ;;  %v2259_v58 = vadd.f32 %v17895_v33, %v17716_v11 }
  0x68   : > { %v1323_v51 = vcombine.high %v1319_v52, %v1319_v52  ;;  %v1737_v37 = vrot.slane %v1319_v52, %v17550_v12  ;;  %v1741_v16 = vrot.slane %v1321_v5, %v17550_v12  ;;  %v2046_v34 = vsel %vm446_vm0, %v725_v35, %v1733_v31 }
  0x69   : > { %v2949_v18 = vrot.slane %v2935_v19, %v17555_v21  ;;  %v17912_v26 = vmul.f32 0.25, %v2046_v34  ;;  %v2260_v30 = vadd.f32 %v17897_v59, %v17718_v15  ;;  %v2261_v47 = vadd.f32 %v17901_v48, %v17726_v24 }
  0x6a   : > { %v1745_v25 = vrot.slane %v1323_v51, %v17550_v12  ;;  %v2047_v11 = vsel %vm446_vm0, %v739_v42, %v1737_v37  ;;  %v2048_v56 = vsel %vm446_vm0, %v741_v29, %v1741_v16  ;;  %v2968_v40 = vcombine.low %v2258_v39, %v2259_v58 }
  0x6b   : > { %v2950_v36 = vcombine.low %v2942_v38, %v2949_v18  ;;  %v17921_v28 = vmul.f32 0.25, %v2047_v11  ;;  %v17923_v35 = vmul.f32 0.25, %v2048_v56  ;;  %v2350_v52 = vadd.f32 %v17788_v2, %v17912_v26 }
  0x6c   : > { %v2049_v15 = vsel %vm446_vm0, %v743_v53, %v1745_v25  ;;  %v2969_v5 = vcombine.low %v2260_v30, %v2261_v47  ;;  %v2976_v24 = vrot.slane %v2968_v40, %v17555_v21  ;;  %v17929_v31 = vmul.f32 0.75, %v2046_v34 }
  0x6d   : > { %v15590_v19 = vpack.c.bf16 %v2950_v36, %v2950_v36  ;;  %v17931_v42 = vmul.f32 0.25, %v2049_v15  ;;  %v2351_v29 = vadd.f32 %v17798_v50, %v17921_v28  ;;  %v2352_v38 = vadd.f32 %v17800_v8, %v17923_v35 }
  0x6e   : > { %v2983_v39 = vrot.slane %v2969_v5, %v17555_v21  ;;  %v17938_v58 = vmul.f32 0.75, %v2047_v11  ;;  %v17940_v2 = vmul.f32 0.75, %v2048_v56  ;;  %v17942_v53 = vmul.f32 0.75, %v2049_v15  ;;  %v17960_v15 = vld [vmem:[%s17532_s9 + $0x20] sm:$0xff] }
  0x6f   : > { %v3626_v51 = vshrl.u32 %v15590_v19, 16  ;;  %v3629_v37 = vshll.u32 %v15590_v19, 16  ;;  %v2353_v16 = vadd.f32 %v17802_v10, %v17931_v42  ;;  %v2951_v34 = vcombine.low %v2350_v52, %v2351_v29  ;;  %v3951_v10 = vld [vmem:[#allocation3 + $0x30] sm:$0xf] }
  0x70   : > { %v2984_v18 = vcombine.low %v2976_v24, %v2983_v39  ;;  %v2262_v50 = vadd.f32 %v17929_v31, %v17774_v44  ;;  %v2263_v8 = vadd.f32 %v17938_v58, %v17781_v62  ;;  %v2264_v30 = vadd.f32 %v17940_v2, %v17783_v61 }
  0x71   : > { %v17952_v47 = vrot.slane %v3626_v51, 7  ;;  %v2952_v25 = vcombine.low %v2352_v38, %v2353_v16  ;;  %v2959_v11 = vrot.slane %v2951_v34, %v17555_v21  ;;  %v2265_v56 = vadd.f32 %v17942_v53, %v17792_v7 }
  0x72   : > { %v15592_v40 = vpack.c.bf16 %v2984_v18, %v2984_v18  ;;  %v2985_v36 = vcombine.low %v2262_v50, %v2263_v8  ;;  %v502_v52 = vmul.f32 0.75, %v17814_v49  ;;  %v522_v44 = vmul.f32 0.25, %v17836_v54 }
  0x73   : > { %v3631_v62 = vor.u32 %v3629_v37, %v17952_v47  ;;  %v2966_v61 = vrot.slane %v2952_v25, %v17555_v21  ;;  %v2986_v5 = vcombine.low %v2264_v30, %v2265_v56  ;;  %v431_v24 = vrot.slane %v17960_v15, 7 }
  0x74   : > { %v3643_v19 = vshrl.u32 %v15592_v40, 16  ;;  %v3646_v29 = vshll.u32 %v15592_v40, 16  ;;  %v2993_v7 = vrot.slane %v2985_v36, %v17555_v21  ;;  %v512_v38 = vadd.f32 %v502_v52, %v17844_v57  ;;  %v3958_v57 = vld [vmem:[#allocation3 + $0x3c] sm:$0xf] }
  0x75   : > { %v3952_v49 = vsel %vm17598_vm6, %v3631_v62, %v3951_v10  ;;  %v2967_v39 = vcombine.low %v2959_v11, %v2966_v61  ;;  %v3000_v54 = vrot.slane %v2986_v5, %v17555_v21  ;;  %v532_v51 = vadd.f32 %v522_v44, %v502_v52 }
  0x76   : > { %3953 = vst [vmem:[#allocation3 + $0x30] sm:$0xf] %v3952_v49  ;;  %v17970_v37 = vrot.slane %v3643_v19, 7  ;;  %v751_v16 = vrot.slane %v512_v38, %v17553_v17  ;;  %v744_v34 = vcombine.high %v512_v38, %v512_v38  ;;  %v17975_v18 = vsel %vm446_vm0, %v17960_v15, %v431_v24 }
  0x77   : > { %v17977_v50 = vpack.c.bf16 %v2967_v39, %v2967_v39  ;;  %v3001_v8 = vcombine.low %v2993_v7, %v3000_v54  ;;  %v1331_v30 = vrot.slane %v532_v51, %v17553_v17  ;;  %v1324_v25 = vcombine.high %v532_v51, %v532_v51  ;;  %v3955_v39 = vld [vmem:[#allocation3 + $0x38] sm:$0x1] }
  0x78   : > { %21584 = vst [vmem:[#allocation13_spill] sm:$0xff] %v17970_v37  ;;  %v3648_v11 = vor.u32 %v3646_v29, %v17970_v37  ;;  %v759_v56 = vcombine.high %v751_v16, %v751_v16  ;;  %v767_v10 = vrot.slane %v751_v16, %v17553_v17  ;;  %v758_v40 = vrot.slane %v744_v34, %v17553_v17 }
  0x79   : > { %v3634_v36 = vshrl.u32 %v17977_v50, 16  ;;  %v17984_v52 = vpack.c.bf16 %v3001_v8, %v3001_v8  ;;  %v1339_v44 = vcombine.high %v1331_v30, %v1331_v30  ;;  %v1347_v62 = vrot.slane %v1331_v30, %v17553_v17 }
  0x7a   : > { %v3959_v61 = vsel %vm17598_vm6, %v3648_v11, %v3958_v57  ;;  %v781_v5 = vrot.slane %v759_v56, %v17553_v17  ;;  %v789_v24 = vcombine.high %v767_v10, %v767_v10  ;;  %v760_v19 = vcombine.high %v758_v40, %v758_v40  ;;  %v3962_v56 = vld [vmem:[#allocation3 + $0x44] sm:$0x1] }
  0x7b   : > { %21585 = vst [vmem:[#allocation14_spill] sm:$0xff] %v17984_v52  ;;  %v17990_v29 = vrot.slane %v3634_v36, 7  ;;  %3960 = vst [vmem:[#allocation3 + $0x3c] sm:$0xf] %v3959_v61  ;;  %v3651_v7 = vshrl.u32 %v17984_v52, 16  ;;  %v1361_v38 = vrot.slane %v1339_v44, %v17553_v17  ;;  %v1369_v49 = vcombine.high %v1347_v62, %v1347_v62 }
  0x7c   : > { %v791_v54 = vcombine.high %v781_v5, %v781_v5  ;;  %v1749_v51 = vrot.slane %v1347_v62, %v17550_v12  ;;  %v774_v16 = vrot.slane %v758_v40, %v17553_v17  ;;  %v788_v34 = vrot.slane %v760_v19, %v17553_v17 }
  0x7d   : > { %21586 = vst [vmem:[#allocation15_spill] sm:$0xff] %v17990_v29  ;;  %v3641_v57 = vrot.slane %v17990_v29, 4  ;;  %v17998_v8 = vrot.slane %v3651_v7, 7  ;;  %v1371_v30 = vcombine.high %v1361_v38, %v1361_v38  ;;  %v1753_v11 = vrot.slane %v1361_v38, %v17550_v12 }
  0x7e   : > { %v1757_v36 = vrot.slane %v1369_v49, %v17550_v12  ;;  %v2050_v44 = vsel %vm446_vm0, %v767_v10, %v1749_v51  ;;  %v790_v61 = vcombine.high %v774_v16, %v774_v16  ;;  %v792_v1 = vcombine.high %v788_v34, %v788_v34 }
  0x7f   : > { %21587 = vst [vmem:[#allocation16_spill] sm:$0xff] %v17998_v8  ;;  %v3956_v62 = vsel %vm17606_vm7, %v3641_v57, %v3955_v39  ;;  %v3658_v40 = vrot.slane %v17998_v8, 4  ;;  %v1761_v19 = vrot.slane %v1371_v30, %v17550_v12  ;;  %v2051_v7 = vsel %vm446_vm0, %v781_v5, %v1753_v11  ;;  %v3976_v8 = vld [vmem:[#allocation3 + $0x5c] sm:$0x1] }
  0x80   : > { %3957 = vst [vmem:[#allocation3 + $0x38] sm:$0x1] %v3956_v62  ;;  %v2052_v0 = vsel %vm446_vm0, %v789_v24, %v1757_v36  ;;  %v18009_v38 = vmul.f32 0.25, %v2050_v44  ;;  %v18011_v29 = vmul.f32 0.25, %v2051_v7  ;;  %v1338_v10 = vrot.slane %v1324_v25, %v17553_v17 }
  0x81   : > { %v3963_v49 = vsel %vm17606_vm7, %v3658_v40, %v3962_v56  ;;  %v2053_v39 = vsel %vm446_vm0, %v791_v54, %v1761_v19  ;;  %v18017_v51 = vmul.f32 0.25, %v2052_v0  ;;  %v18019_v57 = vmul.f32 0.75, %v2050_v44 }
  0x82   : > { %3964 = vst [vmem:[#allocation3 + $0x44] sm:$0x1] %v3963_v49  ;;  %v18021_v5 = vmul.f32 0.25, %v2053_v39  ;;  %v2354_v24 = vadd.f32 %v17891_v46, %v18009_v38  ;;  %v2355_v30 = vadd.f32 %v17895_v33, %v18011_v29  ;;  %v1340_v11 = vcombine.high %v1338_v10, %v1338_v10 }
  0x83   : > { %v2356_v25 = vadd.f32 %v17897_v59, %v18017_v51  ;;  %v1354_v56 = vrot.slane %v1338_v10, %v17553_v17  ;;  %v18030_v54 = vmul.f32 0.75, %v2051_v7  ;;  %v18032_v36 = vmul.f32 0.75, %v2052_v0 }
  0x84   : > { %v2357_v44 = vadd.f32 %v17901_v48, %v18021_v5  ;;  %v3002_v62 = vcombine.low %v2354_v24, %v2355_v30  ;;  %v1368_v40 = vrot.slane %v1340_v11, %v17553_v17  ;;  %v18037_v46 = vmul.f32 0.75, %v2053_v39 }
  0x85   : > { %v1370_v19 = vcombine.high %v1354_v56, %v1354_v56  ;;  %v1765_v33 = vrot.slane %v1354_v56, %v17550_v12  ;;  %v2266_v59 = vadd.f32 %v18019_v57, %v17869_v22  ;;  %v2267_v7 = vadd.f32 %v18030_v54, %v17874_v4 }
  0x86   : > { %v3003_v10 = vcombine.low %v2356_v25, %v2357_v44  ;;  %v3010_v0 = vrot.slane %v3002_v62, %v17555_v21  ;;  %v1372_v49 = vcombine.high %v1368_v40, %v1368_v40  ;;  %v1769_v48 = vrot.slane %v1368_v40, %v17550_v12 }
  0x87   : > { %v1773_v24 = vrot.slane %v1370_v19, %v17550_v12  ;;  %v2054_v39 = vsel %vm446_vm0, %v774_v16, %v1765_v33  ;;  %v2268_v30 = vadd.f32 %v18032_v36, %v17876_v27  ;;  %v2269_v11 = vadd.f32 %v18037_v46, %v17884_v45 }
  0x88   : > { %v3017_v22 = vrot.slane %v3003_v10, %v17555_v21  ;;  %v1777_v4 = vrot.slane %v1372_v49, %v17550_v12  ;;  %v2055_v25 = vsel %vm446_vm0, %v788_v34, %v1769_v48  ;;  %v18055_v56 = vmul.f32 0.25, %v2054_v39 }
  0x89   : > { %v2056_v44 = vsel %vm446_vm0, %v790_v61, %v1773_v24  ;;  %v18058_v62 = vmul.f32 0.25, %v2055_v25  ;;  %v3036_v40 = vcombine.low %v2266_v59, %v2267_v7  ;;  %v3037_v16 = vcombine.low %v2268_v30, %v2269_v11 }
  0x8a   : > { %v3018_v19 = vcombine.low %v3010_v0, %v3017_v22  ;;  %v2057_v27 = vsel %vm446_vm0, %v792_v1, %v1777_v4  ;;  %v18061_v33 = vmul.f32 0.25, %v2056_v44  ;;  %v2358_v45 = vadd.f32 %v17929_v31, %v18055_v56 }
  0x8b   : > { %v18065_v10 = vmul.f32 0.25, %v2057_v27  ;;  %v2359_v34 = vadd.f32 %v17938_v58, %v18058_v62  ;;  %v3044_v49 = vrot.slane %v3036_v40, %v17555_v21  ;;  %v3051_v61 = vrot.slane %v3037_v16, %v17555_v21 }
  0x8c   : > { %v15594_v48 = vpack.c.bf16 %v3018_v19, %v3018_v19  ;;  %v2360_v59 = vadd.f32 %v17940_v2, %v18061_v33  ;;  %v18073_v7 = vmul.f32 0.75, %v2054_v39  ;;  %v18075_v1 = vmul.f32 0.75, %v2055_v25 }
  0x8d   : > { %v2361_v31 = vadd.f32 %v17942_v53, %v18065_v10  ;;  %v3019_v0 = vcombine.low %v2358_v45, %v2359_v34  ;;  %v3052_v24 = vcombine.low %v3044_v49, %v3051_v61  ;;  %v18079_v30 = vmul.f32 0.75, %v2056_v44 }
  0x8e   : > { %v3660_v58 = vshrl.u32 %v15594_v48, 16  ;;  %v3663_v11 = vshll.u32 %v15594_v48, 16  ;;  %v18081_v22 = vmul.f32 0.75, %v2057_v27  ;;  %v2270_v4 = vadd.f32 %v18073_v7, %v17912_v26  ;;  %v3965_v27 = vld [vmem:[#allocation3 + $0x48] sm:$0xf] }
  0x8f   : > { %v3020_v40 = vcombine.low %v2360_v59, %v2361_v31  ;;  %v3027_v2 = vrot.slane %v3019_v0, %v17555_v21  ;;  %v15596_v39 = vpack.c.bf16 %v3052_v24, %v3052_v24  ;;  %v2271_v25 = vadd.f32 %v18075_v1, %v17921_v28 }
  0x90   : > { %v18088_v53 = vrot.slane %v3660_v58, 7  ;;  %v2272_v44 = vadd.f32 %v18079_v30, %v17923_v35  ;;  %v2273_v16 = vadd.f32 %v18081_v22, %v17931_v42  ;;  %v462_v19 = vrot.slane %v17960_v15, 1  ;;  %v407_v35 = vld [vmem:[%s17532_s9 + $0x28] sm:$0xff] }
  0x91   : > { %v3034_v26 = vrot.slane %v3020_v40, %v17555_v21  ;;  %v3677_v45 = vshrl.u32 %v15596_v39, 16  ;;  %v3680_v34 = vshll.u32 %v15596_v39, 16  ;;  %v3053_v49 = vcombine.low %v2270_v4, %v2271_v25  ;;  %v3972_v4 = vld [vmem:[#allocation3 + $0x54] sm:$0xf] }
  0x92   : > { %21588 = vst [vmem:[#allocation17_spill] sm:$0xff] %v18088_v53  ;;  %v3665_v61 = vor.u32 %v3663_v11, %v18088_v53  ;;  %v3054_v48 = vcombine.low %v2272_v44, %v2273_v16  ;;  %v483_v28 = vsel %vm477_vm1, %v462_v19, %v17960_v15  ;;  %v493_v59 = vmul.f32 0.25, %v17975_v18 }
  0x93   : > { %v3035_v31 = vcombine.low %v3027_v2, %v3034_v26  ;;  %v18101_v0 = vrot.slane %v3677_v45, 7  ;;  %v3061_v42 = vrot.slane %v3053_v49, %v17555_v21  ;;  %v503_v24 = vmul.f32 0.75, %v17960_v15 }
  0x94   : > { %v3966_v58 = vsel %vm17598_vm6, %v3665_v61, %v3965_v27  ;;  %v3068_v11 = vrot.slane %v3054_v48, %v17555_v21  ;;  %v523_v40 = vmul.f32 0.25, %v483_v28  ;;  %v432_v39 = vrot.slane %v407_v35, 7 }
  0x95   : > { %21589 = vst [vmem:[#allocation18_spill] sm:$0xff] %v18101_v0  ;;  %3967 = vst [vmem:[#allocation3 + $0x48] sm:$0xf] %v3966_v58  ;;  %v18108_v25 = vpack.c.bf16 %v3035_v31, %v3035_v31  ;;  %v3682_v18 = vor.u32 %v3680_v34, %v18101_v0  ;;  %v513_v2 = vadd.f32 %v503_v24, %v493_v59  ;;  %v463_v44 = vrot.slane %v407_v35, 1 }
  0x96   : > { %v3069_v16 = vcombine.low %v3061_v42, %v3068_v11  ;;  %v533_v19 = vadd.f32 %v523_v40, %v503_v24  ;;  %v18112_v26 = vsel %vm446_vm0, %v407_v35, %v432_v39  ;;  %v18114_v15 = vmul.f32 0.75, %v407_v35 }
  0x97   : > { %21590 = vst [vmem:[#allocation19_spill] sm:$0xff] %v18108_v25  ;;  %v3668_v27 = vshrl.u32 %v18108_v25, 16  ;;  %v3973_v45 = vsel %vm17598_vm6, %v3682_v18, %v3972_v4  ;;  %v800_v49 = vrot.slane %v513_v2, %v17553_v17  ;;  %v793_v61 = vcombine.high %v513_v2, %v513_v2  ;;  %v3969_v4 = vld [vmem:[#allocation3 + $0x50] sm:$0x1] }
  0x98   : > { %3974 = vst [vmem:[#allocation3 + $0x54] sm:$0xf] %v3973_v45  ;;  %v18120_v48 = vpack.c.bf16 %v3069_v16, %v3069_v16  ;;  %v1380_v34 = vrot.slane %v533_v19, %v17553_v17  ;;  %v1373_v28 = vcombine.high %v533_v19, %v533_v19  ;;  %v18124_v59 = vsel %vm477_vm1, %v463_v44, %v407_v35 }
  0x99   : > { %v18126_v31 = vrot.slane %v3668_v27, 7  ;;  %v808_v42 = vcombine.high %v800_v49, %v800_v49  ;;  %v816_v24 = vrot.slane %v800_v49, %v17553_v17  ;;  %v807_v58 = vrot.slane %v793_v61, %v17553_v17 }
  0x9a   : > { %21591 = vst [vmem:[#allocation20_spill] sm:$0xff] %v18120_v48  ;;  %v3685_v11 = vshrl.u32 %v18120_v48, 16  ;;  %v1388_v40 = vcombine.high %v1380_v34, %v1380_v34  ;;  %v1396_v39 = vrot.slane %v1380_v34, %v17553_v17  ;;  %v1387_v18 = vrot.slane %v1373_v28, %v17553_v17 }
  0x9b   : > { %21592 = vst [vmem:[#allocation21_spill] sm:$0xff] %v18126_v31  ;;  %v3675_v2 = vrot.slane %v18126_v31, 4  ;;  %v830_v35 = vrot.slane %v808_v42, %v17553_v17  ;;  %v838_v44 = vcombine.high %v816_v24, %v816_v24  ;;  %v809_v16 = vcombine.high %v807_v58, %v807_v58 }
  0x9c   : > { %v18135_v19 = vrot.slane %v3685_v11, 7  ;;  %v1410_v27 = vrot.slane %v1388_v40, %v17553_v17  ;;  %v1418_v45 = vcombine.high %v1396_v39, %v1396_v39  ;;  %v1781_v49 = vrot.slane %v1396_v39, %v17550_v12 }
  0x9d   : > { %v3970_v61 = vsel %vm17606_vm7, %v3675_v2, %v3969_v4  ;;  %v840_v34 = vcombine.high %v830_v35, %v830_v35  ;;  %v823_v28 = vrot.slane %v807_v58, %v17553_v17  ;;  %v837_v31 = vrot.slane %v809_v16, %v17553_v17 }
  0x9e   : > { %21593 = vst [vmem:[#allocation22_spill] sm:$0xff] %v18135_v19  ;;  %3971 = vst [vmem:[#allocation3 + $0x50] sm:$0x1] %v3970_v61  ;;  %v3692_v42 = vrot.slane %v18135_v19, 4  ;;  %v1420_v48 = vcombine.high %v1410_v27, %v1410_v27  ;;  %v1785_v11 = vrot.slane %v1410_v27, %v17550_v12  ;;  %v1789_v40 = vrot.slane %v1418_v45, %v17550_v12 }
  0x9f   : > { %v2058_v0 = vsel %vm446_vm0, %v816_v24, %v1781_v49  ;;  %v839_v39 = vcombine.high %v823_v28, %v823_v28  ;;  %v841_v25 = vcombine.high %v837_v31, %v837_v31  ;;  %v1389_v53 = vcombine.high %v1387_v18, %v1387_v18 }
  0xa0   : > { %v3977_v4 = vsel %vm17606_vm7, %v3692_v42, %v3976_v8  ;;  %v1793_v58 = vrot.slane %v1420_v48, %v17550_v12  ;;  %v2059_v2 = vsel %vm446_vm0, %v830_v35, %v1785_v11  ;;  %v2060_v16 = vsel %vm446_vm0, %v838_v44, %v1789_v40 }
  0xa1   : > { %3978 = vst [vmem:[#allocation3 + $0x5c] sm:$0x1] %v3977_v4  ;;  %v18152_v61 = vmul.f32 0.25, %v2058_v0  ;;  %v18154_v27 = vmul.f32 0.25, %v2059_v2  ;;  %v18156_v45 = vmul.f32 0.25, %v2060_v16  ;;  %v1403_v24 = vrot.slane %v1387_v18, %v17553_v17 }
  0xa2   : > { %v2061_v49 = vsel %vm446_vm0, %v840_v34, %v1793_v58  ;;  %v1417_v19 = vrot.slane %v1389_v53, %v17553_v17  ;;  %v18161_v8 = vmul.f32 0.75, %v2058_v0  ;;  %v18163_v48 = vmul.f32 0.75, %v2059_v2 }
  0xa3   : > { %v18165_v35 = vmul.f32 0.25, %v2061_v49  ;;  %v2362_v44 = vadd.f32 %v18019_v57, %v18152_v61  ;;  %v2363_v42 = vadd.f32 %v18030_v54, %v18154_v27  ;;  %v2364_v11 = vadd.f32 %v18032_v36, %v18156_v45 }
  0xa4   : > { %v1419_v18 = vcombine.high %v1403_v24, %v1403_v24  ;;  %v1421_v40 = vcombine.high %v1417_v19, %v1417_v19  ;;  %v1797_v34 = vrot.slane %v1403_v24, %v17550_v12  ;;  %v1801_v53 = vrot.slane %v1417_v19, %v17550_v12 }
  0xa5   : > { %v2365_v0 = vadd.f32 %v18037_v46, %v18165_v35  ;;  %v3070_v4 = vcombine.low %v2362_v44, %v2363_v42  ;;  %v18177_v58 = vmul.f32 0.75, %v2060_v16  ;;  %v18179_v2 = vmul.f32 0.75, %v2061_v49 }
  0xa6   : > { %v1805_v57 = vrot.slane %v1419_v18, %v17550_v12  ;;  %v1809_v54 = vrot.slane %v1421_v40, %v17550_v12  ;;  %v2062_v36 = vsel %vm446_vm0, %v823_v28, %v1797_v34  ;;  %v2063_v52 = vsel %vm446_vm0, %v837_v31, %v1801_v53 }
  0xa7   : > { %v3071_v41 = vcombine.low %v2364_v11, %v2365_v0  ;;  %v3078_v24 = vrot.slane %v3070_v4, %v17555_v21  ;;  %v18186_v19 = vmul.f32 0.25, %v2062_v36  ;;  %v18188_v37 = vmul.f32 0.25, %v2063_v52 }
  0xa8   : > { %v2064_v46 = vsel %vm446_vm0, %v839_v39, %v1805_v57  ;;  %v2065_v16 = vsel %vm446_vm0, %v841_v25, %v1809_v54  ;;  %v2274_v49 = vadd.f32 %v18161_v8, %v18009_v38  ;;  %v2275_v44 = vadd.f32 %v18163_v48, %v18011_v29 }
  0xa9   : > { %v3085_v28 = vrot.slane %v3071_v41, %v17555_v21  ;;  %v18197_v31 = vmul.f32 0.25, %v2064_v46  ;;  %v18199_v42 = vmul.f32 0.25, %v2065_v16  ;;  %v2366_v11 = vadd.f32 %v18073_v7, %v18186_v19 }
  0xaa   : > { %v2367_v39 = vadd.f32 %v18075_v1, %v18188_v37  ;;  %v2276_v25 = vadd.f32 %v18177_v58, %v18017_v51  ;;  %v2277_v38 = vadd.f32 %v18179_v2, %v18021_v5  ;;  %v3104_v18 = vcombine.low %v2274_v49, %v2275_v44 }
  0xab   : > { %v3086_v29 = vcombine.low %v3078_v24, %v3085_v28  ;;  %v2368_v41 = vadd.f32 %v18079_v30, %v18197_v31  ;;  %v2369_v40 = vadd.f32 %v18081_v22, %v18199_v42  ;;  %v18213_v34 = vmul.f32 0.75, %v2062_v36 }
  0xac   : > { %v3087_v7 = vcombine.low %v2366_v11, %v2367_v39  ;;  %v3105_v53 = vcombine.low %v2276_v25, %v2277_v38  ;;  %v3112_v1 = vrot.slane %v3104_v18, %v17555_v21  ;;  %v18216_v0 = vmul.f32 0.75, %v2063_v52  ;;  %v18235_v39 = vld [vmem:[%s17532_s9 + $0x30] sm:$0xff]  ;;  %v3979_v18 = vld [vmem:[#allocation3 + $0x60] sm:$0xf] }
  0xad   : > { %v15598_v51 = vpack.c.bf16 %v3086_v29, %v3086_v29  ;;  %v3088_v4 = vcombine.low %v2368_v41, %v2369_v40  ;;  %v18218_v5 = vmul.f32 0.75, %v2064_v46  ;;  %v18220_v57 = vmul.f32 0.75, %v2065_v16 }
  0xae   : > { %v3095_v30 = vrot.slane %v3087_v7, %v17555_v21  ;;  %v3119_v54 = vrot.slane %v3105_v53, %v17555_v21  ;;  %v2278_v22 = vadd.f32 %v18213_v34, %v18055_v56  ;;  %v2279_v36 = vadd.f32 %v18216_v0, %v18058_v62 }
  0xaf   : > { %v3694_v24 = vshrl.u32 %v15598_v51, 16  ;;  %v3697_v52 = vshll.u32 %v15598_v51, 16  ;;  %v3102_v49 = vrot.slane %v3088_v4, %v17555_v21  ;;  %v2280_v46 = vadd.f32 %v18218_v5, %v18061_v33 }
  0xb0   : > { %v3120_v44 = vcombine.low %v3112_v1, %v3119_v54  ;;  %v2281_v16 = vadd.f32 %v18220_v57, %v18065_v10  ;;  %v3121_v28 = vcombine.low %v2278_v22, %v2279_v36  ;;  %v494_v11 = vmul.f32 0.25, %v18112_v26 }
  0xb1   : > { %v18237_v56 = vrot.slane %v3694_v24, 7  ;;  %v3103_v25 = vcombine.low %v3095_v30, %v3102_v49  ;;  %v524_v62 = vmul.f32 0.25, %v18124_v59  ;;  %v433_v38 = vrot.slane %v18235_v39, 7 }
  0xb2   : > { %v15600_v29 = vpack.c.bf16 %v3120_v44, %v3120_v44  ;;  %v3122_v41 = vcombine.low %v2280_v46, %v2281_v16  ;;  %v3129_v33 = vrot.slane %v3121_v28, %v17555_v21  ;;  %v514_v40 = vadd.f32 %v18114_v15, %v494_v11  ;;  %v3986_v44 = vld [vmem:[#allocation3 + $0x6c] sm:$0xf] }
  0xb3   : > { %v3699_v10 = vor.u32 %v3697_v52, %v18237_v56  ;;  %v18244_v7 = vpack.c.bf16 %v3103_v25, %v3103_v25  ;;  %v534_v26 = vadd.f32 %v524_v62, %v18114_v15  ;;  %v18249_v53 = vsel %vm446_vm0, %v18235_v39, %v433_v38  ;;  %v3983_v25 = vld [vmem:[#allocation3 + $0x68] sm:$0x1] }
  0xb4   : > { %v3711_v59 = vshrl.u32 %v15600_v29, 16  ;;  %v3714_v1 = vshll.u32 %v15600_v29, 16  ;;  %v3136_v51 = vrot.slane %v3122_v41, %v17555_v21  ;;  %v849_v4 = vrot.slane %v514_v40, %v17553_v17 }
  0xb5   : > { %v3980_v30 = vsel %vm17598_vm6, %v3699_v10, %v3979_v18  ;;  %v3702_v54 = vshrl.u32 %v18244_v7, 16  ;;  %v1429_v22 = vrot.slane %v534_v26, %v17553_v17  ;;  %v842_v36 = vcombine.high %v514_v40, %v514_v40 }
  0xb6   : > { %3981 = vst [vmem:[#allocation3 + $0x60] sm:$0xf] %v3980_v30  ;;  %v18257_v15 = vrot.slane %v3711_v59, 7  ;;  %v3137_v24 = vcombine.low %v3129_v33, %v3136_v51  ;;  %v857_v52 = vcombine.high %v849_v4, %v849_v4  ;;  %v865_v49 = vrot.slane %v849_v4, %v17553_v17 }
  0xb7   : > { %v18260_v46 = vrot.slane %v3702_v54, 7  ;;  %v1437_v16 = vcombine.high %v1429_v22, %v1429_v22  ;;  %v1445_v28 = vrot.slane %v1429_v22, %v17553_v17  ;;  %v856_v11 = vrot.slane %v842_v36, %v17553_v17 }
  0xb8   : > { %21594 = vst [vmem:[#allocation23_spill] sm:$0xff] %v18257_v15  ;;  %v3716_v62 = vor.u32 %v3714_v1, %v18257_v15  ;;  %v18265_v38 = vpack.c.bf16 %v3137_v24, %v3137_v24  ;;  %v879_v18 = vrot.slane %v857_v52, %v17553_v17  ;;  %v887_v29 = vcombine.high %v865_v49, %v865_v49 }
  0xb9   : > { %21595 = vst [vmem:[#allocation24_spill] sm:$0xff] %v18260_v46  ;;  %v3709_v41 = vrot.slane %v18260_v46, 4  ;;  %v1459_v33 = vrot.slane %v1437_v16, %v17553_v17  ;;  %v1467_v40 = vcombine.high %v1445_v28, %v1445_v28  ;;  %v1813_v10 = vrot.slane %v1445_v28, %v17550_v12  ;;  %v3990_v28 = vld [vmem:[#allocation3 + $0x74] sm:$0x1] }
  0xba   : > { %21596 = vst [vmem:[#allocation25_spill] sm:$0xff] %v18265_v38  ;;  %v3987_v59 = vsel %vm17598_vm6, %v3716_v62, %v3986_v44  ;;  %v3719_v51 = vshrl.u32 %v18265_v38, 16  ;;  %v889_v4 = vcombine.high %v879_v18, %v879_v18  ;;  %v858_v30 = vcombine.high %v856_v11, %v856_v11 }
  0xbb   : > { %v3984_v1 = vsel %vm17606_vm7, %v3709_v41, %v3983_v25  ;;  %3988 = vst [vmem:[#allocation3 + $0x6c] sm:$0xf] %v3987_v59  ;;  %v1469_v54 = vcombine.high %v1459_v33, %v1459_v33  ;;  %v1817_v22 = vrot.slane %v1459_v33, %v17550_v12  ;;  %v1821_v36 = vrot.slane %v1467_v40, %v17550_v12 }
  0xbc   : > { %3985 = vst [vmem:[#allocation3 + $0x68] sm:$0x1] %v3984_v1  ;;  %v18278_v24 = vrot.slane %v3719_v51, 7  ;;  %v2066_v52 = vsel %vm446_vm0, %v865_v49, %v1813_v10  ;;  %v872_v44 = vrot.slane %v856_v11, %v17553_v17  ;;  %v886_v16 = vrot.slane %v858_v30, %v17553_v17 }
  0xbd   : > { %v1825_v62 = vrot.slane %v1469_v54, %v17550_v12  ;;  %v2067_v25 = vsel %vm446_vm0, %v879_v18, %v1817_v22  ;;  %v2068_v41 = vsel %vm446_vm0, %v887_v29, %v1821_v36  ;;  %v18286_v59 = vmul.f32 0.25, %v2066_v52 }
  0xbe   : > { %21597 = vst [vmem:[#allocation26_spill] sm:$0xff] %v18278_v24  ;;  %v3726_v33 = vrot.slane %v18278_v24, 4  ;;  %v18289_v40 = vmul.f32 0.25, %v2067_v25  ;;  %v18291_v51 = vmul.f32 0.25, %v2068_v41  ;;  %v888_v49 = vcombine.high %v872_v44, %v872_v44 }
  0xbf   : > { %v2069_v11 = vsel %vm446_vm0, %v889_v4, %v1825_v62  ;;  %v2370_v10 = vadd.f32 %v18161_v8, %v18286_v59  ;;  %v890_v30 = vcombine.high %v886_v16, %v886_v16  ;;  %v1422_v1 = vcombine.high %v534_v26, %v534_v26 }
  0xc0   : > { %v3991_v18 = vsel %vm17606_vm7, %v3726_v33, %v3990_v28  ;;  %v18298_v29 = vmul.f32 0.25, %v2069_v11  ;;  %v2371_v54 = vadd.f32 %v18163_v48, %v18289_v40  ;;  %v2372_v22 = vadd.f32 %v18177_v58, %v18291_v51 }
  0xc1   : > { %3992 = vst [vmem:[#allocation3 + $0x74] sm:$0x1] %v3991_v18  ;;  %v1436_v36 = vrot.slane %v1422_v1, %v17553_v17  ;;  %v18305_v4 = vmul.f32 0.75, %v2066_v52  ;;  %v18307_v62 = vmul.f32 0.75, %v2067_v25  ;;  %v18309_v8 = vmul.f32 0.75, %v2068_v41 }
  0xc2   : > { %v2373_v26 = vadd.f32 %v18179_v2, %v18298_v29  ;;  %v3138_v28 = vcombine.low %v2370_v10, %v2371_v54  ;;  %v18313_v33 = vmul.f32 0.75, %v2069_v11  ;;  %v464_v48 = vrot.slane %v18235_v39, 1 }
  0xc3   : > { %v1438_v24 = vcombine.high %v1436_v36, %v1436_v36  ;;  %v1452_v58 = vrot.slane %v1436_v36, %v17553_v17  ;;  %v2282_v1 = vadd.f32 %v18305_v4, %v18152_v61  ;;  %v2283_v52 = vadd.f32 %v18307_v62, %v18154_v27 }
  0xc4   : > { %v3139_v25 = vcombine.low %v2372_v22, %v2373_v26  ;;  %v3146_v41 = vrot.slane %v3138_v28, %v17555_v21  ;;  %v2284_v2 = vadd.f32 %v18309_v8, %v18156_v45  ;;  %v2285_v11 = vadd.f32 %v18313_v33, %v18165_v35 }
  0xc5   : > { %v1466_v10 = vrot.slane %v1438_v24, %v17553_v17  ;;  %v1468_v18 = vcombine.high %v1452_v58, %v1452_v58  ;;  %v1829_v54 = vrot.slane %v1452_v58, %v17550_v12  ;;  %v3172_v36 = vcombine.low %v2282_v1, %v2283_v52 }
  0xc6   : > { %v3153_v61 = vrot.slane %v3139_v25, %v17555_v21  ;;  %v3173_v38 = vcombine.low %v2284_v2, %v2285_v11  ;;  %v485_v27 = vsel %vm477_vm1, %v464_v48, %v18235_v39  ;;  %v495_v22 = vmul.f32 0.25, %v18249_v53 }
  0xc7   : > { %v1470_v26 = vcombine.high %v1466_v10, %v1466_v10  ;;  %v1833_v45 = vrot.slane %v1466_v10, %v17550_v12  ;;  %v1837_v28 = vrot.slane %v1468_v18, %v17550_v12  ;;  %v2070_v35 = vsel %vm446_vm0, %v872_v44, %v1829_v54 }
  0xc8   : > { %v3154_v24 = vcombine.low %v3146_v41, %v3153_v61  ;;  %v18335_v46 = vmul.f32 0.25, %v2070_v35  ;;  %v3180_v58 = vrot.slane %v3172_v36, %v17555_v21  ;;  %v3187_v1 = vrot.slane %v3173_v38, %v17555_v21 }
  0xc9   : > { %v1841_v52 = vrot.slane %v1470_v26, %v17550_v12  ;;  %v2071_v48 = vsel %vm446_vm0, %v886_v16, %v1833_v45  ;;  %v2072_v53 = vsel %vm446_vm0, %v888_v49, %v1837_v28  ;;  %v18342_v25 = vmul.f32 0.75, %v2070_v35 }
  0xca   : > { %v15602_v2 = vpack.c.bf16 %v3154_v24, %v3154_v24  ;;  %v18344_v11 = vmul.f32 0.25, %v2071_v48  ;;  %v18346_v10 = vmul.f32 0.25, %v2072_v53  ;;  %v2374_v44 = vadd.f32 %v18213_v34, %v18335_v46 }
  0xcb   : > { %v2073_v41 = vsel %vm446_vm0, %v890_v30, %v1841_v52  ;;  %v3188_v18 = vcombine.low %v3180_v58, %v3187_v1  ;;  %v18351_v38 = vmul.f32 0.75, %v2071_v48  ;;  %v18353_v54 = vmul.f32 0.75, %v2072_v53 }
  0xcc   : > { %v3728_v16 = vshrl.u32 %v15602_v2, 16  ;;  %v3731_v36 = vshll.u32 %v15602_v2, 16  ;;  %v18355_v49 = vmul.f32 0.25, %v2073_v41  ;;  %v2375_v61 = vadd.f32 %v18216_v0, %v18344_v11  ;;  %v3993_v0 = vld [vmem:[#allocation3 + $0x78] sm:$0xf] }
  0xcd   : > { %v2376_v26 = vadd.f32 %v18218_v5, %v18346_v10  ;;  %v15604_v45 = vpack.c.bf16 %v3188_v18, %v3188_v18  ;;  %v18361_v28 = vmul.f32 0.75, %v2073_v41  ;;  %v2286_v34 = vadd.f32 %v18342_v25, %v18186_v19 }
  0xce   : > { %v18365_v30 = vrot.slane %v3728_v16, 7  ;;  %v2377_v35 = vadd.f32 %v18220_v57, %v18355_v49  ;;  %v3155_v24 = vcombine.low %v2374_v44, %v2375_v61  ;;  %v2287_v58 = vadd.f32 %v18351_v38, %v18188_v37  ;;  %v409_v16 = vld [vmem:[%s17532_s9 + $0x38] sm:$0xff] }
  0xcf   : > { %v3745_v1 = vshrl.u32 %v15604_v45, 16  ;;  %v3748_v52 = vshll.u32 %v15604_v45, 16  ;;  %v2288_v5 = vadd.f32 %v18353_v54, %v18197_v31  ;;  %v2289_v48 = vadd.f32 %v18361_v28, %v18199_v42  ;;  %v4000_v45 = vld [vmem:[#allocation3 + $0x84] sm:$0xf] }
  0xd0   : > { %21598 = vst [vmem:[#allocation27_spill] sm:$0xff] %v18365_v30  ;;  %v3733_v19 = vor.u32 %v3731_v36, %v18365_v30  ;;  %v3156_v53 = vcombine.low %v2376_v26, %v2377_v35  ;;  %v3163_v2 = vrot.slane %v3155_v24, %v17555_v21  ;;  %v3189_v57 = vcombine.low %v2286_v34, %v2287_v58 }
  0xd1   : > { %v18377_v41 = vrot.slane %v3745_v1, 7  ;;  %v3190_v44 = vcombine.low %v2288_v5, %v2289_v48  ;;  %v505_v37 = vmul.f32 0.75, %v18235_v39  ;;  %v525_v18 = vmul.f32 0.25, %v485_v27 }
  0xd2   : > { %v3994_v61 = vsel %vm17598_vm6, %v3733_v19, %v3993_v0  ;;  %v3170_v31 = vrot.slane %v3156_v53, %v17555_v21  ;;  %v3197_v42 = vrot.slane %v3189_v57, %v17555_v21  ;;  %v434_v36 = vrot.slane %v409_v16, 7 }
  0xd3   : > { %21599 = vst [vmem:[#allocation28_spill] sm:$0xff] %v18377_v41  ;;  %3995 = vst [vmem:[#allocation3 + $0x78] sm:$0xf] %v3994_v61  ;;  %v3750_v26 = vor.u32 %v3748_v52, %v18377_v41  ;;  %v3204_v34 = vrot.slane %v3190_v44, %v17555_v21  ;;  %v515_v35 = vadd.f32 %v505_v37, %v495_v22  ;;  %v465_v27 = vrot.slane %v409_v16, 1 }
  0xd4   : > { %v535_v24 = vadd.f32 %v525_v18, %v505_v37  ;;  %v3171_v58 = vcombine.low %v3163_v2, %v3170_v31  ;;  %v18388_v39 = vsel %vm446_vm0, %v409_v16, %v434_v36  ;;  %v18390_v1 = vmul.f32 0.75, %v409_v16 }
  0xd5   : > { %v4001_v0 = vsel %vm17598_vm6, %v3750_v26, %v4000_v45  ;;  %v3205_v5 = vcombine.low %v3197_v42, %v3204_v34  ;;  %v898_v48 = vrot.slane %v515_v35, %v17553_v17  ;;  %v891_v22 = vcombine.high %v515_v35, %v515_v35 }
  0xd6   : > { %v1478_v19 = vrot.slane %v535_v24, %v17553_v17  ;;  %v18396_v52 = vpack.c.bf16 %v3171_v58, %v3171_v58  ;;  %4002 = vst [vmem:[#allocation3 + $0x84] sm:$0xf] %v4001_v0  ;;  %v1471_v53 = vcombine.high %v535_v24, %v535_v24  ;;  %v18399_v2 = vsel %vm477_vm1, %v465_v27, %v409_v16  ;;  %v3997_v0 = vld [vmem:[#allocation3 + $0x80] sm:$0x1] }
  0xd7   : > { %v18401_v57 = vpack.c.bf16 %v3205_v5, %v3205_v5  ;;  %v906_v44 = vcombine.high %v898_v48, %v898_v48  ;;  %v914_v37 = vrot.slane %v898_v48, %v17553_v17  ;;  %v905_v45 = vrot.slane %v891_v22, %v17553_v17 }
  0xd8   : > { %21600 = vst [vmem:[#allocation29_spill] sm:$0xff] %v18396_v52  ;;  %v1486_v18 = vcombine.high %v1478_v19, %v1478_v19  ;;  %v3736_v61 = vshrl.u32 %v18396_v52, 16  ;;  %v1494_v31 = vrot.slane %v1478_v19, %v17553_v17  ;;  %v1485_v42 = vrot.slane %v1471_v53, %v17553_v17 }
  0xd9   : > { %21601 = vst [vmem:[#allocation30_spill] sm:$0xff] %v18401_v57  ;;  %v3753_v36 = vshrl.u32 %v18401_v57, 16  ;;  %v928_v26 = vrot.slane %v906_v44, %v17553_v17  ;;  %v936_v16 = vcombine.high %v914_v37, %v914_v37  ;;  %v907_v27 = vcombine.high %v905_v45, %v905_v45  ;;  %v4004_v57 = vld [vmem:[#allocation3 + $0x8c] sm:$0x1] }
  0xda   : > { %v1508_v34 = vrot.slane %v1486_v18, %v17553_v17  ;;  %v18411_v35 = vrot.slane %v3736_v61, 7  ;;  %v1516_v24 = vcombine.high %v1494_v31, %v1494_v31  ;;  %v1845_v58 = vrot.slane %v1494_v31, %v17550_v12 }
  0xdb   : > { %v18414_v5 = vrot.slane %v3753_v36, 7  ;;  %v938_v48 = vcombine.high %v928_v26, %v928_v26  ;;  %v921_v61 = vrot.slane %v905_v45, %v17553_v17  ;;  %vm4511_vm8 = vcmask 125952  }
  0xdc   : > { %21602 = vst [vmem:[#allocation31_spill] sm:$0xff] %v18411_v35  ;;  %v1518_v19 = vcombine.high %v1508_v34, %v1508_v34  ;;  %v1849_v22 = vrot.slane %v1508_v34, %v17550_v12  ;;  %v3743_v53 = vrot.slane %v18411_v35, 4  ;;  %v1853_v44 = vrot.slane %v1516_v24, %v17550_v12  ;;  %vm18650_vm9 = vmand %vm4511_vm8, %vm3918_vm3 }
  0xdd   : > { %21603 = vst [vmem:[#allocation32_spill] sm:$0xff] %v18414_v5  ;;  %v2074_v18 = vsel %vm446_vm0, %v914_v37, %v1845_v58  ;;  %v3760_v41 = vrot.slane %v18414_v5, 4  ;;  %v935_v24 = vrot.slane %v907_v27, %v17553_v17  ;;  %vm4518_vm10 = vcmask 122880  }
  0xde   : > { %v1857_v31 = vrot.slane %v1518_v19, %v17550_v12  ;;  %v2075_v36 = vsel %vm446_vm0, %v928_v26, %v1849_v22  ;;  %v18424_v52 = vmul.f32 0.25, %v2074_v18  ;;  %v3998_v34 = vsel %vm17606_vm7, %v3743_v53, %v3997_v0  ;;  %vm18667_vm11 = vmand %vm4518_vm10, %vm3554_vm4 }
  0xdf   : > { %v2076_v35 = vsel %vm446_vm0, %v936_v16, %v1853_v44  ;;  %v18429_v30 = vmul.f32 0.25, %v2075_v36  ;;  %3999 = vst [vmem:[#allocation3 + $0x80] sm:$0x1] %v3998_v34  ;;  %v4005_v37 = vsel %vm17606_vm7, %v3760_v41, %v4004_v57  ;;  %v937_v0 = vcombine.high %v921_v61, %v921_v61  ;;  %vm19209_vm15 = vmand %vm4518_vm10, %vm3918_vm3 }
  0xe0   : > { %v2077_v45 = vsel %vm446_vm0, %v938_v48, %v1857_v31  ;;  %v18435_v58 = vmul.f32 0.25, %v2076_v35  ;;  %v2378_v26 = vadd.f32 %v18305_v4, %v18424_v52  ;;  %4006 = vst [vmem:[#allocation3 + $0x8c] sm:$0x1] %v4005_v37  ;;  %v939_v22 = vcombine.high %v935_v24, %v935_v24 }
  0xe1   : > { %v18439_v19 = vmul.f32 0.25, %v2077_v45  ;;  %v2379_v16 = vadd.f32 %v18307_v62, %v18429_v30  ;;  %v1487_v53 = vcombine.high %v1485_v42, %v1485_v42  ;;  %v1501_v41 = vrot.slane %v1485_v42, %v17553_v17 }
  0xe2   : > { %v2380_v27 = vadd.f32 %v18309_v8, %v18435_v58  ;;  %v18446_v57 = vmul.f32 0.75, %v2074_v18  ;;  %v18450_v44 = vmul.f32 0.75, %v2075_v36  ;;  %v18452_v31 = vmul.f32 0.75, %v2076_v35 }
  0xe3   : > { %v2381_v48 = vadd.f32 %v18313_v33, %v18439_v19  ;;  %v3206_v4 = vcombine.low %v2378_v26, %v2379_v16  ;;  %v1515_v62 = vrot.slane %v1487_v53, %v17553_v17  ;;  %v1517_v34 = vcombine.high %v1501_v41, %v1501_v41 }
  0xe4   : > { %v1861_v37 = vrot.slane %v1501_v41, %v17550_v12  ;;  %v18456_v5 = vmul.f32 0.75, %v2077_v45  ;;  %v2290_v18 = vadd.f32 %v18446_v57, %v18286_v59  ;;  %v2291_v33 = vadd.f32 %v18450_v44, %v18289_v40 }
  0xe5   : > { %v3207_v8 = vcombine.low %v2380_v27, %v2381_v48  ;;  %v3214_v42 = vrot.slane %v3206_v4, %v17555_v21  ;;  %v1519_v36 = vcombine.high %v1515_v62, %v1515_v62  ;;  %v1865_v35 = vrot.slane %v1515_v62, %v17550_v12 }
  0xe6   : > { %v1869_v26 = vrot.slane %v1517_v34, %v17550_v12  ;;  %v2078_v16 = vsel %vm446_vm0, %v921_v61, %v1861_v37  ;;  %v2292_v27 = vadd.f32 %v18452_v31, %v18291_v51  ;;  %v2293_v59 = vadd.f32 %v18456_v5, %v18298_v29 }
  0xe7   : > { %v3221_v53 = vrot.slane %v3207_v8, %v17555_v21  ;;  %v18467_v45 = vmul.f32 0.25, %v2078_v16  ;;  %v1873_v41 = vrot.slane %v1519_v36, %v17550_v12  ;;  %v2079_v40 = vsel %vm446_vm0, %v935_v24, %v1865_v35 }
  0xe8   : > { %v2080_v48 = vsel %vm446_vm0, %v937_v0, %v1869_v26  ;;  %v3240_v4 = vcombine.low %v2290_v18, %v2291_v33  ;;  %v18476_v34 = vmul.f32 0.25, %v2079_v40  ;;  %v3241_v8 = vcombine.low %v2292_v27, %v2293_v59 }
  0xe9   : > { %v3222_v62 = vcombine.low %v3214_v42, %v3221_v53  ;;  %v18478_v61 = vmul.f32 0.25, %v2080_v48  ;;  %v2382_v37 = vadd.f32 %v18342_v25, %v18467_v45  ;;  %v2081_v51 = vsel %vm446_vm0, %v939_v22, %v1873_v41  ;;  %v4042_v41 = vld [vmem:[#allocation3 + $0xcc] sm:$0xf] }
  0xea   : > { %v3248_v29 = vrot.slane %v3240_v4, %v17555_v21  ;;  %v18484_v15 = vmul.f32 0.75, %v2078_v16  ;;  %v18486_v24 = vmul.f32 0.25, %v2081_v51  ;;  %v2383_v0 = vadd.f32 %v18351_v38, %v18476_v34 }
  0xeb   : > { %v15606_v36 = vpack.c.bf16 %v3222_v62, %v3222_v62  ;;  %v2384_v42 = vadd.f32 %v18353_v54, %v18478_v61  ;;  %v3255_v18 = vrot.slane %v3241_v8, %v17555_v21  ;;  %v18493_v33 = vmul.f32 0.75, %v2079_v40  ;;  %v4007_v62 = vld [vmem:[#allocation3 + $0x90] sm:$0xf] }
  0xec   : > { %v18495_v25 = vmul.f32 0.75, %v2080_v48  ;;  %v18497_v22 = vmul.f32 0.75, %v2081_v51  ;;  %v2385_v16 = vadd.f32 %v18361_v28, %v18486_v24  ;;  %v3223_v53 = vcombine.low %v2382_v37, %v2383_v0  ;;  %v4046_v0 = vld [vmem:[#allocation3 + $0xd4] sm:$0x1] }
  0xed   : > { %v3762_v35 = vshrl.u32 %v15606_v36, 16  ;;  %v3765_v26 = vshll.u32 %v15606_v36, 16  ;;  %v3256_v27 = vcombine.low %v3248_v29, %v3255_v18  ;;  %v2294_v38 = vadd.f32 %v18484_v15, %v18335_v46 }
  0xee   : > { %v2295_v54 = vadd.f32 %v18493_v33, %v18344_v11  ;;  %v2296_v59 = vadd.f32 %v18495_v25, %v18346_v10  ;;  %v3224_v48 = vcombine.low %v2384_v42, %v2385_v16  ;;  %v3231_v4 = vrot.slane %v3223_v53, %v17555_v21 }
  0xef   : > { %v18507_v40 = vrot.slane %v3762_v35, 7  ;;  %v2297_v28 = vadd.f32 %v18497_v22, %v18355_v49  ;;  %v15608_v37 = vpack.c.bf16 %v3256_v27, %v3256_v27  ;;  %v496_v46 = vmul.f32 0.25, %v18388_v39 }
  0xf0   : > { %v3257_v51 = vcombine.low %v2294_v38, %v2295_v54  ;;  %v526_v8 = vmul.f32 0.25, %v18399_v2  ;;  %v3238_v10 = vrot.slane %v3224_v48, %v17555_v21  ;;  %v4043_v36 = vsel %vm17598_vm6, %v17612_v13, %v4042_v41  ;;  %v4014_v41 = vld [vmem:[#allocation3 + $0x9c] sm:$0xf] }
  0xf1   : > { %v3767_v11 = vor.u32 %v3765_v26, %v18507_v40  ;;  %v3258_v29 = vcombine.low %v2296_v59, %v2297_v28  ;;  %v3779_v42 = vshrl.u32 %v15608_v37, 16  ;;  %v3782_v18 = vshll.u32 %v15608_v37, 16  ;;  %4044 = vst [vmem:[#allocation3 + $0xcc] sm:$0xf] %v4043_v36 }
  0xf2   : > { %v3265_v49 = vrot.slane %v3257_v51, %v17555_v21  ;;  %v516_v35 = vadd.f32 %v18390_v1, %v496_v46  ;;  %v3239_v2 = vcombine.low %v3231_v4, %v3238_v10  ;;  %v536_v16 = vadd.f32 %v526_v8, %v18390_v1 }
  0xf3   : > { %v4008_v39 = vsel %vm17598_vm6, %v3767_v11, %v4007_v62  ;;  %v3272_v26 = vrot.slane %v3258_v29, %v17555_v21  ;;  %v18525_v53 = vrot.slane %v3779_v42, 7  ;;  %v4047_v54 = vsel %vm17606_vm7, %v17614_v14, %v4046_v0 }
  0xf4   : > { %4009 = vst [vmem:[#allocation3 + $0x90] sm:$0xf] %v4008_v39  ;;  %v947_v27 = vrot.slane %v516_v35, %v17553_v17  ;;  %v940_v38 = vcombine.high %v516_v35, %v516_v35  ;;  %v18531_v59 = vpack.c.bf16 %v3239_v2, %v3239_v2  ;;  %v1527_v4 = vrot.slane %v536_v16, %v17553_v17  ;;  %v4011_v2 = vld [vmem:[#allocation3 + $0x98] sm:$0x1] }
  0xf5   : > { %21604 = vst [vmem:[#allocation33_spill] sm:$0xff] %v18525_v53  ;;  %v3273_v48 = vcombine.low %v3265_v49, %v3272_v26  ;;  %v1520_v28 = vcombine.high %v536_v16, %v536_v16  ;;  %4048 = vst [vmem:[#allocation3 + $0xd4] sm:$0x1] %v4047_v54  ;;  %v3784_v1 = vor.u32 %v3782_v18, %v18525_v53  ;;  %vm3555_vm12 = vsmask.f32 4368 }
  0xf6   : > { %v955_v62 = vcombine.high %v947_v27, %v947_v27  ;;  %v963_v37 = vrot.slane %v947_v27, %v17553_v17  ;;  %v954_v51 = vrot.slane %v940_v38, %v17553_v17  ;;  %v3770_v46 = vshrl.u32 %v18531_v59, 16  ;;  %vm18906_vm13 = vmor %vm3554_vm4, %vm3555_vm12 }
  0xf7   : > { %v18538_v8 = vpack.c.bf16 %v3273_v48, %v3273_v48  ;;  %v1535_v11 = vcombine.high %v1527_v4, %v1527_v4  ;;  %v1543_v10 = vrot.slane %v1527_v4, %v17553_v17  ;;  %v4015_v29 = vsel %vm17598_vm6, %v3784_v1, %v4014_v41  ;;  %v4018_v1 = vld [vmem:[#allocation3 + $0xa4] sm:$0x1] }
  0xf8   : > { %v977_v36 = vrot.slane %v955_v62, %v17553_v17  ;;  %v985_v0 = vcombine.high %v963_v37, %v963_v37  ;;  %v956_v42 = vcombine.high %v954_v51, %v954_v51  ;;  %v18544_v18 = vrot.slane %v3770_v46, 7  ;;  %4016 = vst [vmem:[#allocation3 + $0x9c] sm:$0xf] %v4015_v29 }
  0xf9   : > { %21605 = vst [vmem:[#allocation34_spill] sm:$0xff] %v18538_v8  ;;  %v3787_v49 = vshrl.u32 %v18538_v8, 16  ;;  %v1557_v35 = vrot.slane %v1535_v11, %v17553_v17  ;;  %v1565_v39 = vcombine.high %v1543_v10, %v1543_v10  ;;  %v1877_v16 = vrot.slane %v1543_v10, %v17550_v12 }
  0xfa   : > { %21606 = vst [vmem:[#allocation35_spill] sm:$0xff] %v18544_v18  ;;  %v987_v26 = vcombine.high %v977_v36, %v977_v36  ;;  %v970_v27 = vrot.slane %v954_v51, %v17553_v17  ;;  %v984_v38 = vrot.slane %v956_v42, %v17553_v17  ;;  %v3777_v54 = vrot.slane %v18544_v18, 4 }
  0xfb   : > { %v18552_v41 = vrot.slane %v3787_v49, 7  ;;  %v1567_v48 = vcombine.high %v1557_v35, %v1557_v35  ;;  %v1881_v4 = vrot.slane %v1557_v35, %v17550_v12  ;;  %v1885_v62 = vrot.slane %v1565_v39, %v17550_v12 }
  0xfc   : > { %v2082_v46 = vsel %vm446_vm0, %v963_v37, %v1877_v16  ;;  %v986_v11 = vcombine.high %v970_v27, %v970_v27  ;;  %v988_v29 = vcombine.high %v984_v38, %v984_v38  ;;  %v4012_v10 = vsel %vm17606_vm7, %v3777_v54, %v4011_v2 }
  0xfd   : > { %21607 = vst [vmem:[#allocation36_spill] sm:$0xff] %v18552_v41  ;;  %v3794_v51 = vrot.slane %v18552_v41, 4  ;;  %v1889_v42 = vrot.slane %v1567_v48, %v17550_v12  ;;  %v2083_v49 = vsel %vm446_vm0, %v977_v36, %v1881_v4  ;;  %4013 = vst [vmem:[#allocation3 + $0x98] sm:$0x1] %v4012_v10  ;;  %v2084_v18 = vsel %vm446_vm0, %v985_v0, %v1885_v62 }
  0xfe   : > { %v18563_v35 = vmul.f32 0.25, %v2082_v46  ;;  %v18565_v8 = vmul.f32 0.25, %v2083_v49  ;;  %v1534_v37 = vrot.slane %v1520_v28, %v17553_v17  ;;  %v18571_v16 = vmul.f32 0.25, %v2084_v18 }
  0xff   : > { %v4019_v39 = vsel %vm17606_vm7, %v3794_v51, %v4018_v1  ;;  %v2085_v2 = vsel %vm446_vm0, %v987_v26, %v1889_v42  ;;  %v2226_v54 = vmul.f32 0.75, %v2082_v46  ;;  %v2227_v62 = vmul.f32 0.75, %v2083_v49 }
 0x100   : > { %4020 = vst [vmem:[#allocation3 + $0xa4] sm:$0x1] %v4019_v39  ;;  %v18573_v48 = vmul.f32 0.25, %v2085_v2  ;;  %v2386_v36 = vadd.f32 %v18446_v57, %v18563_v35  ;;  %v2387_v0 = vadd.f32 %v18450_v44, %v18565_v8  ;;  %v1536_v4 = vcombine.high %v1534_v37, %v1534_v37 }
 0x101   : > { %v2388_v28 = vadd.f32 %v18452_v31, %v18571_v16  ;;  %v1550_v1 = vrot.slane %v1534_v37, %v17553_v17  ;;  %v2228_v26 = vmul.f32 0.75, %v2084_v18  ;;  %v2229_v42 = vmul.f32 0.75, %v2085_v2 }
 0x102   : > { %v2389_v46 = vadd.f32 %v18456_v5, %v18573_v48  ;;  %v3274_v10 = vcombine.low %v2386_v36, %v2387_v0  ;;  %v1564_v51 = vrot.slane %v1536_v4, %v17553_v17  ;;  %v2298_v44 = vadd.f32 %v2226_v54, %v18424_v52 }
 0x103   : > { %v1566_v39 = vcombine.high %v1550_v1, %v1550_v1  ;;  %v1893_v57 = vrot.slane %v1550_v1, %v17550_v12  ;;  %v2299_v41 = vadd.f32 %v2227_v62, %v18429_v30  ;;  %v2300_v17 = vadd.f32 %v2228_v26, %v18435_v58 }
 0x104   : > { %v3275_v53 = vcombine.low %v2388_v28, %v2389_v46  ;;  %v3282_v31 = vrot.slane %v3274_v10, %v17555_v21  ;;  %v1568_v37 = vcombine.high %v1564_v51, %v1564_v51  ;;  %v1897_v18 = vrot.slane %v1564_v51, %v17550_v12 }
 0x105   : > { %v1901_v49 = vrot.slane %v1566_v39, %v17550_v12  ;;  %v2086_v5 = vsel %vm446_vm0, %v970_v27, %v1893_v57  ;;  %v2301_v2 = vadd.f32 %v2229_v42, %v18439_v19  ;;  %v3308_v1 = vcombine.low %v2298_v44, %v2299_v41 }
 0x106   : > { %v3289_v36 = vrot.slane %v3275_v53, %v17555_v21  ;;  %v1905_v52 = vrot.slane %v1568_v37, %v17550_v12  ;;  %v2087_v30 = vsel %vm446_vm0, %v984_v38, %v1897_v18  ;;  %v2166_v0 = vmul.f32 0.25, %v2086_v5 }
 0x107   : > { %v2088_v4 = vsel %vm446_vm0, %v986_v11, %v1901_v49  ;;  %v2167_v28 = vmul.f32 0.25, %v2087_v30  ;;  %v3309_v46 = vcombine.low %v2300_v17, %v2301_v2  ;;  %v3316_v53 = vrot.slane %v3308_v1, %v17555_v21 }
 0x108   : > { %v3290_v10 = vcombine.low %v3282_v31, %v3289_v36  ;;  %v2089_v51 = vsel %vm446_vm0, %v988_v29, %v1905_v52  ;;  %v2168_v27 = vmul.f32 0.25, %v2088_v4  ;;  %v2390_v58 = vadd.f32 %v18484_v15, %v2166_v0 }
 0x109   : > { %v2169_v39 = vmul.f32 0.25, %v2089_v51  ;;  %v2391_v19 = vadd.f32 %v18493_v33, %v2167_v28  ;;  %v3323_v12 = vrot.slane %v3309_v46, %v17555_v21  ;;  %v2230_v11 = vmul.f32 0.75, %v2086_v5 }
 0x10a   : > { %v15610_v38 = vpack.c.bf16 %v3290_v10, %v3290_v10  ;;  %v2392_v57 = vadd.f32 %v18495_v25, %v2168_v27  ;;  %v2231_v37 = vmul.f32 0.75, %v2087_v30  ;;  %v2232_v29 = vmul.f32 0.75, %v2088_v4  ;;  %v4021_v30 = vld [vmem:[#allocation3 + $0xa8] sm:$0xf] }
 0x10b   : > { %v2393_v41 = vadd.f32 %v18497_v22, %v2169_v39  ;;  %v3291_v44 = vcombine.low %v2390_v58, %v2391_v19  ;;  %v3324_v31 = vcombine.low %v3316_v53, %v3323_v12  ;;  %v2233_v15 = vmul.f32 0.75, %v2089_v51  ;;  %v4028_v12 = vld [vmem:[#allocation3 + $0xb4] sm:$0xf] }
 0x10c   : > { %v3796_v18 = vshrl.u32 %v15610_v38, 16  ;;  %v3799_v49 = vshll.u32 %v15610_v38, 16  ;;  %v2302_v17 = vadd.f32 %v2230_v11, %v18467_v45  ;;  %v2303_v52 = vadd.f32 %v2231_v37, %v18476_v34 }
 0x10d   : > { %v3292_v33 = vcombine.low %v2392_v57, %v2393_v41  ;;  %v3299_v2 = vrot.slane %v3291_v44, %v17555_v21  ;;  %v15612_v36 = vpack.c.bf16 %v3324_v31, %v3324_v31  ;;  %v2304_v25 = vadd.f32 %v2232_v29, %v18478_v61  ;;  %v4158_v44 = vld [vmem:[%s17537_s12] sm:$0xf] }
 0x10e   : > { %v18608_v1 = vrot.slane %v3796_v18, 7  ;;  %v2305_v22 = vadd.f32 %v2233_v15, %v18486_v24  ;;  %v2394_v5 = vadd.f32 %v2226_v54, %v18563_v35  ;;  %v3325_v45 = vcombine.low %v2302_v17, %v2303_v52  ;;  %v4160_v52 = vld [vmem:[%s17537_s12 + $0x8] sm:$0xf] }
 0x10f   : > { %v3306_v4 = vrot.slane %v3292_v33, %v17555_v21  ;;  %v3813_v46 = vshrl.u32 %v15612_v36, 16  ;;  %v3816_v10 = vshll.u32 %v15612_v36, 16  ;;  %v2395_v19 = vadd.f32 %v2227_v62, %v18565_v8  ;;  %v18634_v33 = vld [vmem:[%s17537_s12 + $0x4] sm:$0xf] }
 0x110   : > { %v3801_v51 = vor.u32 %v3799_v49, %v18608_v1  ;;  %v3326_v58 = vcombine.low %v2304_v25, %v2305_v22  ;;  %v2396_v34 = vadd.f32 %v2228_v26, %v18571_v16  ;;  %v3333_v24 = vrot.slane %v3325_v45, %v17555_v21 }
 0x111   : > { %v3307_v53 = vcombine.low %v3299_v2, %v3306_v4  ;;  %v18617_v61 = vrot.slane %v3813_v46, 7  ;;  %v2397_v35 = vadd.f32 %v2229_v42, %v18573_v48  ;;  %v3342_v57 = vcombine.low %v2394_v5, %v2395_v19  ;;  %v4032_v46 = vld [vmem:[#allocation3 + $0xbc] sm:$0x1] }
 0x112   : > { %v4022_v54 = vsel %vm17598_vm6, %v3801_v51, %v4021_v30  ;;  %v3340_v38 = vrot.slane %v3326_v58, %v17555_v21  ;;  %v2398_v41 = vadd.f32 %v2230_v11, %v2166_v0  ;;  %v2399_v26 = vadd.f32 %v2231_v37, %v2167_v28  ;;  %v4513_v51 = vld [vmem:[#allocation2 + $0xc] sm:$0xf] }
 0x113   : > { %4023 = vst [vmem:[#allocation3 + $0xa8] sm:$0xf] %v4022_v54  ;;  %v18624_v8 = vpack.c.bf16 %v3307_v53, %v3307_v53  ;;  %v3818_v16 = vor.u32 %v3816_v10, %v18617_v61  ;;  %v3343_v62 = vcombine.low %v2396_v34, %v2397_v35  ;;  %v3350_v48 = vrot.slane %v3342_v57, %v17555_v21  ;;  %v4162_v35 = vld [vmem:[%s17537_s12 + $0x10] sm:$0xf] }
 0x114   : > { %v3341_v31 = vcombine.low %v3333_v24, %v3340_v38  ;;  %v2400_v42 = vadd.f32 %v2232_v29, %v2168_v27  ;;  %v2401_v18 = vadd.f32 %v2233_v15, %v2169_v39  ;;  %v3359_v11 = vcombine.low %v2398_v41, %v2399_v26  ;;  %v4025_v29 = vld [vmem:[#allocation3 + $0xb0] sm:$0x1]  ;;  %v18660_v24 = vld [vmem:[%s17537_s12 + $0xc] sm:$0xf]  ;;  %v4520_v41 = vld [vmem:[#allocation2 + $0x14] sm:$0x1] }
 0x115   : > { %v3804_v49 = vshrl.u32 %v18624_v8, 16  ;;  %v4029_v17 = vsel %vm17598_vm6, %v3818_v16, %v4028_v12  ;;  %v3357_v0 = vrot.slane %v3343_v62, %v17555_v21  ;;  %v4191_v37 = vshrl.u32 %v4158_v44, 16  ;;  %v4035_v26 = vld [vmem:[#allocation3 + $0xc0] sm:$0xf] }
 0x116   : > { %4030 = vst [vmem:[#allocation3 + $0xb4] sm:$0xf] %v4029_v17  ;;  %v18636_v2 = vpack.c.bf16 %v3341_v31, %v3341_v31  ;;  %v3360_v28 = vcombine.low %v2400_v42, %v2401_v18  ;;  %v4194_v36 = vshll.u32 %v4158_v44, 16  ;;  %v3367_v39 = vrot.slane %v3359_v11, %v17555_v21  ;;  %v18680_v42 = vld [vmem:[%s17537_s12 + $0x14] sm:$0xf] }
 0x117   : > { %v18639_v25 = vrot.slane %v3804_v49, 7  ;;  %v3358_v27 = vcombine.low %v3350_v48, %v3357_v0  ;;  %v18644_v5 = vrot.slane %v4191_v37, 7  ;;  %v4199_v30 = vshrl.u32 %v18634_v33, 16  ;;  %v4164_v18 = vld [vmem:[%s17537_s12 + $0x18] sm:$0xf] }
 0x118   : > { %v3821_v15 = vshrl.u32 %v18636_v2, 16  ;;  %v3374_v22 = vrot.slane %v3360_v28, %v17555_v21  ;;  %v4208_v58 = vshrl.u32 %v4160_v52, 16  ;;  %v4211_v17 = vshll.u32 %v4160_v52, 16  ;;  %v18687_v28 = vld [vmem:[%s17537_s12 + $0x1c] sm:$0xf] }
 0x119   : > { %v3811_v4 = vrot.slane %v18639_v25, 4  ;;  %v15614_v10 = vpack.c.bf16 %v3358_v27, %v3358_v27  ;;  %v4196_v34 = vor.u32 %v4194_v36, %v18644_v5  ;;  %v18657_v53 = vrot.slane %v4199_v30, 7  ;;  %v4039_v52 = vld [vmem:[#allocation3 + $0xc8] sm:$0x1] }
 0x11a   : > { %v18654_v19 = vrot.slane %v3821_v15, 7  ;;  %v3375_v21 = vcombine.low %v3367_v39, %v3374_v22  ;;  %v18671_v16 = vrot.slane %v4208_v58, 7  ;;  %v4216_v0 = vshrl.u32 %v18660_v24, 16  ;;  %v4523_v39 = vld [vmem:[#allocation2 + $0x18] sm:$0xf] }
 0x11b   : > { %21610 = vst [vmem:[#allocation37_spill] sm:$0xff] %v18657_v53  ;;  %v4026_v54 = vsel %vm17606_vm7, %v3811_v4, %v4025_v29  ;;  %v3830_v12 = vshrl.u32 %v15614_v10, 16  ;;  %v3833_v38 = vshll.u32 %v15614_v10, 16  ;;  %v4514_v31 = vsel %vm18650_vm9, %v4196_v34, %v4513_v51  ;;  %v4166_v15 = vld [vmem:[%s17537_s12 + $0x20] sm:$0xf] }
 0x11c   : > { %4027 = vst [vmem:[#allocation3 + $0xb0] sm:$0x1] %v4026_v54  ;;  %v3828_v62 = vrot.slane %v18654_v19, 4  ;;  %v18674_v44 = vpack.c.bf16 %v3375_v21, %v3375_v21  ;;  %v4206_v48 = vrot.slane %v18657_v53, 4  ;;  %4515 = vst [vmem:[#allocation2 + $0xc] sm:$0xf] %v4514_v31  ;;  %v4213_v30 = vor.u32 %v4211_v17, %v18671_v16 }
 0x11d   : > { %v18683_v49 = vrot.slane %v3830_v12, 7  ;;  %v4225_v11 = vshrl.u32 %v4162_v35, 16  ;;  %v4228_v29 = vshll.u32 %v4162_v35, 16  ;;  %v18697_v4 = vrot.slane %v4216_v0, 7  ;;  %v4527_v10 = vld [vmem:[#allocation2 + $0x20] sm:$0x1] }
 0x11e   : > { %v4033_v37 = vsel %vm17606_vm7, %v3828_v62, %v4032_v46  ;;  %v3838_v36 = vshrl.u32 %v18674_v44, 16  ;;  %v4521_v27 = vsel %vm18667_vm11, %v4206_v48, %v4520_v41  ;;  %v4530_v58 = vld [vmem:[#allocation2 + $0x24] sm:$0xf]  ;;  %v4233_v21 = vshrl.u32 %v18680_v42, 16  ;;  %v4534_v62 = vld [vmem:[#allocation2 + $0x2c] sm:$0x1] }
 0x11f   : > { %4034 = vst [vmem:[#allocation3 + $0xbc] sm:$0x1] %v4033_v37  ;;  %v3835_v22 = vor.u32 %v3833_v38, %v18683_v49  ;;  %4522 = vst [vmem:[#allocation2 + $0x14] sm:$0x1] %v4521_v27  ;;  %v18699_v46 = vrot.slane %v4225_v11, 7  ;;  %v4242_v34 = vshrl.u32 %v4164_v18, 16  ;;  %v4524_v12 = vsel %vm18650_vm9, %v4213_v30, %v4523_v39 }
 0x120   : > { %21613 = vst [vmem:[#allocation38_spill] sm:$0xff] %v18697_v4  ;;  %v18701_v51 = vrot.slane %v3838_v36, 7  ;;  %v4245_v35 = vshll.u32 %v4164_v18, 16  ;;  %v4223_v38 = vrot.slane %v18697_v4, 4  ;;  %v4537_v31 = vld [vmem:[#allocation2 + $0x30] sm:$0xf] }
 0x121   : > { %v4036_v54 = vsel %vm17598_vm6, %v3835_v22, %v4035_v26  ;;  %v4230_v41 = vor.u32 %v4228_v29, %v18699_v46  ;;  %v18711_v48 = vld [vmem:[%s17537_s12 + $0x24] sm:$0xf]  ;;  %4525 = vst [vmem:[#allocation2 + $0x18] sm:$0xf] %v4524_v12  ;;  %v18714_v18 = vrot.slane %v4233_v21, 7  ;;  %v18716_v63 = vrot.slane %v4242_v34, 7 }
 0x122   : > { %21614 = vst [vmem:[#allocation39_spill] sm:$0xff] %v18711_v48  ;;  %4037 = vst [vmem:[#allocation3 + $0xc0] sm:$0xf] %v4036_v54  ;;  %v3845_v17 = vrot.slane %v18701_v51, 4  ;;  %v4250_v26 = vshrl.u32 %v18687_v28, 16  ;;  %v4528_v11 = vsel %vm18667_vm11, %v4223_v38, %v4527_v10  ;;  %v4259_v27 = vshrl.u32 %v4166_v15, 16 }
 0x123   : > { %21615 = vst [vmem:[#allocation40_spill] sm:$0xff] %v18714_v18  ;;  %v4168_v0 = vld [vmem:[%s17537_s12 + $0x28] sm:$0xf]  ;;  %v4531_v37 = vsel %vm18650_vm9, %v4230_v41, %v4530_v58  ;;  %v4541_v36 = vld [vmem:[#allocation2 + $0x38] sm:$0x1]  ;;  %v4262_v39 = vshll.u32 %v4166_v15, 16  ;;  %v4247_v21 = vor.u32 %v4245_v35, %v18716_v63 }
 0x124   : > { %v18725_v29 = vld [vmem:[%s17537_s12 + $0x2c] sm:$0xf]  ;;  %v4040_v22 = vsel %vm17606_vm7, %v3845_v17, %v4039_v52  ;;  %4529 = vst [vmem:[#allocation2 + $0x20] sm:$0x1] %v4528_v11  ;;  %4532 = vst [vmem:[#allocation2 + $0x24] sm:$0xf] %v4531_v37 }
 0x125   : > { %21616 = vst [vmem:[#allocation41_spill] sm:$0xff] %v18725_v29  ;;  %v4240_v30 = vrot.slane %v18714_v18, 4  ;;  %v18731_v34 = vrot.slane %v4250_v26, 7  ;;  %v4544_v10 = vld [vmem:[#allocation2 + $0x3c] sm:$0xf]  ;;  %v18737_v15 = vrot.slane %v4259_v27, 7  ;;  %v4538_v35 = vsel %vm18650_vm9, %v4247_v21, %v4537_v31 }
 0x126   : > { %v4170_v58 = vld [vmem:[%s17537_s12 + $0x30] sm:$0xf]  ;;  %v18735_v54 = vld [vmem:[%s17537_s12 + $0x34] sm:$0xf]  ;;  %4041 = vst [vmem:[#allocation3 + $0xc8] sm:$0x1] %v4040_v22 }
 0x127   : > { %21617 = vst [vmem:[#allocation42_spill] sm:$0xff] %v18731_v34  ;;  %21618 = vst [vmem:[#allocation43_spill] sm:$0xff] %v18735_v54  ;;  %v4267_v12 = vshrl.u32 %v18711_v48, 16  ;;  %v4276_v38 = vshrl.u32 %v4168_v0, 16  ;;  %v4279_v52 = vshll.u32 %v4168_v0, 16  ;;  %v4535_v17 = vsel %vm18667_vm11, %v4240_v30, %v4534_v62 }
 0x128   : > { %21619 = vst [vmem:[#allocation44_spill] sm:$0xff] %v18737_v15  ;;  %v4172_v41 = vld [vmem:[%s17537_s12 + $0x38] sm:$0xf]  ;;  %v4257_v26 = vrot.slane %v18731_v34, 4  ;;  %v4548_v11 = vld [vmem:[#allocation2 + $0x44] sm:$0x1]  ;;  %v4264_v0 = vor.u32 %v4262_v39, %v18737_v15 }
 0x129   : > { %v4551_v37 = vld [vmem:[#allocation2 + $0x48] sm:$0xf]  ;;  %v4284_v27 = vshrl.u32 %v18725_v29, 16  ;;  %v18748_v22 = vld [vmem:[%s17537_s12 + $0x3c] sm:$0xf]  ;;  %v18751_v18 = vrot.slane %v4267_v12, 7 }
 0x12a   : > { %21620 = vst [vmem:[#allocation45_spill] sm:$0xff] %v18748_v22  ;;  %4536 = vst [vmem:[#allocation2 + $0x2c] sm:$0x1] %v4535_v17  ;;  %v18753_v48 = vrot.slane %v4276_v38, 7  ;;  %v4555_v62 = vld [vmem:[#allocation2 + $0x50] sm:$0x1]  ;;  %v4542_v21 = vsel %vm18667_vm11, %v4257_v26, %v4541_v36  ;;  %v4545_v39 = vsel %vm18650_vm9, %v4264_v0, %v4544_v10 }
 0x12b   : > { %4539 = vst [vmem:[#allocation2 + $0x30] sm:$0xf] %v4538_v35  ;;  %21621 = vst [vmem:[#allocation46_spill] sm:$0xff] %v18751_v18  ;;  %v4293_v31 = vshrl.u32 %v4170_v58, 16  ;;  %v4174_v30 = vld [vmem:[%s17537_s12 + $0x40] sm:$0xf] }
 0x12c   : > { %21622 = vst [vmem:[#allocation47_spill] sm:$0xff] %v18753_v48  ;;  %v18758_v34 = vrot.slane %v4284_v27, 7  ;;  %v4296_v29 = vshll.u32 %v4170_v58, 16  ;;  %v4558_v4 = vld [vmem:[#allocation2 + $0x54] sm:$0xf]  ;;  %v4301_v17 = vshrl.u32 %v18735_v54, 16  ;;  %v4281_v38 = vor.u32 %v4279_v52, %v18753_v48 }
 0x12d   : > { %v18762_v35 = vld [vmem:[%s17537_s12 + $0x44] sm:$0xf]  ;;  %4543 = vst [vmem:[#allocation2 + $0x38] sm:$0x1] %v4542_v21  ;;  %v4274_v12 = vrot.slane %v18751_v18, 4  ;;  %v18768_v15 = vrot.slane %v4293_v31, 7 }
 0x12e   : > { %21623 = vst [vmem:[#allocation48_spill] sm:$0xff] %v18758_v34  ;;  %21624 = vst [vmem:[#allocation49_spill] sm:$0xff] %v18762_v35  ;;  %v4562_v36 = vld [vmem:[#allocation2 + $0x5c] sm:$0x1]  ;;  %v4176_v26 = vld [vmem:[%s17537_s12 + $0x48] sm:$0xf]  ;;  %v4552_v0 = vsel %vm18650_vm9, %v4281_v38, %v4551_v37 }
 0x12f   : > { %21625 = vst [vmem:[#allocation50_spill] sm:$0xff] %v18768_v15  ;;  %4546 = vst [vmem:[#allocation2 + $0x3c] sm:$0xf] %v4545_v39  ;;  %v4291_v58 = vrot.slane %v18758_v34, 4  ;;  %v18772_v27 = vrot.slane %v4301_v17, 7  ;;  %v4310_v54 = vshrl.u32 %v4172_v41, 16  ;;  %v4549_v10 = vsel %vm18667_vm11, %v4274_v12, %v4548_v11 }
 0x130   : > { %v4313_v53 = vshll.u32 %v4172_v41, 16  ;;  %v18775_v21 = vld [vmem:[%s17537_s12 + $0x4c] sm:$0xf]  ;;  %v4298_v52 = vor.u32 %v4296_v29, %v18768_v15  ;;  %v4565_v31 = vld [vmem:[#allocation2 + $0x60] sm:$0xf]  ;;  %v4318_v39 = vshrl.u32 %v18748_v22, 16 }
 0x131   : > { %21626 = vst [vmem:[#allocation51_spill] sm:$0xff] %v18772_v27  ;;  %21627 = vst [vmem:[#allocation52_spill] sm:$0xff] %v18775_v21  ;;  %v4178_v18 = vld [vmem:[%s17537_s12 + $0x50] sm:$0xf]  ;;  %v4556_v41 = vsel %vm18667_vm11, %v4291_v58, %v4555_v62  ;;  %v4308_v17 = vrot.slane %v18772_v27, 4  ;;  %v18787_v34 = vrot.slane %v4310_v54, 7 }
 0x132   : > { %4550 = vst [vmem:[#allocation2 + $0x44] sm:$0x1] %v4549_v10  ;;  %4553 = vst [vmem:[#allocation2 + $0x48] sm:$0xf] %v4552_v0  ;;  %v4569_v11 = vld [vmem:[#allocation2 + $0x68] sm:$0x1]  ;;  %v4559_v29 = vsel %vm18650_vm9, %v4298_v52, %v4558_v4 }
 0x133   : > { %21628 = vst [vmem:[#allocation53_spill] sm:$0xff] %v18787_v34  ;;  %v4327_v12 = vshrl.u32 %v4174_v30, 16  ;;  %4557 = vst [vmem:[#allocation2 + $0x50] sm:$0x1] %v4556_v41  ;;  %v18791_v37 = vrot.slane %v4318_v39, 7  ;;  %v4330_v38 = vshll.u32 %v4174_v30, 16  ;;  %v4563_v54 = vsel %vm18667_vm11, %v4308_v17, %v4562_v36 }
 0x134   : > { %v4572_v22 = vld [vmem:[#allocation2 + $0x6c] sm:$0xf]  ;;  %v4335_v10 = vshrl.u32 %v18762_v35, 16  ;;  %v18795_v0 = vld [vmem:[%s17537_s12 + $0x54] sm:$0xf]  ;;  %v4315_v62 = vor.u32 %v4313_v53, %v18787_v34  ;;  %v4344_v4 = vshrl.u32 %v4176_v26, 16 }
 0x135   : > { %21629 = vst [vmem:[#allocation54_spill] sm:$0xff] %v18791_v37  ;;  %21630 = vst [vmem:[#allocation55_spill] sm:$0xff] %v18795_v0  ;;  %v18800_v58 = vrot.slane %v4327_v12, 7  ;;  %v4576_v41 = vld [vmem:[#allocation2 + $0x74] sm:$0x1]  ;;  %v4325_v30 = vrot.slane %v18791_v37, 4 }
 0x136   : > { %4560 = vst [vmem:[#allocation2 + $0x54] sm:$0xf] %v4559_v29  ;;  %v4180_v52 = vld [vmem:[%s17537_s12 + $0x58] sm:$0xf]  ;;  %4564 = vst [vmem:[#allocation2 + $0x5c] sm:$0x1] %v4563_v54  ;;  %v4566_v53 = vsel %vm18650_vm9, %v4315_v62, %v4565_v31 }
 0x137   : > { %v18804_v39 = vrot.slane %v4335_v10, 7  ;;  %v4347_v35 = vshll.u32 %v4176_v26, 16  ;;  %v4579_v27 = vld [vmem:[#allocation2 + $0x78] sm:$0xf]  ;;  %v4352_v29 = vshrl.u32 %v18775_v21, 16  ;;  %v4332_v36 = vor.u32 %v4330_v38, %v18800_v58 }
 0x138   : > { %v18808_v15 = vld [vmem:[%s17537_s12 + $0x5c] sm:$0xf]  ;;  %v18813_v17 = vrot.slane %v4344_v4, 7  ;;  %v4583_v12 = vld [vmem:[#allocation2 + $0x80] sm:$0x1]  ;;  %v4361_v54 = vshrl.u32 %v4178_v18, 16  ;;  %v4570_v26 = vsel %vm18667_vm11, %v4325_v30, %v4569_v11 }
 0x139   : > { %21631 = vst [vmem:[#allocation56_spill] sm:$0xff] %v18804_v39  ;;  %21632 = vst [vmem:[#allocation57_spill] sm:$0xff] %v18808_v15  ;;  %v4182_v37 = vld [vmem:[%s17537_s12 + $0x60] sm:$0xf]  ;;  %v4342_v10 = vrot.slane %v18804_v39, 4  ;;  %v18819_v21 = vrot.slane %v4352_v29, 7  ;;  %v4573_v31 = vsel %vm18650_vm9, %v4332_v36, %v4572_v22 }
 0x13a   : > { %4567 = vst [vmem:[#allocation2 + $0x60] sm:$0xf] %v4566_v53  ;;  %v4364_v34 = vshll.u32 %v4178_v18, 16  ;;  %v18822_v48 = vld [vmem:[%s17537_s12 + $0x64] sm:$0xf]  ;;  %v4349_v38 = vor.u32 %v4347_v35, %v18813_v17  ;;  %v18827_v62 = vrot.slane %v4361_v54, 7 }
 0x13b   : > { %21633 = vst [vmem:[#allocation58_spill] sm:$0xff] %v18819_v21  ;;  %21634 = vst [vmem:[#allocation59_spill] sm:$0xff] %v18822_v48  ;;  %v4586_v4 = vld [vmem:[#allocation2 + $0x84] sm:$0xf]  ;;  %v4369_v11 = vshrl.u32 %v18795_v0, 16  ;;  %v4577_v29 = vsel %vm18667_vm11, %v4342_v10, %v4576_v41  ;;  %v4359_v18 = vrot.slane %v18819_v21, 4 }
 0x13c   : > { %4571 = vst [vmem:[#allocation2 + $0x68] sm:$0x1] %v4570_v26  ;;  %21635 = vst [vmem:[#allocation60_spill] sm:$0xff] %v18827_v62  ;;  %v4184_v30 = vld [vmem:[%s17537_s12 + $0x68] sm:$0xf]  ;;  %v4378_v53 = vshrl.u32 %v4180_v52, 16  ;;  %v4580_v22 = vsel %vm18650_vm9, %v4349_v38, %v4579_v27  ;;  %v4366_v35 = vor.u32 %v4364_v34, %v18827_v62 }
 0x13d   : > { %4574 = vst [vmem:[#allocation2 + $0x6c] sm:$0xf] %v4573_v31  ;;  %v4381_v26 = vshll.u32 %v4180_v52, 16  ;;  %v18835_v39 = vld [vmem:[%s17537_s12 + $0x6c] sm:$0xf]  ;;  %v18840_v36 = vrot.slane %v4369_v11, 7  ;;  %v4584_v41 = vsel %vm18667_vm11, %v4359_v18, %v4583_v12 }
 0x13e   : > { %21636 = vst [vmem:[#allocation61_spill] sm:$0xff] %v18835_v39  ;;  %4578 = vst [vmem:[#allocation2 + $0x74] sm:$0x1] %v4577_v29  ;;  %v4590_v54 = vld [vmem:[#allocation2 + $0x8c] sm:$0x1]  ;;  %v4386_v31 = vshrl.u32 %v18808_v15, 16  ;;  %v4587_v34 = vsel %vm18650_vm9, %v4366_v35, %v4586_v4 }
 0x13f   : > { %21637 = vst [vmem:[#allocation62_spill] sm:$0xff] %v18840_v36  ;;  %v4186_v0 = vld [vmem:[%s17537_s12 + $0x70] sm:$0xf]  ;;  %4581 = vst [vmem:[#allocation2 + $0x78] sm:$0xf] %v4580_v22  ;;  %v18846_v52 = vrot.slane %v4378_v53, 7 }
 0x140   : > { %v4593_v10 = vld [vmem:[#allocation2 + $0x90] sm:$0xf]  ;;  %v4395_v29 = vshrl.u32 %v4182_v37, 16  ;;  %v4398_v21 = vshll.u32 %v4182_v37, 16  ;;  %4585 = vst [vmem:[#allocation2 + $0x80] sm:$0x1] %v4584_v41 }
 0x141   : > { %21638 = vst [vmem:[#allocation63_spill] sm:$0xff] %v18846_v52  ;;  %v4376_v27 = vrot.slane %v18840_v36, 4  ;;  %v18851_v38 = vrot.slane %v4386_v31, 7  ;;  %v4597_v11 = vld [vmem:[#allocation2 + $0x98] sm:$0x1]  ;;  %v4403_v22 = vshrl.u32 %v18822_v48, 16  ;;  %v4383_v12 = vor.u32 %v4381_v26, %v18846_v52 }
 0x142   : > { %v18855_v15 = vld [vmem:[%s17537_s12 + $0x74] sm:$0xf]  ;;  %4588 = vst [vmem:[#allocation2 + $0x84] sm:$0xf] %v4587_v34  ;;  %v18858_v18 = vrot.slane %v4395_v29, 7  ;;  %v4412_v53 = vshrl.u32 %v4184_v30, 16 }
 0x143   : > { %v4600_v37 = vld [vmem:[#allocation2 + $0x9c] sm:$0xf]  ;;  %v4415_v41 = vshll.u32 %v4184_v30, 16  ;;  %v4591_v4 = vsel %vm18667_vm11, %v4376_v27, %v4590_v54  ;;  %v4393_v35 = vrot.slane %v18851_v38, 4  ;;  %v18863_v31 = vrot.slane %v4403_v22, 7 }
 0x144   : > { %v4420_v48 = vshrl.u32 %v18835_v39, 16  ;;  %v4188_v36 = vld [vmem:[%s17537_s12 + $0x78] sm:$0xf]  ;;  %4592 = vst [vmem:[#allocation2 + $0x8c] sm:$0x1] %v4591_v4  ;;  %v4594_v26 = vsel %vm18650_vm9, %v4383_v12, %v4593_v10  ;;  %v4400_v29 = vor.u32 %v4398_v21, %v18858_v18  ;;  %v18870_v52 = vrot.slane %v4412_v53, 7 }
 0x145   : > { %21639 = vst [vmem:[#allocation64_spill] sm:$0xff] %v18863_v31  ;;  %v4604_v34 = vld [vmem:[#allocation2 + $0xa4] sm:$0x1]  ;;  %v4429_v30 = vshrl.u32 %v4186_v0, 16  ;;  %v18873_v62 = vld [vmem:[%s17537_s12 + $0x7c] sm:$0xf]  ;;  %v4598_v54 = vsel %vm18667_vm11, %v4393_v35, %v4597_v11 }
 0x146   : > { %4595 = vst [vmem:[#allocation2 + $0x90] sm:$0xf] %v4594_v26  ;;  %v4410_v27 = vrot.slane %v18863_v31, 4  ;;  %v4607_v22 = vld [vmem:[#allocation2 + $0xa8] sm:$0xf]  ;;  %v18878_v39 = vrot.slane %v4420_v48, 7  ;;  %v4601_v21 = vsel %vm18650_vm9, %v4400_v29, %v4600_v37  ;;  %v4417_v10 = vor.u32 %v4415_v41, %v18870_v52 }
 0x147   : > { %v4432_v4 = vshll.u32 %v4186_v0, 16  ;;  %4599 = vst [vmem:[#allocation2 + $0x98] sm:$0x1] %v4598_v54  ;;  %v4611_v12 = vld [vmem:[#allocation2 + $0xb0] sm:$0x1]  ;;  %v18883_v53 = vrot.slane %v4429_v30, 7 }
 0x148   : > { %v4437_v26 = vshrl.u32 %v18855_v15, 16  ;;  %4602 = vst [vmem:[#allocation2 + $0x9c] sm:$0xf] %v4601_v21  ;;  %v4605_v11 = vsel %vm18667_vm11, %v4410_v27, %v4604_v34  ;;  %v4427_v35 = vrot.slane %v18878_v39, 4  ;;  %v4614_v48 = vld [vmem:[#allocation2 + $0xb4] sm:$0xf]  ;;  %v4608_v37 = vsel %vm18650_vm9, %v4417_v10, %v4607_v22 }
 0x149   : > { %v4446_v31 = vshrl.u32 %v4188_v36, 16  ;;  %v4449_v0 = vshll.u32 %v4188_v36, 16  ;;  %4606 = vst [vmem:[#allocation2 + $0xa4] sm:$0x1] %v4605_v11  ;;  %v4434_v41 = vor.u32 %v4432_v4, %v18883_v53  ;;  %v4454_v30 = vshrl.u32 %v18873_v62, 16 }
 0x14a   : > { %v18892_v29 = vrot.slane %v4437_v26, 7  ;;  %4609 = vst [vmem:[#allocation2 + $0xa8] sm:$0xf] %v4608_v37  ;;  %v4612_v54 = vsel %vm18667_vm11, %v4427_v35, %v4611_v12  ;;  %v4618_v34 = vld [vmem:[#allocation2 + $0xbc] sm:$0x1]  ;;  %v3581_v36 = vrot.slane %v17702_v60, 4  ;;  %v3572_v11 = vsel %vm18906_vm13, %v17614_v14, %v17612_v13 }
 0x14b   : > { %v18897_v27 = vrot.slane %v4446_v31, 7  ;;  %4613 = vst [vmem:[#allocation2 + $0xb0] sm:$0x1] %v4612_v54  ;;  %v4615_v22 = vsel %vm18650_vm9, %v4434_v41, %v4614_v48  ;;  %v4621_v21 = vld [vmem:[#allocation2 + $0xc0] sm:$0xf]  ;;  %v18903_v10 = vrot.slane %v4454_v30, 7 }
 0x14c   : > { %v4444_v4 = vrot.slane %v18892_v29, 4  ;;  %v3586_v31 = vshll.u32 %v17735_v43, 16  ;;  %4616 = vst [vmem:[#allocation2 + $0xb4] sm:$0xf] %v4615_v22  ;;  %v4625_v60 = vld [vmem:[#allocation2 + $0xc8] sm:$0x1] }
 0x14d   : > { %v4451_v12 = vor.u32 %v4449_v0, %v18897_v27  ;;  %v3598_v35 = vrot.slane %v17790_v3, 4  ;;  %v3603_v48 = vshll.u32 %v17842_v20, 16  ;;  %v4461_v41 = vrot.slane %v18903_v10, 4  ;;  %3924 = vst.msk [vmem:[#allocation3 + $0x4] sm:$0xf] %vm3917_vm2, %v3572_v11 }
 0x14e   : > { %v4619_v37 = vsel %vm18667_vm11, %v4444_v4, %v4618_v34  ;;  %4045 = vst.msk [vmem:[#allocation3 + $0xd0] sm:$0xf] %vm3917_vm2, %v3572_v11  ;;  %v3588_v43 = vor.u32 %v3586_v31, %v17755_v55  ;;  %v3615_v0 = vrot.slane %v17821_v9, 4  ;;  %v3620_v3 = vshll.u32 %v17849_v32, 16  ;;  %v21642_v9 = vld [vmem:[#allocation13_spill] sm:$0xff]  ;;  %v21643_v32 = vld [vmem:[#allocation12_spill] sm:$0xff] }
 0x14f   : > { %4620 = vst [vmem:[#allocation2 + $0xbc] sm:$0x1] %v4619_v37  ;;  %v4622_v13 = vsel %vm18650_vm9, %v4451_v12, %v4621_v21  ;;  %v3605_v14 = vor.u32 %v3603_v48, %v17855_v23  ;;  %v3632_v20 = vrot.slane %v17952_v47, 4  ;;  %v4626_v30 = vsel %vm18667_vm11, %v4461_v41, %v4625_v60  ;;  %v21644_v47 = vld [vmem:[#allocation14_spill] sm:$0xff]  ;;  %v21645_v21 = vld [vmem:[#allocation17_spill] sm:$0xff]  ;;  %v21646_v12 = vld [vmem:[#allocation15_spill] sm:$0xff] }
 0x150   : > { %4623 = vst [vmem:[#allocation2 + $0xc0] sm:$0xf] %v4622_v13  ;;  %v3589_v54 = vsel %vm18906_vm13, %v3581_v36, %v3588_v43  ;;  %v3637_v55 = vshll.u32 %v17977_v50, 16  ;;  %v3649_v34 = vrot.slane %v21642_v9, 4  ;;  %4627 = vst [vmem:[#allocation2 + $0xc8] sm:$0x1] %v4626_v30  ;;  %v3622_v22 = vor.u32 %v3620_v3, %v21643_v32 }
 0x151   : > { %3933 = vst.msk [vmem:[#allocation3 + $0x10] sm:$0xf] %vm3917_vm2, %v3589_v54  ;;  %v3606_v23 = vsel %vm18906_vm13, %v3598_v35, %v3605_v14  ;;  %v3654_v4 = vshll.u32 %v21644_v47, 16  ;;  %v3666_v31 = vrot.slane %v21645_v21, 4  ;;  %v21647_v60 = vld [vmem:[#allocation19_spill] sm:$0xff]  ;;  %v21648_v11 = vld [vmem:[#allocation18_spill] sm:$0xff] }
 0x152   : > { %3940 = vst.msk [vmem:[#allocation3 + $0x1c] sm:$0xf] %vm3917_vm2, %v3606_v23  ;;  %v3639_v36 = vor.u32 %v3637_v55, %v21646_v12  ;;  %v3671_v50 = vshll.u32 %v21647_v60, 16  ;;  %v3683_v48 = vrot.slane %v21648_v11, 4  ;;  %v21649_v37 = vld [vmem:[#allocation20_spill] sm:$0xff]  ;;  %v3623_v43 = vsel %vm18906_vm13, %v3615_v0, %v3622_v22  ;;  %v21651_v54 = vld [vmem:[#allocation21_spill] sm:$0xff] }
 0x153   : > { %v3688_v41 = vshll.u32 %v21649_v37, 16  ;;  %v21650_v35 = vld [vmem:[#allocation16_spill] sm:$0xff]  ;;  %v3700_v14 = vrot.slane %v18237_v56, 4  ;;  %v3705_v3 = vshll.u32 %v18244_v7, 16  ;;  %3947 = vst.msk [vmem:[#allocation3 + $0x28] sm:$0xf] %vm3917_vm2, %v3623_v43 }
 0x154   : > { %v3656_v13 = vor.u32 %v3654_v4, %v21650_v35  ;;  %v3640_v30 = vsel %vm18906_vm13, %v3632_v20, %v3639_v36  ;;  %v3673_v55 = vor.u32 %v3671_v50, %v21651_v54  ;;  %v21652_v9 = vld [vmem:[#allocation22_spill] sm:$0xff]  ;;  %v21653_v32 = vld [vmem:[#allocation23_spill] sm:$0xff]  ;;  %v21654_v22 = vld [vmem:[#allocation24_spill] sm:$0xff]  ;;  %v3773_v54 = vshll.u32 %v18531_v59, 16 }
 0x155   : > { %v3690_v23 = vor.u32 %v3688_v41, %v21652_v9  ;;  %v3717_v47 = vrot.slane %v21653_v32, 4  ;;  %3954 = vst.msk [vmem:[#allocation3 + $0x34] sm:$0xf] %vm3917_vm2, %v3640_v30  ;;  %v3707_v56 = vor.u32 %v3705_v3, %v21654_v22  ;;  %v21655_v4 = vld [vmem:[#allocation25_spill] sm:$0xff]  ;;  %v21656_v21 = vld [vmem:[#allocation27_spill] sm:$0xff]  ;;  %v21658_v11 = vld [vmem:[#allocation28_spill] sm:$0xff] }
 0x156   : > { %v3657_v0 = vsel %vm18906_vm13, %v3649_v34, %v3656_v13  ;;  %v3722_v7 = vshll.u32 %v21655_v4, 16  ;;  %v3734_v12 = vrot.slane %v21656_v21, 4  ;;  %v3674_v20 = vsel %vm18906_vm13, %v3666_v31, %v3673_v55  ;;  %v21657_v60 = vld [vmem:[#allocation29_spill] sm:$0xff]  ;;  %v21659_v41 = vld [vmem:[#allocation26_spill] sm:$0xff]  ;;  %v4049_v3 = vld [vmem:[#allocation3] sm:$0x1] }
 0x157   : > { %3961 = vst.msk [vmem:[#allocation3 + $0x40] sm:$0xf] %vm3917_vm2, %v3657_v0  ;;  %v3691_v36 = vsel %vm18906_vm13, %v3683_v48, %v3690_v23  ;;  %v3739_v50 = vshll.u32 %v21657_v60, 16  ;;  %v3751_v37 = vrot.slane %v21658_v11, 4  ;;  %3968 = vst.msk [vmem:[#allocation3 + $0x4c] sm:$0xf] %vm3917_vm2, %v3674_v20  ;;  %v3708_v34 = vsel %vm18906_vm13, %v3700_v14, %v3707_v56 }
 0x158   : > { %3975 = vst.msk [vmem:[#allocation3 + $0x58] sm:$0xf] %vm3917_vm2, %v3691_v36  ;;  %v3724_v43 = vor.u32 %v3722_v7, %v21659_v41  ;;  %v21660_v35 = vld [vmem:[#allocation30_spill] sm:$0xff]  ;;  %v3768_v31 = vrot.slane %v18507_v40, 4  ;;  %3982 = vst.msk [vmem:[#allocation3 + $0x64] sm:$0xf] %vm3917_vm2, %v3708_v34 }
 0x159   : > { %v3756_v13 = vshll.u32 %v21660_v35, 16  ;;  %v21661_v48 = vld [vmem:[#allocation31_spill] sm:$0xff]  ;;  %v21662_v55 = vld [vmem:[#allocation33_spill] sm:$0xff]  ;;  %v21663_v23 = vld [vmem:[#allocation34_spill] sm:$0xff]  ;;  %v3802_v40 = vrot.slane %v18608_v1, 4  ;;  %v3807_v7 = vshll.u32 %v18624_v8, 16 }
 0x15a   : > { %v3741_v30 = vor.u32 %v3739_v50, %v21661_v48  ;;  %v3785_v9 = vrot.slane %v21662_v55, 4  ;;  %v3790_v32 = vshll.u32 %v21663_v23, 16  ;;  %v4052_v0 = vld [vmem:[#allocation3 + $0xc] sm:$0x1]  ;;  %v4055_v22 = vld [vmem:[#allocation3 + $0x18] sm:$0x1]  ;;  %v3725_v14 = vsel %vm18906_vm13, %v3717_v47, %v3724_v43 }
 0x15b   : > { %v21664_v56 = vld [vmem:[#allocation32_spill] sm:$0xff]  ;;  %v4058_v21 = vld [vmem:[#allocation3 + $0x24] sm:$0x1]  ;;  %v4061_v20 = vld [vmem:[#allocation3 + $0x30] sm:$0x1]  ;;  %v3819_v47 = vrot.slane %v18617_v61, 4  ;;  %v3809_v8 = vor.u32 %v3807_v7, %v18639_v25 }
 0x15c   : > { %v3758_v4 = vor.u32 %v3756_v13, %v21664_v56  ;;  %v4064_v36 = vld [vmem:[#allocation3 + $0x3c] sm:$0x1]  ;;  %3989 = vst.msk [vmem:[#allocation3 + $0x70] sm:$0xf] %vm3917_vm2, %v3725_v14  ;;  %v3742_v59 = vsel %vm18906_vm13, %v3734_v12, %v3741_v30  ;;  %v21665_v60 = vld [vmem:[#allocation35_spill] sm:$0xff]  ;;  %v21666_v11 = vld [vmem:[#allocation36_spill] sm:$0xff] }
 0x15d   : > { %v3775_v50 = vor.u32 %v3773_v54, %v21665_v60  ;;  %v3792_v34 = vor.u32 %v3790_v32, %v21666_v11  ;;  %v4067_v41 = vld [vmem:[#allocation3 + $0x48] sm:$0x1]  ;;  %v4070_v43 = vld [vmem:[#allocation3 + $0x54] sm:$0x1]  ;;  %v4073_v35 = vld [vmem:[#allocation3 + $0x60] sm:$0x1] }
 0x15e   : > { %3996 = vst.msk [vmem:[#allocation3 + $0x7c] sm:$0xf] %vm3917_vm2, %v3742_v59  ;;  %v3759_v1 = vsel %vm18906_vm13, %v3751_v37, %v3758_v4  ;;  %v3824_v13 = vshll.u32 %v18636_v2, 16  ;;  %v3836_v12 = vrot.slane %v18683_v49, 4  ;;  %v4076_v48 = vld [vmem:[#allocation3 + $0x6c] sm:$0x1]  ;;  %v3810_v2 = vsel %vm18906_vm13, %v3802_v40, %v3809_v8 }
 0x15f   : > { %v4079_v30 = vld [vmem:[#allocation3 + $0x78] sm:$0x1]  ;;  %4003 = vst.msk [vmem:[#allocation3 + $0x88] sm:$0xf] %vm3917_vm2, %v3759_v1  ;;  %v3776_v61 = vsel %vm18906_vm13, %v3768_v31, %v3775_v50  ;;  %v3793_v54 = vsel %vm18906_vm13, %v3785_v9, %v3792_v34  ;;  %v3841_v55 = vshll.u32 %v18674_v44, 16  ;;  %v4050_v37 = vsel %vm17606_vm7, 0, %v4049_v3 }
 0x160   : > { %v4082_v25 = vld [vmem:[#allocation3 + $0x84] sm:$0x1]  ;;  %v4085_v23 = vld [vmem:[#allocation3 + $0x90] sm:$0x1]  ;;  %4010 = vst.msk [vmem:[#allocation3 + $0x94] sm:$0xf] %vm3917_vm2, %v3776_v61  ;;  %v3826_v49 = vor.u32 %v3824_v13, %v18654_v19 }
 0x161   : > { %4017 = vst.msk [vmem:[#allocation3 + $0xa0] sm:$0xf] %vm3917_vm2, %v3793_v54  ;;  %4051 = vst [vmem:[#allocation3] sm:$0x1] %v4050_v37  ;;  %v4053_v31 = vsel %vm17606_vm7, 0, %v4052_v0  ;;  %v4056_v44 = vsel %vm17606_vm7, 0, %v4055_v22  ;;  %v3843_v4 = vor.u32 %v3841_v55, %v18701_v51 }
 0x162   : > { %v4088_v9 = vld [vmem:[#allocation3 + $0x9c] sm:$0x1]  ;;  %v4091_v3 = vld [vmem:[#allocation3 + $0xa8] sm:$0x1]  ;;  %v4100_v32 = vld [vmem:[#allocation3 + $0xcc] sm:$0x1]  ;;  %v3827_v11 = vsel %vm18906_vm13, %v3819_v47, %v3826_v49 }
 0x163   : > { %v4104_v14 = vld [vmem:[#allocation3 + $0x8] sm:$0x1]  ;;  %v4107_v56 = vld [vmem:[#allocation3 + $0x14] sm:$0x1]  ;;  %4024 = vst.msk [vmem:[#allocation3 + $0xac] sm:$0xf] %vm3917_vm2, %v3810_v2 }
 0x164   : > { %4054 = vst [vmem:[#allocation3 + $0xc] sm:$0x1] %v4053_v31  ;;  %4057 = vst [vmem:[#allocation3 + $0x18] sm:$0x1] %v4056_v44  ;;  %v4059_v19 = vsel %vm17606_vm7, 0, %v4058_v21  ;;  %v4062_v0 = vsel %vm17606_vm7, 0, %v4061_v20 }
 0x165   : > { %v4065_v22 = vsel %vm17606_vm7, 0, %v4064_v36  ;;  %v4094_v40 = vld [vmem:[#allocation3 + $0xb4] sm:$0x1]  ;;  %v4110_v7 = vld [vmem:[#allocation3 + $0x20] sm:$0x1]  ;;  %v4068_v51 = vsel %vm17606_vm7, 0, %v4067_v41  ;;  %v3844_v41 = vsel %vm18906_vm13, %v3836_v12, %v3843_v4 }
 0x166   : > { %v4113_v59 = vld [vmem:[#allocation3 + $0x2c] sm:$0x1]  ;;  %v4116_v60 = vld [vmem:[#allocation3 + $0x38] sm:$0x1]  ;;  %v4119_v50 = vld [vmem:[#allocation3 + $0x44] sm:$0x1] }
 0x167   : > { %4060 = vst [vmem:[#allocation3 + $0x24] sm:$0x1] %v4059_v19  ;;  %4063 = vst [vmem:[#allocation3 + $0x30] sm:$0x1] %v4062_v0  ;;  %v4071_v21 = vsel %vm17606_vm7, 0, %v4070_v43  ;;  %v4074_v20 = vsel %vm17606_vm7, 0, %v4073_v35 }
 0x168   : > { %4066 = vst [vmem:[#allocation3 + $0x3c] sm:$0x1] %v4065_v22  ;;  %v4097_v36 = vld [vmem:[#allocation3 + $0xc0] sm:$0x1]  ;;  %v4122_v47 = vld [vmem:[#allocation3 + $0x50] sm:$0x1] }
 0x169   : > { %v4125_v1 = vld [vmem:[#allocation3 + $0x5c] sm:$0x1]  ;;  %v4128_v8 = vld [vmem:[#allocation3 + $0x68] sm:$0x1]  ;;  %v4131_v13 = vld [vmem:[#allocation3 + $0x74] sm:$0x1] }
 0x16a   : > { %4031 = vst.msk [vmem:[#allocation3 + $0xb8] sm:$0xf] %vm3917_vm2, %v3827_v11  ;;  %4069 = vst [vmem:[#allocation3 + $0x48] sm:$0x1] %v4068_v51  ;;  %v4077_v43 = vsel %vm17606_vm7, 0, %v4076_v48  ;;  %v4080_v35 = vsel %vm17606_vm7, 0, %v4079_v30 }
 0x16b   : > { %4072 = vst [vmem:[#allocation3 + $0x54] sm:$0x1] %v4071_v21  ;;  %4075 = vst [vmem:[#allocation3 + $0x60] sm:$0x1] %v4074_v20  ;;  %v4083_v61 = vsel %vm17606_vm7, 0, %v4082_v25  ;;  %v4086_v12 = vsel %vm17606_vm7, 0, %v4085_v23 }
 0x16c   : > { %v4134_v54 = vld [vmem:[#allocation3 + $0x80] sm:$0x1]  ;;  %v4137_v55 = vld [vmem:[#allocation3 + $0x8c] sm:$0x1]  ;;  %v4140_v37 = vld [vmem:[#allocation3 + $0x98] sm:$0x1] }
 0x16d   : > { %v4143_v2 = vld [vmem:[#allocation3 + $0xa4] sm:$0x1]  ;;  %4038 = vst.msk [vmem:[#allocation3 + $0xc4] sm:$0xf] %vm3917_vm2, %v3844_v41  ;;  %4078 = vst [vmem:[#allocation3 + $0x6c] sm:$0x1] %v4077_v43 }
 0x16e   : > { %4081 = vst [vmem:[#allocation3 + $0x78] sm:$0x1] %v4080_v35  ;;  %4084 = vst [vmem:[#allocation3 + $0x84] sm:$0x1] %v4083_v61  ;;  %v4089_v48 = vsel %vm17606_vm7, 0, %v4088_v9  ;;  %v4092_v30 = vsel %vm17606_vm7, 0, %v4091_v3 }
 0x16f   : > { %v4095_v25 = vsel %vm17606_vm7, 0, %v4094_v40  ;;  %v4146_v49 = vld [vmem:[#allocation3 + $0xb0] sm:$0x1]  ;;  %v4155_v31 = vld [vmem:[#allocation3 + $0xd4] sm:$0x1]  ;;  %v4098_v44 = vsel %vm17606_vm7, 0, %v4097_v36 }
 0x170   : > { %4087 = vst [vmem:[#allocation3 + $0x90] sm:$0x1] %v4086_v12  ;;  %4090 = vst [vmem:[#allocation3 + $0x9c] sm:$0x1] %v4089_v48  ;;  %v4101_v23 = vsel %vm17606_vm7, 0, %v4100_v32  ;;  %v4105_v9 = vsel %vm19035_vm14, 0, %v4104_v14 }
 0x171   : > { %4093 = vst [vmem:[#allocation3 + $0xa8] sm:$0x1] %v4092_v30  ;;  %4096 = vst [vmem:[#allocation3 + $0xb4] sm:$0x1] %v4095_v25  ;;  %v4108_v3 = vsel %vm19035_vm14, 0, %v4107_v56  ;;  %v4111_v19 = vsel %vm19035_vm14, 0, %v4110_v7 }
 0x172   : > { %v4149_v4 = vld [vmem:[#allocation3 + $0xbc] sm:$0x1]  ;;  %4099 = vst [vmem:[#allocation3 + $0xc0] sm:$0x1] %v4098_v44  ;;  %4102 = vst [vmem:[#allocation3 + $0xcc] sm:$0x1] %v4101_v23 }
 0x173   : > { %4106 = vst [vmem:[#allocation3 + $0x8] sm:$0x1] %v4105_v9  ;;  %4109 = vst [vmem:[#allocation3 + $0x14] sm:$0x1] %v4108_v3  ;;  %v4114_v0 = vsel %vm19035_vm14, 0, %v4113_v59  ;;  %v4117_v6 = vsel %vm19035_vm14, 0, %v4116_v60 }
 0x174   : > { %v4120_v32 = vsel %vm19035_vm14, 0, %v4119_v50  ;;  %v4152_v14 = vld [vmem:[#allocation3 + $0xc8] sm:$0x1]  ;;  %4112 = vst [vmem:[#allocation3 + $0x20] sm:$0x1] %v4111_v19  ;;  %v4123_v56 = vsel %vm19035_vm14, 0, %v4122_v47 }
 0x175   : > { %4115 = vst [vmem:[#allocation3 + $0x2c] sm:$0x1] %v4114_v0  ;;  %4118 = vst [vmem:[#allocation3 + $0x38] sm:$0x1] %v4117_v6  ;;  %v4126_v22 = vsel %vm19035_vm14, 0, %v4125_v1  ;;  %v4129_v40 = vsel %vm19035_vm14, 0, %v4128_v8 }
 0x176   : > { %4121 = vst [vmem:[#allocation3 + $0x44] sm:$0x1] %v4120_v32  ;;  %v4132_v7 = vsel %vm19035_vm14, 0, %v4131_v13  ;;  %4124 = vst [vmem:[#allocation3 + $0x50] sm:$0x1] %v4123_v56  ;;  %v4135_v59 = vsel %vm19035_vm14, 0, %v4134_v54 }
 0x177   : > { %4127 = vst [vmem:[#allocation3 + $0x5c] sm:$0x1] %v4126_v22  ;;  %4130 = vst [vmem:[#allocation3 + $0x68] sm:$0x1] %v4129_v40  ;;  %v4138_v60 = vsel %vm19035_vm14, 0, %v4137_v55  ;;  %v4141_v50 = vsel %vm19035_vm14, 0, %v4140_v37 }
 0x178   : > { %4133 = vst [vmem:[#allocation3 + $0x74] sm:$0x1] %v4132_v7  ;;  %v4144_v11 = vsel %vm19035_vm14, 0, %v4143_v2  ;;  %4136 = vst [vmem:[#allocation3 + $0x80] sm:$0x1] %v4135_v59  ;;  %v4147_v51 = vsel %vm19035_vm14, 0, %v4146_v49 }
 0x179   : > { %4139 = vst [vmem:[#allocation3 + $0x8c] sm:$0x1] %v4138_v60  ;;  %4142 = vst [vmem:[#allocation3 + $0x98] sm:$0x1] %v4141_v50  ;;  %v4150_v21 = vsel %vm19035_vm14, 0, %v4149_v4  ;;  %v4153_v20 = vsel %vm19035_vm14, 0, %v4152_v14 }
 0x17a   : > { %4145 = vst [vmem:[#allocation3 + $0xa4] sm:$0x1] %v4144_v11  ;;  %v4156_v36 = vsel %vm19035_vm14, 0, %v4155_v31  ;;  %4148 = vst [vmem:[#allocation3 + $0xb0] sm:$0x1] %v4147_v51  ;;  %v4197_v47 = vrot.slane %v18644_v5, 4 }
 0x17b   : > { %4151 = vst [vmem:[#allocation3 + $0xbc] sm:$0x1] %v4150_v21  ;;  %4154 = vst [vmem:[#allocation3 + $0xc8] sm:$0x1] %v4153_v20  ;;  %v4202_v1 = vshll.u32 %v18634_v33, 16  ;;  %v4214_v8 = vrot.slane %v18671_v16, 4 }
 0x17c   : > { %4157 = vst [vmem:[#allocation3 + $0xd4] sm:$0x1] %v4156_v36  ;;  %v4219_v13 = vshll.u32 %v18660_v24, 16  ;;  %v4231_v41 = vrot.slane %v18699_v46, 4  ;;  %v4236_v43 = vshll.u32 %v18680_v42, 16  ;;  %v4248_v35 = vrot.slane %v18716_v63, 4 }
 0x17d   : > { %v4253_v34 = vshll.u32 %v18687_v28, 16  ;;  %v21669_v61 = vld [vmem:[#allocation37_spill] sm:$0xff]  ;;  %v21670_v55 = vld [vmem:[#allocation38_spill] sm:$0xff]  ;;  %v21671_v2 = vld [vmem:[#allocation44_spill] sm:$0xff]  ;;  %v4333_v59 = vrot.slane %v18800_v58, 4  ;;  %v4350_v20 = vrot.slane %v18813_v17, 4 }
 0x17e   : > { %v4204_v54 = vor.u32 %v4202_v1, %v21669_v61  ;;  %v4221_v37 = vor.u32 %v4219_v13, %v21670_v55  ;;  %v4265_v5 = vrot.slane %v21671_v2, 4  ;;  %v21672_v12 = vld [vmem:[#allocation39_spill] sm:$0xff]  ;;  %v21673_v48 = vld [vmem:[#allocation40_spill] sm:$0xff]  ;;  %v21674_v30 = vld [vmem:[#allocation42_spill] sm:$0xff] }
 0x17f   : > { %v4270_v33 = vshll.u32 %v21672_v12, 16  ;;  %v4238_v16 = vor.u32 %v4236_v43, %v21673_v48  ;;  %v4255_v24 = vor.u32 %v4253_v34, %v21674_v30  ;;  %v21675_v25 = vld [vmem:[#allocation47_spill] sm:$0xff]  ;;  %v21676_v49 = vld [vmem:[#allocation41_spill] sm:$0xff]  ;;  %v21677_v31 = vld [vmem:[#allocation46_spill] sm:$0xff] }
 0x180   : > { %v4282_v46 = vrot.slane %v21675_v25, 4  ;;  %v4287_v42 = vshll.u32 %v21676_v49, 16  ;;  %v4205_v63 = vsel %vm18906_vm13, %v4197_v47, %v4204_v54  ;;  %v4222_v28 = vsel %vm18906_vm13, %v4214_v8, %v4221_v37  ;;  %v21678_v23 = vld [vmem:[#allocation50_spill] sm:$0xff]  ;;  %v21679_v19 = vld [vmem:[#allocation48_spill] sm:$0xff]  ;;  %v21680_v6 = vld [vmem:[#allocation43_spill] sm:$0xff] }
 0x181   : > { %v4272_v44 = vor.u32 %v4270_v33, %v21677_v31  ;;  %v4299_v9 = vrot.slane %v21678_v23, 4  ;;  %4517 = vst.msk [vmem:[#allocation2 + $0x10] sm:$0xf] %vm4511_vm8, %v4205_v63  ;;  %4526 = vst.msk [vmem:[#allocation2 + $0x1c] sm:$0xf] %vm4511_vm8, %v4222_v28  ;;  %v4239_v3 = vsel %vm18906_vm13, %v4231_v41, %v4238_v16  ;;  %v4256_v4 = vsel %vm18906_vm13, %v4248_v35, %v4255_v24  ;;  %v21681_v56 = vld [vmem:[#allocation53_spill] sm:$0xff] }
 0x182   : > { %v4289_v0 = vor.u32 %v4287_v42, %v21679_v19  ;;  %v4304_v32 = vshll.u32 %v21680_v6, 16  ;;  %4533 = vst.msk [vmem:[#allocation2 + $0x28] sm:$0xf] %vm4511_vm8, %v4239_v3  ;;  %4540 = vst.msk [vmem:[#allocation2 + $0x34] sm:$0xf] %vm4511_vm8, %v4256_v4  ;;  %v4316_v22 = vrot.slane %v21681_v56, 4 }
 0x183   : > { %v4273_v14 = vsel %vm18906_vm13, %v4265_v5, %v4272_v44  ;;  %v21682_v40 = vld [vmem:[#allocation45_spill] sm:$0xff]  ;;  %v21683_v50 = vld [vmem:[#allocation51_spill] sm:$0xff]  ;;  %v21685_v36 = vld [vmem:[#allocation54_spill] sm:$0xff]  ;;  %v4401_v24 = vrot.slane %v18858_v18, 4  ;;  %v4418_v31 = vrot.slane %v18870_v52, 4  ;;  %v4435_v19 = vrot.slane %v18883_v53, 4 }
 0x184   : > { %v4321_v7 = vshll.u32 %v21682_v40, 16  ;;  %4547 = vst.msk [vmem:[#allocation2 + $0x40] sm:$0xf] %vm4511_vm8, %v4273_v14  ;;  %v4290_v60 = vsel %vm18906_vm13, %v4282_v46, %v4289_v0  ;;  %v4306_v11 = vor.u32 %v4304_v32, %v21683_v50  ;;  %v21684_v51 = vld [vmem:[#allocation49_spill] sm:$0xff]  ;;  %v21686_v1 = vld [vmem:[#allocation52_spill] sm:$0xff]  ;;  %v21688_v58 = vld [vmem:[#allocation55_spill] sm:$0xff] }
 0x185   : > { %v4338_v21 = vshll.u32 %v21684_v51, 16  ;;  %4554 = vst.msk [vmem:[#allocation2 + $0x4c] sm:$0xf] %vm4511_vm8, %v4290_v60  ;;  %v4355_v8 = vshll.u32 %v21686_v1, 16  ;;  %v21687_v13 = vld [vmem:[#allocation60_spill] sm:$0xff]  ;;  %v4372_v43 = vshll.u32 %v21688_v58, 16 }
 0x186   : > { %v4323_v47 = vor.u32 %v4321_v7, %v21685_v36  ;;  %v4367_v41 = vrot.slane %v21687_v13, 4  ;;  %v4307_v35 = vsel %vm18906_vm13, %v4299_v9, %v4306_v11  ;;  %v21689_v34 = vld [vmem:[#allocation56_spill] sm:$0xff]  ;;  %v21690_v54 = vld [vmem:[#allocation63_spill] sm:$0xff]  ;;  %v21691_v37 = vld [vmem:[#allocation57_spill] sm:$0xff]  ;;  %v4440_v56 = vshll.u32 %v18855_v15, 16 }
 0x187   : > { %v4340_v61 = vor.u32 %v4338_v21, %v21689_v34  ;;  %v4384_v55 = vrot.slane %v21690_v54, 4  ;;  %v4389_v2 = vshll.u32 %v21691_v37, 16  ;;  %v4628_v17 = vld [vmem:[#allocation2] sm:$0x1]  ;;  %v4631_v5 = vld [vmem:[#allocation2 + $0xc] sm:$0x1] }
 0x188   : > { %4561 = vst.msk [vmem:[#allocation2 + $0x58] sm:$0xf] %vm4511_vm8, %v4307_v35  ;;  %v4324_v12 = vsel %vm18906_vm13, %v4316_v22, %v4323_v47  ;;  %v21692_v33 = vld [vmem:[#allocation58_spill] sm:$0xff]  ;;  %v4634_v25 = vld [vmem:[#allocation2 + $0x18] sm:$0x1]  ;;  %v21695_v3 = vld [vmem:[#allocation61_spill] sm:$0xff] }
 0x189   : > { %v4357_v48 = vor.u32 %v4355_v8, %v21692_v33  ;;  %v21693_v16 = vld [vmem:[#allocation62_spill] sm:$0xff]  ;;  %v4637_v46 = vld [vmem:[#allocation2 + $0x24] sm:$0x1]  ;;  %4568 = vst.msk [vmem:[#allocation2 + $0x64] sm:$0xf] %vm4511_vm8, %v4324_v12  ;;  %v4341_v49 = vsel %vm18906_vm13, %v4333_v59, %v4340_v61  ;;  %v4391_v42 = vor.u32 %v4389_v2, %v18851_v38  ;;  %v21694_v63 = vld [vmem:[#allocation59_spill] sm:$0xff] }
 0x18a   : > { %v4374_v30 = vor.u32 %v4372_v43, %v21693_v16  ;;  %v4406_v28 = vshll.u32 %v21694_v63, 16  ;;  %v4640_v44 = vld [vmem:[#allocation2 + $0x30] sm:$0x1]  ;;  %v4643_v23 = vld [vmem:[#allocation2 + $0x3c] sm:$0x1]  ;;  %v4423_v4 = vshll.u32 %v21695_v3, 16 }
 0x18b   : > { %4575 = vst.msk [vmem:[#allocation2 + $0x70] sm:$0xf] %vm4511_vm8, %v4341_v49  ;;  %v4358_v18 = vsel %vm18906_vm13, %v4350_v20, %v4357_v48  ;;  %v4646_v0 = vld [vmem:[#allocation2 + $0x48] sm:$0x1]  ;;  %v4649_v38 = vld [vmem:[#allocation2 + $0x54] sm:$0x1]  ;;  %v4392_v52 = vsel %vm18906_vm13, %v4384_v55, %v4391_v42 }
 0x18c   : > { %v4375_v9 = vsel %vm18906_vm13, %v4367_v41, %v4374_v30  ;;  %v4652_v6 = vld [vmem:[#allocation2 + $0x60] sm:$0x1]  ;;  %4582 = vst.msk [vmem:[#allocation2 + $0x7c] sm:$0xf] %vm4511_vm8, %v4358_v18  ;;  %v4452_v22 = vrot.slane %v18897_v27, 4  ;;  %v4425_v53 = vor.u32 %v4423_v4, %v18878_v39  ;;  %v4457_v59 = vshll.u32 %v18873_v62, 16 }
 0x18d   : > { %4589 = vst.msk [vmem:[#allocation2 + $0x88] sm:$0xf] %vm4511_vm8, %v4375_v9  ;;  %v21696_v32 = vld [vmem:[#allocation64_spill] sm:$0xff]  ;;  %v4655_v40 = vld [vmem:[#allocation2 + $0x6c] sm:$0x1]  ;;  %v4629_v60 = vsel %vm18667_vm11, 0, %v4628_v17  ;;  %v4442_v27 = vor.u32 %v4440_v56, %v18892_v29 }
 0x18e   : > { %v4408_v14 = vor.u32 %v4406_v28, %v21696_v32  ;;  %v4658_v7 = vld [vmem:[#allocation2 + $0x78] sm:$0x1]  ;;  %4596 = vst.msk [vmem:[#allocation2 + $0x94] sm:$0xf] %vm4511_vm8, %v4392_v52  ;;  %v4632_v50 = vsel %vm18667_vm11, 0, %v4631_v5  ;;  %v4635_v51 = vsel %vm18667_vm11, 0, %v4634_v25  ;;  %v4426_v1 = vsel %vm18906_vm13, %v4418_v31, %v4425_v53 }
 0x18f   : > { %v4661_v11 = vld [vmem:[#allocation2 + $0x84] sm:$0x1]  ;;  %4630 = vst [vmem:[#allocation2] sm:$0x1] %v4629_v60  ;;  %4633 = vst [vmem:[#allocation2 + $0xc] sm:$0x1] %v4632_v50  ;;  %v4459_v29 = vor.u32 %v4457_v59, %v18903_v10  ;;  %v4443_v54 = vsel %vm18906_vm13, %v4435_v19, %v4442_v27 }
 0x190   : > { %v4409_v15 = vsel %vm18906_vm13, %v4401_v24, %v4408_v14  ;;  %v4638_v39 = vsel %vm18667_vm11, 0, %v4637_v46  ;;  %v4664_v62 = vld [vmem:[#allocation2 + $0x90] sm:$0x1]  ;;  %v4667_v21 = vld [vmem:[#allocation2 + $0x9c] sm:$0x1]  ;;  %v4641_v8 = vsel %vm18667_vm11, 0, %v4640_v44 }
 0x191   : > { %v4679_v20 = vld [vmem:[#allocation2 + $0xcc] sm:$0x1]  ;;  %v4683_v36 = vld [vmem:[#allocation2 + $0x8] sm:$0x1]  ;;  %v4686_v47 = vld [vmem:[#allocation2 + $0x14] sm:$0x1]  ;;  %v4460_v16 = vsel %vm18906_vm13, %v4452_v22, %v4459_v29 }
 0x192   : > { %4603 = vst.msk [vmem:[#allocation2 + $0xa0] sm:$0xf] %vm4511_vm8, %v4409_v15  ;;  %4636 = vst [vmem:[#allocation2 + $0x18] sm:$0x1] %v4635_v51  ;;  %v4644_v13 = vsel %vm18667_vm11, 0, %v4643_v23  ;;  %v4647_v10 = vsel %vm18667_vm11, 0, %v4646_v0 }
 0x193   : > { %4639 = vst [vmem:[#allocation2 + $0x24] sm:$0x1] %v4638_v39  ;;  %v4670_v41 = vld [vmem:[#allocation2 + $0xa8] sm:$0x1]  ;;  %v4673_v58 = vld [vmem:[#allocation2 + $0xb4] sm:$0x1] }
 0x194   : > { %v4689_v43 = vld [vmem:[#allocation2 + $0x20] sm:$0x1]  ;;  %v4692_v35 = vld [vmem:[#allocation2 + $0x2c] sm:$0x1]  ;;  %v4695_v34 = vld [vmem:[#allocation2 + $0x38] sm:$0x1] }
 0x195   : > { %v4698_v61 = vld [vmem:[#allocation2 + $0x44] sm:$0x1]  ;;  %4610 = vst.msk [vmem:[#allocation2 + $0xac] sm:$0xf] %vm4511_vm8, %v4426_v1  ;;  %4642 = vst [vmem:[#allocation2 + $0x30] sm:$0x1] %v4641_v8 }
 0x196   : > { %4645 = vst [vmem:[#allocation2 + $0x3c] sm:$0x1] %v4644_v13  ;;  %v4650_v55 = vsel %vm18667_vm11, 0, %v4649_v38  ;;  %v4653_v37 = vsel %vm18667_vm11, 0, %v4652_v6  ;;  %v4676_v2 = vld [vmem:[#allocation2 + $0xc0] sm:$0x1] }
 0x197   : > { %v4701_v5 = vld [vmem:[#allocation2 + $0x50] sm:$0x1]  ;;  %v4704_v12 = vld [vmem:[#allocation2 + $0x5c] sm:$0x1]  ;;  %v4707_v33 = vld [vmem:[#allocation2 + $0x68] sm:$0x1] }
 0x198   : > { %v4710_v48 = vld [vmem:[#allocation2 + $0x74] sm:$0x1]  ;;  %4617 = vst.msk [vmem:[#allocation2 + $0xb8] sm:$0xf] %vm4511_vm8, %v4443_v54  ;;  %4648 = vst [vmem:[#allocation2 + $0x48] sm:$0x1] %v4647_v10 }
 0x199   : > { %4651 = vst [vmem:[#allocation2 + $0x54] sm:$0x1] %v4650_v55  ;;  %4654 = vst [vmem:[#allocation2 + $0x60] sm:$0x1] %v4653_v37  ;;  %v4656_v30 = vsel %vm18667_vm11, 0, %v4655_v40  ;;  %v4659_v24 = vsel %vm18667_vm11, 0, %v4658_v7 }
 0x19a   : > { %v4662_v25 = vsel %vm18667_vm11, 0, %v4661_v11  ;;  %v4713_v46 = vld [vmem:[#allocation2 + $0x80] sm:$0x1]  ;;  %v4716_v49 = vld [vmem:[#allocation2 + $0x8c] sm:$0x1]  ;;  %v4665_v26 = vsel %vm18667_vm11, 0, %v4664_v62 }
 0x19b   : > { %v4719_v42 = vld [vmem:[#allocation2 + $0x98] sm:$0x1]  ;;  %v4722_v63 = vld [vmem:[#allocation2 + $0xa4] sm:$0x1]  ;;  %4624 = vst.msk [vmem:[#allocation2 + $0xc4] sm:$0xf] %vm4511_vm8, %v4460_v16 }
 0x19c   : > { %4657 = vst [vmem:[#allocation2 + $0x6c] sm:$0x1] %v4656_v30  ;;  %4660 = vst [vmem:[#allocation2 + $0x78] sm:$0x1] %v4659_v24  ;;  %v4668_v28 = vsel %vm18667_vm11, 0, %v4667_v21  ;;  %v4671_v31 = vsel %vm18667_vm11, 0, %v4670_v41 }
 0x19d   : > { %4663 = vst [vmem:[#allocation2 + $0x84] sm:$0x1] %v4662_v25  ;;  %v4674_v44 = vsel %vm18667_vm11, 0, %v4673_v58  ;;  %v4725_v23 = vld [vmem:[#allocation2 + $0xb0] sm:$0x1]  ;;  %v4677_v9 = vsel %vm18667_vm11, 0, %v4676_v2 }
 0x19e   : > { %v4734_v18 = vld [vmem:[#allocation2 + $0xd4] sm:$0x1]  ;;  %4666 = vst [vmem:[#allocation2 + $0x90] sm:$0x1] %v4665_v26  ;;  %4669 = vst [vmem:[#allocation2 + $0x9c] sm:$0x1] %v4668_v28 }
 0x19f   : > { %4672 = vst [vmem:[#allocation2 + $0xa8] sm:$0x1] %v4671_v31  ;;  %4675 = vst [vmem:[#allocation2 + $0xb4] sm:$0x1] %v4674_v44  ;;  %v4680_v3 = vsel %vm18667_vm11, 0, %v4679_v20  ;;  %v4684_v4 = vsel %vm19209_vm15, 0, %v4683_v36 }
 0x1a0   : > { %v4687_v19 = vsel %vm19209_vm15, 0, %v4686_v47  ;;  %v4728_v0 = vld [vmem:[#allocation2 + $0xbc] sm:$0x1]  ;;  %4678 = vst [vmem:[#allocation2 + $0xc0] sm:$0x1] %v4677_v9  ;;  %v4690_v38 = vsel %vm19209_vm15, 0, %v4689_v43 }
 0x1a1   : > { %4681 = vst [vmem:[#allocation2 + $0xcc] sm:$0x1] %v4680_v3  ;;  %4685 = vst [vmem:[#allocation2 + $0x8] sm:$0x1] %v4684_v4  ;;  %v4693_v6 = vsel %vm19209_vm15, 0, %v4692_v35  ;;  %v4696_v52 = vsel %vm19209_vm15, 0, %v4695_v34 }
 0x1a2   : > { %4688 = vst [vmem:[#allocation2 + $0x14] sm:$0x1] %v4687_v19  ;;  %v4699_v32 = vsel %vm19209_vm15, 0, %v4698_v61  ;;  %v4731_v14 = vld [vmem:[#allocation2 + $0xc8] sm:$0x1]  ;;  %v4702_v56 = vsel %vm19209_vm15, 0, %v4701_v5 }
 0x1a3   : > { %4691 = vst [vmem:[#allocation2 + $0x20] sm:$0x1] %v4690_v38  ;;  %4694 = vst [vmem:[#allocation2 + $0x2c] sm:$0x1] %v4693_v6  ;;  %v4705_v22 = vsel %vm19209_vm15, 0, %v4704_v12  ;;  %v4708_v40 = vsel %vm19209_vm15, 0, %v4707_v33 }
 0x1a4   : > { %4697 = vst [vmem:[#allocation2 + $0x38] sm:$0x1] %v4696_v52  ;;  %4700 = vst [vmem:[#allocation2 + $0x44] sm:$0x1] %v4699_v32  ;;  %v4711_v7 = vsel %vm19209_vm15, 0, %v4710_v48  ;;  %v4714_v53 = vsel %vm19209_vm15, 0, %v4713_v46 }
 0x1a5   : > { %4703 = vst [vmem:[#allocation2 + $0x50] sm:$0x1] %v4702_v56  ;;  %4706 = vst [vmem:[#allocation2 + $0x5c] sm:$0x1] %v4705_v22  ;;  %v4717_v59 = vsel %vm19209_vm15, 0, %v4716_v49  ;;  %v4720_v60 = vsel %vm19209_vm15, 0, %v4719_v42 }
 0x1a6   : > { %4709 = vst [vmem:[#allocation2 + $0x68] sm:$0x1] %v4708_v40  ;;  %4712 = vst [vmem:[#allocation2 + $0x74] sm:$0x1] %v4711_v7  ;;  %v4723_v50 = vsel %vm19209_vm15, 0, %v4722_v63  ;;  %v4726_v11 = vsel %vm19209_vm15, 0, %v4725_v23 }
 0x1a7   : > { %4715 = vst [vmem:[#allocation2 + $0x80] sm:$0x1] %v4714_v53  ;;  %4718 = vst [vmem:[#allocation2 + $0x8c] sm:$0x1] %v4717_v59  ;;  %v4729_v15 = vsel %vm19209_vm15, 0, %v4728_v0  ;;  %v4732_v27 = vsel %vm19209_vm15, 0, %v4731_v14 }
 0x1a8   : > { %4721 = vst [vmem:[#allocation2 + $0x98] sm:$0x1] %v4720_v60  ;;  %4724 = vst [vmem:[#allocation2 + $0xa4] sm:$0x1] %v4723_v50  ;;  %v4735_v51 = vsel %vm19209_vm15, 0, %v4734_v18 }
 0x1a9   : > { %4727 = vst [vmem:[#allocation2 + $0xb0] sm:$0x1] %v4726_v11  ;;  %4730 = vst [vmem:[#allocation2 + $0xbc] sm:$0x1] %v4729_v15 }
 0x1aa   : > { %4733 = vst [vmem:[#allocation2 + $0xc8] sm:$0x1] %v4732_v27  ;;  %4736 = vst [vmem:[#allocation2 + $0xd4] sm:$0x1] %v4735_v51 }
 0x1ab   : > { %17451 = dma.done.wait [#allocation5], 128 }
 0x1ac   : > { %17452 = vsyncadd [#allocation5], 4294967168 }
 0x1ad   : > { %17453 = dma.done.wait [#allocation5 + $0x1], 128 }
 0x1ae   : > { %17454 = vsyncadd [#allocation5 + $0x1], 4294967168  ;;  %v21699_v39 = vld [vmem:[#allocation10_spill] sm:$0xff]  ;;  %v21700_v20 = vld [vmem:[#allocation11_spill] sm:$0xff]  ;;  %vm5655_vm0 = vsmask.f32 3328 }
 0x1af   : > { %v14820_v62 = vcombine.low %v21699_v39, %v21699_v39  ;;  %v14821_v21 = vcombine.high %v21699_v39, %v21699_v39  ;;  %v14822_v36 = vcombine.low %v21700_v20, %v21700_v20  ;;  %v14823_v47 = vcombine.high %v21700_v20, %v21700_v20  ;;  %v4770_v55 = vld [vmem:[#allocation2] sm:$0xf]  ;;  %v4774_v37 = vld [vmem:[#allocation2 + $0x8] sm:$0x1]  ;;  %v4804_v33 = vld [vmem:[#allocation2 + $0xcc] sm:$0xf] }
 0x1b0   : > { %v17136_v24 = vld [vmem:[%s21518_s4] sm:$0xff]   ;;  %vm5656_vm1 = vsmask.f32 7440  ;;  %v17138_v45 = vld [vmem:[%s21518_s4 + $0x8] sm:$0xff]   ;;  %vm5005_vm2 = vcmask 261120   ;;  %v17140_v46 = vld [vmem:[#allocation3] sm:$0xff]  }
 0x1b1   : > { %v4751_v1 = vshrl.u32 %v14820_v62, 16  ;;  %v4754_v29 = vshll.u32 %v14820_v62, 16  ;;  %v4759_v8 = vshrl.u32 %v14821_v21, 16  ;;  %v4784_v13 = vshrl.u32 %v14822_v36, 16  ;;  %v4808_v48 = vld [vmem:[#allocation2 + $0xd4] sm:$0x1]  ;;  %15934 = vmatprep.subr.bf16.mxu1 %v17136_v24  ;;  %15938 = vmatprep.mubr.msk.bf16.mxu1 %vm5005_vm2, %v17140_v46  ;;  %vm19327_vm5 = vmor %vm5655_vm0, %vm5656_vm1 }
 0x1b2   : > { %v4787_v41 = vshll.u32 %v14822_v36, 16  ;;  %v4792_v58 = vshrl.u32 %v14823_v47, 16  ;;  %v17137_v25 = vld [vmem:[%s21518_s4 + $0x40] sm:$0xff]   ;;  %15935 = vmatpush3.bf16.msra.mxu1 %v17136_v24  ;;  %v17139_v57 = vld [vmem:[%s21518_s4 + $0x48] sm:$0xff]   ;;  %v8789_v52 = vld [vmem:[#allocation3 + $0x18] sm:$0xf] }
 0x1b3   : > { %v4753_v43 = vrot.slane %v4751_v1, 7  ;;  %v4761_v35 = vrot.slane %v4759_v8, 7  ;;  %v4786_v34 = vrot.slane %v4784_v13, 7  ;;  %16248 = vmatprep.subr.bf16.mxu0 %v17137_v25  ;;  %15936 = vmatprep.subr.bf16.mxu1 %v17138_v45  ;;  %v17141_v49 = vld [vmem:[#allocation3 + $0xc] sm:$0xff]   ;;  %v19305_v28 = vld [vmem:[#allocation3 + $0x14] sm:$0x1] }
 0x1b4   : > { %v4794_v61 = vrot.slane %v4792_v58, 7  ;;  %16249 = vmatpush3.bf16.msra.mxu0 %v17137_v25  ;;  %v17142_v42 = vld [vmem:[%s21517_s3] sm:$0xff]   ;;  %v19303_v26 = vld [vmem:[#allocation3 + $0x10] sm:$0xf]  ;;  %v9536_v9 = vshll.u32 %v19305_v28, 16  ;;  %v17144_v32 = vld [vmem:[#allocation3 + $0x18] sm:$0xff]  }
 0x1b5   : > { %v4756_v54 = vor.u32 %v4754_v29, %v4753_v43  ;;  %v4766_v10 = vrot.slane %v4761_v35, 4  ;;  %v4789_v2 = vor.u32 %v4787_v41, %v4786_v34  ;;  %16250 = vmatprep.subr.bf16.mxu0 %v17139_v57  ;;  %v8786_v63 = vld [vmem:[#allocation3 + $0xc] sm:$0xf]  ;;  %v9526_v23 = vshll.u32 %v19303_v26, 16  ;;  %v19313_v19 = vld [vmem:[%s21517_s3 + $0x28] sm:$0xff]   ;;  %v17145_v51 = vld [vmem:[#allocation3 + $0x24] sm:$0xff]  }
 0x1b6   : > { %v4799_v17 = vrot.slane %v4794_v61, 4  ;;  %15937 = vmatpush3.bf16.msra.mxu1 %v17138_v45  ;;  %v9517_v31 = vshrl.u32 %v8786_v63, 16  ;;  %v9520_v44 = vshll.u32 %v8786_v63, 16  ;;  %v9530_v18 = vshrl.u32 %v19303_v26, 16  ;;  %v19317_v56 = vld [vmem:[#allocation3 + $0x1c] sm:$0xf] }
 0x1b7   : > { %v4771_v5 = vsel %vm18650_vm9, %v4756_v54, %v4770_v55  ;;  %v4775_v12 = vsel %vm18667_vm11, %v4766_v10, %v4774_v37  ;;  %v4805_v16 = vsel %vm18650_vm9, %v4789_v2, %v4804_v33  ;;  %15970 = vmatprep.subr.bf16.mxu1 %v17142_v42  ;;  %v9528_v0 = vrot.slane %v9526_v23, 5  ;;  %v19319_v22 = vld [vmem:[#allocation3 + $0x20] sm:$0x1]  ;;  %v8792_v43 = vld [vmem:[#allocation3 + $0x24] sm:$0xf]  ;;  %v17146_v33 = vld [vmem:[#allocation3 + $0x30] sm:$0xff]  }
 0x1b8   : > { %4772 = vst [vmem:[#allocation2] sm:$0xf] %v4771_v5  ;;  %4776 = vst [vmem:[#allocation2 + $0x8] sm:$0x1] %v4775_v12  ;;  %v4809_v30 = vsel %vm18667_vm11, %v4799_v17, %v4808_v48  ;;  %16251 = vmatpush3.bf16.msra.mxu0 %v17139_v57  ;;  %v9519_v3 = vrot.slane %v9517_v31, 4  ;;  %v9522_v4 = vrot.slane %v9520_v44, 5 }
 0x1b9   : > { %4806 = vst [vmem:[#allocation2 + $0xcc] sm:$0xf] %v4805_v16  ;;  %4810 = vst [vmem:[#allocation2 + $0xd4] sm:$0x1] %v4809_v30  ;;  %15939 = vmatmul.mubr.msk.bf16.vlgmr.msra.gmra.mrb[0].mxu1 %vm5005_vm2, %v17141_v49  ;;  %v9532_v38 = vrot.slane %v9530_v18, 4  ;;  %v9538_v6 = vrot.slane %v9536_v9, 5  ;;  %16284 = vmatprep.subr.bf16.mxu0 %v19313_v19 }
 0x1ba   : > { %v9523_v14 = vor.u32 %v9522_v4, %v9519_v3  ;;  %15971 = vmatpush3.bf16.msra.mxu1 %v17142_v42  ;;  %v9541_v40 = vshrl.u32 %v8789_v52, 16  ;;  %v9544_v7 = vshll.u32 %v8789_v52, 16  ;;  %v21576_v53 = vmov 0   ;;  %15942 = vmatprep.mubr.msk.bf16.mxu1 %vm5005_vm2, %v17144_v32  ;;  %v19343_v61 = vld [vmem:[#allocation3 + $0x28] sm:$0xf]  ;;  %v17147_v18 = vld [vmem:[#allocation3 + $0x3c] sm:$0xff]  }
 0x1bb   : > { %v19323_v59 = vcombine.low %v21576_v53, %v21576_v53  ;;  %vm7126_vm3 = vcmask 1042432   ;;  %vm7127_vm4 = vcmask 1046532   ;;  %v9533_v50 = vor.u32 %v9532_v38, %v9528_v0  ;;  %v8794_v54 = vld [vmem:[#allocation3 + $0x2c] sm:$0x1]  ;;  %v8795_v12 = vld [vmem:[#allocation3 + $0x30] sm:$0xf] }
 0x1bc   : > { %v9550_v11 = vshll.u32 %v19317_v56, 16  ;;  %v9554_v15 = vshrl.u32 %v19317_v56, 16  ;;  %v9560_v27 = vshll.u32 %v19319_v22, 16  ;;  %v9524_v39 = vrot.slane %v9523_v14, 4  ;;  %v19348_v25 = vld [vmem:[#allocation3 + $0x34] sm:$0xf]  ;;  %vm19360_vm6 = vmor %vm7126_vm3, %vm7127_vm4 }
 0x1bd   : > { %v9543_v62 = vrot.slane %v9541_v40, 4  ;;  %v9546_v21 = vrot.slane %v9544_v7, 5  ;;  %v10753_v20 = vrot.slane %v19317_v56, 5  ;;  %v9534_v36 = vrot.slane %v9533_v50, 4  ;;  %v8797_v49 = vld [vmem:[#allocation3 + $0x38] sm:$0x1] }
 0x1be   : > { %v9552_v47 = vrot.slane %v9550_v11, 5  ;;  %v9556_v1 = vrot.slane %v9554_v15, 4  ;;  %v9562_v29 = vrot.slane %v9560_v27, 5  ;;  %v9529_v8 = vsel %vm19327_vm5, %v9524_v39, %v9528_v0  ;;  %v8798_v14 = vld [vmem:[#allocation3 + $0x3c] sm:$0xf] }
 0x1bf   : > { %v9547_v13 = vor.u32 %v9546_v21, %v9543_v62  ;;  %v10755_v41 = vrot.slane %v10753_v20, 4  ;;  %v10756_v58 = vrot.slane %v19319_v22, 5  ;;  %v9539_v35 = vsel %vm19327_vm5, %v9534_v36, %v9538_v6  ;;  %v8799_v50 = vld [vmem:[#allocation3 + $0x40] sm:$0xf]  ;;  %v8800_v21 = vld [vmem:[#allocation3 + $0x44] sm:$0x1] }
 0x1c0   : > { %v9557_v34 = vor.u32 %v9556_v1, %v9552_v47  ;;  %v9565_v10 = vshrl.u32 %v8792_v43, 16  ;;  %v9568_v55 = vshll.u32 %v8792_v43, 16  ;;  %v15181_v37 = vcombine.low %v9529_v8, %v9539_v35  ;;  %v8801_v36 = vld [vmem:[#allocation3 + $0x48] sm:$0xf] }
 0x1c1   : > { %v9548_v2 = vrot.slane %v9547_v13, 4  ;;  %v9574_v17 = vshll.u32 %v19343_v61, 16  ;;  %v9578_v5 = vshrl.u32 %v19343_v61, 16  ;;  %15943 = vmatmul.mubr.msk.bf16.gmra.mrb[4].mxu1 %vm5005_vm2, %v17145_v51  ;;  %v9584_v24 = vshll.u32 %v8794_v54, 16  ;;  %v8802_v13 = vld [vmem:[#allocation3 + $0x4c] sm:$0xf] }
 0x1c2   : > { %v9558_v48 = vrot.slane %v9557_v34, 4  ;;  %v9567_v16 = vrot.slane %v9565_v10, 4  ;;  %v9570_v30 = vrot.slane %v9568_v55, 5  ;;  %16252 = vmatprep.mubr.msk.bf16.mxu0 %vm5005_vm2, %v15181_v37  ;;  %v9589_v42 = vshrl.u32 %v8795_v12, 16  ;;  %15946 = vmatprep.mubr.msk.bf16.mxu1 %vm5005_vm2, %v17146_v33  ;;  %v17148_v43 = vld [vmem:[#allocation3 + $0x48] sm:$0xff]  }
 0x1c3   : > { %v9553_v45 = vsel %vm19327_vm5, %v9548_v2, %v9552_v47  ;;  %v9576_v57 = vrot.slane %v9574_v17, 5  ;;  %v9580_v46 = vrot.slane %v9578_v5, 4  ;;  %v9586_v44 = vrot.slane %v9584_v24, 5  ;;  %v8803_v37 = vld [vmem:[#allocation3 + $0x50] sm:$0x1] }
 0x1c4   : > { %v9563_v63 = vsel %vm19327_vm5, %v9558_v48, %v9562_v29  ;;  %v9571_v31 = vor.u32 %v9570_v30, %v9567_v16  ;;  %v9592_v23 = vshll.u32 %v8795_v12, 16  ;;  %v9591_v4 = vrot.slane %v9589_v42, 4  ;;  %v8804_v24 = vld [vmem:[#allocation3 + $0x54] sm:$0xf]  ;;  %v21407_v22 = vld [vmem:[%s21519_s5] ss:$0 sm:$0xff] }
 0x1c5   : > { %v15182_v9 = vcombine.low %v9553_v45, %v9563_v63  ;;  %v9581_v3 = vor.u32 %v9580_v46, %v9576_v57  ;;  %v9598_v0 = vshll.u32 %v19348_v25, 16  ;;  %v9602_v52 = vshrl.u32 %v19348_v25, 16  ;;  %v17149_v42 = vld [vmem:[#allocation3 + $0x54] sm:$0xff]  }
 0x1c6   : > { %v9572_v38 = vrot.slane %v9571_v31, 4  ;;  %v9594_v6 = vrot.slane %v9592_v23, 5  ;;  %v9608_v32 = vshll.u32 %v8797_v49, 16  ;;  %v19366_v11 = vrot.slane %v21576_v53, 5  ;;  %v8805_v63 = vld [vmem:[#allocation3 + $0x58] sm:$0xf] }
 0x1c7   : > { %16253 = vmatmul.mubr.msk.bf16.vlgmr.msra.gmra.mrb[0].mxu0 %vm5005_vm2, %v15182_v9  ;;  %v9582_v40 = vrot.slane %v9581_v3, 4  ;;  %v9600_v7 = vrot.slane %v9598_v0, 5  ;;  %v19370_v15 = vsel %vm19360_vm6, %v10755_v41, %v10756_v58  ;;  %v9604_v39 = vrot.slane %v9602_v52, 4  ;;  %v8806_v9 = vld [vmem:[#allocation3 + $0x5c] sm:$0x1]  ;;  %v17150_v3 = vld [vmem:[#allocation3 + $0x60] sm:$0xff]  }
 0x1c8   : > { %16285 = vmatpush3.bf16.msra.mxu0 %v19313_v19  ;;  %v9577_v27 = vsel %vm19327_vm5, %v9572_v38, %v9576_v57  ;;  %v9595_v51 = vor.u32 %v9594_v6, %v9591_v4  ;;  %v9610_v62 = vrot.slane %v9608_v32, 5  ;;  %v9613_v1 = vshrl.u32 %v8798_v14, 16  ;;  %v8807_v52 = vld [vmem:[#allocation3 + $0x60] sm:$0xf] }
 0x1c9   : > { %v9587_v47 = vsel %vm19327_vm5, %v9582_v40, %v9586_v44  ;;  %v9616_v29 = vshll.u32 %v8798_v14, 16  ;;  %v9622_v8 = vshll.u32 %v8799_v50, 16  ;;  %v9605_v35 = vor.u32 %v9604_v39, %v9600_v7  ;;  %15947 = vmatmul.mubr.msk.bf16.gmra.mrb[8].mxu1 %vm5005_vm2, %v17147_v18 }
 0x1ca   : > { %v15183_v41 = vcombine.low %v9577_v27, %v9587_v47  ;;  %v9596_v58 = vrot.slane %v9595_v51, 4  ;;  %v9626_v19 = vshrl.u32 %v8799_v50, 16  ;;  %v9615_v34 = vrot.slane %v9613_v1, 4  ;;  %15950 = vmatprep.mubr.msk.bf16.mxu1 %vm5005_vm2, %v17148_v43  ;;  %v8808_v50 = vld [vmem:[#allocation3 + $0x64] sm:$0xf] }
 0x1cb   : > { %v9618_v54 = vrot.slane %v9616_v29, 5  ;;  %v9624_v10 = vrot.slane %v9622_v8, 5  ;;  %v9632_v55 = vshll.u32 %v8800_v21, 16  ;;  %v9606_v17 = vrot.slane %v9605_v35, 4  ;;  %v8809_v35 = vld [vmem:[#allocation3 + $0x68] sm:$0x1] }
 0x1cc   : > { %16256 = vmatprep.mubr.msk.bf16.mxu0 %vm5005_vm2, %v15183_v41  ;;  %v9601_v2 = vsel %vm19327_vm5, %v9596_v58, %v9600_v7  ;;  %v9628_v5 = vrot.slane %v9626_v19, 4  ;;  %v9637_v12 = vshrl.u32 %v8801_v36, 16  ;;  %v9640_v16 = vshll.u32 %v8801_v36, 16 }
 0x1cd   : > { %v9619_v33 = vor.u32 %v9618_v54, %v9615_v34  ;;  %v9634_v48 = vrot.slane %v9632_v55, 5  ;;  %v9646_v30 = vshll.u32 %v8802_v13, 16  ;;  %v9611_v45 = vsel %vm19327_vm5, %v9606_v17, %v9610_v62  ;;  %v8810_v54 = vld [vmem:[#allocation3 + $0x6c] sm:$0xf] }
 0x1ce   : > { %v9629_v57 = vor.u32 %v9628_v5, %v9624_v10  ;;  %v9639_v46 = vrot.slane %v9637_v12, 4  ;;  %v9650_v49 = vshrl.u32 %v8802_v13, 16  ;;  %v15184_v31 = vcombine.low %v9601_v2, %v9611_v45  ;;  %v17151_v17 = vld [vmem:[#allocation3 + $0x6c] sm:$0xff]  }
 0x1cf   : > { %v9620_v44 = vrot.slane %v9619_v33, 4  ;;  %v9642_v23 = vrot.slane %v9640_v16, 5  ;;  %v9648_v18 = vrot.slane %v9646_v30, 5  ;;  %v9656_v38 = vshll.u32 %v8803_v37, 16  ;;  %v8811_v5 = vld [vmem:[#allocation3 + $0x70] sm:$0xf] }
 0x1d0   : > { %v9630_v4 = vrot.slane %v9629_v57, 4  ;;  %v9652_v0 = vrot.slane %v9650_v49, 4  ;;  %v9661_v6 = vshrl.u32 %v8804_v24, 16  ;;  %16257 = vmatmul.mubr.msk.bf16.gmra.mrb[4].mxu0 %vm5005_vm2, %v15184_v31  ;;  %v9664_v40 = vshll.u32 %v8804_v24, 16  ;;  %v8812_v30 = vld [vmem:[#allocation3 + $0x74] sm:$0x1] }
 0x1d1   : > { %v9625_v32 = vsel %vm19327_vm5, %v9620_v44, %v9624_v10  ;;  %v9643_v14 = vor.u32 %v9642_v23, %v9639_v46  ;;  %v9670_v7 = vshll.u32 %v8805_v63, 16  ;;  %v9658_v39 = vrot.slane %v9656_v38, 5  ;;  %15951 = vmatmul.mubr.msk.bf16.gmra.mrb[12].mxu1 %vm5005_vm2, %v17149_v42  ;;  %v17152_v24 = vld [vmem:[#allocation3 + $0x78] sm:$0xff]  }
 0x1d2   : > { %v9635_v27 = vsel %vm19327_vm5, %v9630_v4, %v9634_v48  ;;  %v9653_v51 = vor.u32 %v9652_v0, %v9648_v18  ;;  %v9663_v62 = vrot.slane %v9661_v6, 4  ;;  %v9666_v47 = vrot.slane %v9664_v40, 5  ;;  %15954 = vmatprep.mubr.msk.bf16.mxu1 %vm5005_vm2, %v17150_v3  ;;  %v8813_v42 = vld [vmem:[#allocation3 + $0x78] sm:$0xf] }
 0x1d3   : > { %v15185_v21 = vcombine.low %v9625_v32, %v9635_v27  ;;  %v9644_v36 = vrot.slane %v9643_v14, 4  ;;  %v9672_v1 = vrot.slane %v9670_v7, 5  ;;  %v9674_v8 = vshrl.u32 %v8805_v63, 16  ;;  %v8814_v7 = vld [vmem:[#allocation3 + $0x7c] sm:$0xf] }
 0x1d4   : > { %v9654_v29 = vrot.slane %v9653_v51, 4  ;;  %v9680_v13 = vshll.u32 %v8806_v9, 16  ;;  %v9685_v43 = vshrl.u32 %v8807_v52, 16  ;;  %v9667_v58 = vor.u32 %v9666_v47, %v9663_v62  ;;  %v8816_v47 = vld [vmem:[#allocation3 + $0x84] sm:$0xf] }
 0x1d5   : > { %16260 = vmatprep.mubr.msk.bf16.mxu0 %vm5005_vm2, %v15185_v21  ;;  %v9649_v41 = vsel %vm19327_vm5, %v9644_v36, %v9648_v18  ;;  %v9688_v19 = vshll.u32 %v8807_v52, 16  ;;  %v9694_v34 = vshll.u32 %v8808_v50, 16  ;;  %v9676_v55 = vrot.slane %v9674_v8, 4  ;;  %v8815_v21 = vld [vmem:[#allocation3 + $0x80] sm:$0x1]  ;;  %v17153_v36 = vld [vmem:[#allocation3 + $0x84] sm:$0xff]  }
 0x1d6   : > { %v9659_v10 = vsel %vm19327_vm5, %v9654_v29, %v9658_v39  ;;  %v9682_v37 = vrot.slane %v9680_v13, 5  ;;  %v9687_v2 = vrot.slane %v9685_v43, 4  ;;  %v9668_v33 = vrot.slane %v9667_v58, 4  ;;  %v8817_v43 = vld [vmem:[#allocation3 + $0x88] sm:$0xf] }
 0x1d7   : > { %v15186_v12 = vcombine.low %v9649_v41, %v9659_v10  ;;  %v9690_v48 = vrot.slane %v9688_v19, 5  ;;  %v9696_v16 = vrot.slane %v9694_v34, 5  ;;  %v9677_v45 = vor.u32 %v9676_v55, %v9672_v1  ;;  %v8818_v34 = vld [vmem:[#allocation3 + $0x8c] sm:$0x1] }
 0x1d8   : > { %v9698_v57 = vshrl.u32 %v8808_v50, 16  ;;  %v9704_v46 = vshll.u32 %v8809_v35, 16  ;;  %v9709_v49 = vshrl.u32 %v8810_v54, 16  ;;  %v9673_v63 = vsel %vm19327_vm5, %v9668_v33, %v9672_v1 }
 0x1d9   : > { %16261 = vmatmul.mubr.msk.bf16.gmra.mrb[8].mxu0 %vm5005_vm2, %v15186_v12  ;;  %v9691_v31 = vor.u32 %v9690_v48, %v9687_v2  ;;  %v9712_v44 = vshll.u32 %v8810_v54, 16  ;;  %v9718_v23 = vshll.u32 %v8811_v5, 16  ;;  %v9678_v18 = vrot.slane %v9677_v45, 4  ;;  %15955 = vmatmul.mubr.msk.bf16.gmra.mrb[16].mxu1 %vm5005_vm2, %v17151_v17  ;;  %v17154_v54 = vld [vmem:[#allocation3 + $0x90] sm:$0xff]  }
 0x1da   : > { %v9700_v9 = vrot.slane %v9698_v57, 4  ;;  %v9706_v3 = vrot.slane %v9704_v46, 5  ;;  %v9711_v4 = vrot.slane %v9709_v49, 4  ;;  %v9722_v52 = vshrl.u32 %v8811_v5, 16  ;;  %15958 = vmatprep.mubr.msk.bf16.mxu1 %vm5005_vm2, %v17152_v24  ;;  %v8819_v17 = vld [vmem:[#allocation3 + $0x90] sm:$0xf] }
 0x1db   : > { %v9692_v0 = vrot.slane %v9691_v31, 4  ;;  %v9714_v38 = vrot.slane %v9712_v44, 5  ;;  %v9720_v6 = vrot.slane %v9718_v23, 5  ;;  %v9683_v32 = vsel %vm19327_vm5, %v9678_v18, %v9682_v37  ;;  %v19414_v57 = vld [vmem:[%s21517_s3 + $0x8] sm:$0xff]   ;;  %v19423_v31 = vld [vmem:[%s21518_s4 + $0x50] sm:$0xff]  }
 0x1dc   : > { %v9701_v14 = vor.u32 %v9700_v9, %v9696_v16  ;;  %v9728_v40 = vshll.u32 %v8812_v30, 16  ;;  %v9733_v50 = vshrl.u32 %v8813_v42, 16  ;;  %v15187_v27 = vcombine.low %v9673_v63, %v9683_v32  ;;  %16004 = vmatprep.subr.bf16.mxu1 %v19414_v57  ;;  %16318 = vmatprep.subr.bf16.mxu0 %v19423_v31 }
 0x1dd   : > { %v9697_v51 = vsel %vm19327_vm5, %v9692_v0, %v9696_v16  ;;  %v9715_v39 = vor.u32 %v9714_v38, %v9711_v4  ;;  %v9724_v62 = vrot.slane %v9722_v52, 4  ;;  %v9736_v13 = vshll.u32 %v8813_v42, 16  ;;  %v17155_v4 = vld [vmem:[#allocation3 + $0x9c] sm:$0xff]   ;;  %v8821_v52 = vld [vmem:[#allocation3 + $0x98] sm:$0x1] }
 0x1de   : > { %v9702_v1 = vrot.slane %v9701_v14, 4  ;;  %v9730_v29 = vrot.slane %v9728_v40, 5  ;;  %v9735_v8 = vrot.slane %v9733_v50, 4  ;;  %16264 = vmatprep.mubr.msk.bf16.mxu0 %vm5005_vm2, %v15187_v27  ;;  %v9742_v35 = vshll.u32 %v8814_v7, 16  ;;  %v8822_v27 = vld [vmem:[#allocation3 + $0x9c] sm:$0xf] }
 0x1df   : > { %v9716_v41 = vrot.slane %v9715_v39, 4  ;;  %v9725_v58 = vor.u32 %v9724_v62, %v9720_v6  ;;  %v9746_v19 = vshrl.u32 %v8814_v7, 16  ;;  %v9738_v55 = vrot.slane %v9736_v13, 5 }
 0x1e0   : > { %v9707_v10 = vsel %vm19327_vm5, %v9702_v1, %v9706_v3  ;;  %v9752_v37 = vshll.u32 %v8815_v21, 16  ;;  %v9757_v2 = vshrl.u32 %v8816_v47, 16  ;;  %v9744_v48 = vrot.slane %v9742_v35, 5  ;;  %v8820_v3 = vld [vmem:[#allocation3 + $0x94] sm:$0xf] }
 0x1e1   : > { %v15188_v5 = vcombine.low %v9697_v51, %v9707_v10  ;;  %v9721_v12 = vsel %vm19327_vm5, %v9716_v41, %v9720_v6  ;;  %v9726_v33 = vrot.slane %v9725_v58, 4  ;;  %v9739_v16 = vor.u32 %v9738_v55, %v9735_v8  ;;  %15959 = vmatmul.mubr.msk.bf16.gmra.mrb[20].mxu1 %vm5005_vm2, %v17153_v36  ;;  %v17156_v51 = vld [vmem:[#allocation3 + $0xa8] sm:$0xff]  }
 0x1e2   : > { %v9748_v30 = vrot.slane %v9746_v19, 4  ;;  %v9754_v24 = vrot.slane %v9752_v37, 5  ;;  %v9759_v45 = vrot.slane %v9757_v2, 4  ;;  %v9760_v49 = vshll.u32 %v8816_v47, 16  ;;  %15962 = vmatprep.mubr.msk.bf16.mxu1 %vm5005_vm2, %v17154_v54  ;;  %v8823_v47 = vld [vmem:[#allocation3 + $0xa0] sm:$0xf] }
 0x1e3   : > { %16265 = vmatmul.mubr.msk.bf16.gmra.mrb[12].mxu0 %vm5005_vm2, %v15188_v5  ;;  %v9731_v46 = vsel %vm19327_vm5, %v9726_v33, %v9730_v29  ;;  %v9766_v42 = vshll.u32 %v8817_v43, 16  ;;  %v9770_v63 = vshrl.u32 %v8817_v43, 16  ;;  %v9740_v23 = vrot.slane %v9739_v16, 4  ;;  %v8824_v43 = vld [vmem:[#allocation3 + $0xa4] sm:$0x1] }
 0x1e4   : > { %v15189_v44 = vcombine.low %v9721_v12, %v9731_v46  ;;  %v9749_v18 = vor.u32 %v9748_v30, %v9744_v48  ;;  %v9776_v9 = vshll.u32 %v8818_v34, 16  ;;  %v9762_v0 = vrot.slane %v9760_v49, 5  ;;  %v8825_v12 = vld [vmem:[#allocation3 + $0xa8] sm:$0xf] }
 0x1e5   : > { %v9768_v38 = vrot.slane %v9766_v42, 5  ;;  %v9772_v6 = vrot.slane %v9770_v63, 4  ;;  %v9781_v32 = vshrl.u32 %v8819_v17, 16  ;;  %v9745_v14 = vsel %vm19327_vm5, %v9740_v23, %v9744_v48  ;;  %v8827_v63 = vld [vmem:[#allocation3 + $0xb0] sm:$0x1] }
 0x1e6   : > { %16268 = vmatprep.mubr.msk.bf16.mxu0 %vm5005_vm2, %v15189_v44  ;;  %v9750_v40 = vrot.slane %v9749_v18, 4  ;;  %v9778_v7 = vrot.slane %v9776_v9, 5  ;;  %v9784_v50 = vshll.u32 %v8819_v17, 16  ;;  %v9763_v39 = vor.u32 %v9762_v0, %v9759_v45  ;;  %v8828_v44 = vld [vmem:[#allocation3 + $0xb4] sm:$0xf] }
 0x1e7   : > { %v9773_v62 = vor.u32 %v9772_v6, %v9768_v38  ;;  %v9783_v21 = vrot.slane %v9781_v32, 4  ;;  %v9790_v36 = vshll.u32 %v8820_v3, 16  ;;  %v9794_v8 = vshrl.u32 %v8820_v3, 16  ;;  %v8829_v0 = vld [vmem:[#allocation3 + $0xb8] sm:$0xf] }
 0x1e8   : > { %v9755_v1 = vsel %vm19327_vm5, %v9750_v40, %v9754_v24  ;;  %v9786_v29 = vrot.slane %v9784_v50, 5  ;;  %v9800_v13 = vshll.u32 %v8821_v52, 16  ;;  %vm5301_vm7 = vcmask 130048   ;;  %v8826_v24 = vld [vmem:[#allocation3 + $0xac] sm:$0xf] }
 0x1e9   : > { %v15190_v41 = vcombine.low %v9745_v14, %v9755_v1  ;;  %v9764_v58 = vrot.slane %v9763_v39, 4  ;;  %v9774_v35 = vrot.slane %v9773_v62, 4  ;;  %v9792_v19 = vrot.slane %v9790_v36, 5  ;;  %15963 = vmatmul.mubr.msk.bf16.gmra.mrb[24].mxu1 %vm5005_vm2, %v17155_v4  ;;  %v17157_v4 = vld [vmem:[#allocation3 + $0xb4] sm:$0xff]   ;;  %v8830_v1 = vld [vmem:[#allocation3 + $0xbc] sm:$0x1] }
 0x1ea   : > { %v9787_v34 = vor.u32 %v9786_v29, %v9783_v21  ;;  %v9796_v54 = vrot.slane %v9794_v8, 4  ;;  %v9802_v10 = vrot.slane %v9800_v13, 5  ;;  %v9805_v55 = vshrl.u32 %v8822_v27, 16  ;;  %15966 = vmatprep.mubr.msk.bf16.mxu1 %vm5005_vm2, %v17156_v51 }
 0x1eb   : > { %16269 = vmatmul.mubr.msk.bf16.gmra.mrb[16].mxu0 %vm5005_vm2, %v15190_v41  ;;  %v9769_v37 = vsel %vm19327_vm5, %v9764_v58, %v9768_v38  ;;  %v9779_v2 = vsel %vm19327_vm5, %v9774_v35, %v9778_v7  ;;  %v9808_v17 = vshll.u32 %v8822_v27, 16  ;;  %v9814_v5 = vshll.u32 %v8823_v47, 16  ;;  %v8831_v58 = vld [vmem:[#allocation3 + $0xc0] sm:$0xf] }
 0x1ec   : > { %v15191_v33 = vcombine.low %v9769_v37, %v9779_v2  ;;  %v9788_v48 = vrot.slane %v9787_v34, 4  ;;  %v9797_v16 = vor.u32 %v9796_v54, %v9792_v19  ;;  %v9807_v30 = vrot.slane %v9805_v55, 4 }
 0x1ed   : > { %v9810_v45 = vrot.slane %v9808_v17, 5  ;;  %v9816_v46 = vrot.slane %v9814_v5, 5  ;;  %v9818_v49 = vshrl.u32 %v8823_v47, 16  ;;  %v9824_v42 = vshll.u32 %v8824_v43, 16  ;;  %v8833_v5 = vld [vmem:[#allocation3 + $0xc8] sm:$0x1] }
 0x1ee   : > { %16272 = vmatprep.mubr.msk.bf16.mxu0 %vm5005_vm2, %v15191_v33  ;;  %v9793_v23 = vsel %vm19327_vm5, %v9788_v48, %v9792_v19  ;;  %v9798_v18 = vrot.slane %v9797_v16, 4  ;;  %v9829_v9 = vshrl.u32 %v8825_v12, 16  ;;  %v9832_v3 = vshll.u32 %v8825_v12, 16  ;;  %v17158_v12 = vld [vmem:[#allocation2 + $0xc] sm:$0xff]  }
 0x1ef   : > { %v9811_v38 = vor.u32 %v9810_v45, %v9807_v30  ;;  %v9820_v6 = vrot.slane %v9818_v49, 4  ;;  %v9826_v52 = vrot.slane %v9824_v42, 5  ;;  %v9838_v32 = vshll.u32 %v8826_v24, 16 }
 0x1f0   : > { %v9803_v14 = vsel %vm19327_vm5, %v9798_v18, %v9802_v10  ;;  %v9831_v40 = vrot.slane %v9829_v9, 4  ;;  %v9834_v7 = vrot.slane %v9832_v3, 5  ;;  %v9842_v50 = vshrl.u32 %v8826_v24, 16  ;;  %v8832_v10 = vld [vmem:[#allocation3 + $0xc4] sm:$0xf] }
 0x1f1   : > { %v15192_v27 = vcombine.low %v9793_v23, %v9803_v14  ;;  %v9812_v51 = vrot.slane %v9811_v38, 4  ;;  %v9821_v39 = vor.u32 %v9820_v6, %v9816_v46  ;;  %v9840_v62 = vrot.slane %v9838_v32, 5  ;;  %15967 = vmatmul.mubr.msk.bf16.gmra.mrb[28].mxu1 %vm5005_vm2, %v17157_v4  ;;  %v8739_v24 = vld [vmem:[#allocation2 + $0x10] sm:$0xf]  ;;  %v19457_v4 = vld [vmem:[#allocation2 + $0x18] sm:$0xe] }
 0x1f2   : > { %v9835_v21 = vor.u32 %v9834_v7, %v9831_v40  ;;  %v9844_v36 = vrot.slane %v9842_v50, 4  ;;  %v9848_v47 = vshll.u32 %v8827_v63, 16  ;;  %v9853_v29 = vshrl.u32 %v8828_v44, 16  ;;  %15972 = vmatprep.mubr.msk.bf16.mxu1 %vm5301_vm7, %v19323_v59  ;;  %v8740_v63 = vld [vmem:[#allocation2 + $0x14] sm:$0x1] }
 0x1f3   : > { %16273 = vmatmul.mubr.msk.bf16.gmra.mrb[20].mxu0 %vm5005_vm2, %v15192_v27  ;;  %v9817_v8 = vsel %vm19327_vm5, %v9812_v51, %v9816_v46  ;;  %v9822_v13 = vrot.slane %v9821_v39, 4  ;;  %v9856_v43 = vshll.u32 %v8828_v44, 16  ;;  %v9862_v41 = vshll.u32 %v8829_v0, 16  ;;  %v10206_v44 = vld [vmem:[#allocation2 + $0xc] sm:$0xe] }
 0x1f4   : > { %v9836_v35 = vrot.slane %v9835_v21, 4  ;;  %v9845_v19 = vor.u32 %v9844_v36, %v9840_v62  ;;  %v9850_v34 = vrot.slane %v9848_v47, 5  ;;  %v9855_v54 = vrot.slane %v9853_v29, 4  ;;  %v8742_v14 = vld [vmem:[#allocation2 + $0x1c] sm:$0xf] }
 0x1f5   : > { %v9827_v55 = vsel %vm19327_vm5, %v9822_v13, %v9826_v52  ;;  %v9858_v37 = vrot.slane %v9856_v43, 5  ;;  %v9864_v2 = vrot.slane %v9862_v41, 5  ;;  %v9866_v17 = vshrl.u32 %v8829_v0, 16  ;;  %v17161_v0 = vld [vmem:[#allocation2 + $0x18] sm:$0xff]   ;;  %v17162_v13 = vld [vmem:[#allocation2 + $0x24] sm:$0xff]  }
 0x1f6   : > { %v15193_v33 = vcombine.low %v9817_v8, %v9827_v55  ;;  %v9841_v48 = vsel %vm19327_vm5, %v9836_v35, %v9840_v62  ;;  %v9846_v16 = vrot.slane %v9845_v19, 4  ;;  %v9872_v30 = vshll.u32 %v8830_v1, 16  ;;  %v8743_v8 = vld [vmem:[#allocation2 + $0x20] sm:$0x1]  ;;  %v8745_v43 = vld [vmem:[#allocation2 + $0x28] sm:$0xf] }
 0x1f7   : > { %v9859_v45 = vor.u32 %v9858_v37, %v9855_v54  ;;  %v9868_v46 = vrot.slane %v9866_v17, 4  ;;  %v9877_v49 = vshrl.u32 %v8831_v58, 16  ;;  %v9880_v42 = vshll.u32 %v8831_v58, 16  ;;  %v19470_v54 = vld [vmem:[#allocation2 + $0x34] sm:$0xf] }
 0x1f8   : > { %16276 = vmatprep.mubr.msk.bf16.mxu0 %vm5005_vm2, %v15193_v33  ;;  %v9851_v23 = vsel %vm19327_vm5, %v9846_v16, %v9850_v34  ;;  %v9874_v18 = vrot.slane %v9872_v30, 5  ;;  %v9886_v9 = vshll.u32 %v8832_v10, 16  ;;  %v9890_v3 = vshrl.u32 %v8832_v10, 16  ;;  %v8746_v34 = vld [vmem:[#allocation2 + $0x2c] sm:$0x1] }
 0x1f9   : > { %v15194_v38 = vcombine.low %v9841_v48, %v9851_v23  ;;  %v9860_v6 = vrot.slane %v9859_v45, 4  ;;  %v9869_v52 = vor.u32 %v9868_v46, %v9864_v2  ;;  %v9879_v32 = vrot.slane %v9877_v49, 4  ;;  %15973 = vmatmul.mubr.msk.bf16.vlgmr.msra.gmra.mrb[0].mxu1 %vm5301_vm7, %v17158_v12  ;;  %v19472_v17 = vld [vmem:[#allocation2 + $0x38] sm:$0x1]  ;;  %v10209_v30 = vld [vmem:[#allocation2 + $0x30] sm:$0xe] }
 0x1fa   : > { %v9882_v40 = vrot.slane %v9880_v42, 5  ;;  %v9888_v7 = vrot.slane %v9886_v9, 5  ;;  %v9892_v50 = vrot.slane %v9890_v3, 4  ;;  %v9896_v27 = vshll.u32 %v8833_v5, 16  ;;  %16005 = vmatpush3.bf16.msra.mxu1 %v19414_v57  ;;  %15976 = vmatprep.mubr.msk.bf16.mxu1 %vm5301_vm7, %v17161_v0  ;;  %v10208_v57 = vld [vmem:[#allocation2 + $0x24] sm:$0xe] }
 0x1fb   : > { %16277 = vmatmul.mubr.msk.bf16.gmra.mrb[24].mxu0 %vm5005_vm2, %v15194_v38  ;;  %v9865_v51 = vsel %vm19327_vm5, %v9860_v6, %v9864_v2  ;;  %v9870_v39 = vrot.slane %v9869_v52, 4  ;;  %v15215_v62 = vrot.slane %v10206_v44, 9  ;;  %v10288_v21 = vrot.slane %v8739_v24, 5  ;;  %v17163_v5 = vld [vmem:[#allocation2 + $0x30] sm:$0xff]   ;;  %v8751_v23 = vld [vmem:[#allocation2 + $0x40] sm:$0xf] }
 0x1fc   : > { %v9883_v36 = vor.u32 %v9882_v40, %v9879_v32  ;;  %v9893_v47 = vor.u32 %v9892_v50, %v9888_v7  ;;  %v9898_v1 = vrot.slane %v9896_v27, 5  ;;  %v10291_v29 = vrot.slane %v8740_v63, 5  ;;  %v19479_v24 = vld [vmem:[%s21518_s4 + $0x10] sm:$0xff]   ;;  %v8752_v0 = vld [vmem:[#allocation2 + $0x44] sm:$0x1]  ;;  %v17164_v50 = vld [vmem:[#allocation2 + $0x3c] sm:$0xff]  }
 0x1fd   : > { %v9875_v41 = vsel %vm19327_vm5, %v9870_v39, %v9874_v18  ;;  %v10289_v58 = vsel %vm19360_vm6, %v15215_v62, %v10288_v21  ;;  %v10290_v35 = vrot.slane %v10288_v21, 4  ;;  %v15216_v19 = vrot.slane %v19457_v4, 9  ;;  %16038 = vmatprep.subr.bf16.mxu1 %v19479_v24  ;;  %v10210_v32 = vld [vmem:[#allocation2 + $0x3c] sm:$0xe]  ;;  %v8755_v21 = vld [vmem:[#allocation2 + $0x50] sm:$0x1] }
 0x1fe   : > { %v15195_v10 = vcombine.low %v9865_v51, %v9875_v41  ;;  %v9884_v55 = vrot.slane %v9883_v36, 4  ;;  %v9894_v37 = vrot.slane %v9893_v47, 4  ;;  %v10295_v2 = vrot.slane %v8742_v14, 5  ;;  %v19496_v14 = vld [vmem:[#allocation2 + $0x4c] sm:$0xf]  ;;  %v17169_v41 = vld [vmem:[%s21518_s4 + $0x58] sm:$0xff]  }
 0x1ff   : > { %v10292_v12 = vsel %vm19360_vm6, %v10290_v35, %v10291_v29  ;;  %v10298_v33 = vrot.slane %v8743_v8, 5  ;;  %v15217_v48 = vrot.slane %v10208_v57, 9  ;;  %v10302_v16 = vrot.slane %v8745_v43, 5  ;;  %v10211_v36 = vld [vmem:[#allocation2 + $0x48] sm:$0xe] }
 0x200   : > { %16280 = vmatprep.mubr.msk.bf16.mxu0 %vm5005_vm2, %v15195_v10  ;;  %v9889_v45 = vsel %vm19327_vm5, %v9884_v55, %v9888_v7  ;;  %v9899_v46 = vsel %vm19327_vm5, %v9894_v37, %v9898_v1  ;;  %v15233_v49 = vcombine.low %v10289_v58, %v10292_v12  ;;  %v10297_v63 = vrot.slane %v10295_v2, 4  ;;  %v17165_v47 = vld [vmem:[#allocation2 + $0x48] sm:$0xff]   ;;  %v8758_v43 = vld [vmem:[#allocation2 + $0x5c] sm:$0x1]  ;;  %v8760_v57 = vld [vmem:[#allocation2 + $0x64] sm:$0xf] }
 0x201   : > { %v15196_v42 = vcombine.low %v9889_v45, %v9899_v46  ;;  %v10304_v44 = vrot.slane %v10302_v16, 4  ;;  %v10746_v18 = vrot.slane %v19303_v26, 5  ;;  %v10749_v9 = vrot.slane %v19305_v28, 5  ;;  %15977 = vmatmul.mubr.msk.bf16.gmra.mrb[4].mxu1 %vm5301_vm7, %v17162_v13  ;;  %v8757_v13 = vld [vmem:[#allocation2 + $0x58] sm:$0xf] }
 0x202   : > { %v10305_v3 = vrot.slane %v8746_v34, 5  ;;  %v10309_v4 = vrot.slane %v19470_v54, 5  ;;  %v10296_v38 = vsel %vm19360_vm6, %v15216_v19, %v10295_v2  ;;  %v15218_v6 = vrot.slane %v10209_v30, 9  ;;  %15980 = vmatprep.mubr.msk.bf16.mxu1 %vm5301_vm7, %v17163_v5  ;;  %v10212_v19 = vld [vmem:[#allocation2 + $0x54] sm:$0xe] }
 0x203   : > { %16281 = vmatmul.mubr.msk.bf16.gmra.mrb[28].mxu0 %vm5005_vm2, %v15196_v42  ;;  %v10312_v52 = vrot.slane %v19472_v17, 5  ;;  %v10299_v40 = vsel %vm19360_vm6, %v10297_v63, %v10298_v33  ;;  %v10316_v27 = vrot.slane %v8751_v23, 5  ;;  %v10319_v51 = vrot.slane %v8752_v0, 5  ;;  %v10213_v2 = vld [vmem:[#allocation2 + $0x60] sm:$0xe]  ;;  %v19518_v30 = vld [vmem:[%s21517_s3 + $0x30] sm:$0xff]  }
 0x204   : > { %16286 = vmatprep.mubr.msk.bf16.mxu0 %vm5301_vm7, %v15233_v49  ;;  %v10311_v7 = vrot.slane %v10309_v4, 4  ;;  %v10303_v39 = vsel %vm19360_vm6, %v15217_v48, %v10302_v16  ;;  %v10306_v62 = vsel %vm19360_vm6, %v10304_v44, %v10305_v3  ;;  %v15219_v1 = vrot.slane %v10210_v32, 9  ;;  %v8761_v5 = vld [vmem:[#allocation2 + $0x68] sm:$0x1]  ;;  %v17166_v49 = vld [vmem:[#allocation2 + $0x54] sm:$0xff]  }
 0x205   : > { %v10323_v29 = vrot.slane %v19496_v14, 5  ;;  %v15234_v8 = vcombine.low %v10296_v38, %v10299_v40  ;;  %v15235_v58 = vcombine.low %v10303_v39, %v10306_v62  ;;  %v10318_v35 = vrot.slane %v10316_v27, 4  ;;  %v8763_v63 = vld [vmem:[#allocation2 + $0x70] sm:$0xf]  ;;  %v10214_v0 = vld [vmem:[#allocation2 + $0x6c] sm:$0xe] }
 0x206   : > { %v10330_v34 = vrot.slane %v8757_v13, 5  ;;  %v15220_v54 = vrot.slane %v10211_v36, 9  ;;  %v10326_v55 = vrot.slane %v8755_v21, 5  ;;  %v15221_v37 = vrot.slane %v10212_v19, 9  ;;  %v10215_v21 = vld [vmem:[#allocation2 + $0x78] sm:$0xe] }
 0x207   : > { %v10325_v10 = vrot.slane %v10323_v29, 4  ;;  %v10333_v17 = vrot.slane %v8758_v43, 5  ;;  %v10337_v12 = vrot.slane %v8760_v57, 5  ;;  %v10310_v33 = vsel %vm19360_vm6, %v15218_v6, %v10309_v4  ;;  %v17167_v4 = vld [vmem:[#allocation2 + $0x60] sm:$0xff]   ;;  %v8770_v19 = vld [vmem:[#allocation2 + $0x8c] sm:$0x1] }
 0x208   : > { %v10332_v48 = vrot.slane %v10330_v34, 4  ;;  %v5661_v16 = vrot.slane %v21576_v53, 4  ;;  %v10313_v45 = vsel %vm19360_vm6, %v10311_v7, %v10312_v52  ;;  %v10317_v46 = vsel %vm19360_vm6, %v15219_v1, %v10316_v27  ;;  %v8766_v27 = vld [vmem:[#allocation2 + $0x7c] sm:$0xf] }
 0x209   : > { %15981 = vmatmul.mubr.msk.bf16.gmra.mrb[8].mxu1 %vm5301_vm7, %v17164_v50  ;;  %v15222_v42 = vrot.slane %v10213_v2, 9  ;;  %v10748_v44 = vrot.slane %v10746_v18, 4  ;;  %v10320_v23 = vsel %vm19360_vm6, %v10318_v35, %v10319_v51  ;;  %v10340_v3 = vrot.slane %v8761_v5, 5  ;;  %v8767_v51 = vld [vmem:[#allocation2 + $0x80] sm:$0x1] }
 0x20a   : > { %15984 = vmatprep.mubr.msk.bf16.mxu1 %vm5301_vm7, %v17165_v47  ;;  %v10344_v38 = vrot.slane %v8763_v63, 5  ;;  %v5665_v6 = vor.u32 %v19366_v11, %v5661_v16  ;;  %v10339_v52 = vrot.slane %v10337_v12, 4  ;;  %v10760_v14 = vrot.slane %v19343_v61, 5  ;;  %v8773_v5 = vld [vmem:[#allocation2 + $0x98] sm:$0x1] }
 0x20b   : > { %16287 = vmatmul.mubr.msk.bf16.vlgmr.msra.gmra.mrb[0].mxu0 %vm5301_vm7, %v15234_v8  ;;  %v19535_v32 = vsel %vm19360_vm6, %v10748_v44, %v10749_v9  ;;  %v15236_v40 = vcombine.low %v10310_v33, %v10313_v45  ;;  %v15223_v7 = vrot.slane %v10214_v0, 9  ;;  %v15237_v39 = vcombine.low %v10317_v46, %v10320_v23  ;;  %v10217_v16 = vld [vmem:[#allocation2 + $0x90] sm:$0xe]  ;;  %v17257_v46 = vld [vmem:[#allocation3 + $0x2c] sm:$0x1] }
 0x20c   : > { %16319 = vmatpush3.bf16.msra.mxu0 %v19423_v31  ;;  %16290 = vmatprep.mubr.msk.bf16.mxu0 %vm5301_vm7, %v15235_v58  ;;  %v8764_v31 = vld [vmem:[#allocation2 + $0x74] sm:$0x1]  ;;  %v10346_v62 = vrot.slane %v10344_v38, 4  ;;  %v10351_v36 = vrot.slane %v8766_v27, 5  ;;  %v19540_v47 = vsel %vm19360_vm6, %v15220_v54, %v10323_v29  ;;  %v10327_v28 = vsel %vm19360_vm6, %v10325_v10, %v10326_v55  ;;  %v17168_v55 = vld [vmem:[#allocation2 + $0x6c] sm:$0xff]  }
 0x20d   : > { %16320 = vmatprep.subr.bf16.mxu0 %v17169_v41  ;;  %v10347_v50 = vrot.slane %v8764_v31, 5  ;;  %v10354_v9 = vrot.slane %v8767_v51, 5  ;;  %v5666_v1 = vrot.slane %v5665_v6, 4  ;;  %v19548_v8 = vsel %vm19360_vm6, %v15221_v37, %v10330_v34  ;;  %v10216_v34 = vld [vmem:[#allocation2 + $0x84] sm:$0xe] }
 0x20e   : > { %v10334_v13 = vsel %vm19360_vm6, %v10332_v48, %v10333_v17  ;;  %v15224_v43 = vrot.slane %v10215_v21, 9  ;;  %v19554_v29 = vrot.slane %v10760_v14, 4  ;;  %v19559_v58 = vsel %vm19360_vm6, %v15222_v42, %v10337_v12  ;;  %v8772_v17 = vld [vmem:[#allocation2 + $0x94] sm:$0xf]  ;;  %v17170_v12 = vld [vmem:[#allocation2 + $0x78] sm:$0xff]  }
 0x20f   : > { %v19563_v35 = vsel %vm19360_vm6, %v10339_v52, %v10340_v3  ;;  %v10767_v54 = vrot.slane %v19348_v25, 5  ;;  %v15238_v10 = vcombine.low %v19540_v47, %v10327_v28  ;;  %v10353_v37 = vrot.slane %v10351_v36, 4  ;;  %v8778_v21 = vld [vmem:[#allocation2 + $0xac] sm:$0xf] }
 0x210   : > { %16321 = vmatpush3.bf16.msra.mxu0 %v17169_v41  ;;  %v8769_v41 = vld [vmem:[#allocation2 + $0x88] sm:$0xf]  ;;  %v15225_v2 = vrot.slane %v10216_v34, 9  ;;  %v10361_v48 = vrot.slane %v8770_v19, 5  ;;  %v10365_v45 = vrot.slane %v8772_v17, 5  ;;  %v15239_v42 = vcombine.low %v19548_v8, %v10334_v13 }
 0x211   : > { %16354 = vmatprep.subr.bf16.mxu0 %v19518_v30  ;;  %15985 = vmatmul.mubr.msk.bf16.gmra.mrb[12].mxu1 %vm5301_vm7, %v17166_v49  ;;  %v10358_v57 = vrot.slane %v8769_v41, 5  ;;  %v10763_v49 = vrot.slane %v17257_v46, 5  ;;  %v15240_v63 = vcombine.low %v19559_v58, %v19563_v35  ;;  %v15226_v44 = vrot.slane %v10217_v16, 9  ;;  %v10219_v8 = vld [vmem:[#allocation2 + $0xa8] sm:$0xe]  ;;  %v17172_v16 = vld [vmem:[#allocation2 + $0x90] sm:$0xff]  }
 0x212   : > { %15988 = vmatprep.mubr.msk.bf16.mxu1 %vm5301_vm7, %v17167_v4  ;;  %v10368_v23 = vrot.slane %v8773_v5, 5  ;;  %v19574_v3 = vsel %vm19360_vm6, %v15223_v7, %v10344_v38  ;;  %v19578_v4 = vsel %vm19360_vm6, %v10346_v62, %v10347_v50  ;;  %v10367_v31 = vrot.slane %v10365_v45, 4  ;;  %v8776_v7 = vld [vmem:[#allocation2 + $0xa4] sm:$0x1]  ;;  %v10218_v50 = vld [vmem:[#allocation2 + $0x9c] sm:$0xe] }
 0x213   : > { %16291 = vmatmul.mubr.msk.bf16.gmra.mrb[4].mxu0 %vm5301_vm7, %v15236_v40  ;;  %v10360_v33 = vrot.slane %v10358_v57, 4  ;;  %v10769_v0 = vrot.slane %v10767_v54, 4  ;;  %v19584_v6 = vsel %vm19360_vm6, %v15224_v43, %v10351_v36  ;;  %v19588_v52 = vsel %vm19360_vm6, %v10353_v37, %v10354_v9  ;;  %v8775_v40 = vld [vmem:[#allocation2 + $0xa0] sm:$0xf]  ;;  %v17258_v36 = vld [vmem:[#allocation3 + $0x38] sm:$0x1] }
 0x214   : > { %16294 = vmatprep.mubr.msk.bf16.mxu0 %vm5301_vm7, %v15237_v39  ;;  %v19592_v38 = vsel %vm19360_vm6, %v15225_v2, %v10358_v57  ;;  %v5671_v27 = vsel %vm19327_vm5, %v5666_v1, %v19366_v11  ;;  %v15227_v39 = vrot.slane %v10218_v50, 9  ;;  %v10372_v62 = vrot.slane %v8775_v40, 5  ;;  %v8779_v1 = vld [vmem:[#allocation2 + $0xb0] sm:$0x1]  ;;  %v19610_v43 = vld [vmem:[#allocation3 + $0x40] sm:$0xf] }
 0x215   : > { %v19599_v51 = vsel %vm19360_vm6, %v10360_v33, %v10361_v48  ;;  %v10770_v47 = vrot.slane %v17258_v36, 5  ;;  %v19604_v28 = vsel %vm19360_vm6, %v15226_v44, %v10365_v45  ;;  %v19608_v9 = vsel %vm19360_vm6, %v10367_v31, %v10368_v23  ;;  %v17171_v2 = vld [vmem:[#allocation2 + $0x84] sm:$0xff]   ;;  %v8781_v45 = vld [vmem:[#allocation2 + $0xb8] sm:$0xf]  ;;  %v8782_v46 = vld [vmem:[#allocation2 + $0xbc] sm:$0x1] }
 0x216   : > { %v10379_v13 = vrot.slane %v8778_v21, 5  ;;  %v10774_v41 = vrot.slane %v19610_v43, 5  ;;  %v10374_v19 = vrot.slane %v10372_v62, 4  ;;  %v10375_v34 = vrot.slane %v8776_v7, 5  ;;  %v10220_v23 = vld [vmem:[#allocation2 + $0xb4] sm:$0xe] }
 0x217   : > { %v15228_v57 = vrot.slane %v10219_v8, 9  ;;  %v15241_v37 = vcombine.low %v19574_v3, %v19578_v4  ;;  %v19618_v5 = vcombine.low %v5671_v27, %v5671_v27  ;;  %v15244_v48 = vcombine.low %v19604_v28, %v19608_v9  ;;  %v8784_v31 = vld [vmem:[#allocation2 + $0xc4] sm:$0xf]  ;;  %v8785_v50 = vld [vmem:[#allocation2 + $0xc8] sm:$0x1] }
 0x218   : > { %v10381_v17 = vrot.slane %v10379_v13, 4  ;;  %v10776_v33 = vrot.slane %v10774_v41, 4  ;;  %v19635_v44 = vsel %vm19360_vm6, %v15227_v39, %v10372_v62  ;;  %v10386_v3 = vrot.slane %v8781_v45, 5  ;;  %v10221_v27 = vld [vmem:[#allocation2 + $0xc0] sm:$0xe] }
 0x219   : > { %15989 = vmatmul.mubr.msk.bf16.gmra.mrb[16].mxu1 %vm5301_vm7, %v17168_v55  ;;  %v10382_v55 = vrot.slane %v8779_v1, 5  ;;  %v10389_v4 = vrot.slane %v8782_v46, 5  ;;  %v19639_v40 = vsel %vm19360_vm6, %v10769_v0, %v10770_v47  ;;  %v19643_v7 = vsel %vm19360_vm6, %v10374_v19, %v10375_v34  ;;  %v5514_v1 = vld [vmem:[#allocation2 + $0xc] sm:$0xf]  ;;  %v17260_v8 = vld [vmem:[#allocation3 + $0x44] sm:$0x1] }
 0x21a   : > { %15992 = vmatprep.mubr.msk.bf16.mxu1 %vm5301_vm7, %v17170_v12  ;;  %v15243_v12 = vcombine.low %v19592_v38, %v19599_v51  ;;  %v10393_v39 = vrot.slane %v8784_v31, 5  ;;  %v10388_v62 = vrot.slane %v10386_v3, 4  ;;  %v15230_v21 = vrot.slane %v10221_v27, 9  ;;  %v5515_v19 = vld [vmem:[#allocation2 + $0x10] sm:$0xf] }
 0x21b   : > { %16295 = vmatmul.mubr.msk.bf16.gmra.mrb[8].mxu0 %vm5301_vm7, %v15238_v10  ;;  %v15242_v10 = vcombine.low %v19584_v6, %v19588_v52  ;;  %v10396_v36 = vrot.slane %v8785_v50, 5  ;;  %v10777_v45 = vrot.slane %v17260_v8, 5  ;;  %v19651_v0 = vsel %vm19360_vm6, %v10381_v17, %v10382_v55  ;;  %v5516_v34 = vld [vmem:[#allocation2 + $0x14] sm:$0x1]  ;;  %v5528_v28 = vld [vmem:[#allocation2 + $0x44] sm:$0x1] }
 0x21c   : > { %16298 = vmatprep.mubr.msk.bf16.mxu0 %vm5301_vm7, %v15239_v42  ;;  %v19631_v42 = vsel %vm19360_vm6, %v19554_v29, %v10763_v49  ;;  %v19647_v29 = vsel %vm19360_vm6, %v15228_v57, %v10379_v13  ;;  %v15229_v49 = vrot.slane %v10220_v23, 9  ;;  %v10395_v13 = vrot.slane %v10393_v39, 4  ;;  %v5530_v43 = vld [vmem:[#allocation2 + $0x4c] sm:$0xf] }
 0x21d   : > { %v5683_v57 = vshrl.u32 %v5514_v1, 16  ;;  %v19660_v46 = vsel %vm19360_vm6, %v10388_v62, %v10389_v4  ;;  %v19664_v23 = vsel %vm19360_vm6, %v15230_v21, %v10393_v39  ;;  %v5686_v55 = vshll.u32 %v5514_v1, 16  ;;  %v10223_v21 = vld [vmem:[#allocation3 + $0x18] sm:$0xe]  ;;  %v17173_v1 = vld [vmem:[#allocation2 + $0x9c] sm:$0xff]  }
 0x21e   : > { %v19655_v47 = vsel %vm19360_vm6, %v15229_v49, %v10386_v3  ;;  %v5692_v17 = vshll.u32 %v5515_v19, 16  ;;  %v19675_v3 = vsel %vm19360_vm6, %v10395_v13, %v10396_v36  ;;  %v5696_v31 = vshrl.u32 %v5515_v19, 16  ;;  %v10222_v49 = vld [vmem:[#allocation3 + $0xc] sm:$0xe]  ;;  %v5517_v36 = vld [vmem:[#allocation2 + $0x18] sm:$0xf] }
 0x21f   : > { %v5685_v4 = vrot.slane %v5683_v57, 4  ;;  %v15246_v50 = vcombine.low %v19647_v29, %v19651_v0  ;;  %v5688_v58 = vrot.slane %v5686_v55, 5  ;;  %v15266_v62 = vrot.slane %v10222_v49, 9  ;;  %v5518_v19 = vld [vmem:[#allocation2 + $0x1c] sm:$0xf] }
 0x220   : > { %v5694_v35 = vrot.slane %v5692_v17, 5  ;;  %v5698_v39 = vrot.slane %v5696_v31, 4  ;;  %v19686_v57 = vsel %vm19360_vm6, %v10776_v33, %v10777_v45  ;;  %v5519_v31 = vld [vmem:[#allocation2 + $0x20] sm:$0x1]  ;;  %v5707_v49 = vshrl.u32 %v5517_v36, 16 }
 0x221   : > { %15993 = vmatmul.mubr.msk.bf16.gmra.mrb[20].mxu1 %vm5301_vm7, %v17171_v2  ;;  %v15245_v2 = vcombine.low %v19635_v44, %v19643_v7  ;;  %v5689_v8 = vor.u32 %v5688_v58, %v5685_v4  ;;  %v19692_v17 = vsel %vm19360_vm6, %v15266_v62, %v10746_v18  ;;  %v5710_v53 = vshll.u32 %v5517_v36, 16  ;;  %v5520_v58 = vld [vmem:[#allocation2 + $0x24] sm:$0xf]  ;;  %v5521_v62 = vld [vmem:[#allocation2 + $0x28] sm:$0xf] }
 0x222   : > { %15996 = vmatprep.mubr.msk.bf16.mxu1 %vm5301_vm7, %v17172_v16  ;;  %v15247_v16 = vcombine.low %v19655_v47, %v19660_v46  ;;  %v5699_v55 = vor.u32 %v5698_v39, %v5694_v35  ;;  %v15286_v4 = vcombine.low %v19692_v17, %v19535_v32  ;;  %v5716_v45 = vshll.u32 %v5518_v19, 16  ;;  %v10227_v44 = vld [vmem:[#allocation3 + $0x48] sm:$0xe]  ;;  %v17262_v29 = vld [vmem:[#allocation3 + $0x50] sm:$0x1] }
 0x223   : > { %16299 = vmatmul.mubr.msk.bf16.gmra.mrb[12].mxu0 %vm5301_vm7, %v15240_v63  ;;  %v5702_v63 = vshll.u32 %v5516_v34, 16  ;;  %v17174_v34 = vld [vmem:[#allocation2 + $0xa8] sm:$0xff]   ;;  %v5690_v27 = vrot.slane %v5689_v8, 4  ;;  %v5712_v39 = vrot.slane %v5710_v53, 5  ;;  %v5720_v56 = vshrl.u32 %v5518_v19, 16 }
 0x224   : > { %16302 = vmatprep.mubr.msk.bf16.mxu0 %vm5301_vm7, %v15241_v37  ;;  %v15267_v37 = vrot.slane %v10223_v21, 9  ;;  %v5700_v26 = vrot.slane %v5699_v55, 4  ;;  %v5718_v36 = vrot.slane %v5716_v45, 5  ;;  %v5726_v8 = vshll.u32 %v5519_v31, 16  ;;  %v5523_v45 = vld [vmem:[#allocation2 + $0x30] sm:$0xf] }
 0x225   : > { %v5704_v13 = vrot.slane %v5702_v63, 5  ;;  %v5709_v63 = vrot.slane %v5707_v49, 4  ;;  %v5695_v21 = vsel %vm19327_vm5, %v5690_v27, %v5694_v35  ;;  %v5731_v55 = vshrl.u32 %v5520_v58, 16  ;;  %v10224_v49 = vld [vmem:[#allocation3 + $0x24] sm:$0xe] }
 0x226   : > { %v19700_v33 = vsel %vm19360_vm6, %v15267_v37, %v10753_v20  ;;  %v5522_v37 = vld [vmem:[#allocation2 + $0x2c] sm:$0x1]  ;;  %v5722_v6 = vrot.slane %v5720_v56, 4  ;;  %v5728_v52 = vrot.slane %v5726_v8, 5  ;;  %v10225_v27 = vld [vmem:[#allocation3 + $0x30] sm:$0xe] }
 0x227   : > { %v5705_v20 = vsel %vm19327_vm5, %v5700_v26, %v5704_v13  ;;  %v5713_v53 = vor.u32 %v5712_v39, %v5709_v63  ;;  %v5744_v13 = vshrl.u32 %v5521_v62, 16  ;;  %v17175_v26 = vld [vmem:[#allocation2 + $0xb4] sm:$0xff]   ;;  %v5750_v39 = vshll.u32 %v5522_v37, 16 }
 0x228   : > { %v19718_v35 = vcombine.low %v5695_v21, %v5705_v20  ;;  %v5723_v63 = vor.u32 %v5722_v6, %v5718_v36  ;;  %v15268_v18 = vrot.slane %v10224_v49, 9  ;;  %v15269_v21 = vrot.slane %v10225_v27, 9  ;;  %v5525_v49 = vld [vmem:[#allocation2 + $0x38] sm:$0x1]  ;;  %v5526_v6 = vld [vmem:[#allocation2 + $0x3c] sm:$0xf] }
 0x229   : > { %15997 = vmatmul.mubr.msk.bf16.gmra.mrb[24].mxu1 %vm5301_vm7, %v17173_v1  ;;  %v5734_v1 = vshll.u32 %v5520_v58, 16  ;;  %v5714_v19 = vrot.slane %v5713_v53, 4  ;;  %v5752_v8 = vrot.slane %v5750_v39, 5  ;;  %v5755_v53 = vshrl.u32 %v5523_v45, 16  ;;  %v5527_v27 = vld [vmem:[#allocation2 + $0x40] sm:$0xf] }
 0x22a   : > { %16000 = vmatprep.mubr.msk.bf16.mxu1 %vm5301_vm7, %v17174_v34  ;;  %v5733_v34 = vrot.slane %v5731_v55, 4  ;;  %v5724_v56 = vrot.slane %v5723_v63, 4  ;;  %v19726_v20 = vsel %vm19360_vm6, %v15268_v18, %v10760_v14  ;;  %v5779_v9 = vshrl.u32 %v5526_v6, 16  ;;  %v10226_v39 = vld [vmem:[#allocation3 + $0x3c] sm:$0xe] }
 0x22b   : > { %16303 = vmatmul.mubr.msk.bf16.gmra.mrb[16].mxu0 %vm5301_vm7, %v15242_v10  ;;  %v5740_v10 = vshll.u32 %v5521_v62, 16  ;;  %v5736_v31 = vrot.slane %v5734_v1, 5  ;;  %v5719_v38 = vsel %vm19327_vm5, %v5714_v19, %v5718_v36  ;;  %v5524_v62 = vld [vmem:[#allocation2 + $0x34] sm:$0xf]  ;;  %v15288_v37 = vcombine.low %v19726_v20, %v19631_v42  ;;  %v10231_v42 = vld [vmem:[#allocation3 + $0x78] sm:$0xe] }
 0x22c   : > { %16306 = vmatprep.mubr.msk.bf16.mxu0 %vm5301_vm7, %v15243_v12  ;;  %v5746_v12 = vrot.slane %v5744_v13, 4  ;;  %v19734_v36 = vsel %vm19360_vm6, %v15269_v21, %v10767_v54  ;;  %v5729_v61 = vsel %vm19327_vm5, %v5724_v56, %v5728_v52  ;;  %v5757_v18 = vrot.slane %v5755_v53, 4 }
 0x22d   : > { %v5742_v58 = vrot.slane %v5740_v10, 5  ;;  %v5737_v51 = vor.u32 %v5736_v31, %v5733_v34  ;;  %v15289_v14 = vcombine.low %v19734_v36, %v19639_v40  ;;  %v5758_v10 = vshll.u32 %v5523_v45, 16  ;;  %v5545_v36 = vld [vmem:[#allocation2 + $0x88] sm:$0xf] }
 0x22e   : > { %v14895_v25 = vcombine.low %v5719_v38, %v5729_v61  ;;  %v5764_v52 = vshll.u32 %v5524_v62, 16  ;;  %v5768_v31 = vshrl.u32 %v5524_v62, 16  ;;  %v5774_v13 = vshll.u32 %v5525_v49, 16 }
 0x22f   : > { %v5738_v55 = vrot.slane %v5737_v51, 4  ;;  %v5747_v1 = vor.u32 %v5746_v12, %v5742_v58  ;;  %v5760_v34 = vrot.slane %v5758_v10, 5  ;;  %v5788_v63 = vshll.u32 %v5527_v27, 16 }
 0x230   : > { %v5766_v45 = vrot.slane %v5764_v52, 5  ;;  %v5770_v51 = vrot.slane %v5768_v31, 4  ;;  %v5776_v12 = vrot.slane %v5774_v13, 5  ;;  %v5781_v7 = vrot.slane %v5779_v9, 4 }
 0x231   : > { %16001 = vmatmul.mubr.msk.bf16.gmra.mrb[28].mxu1 %vm5301_vm7, %v17175_v26  ;;  %v5743_v54 = vsel %vm19327_vm5, %v5738_v55, %v5742_v58  ;;  %v5748_v19 = vrot.slane %v5747_v1, 4  ;;  %v5782_v26 = vshll.u32 %v5526_v6, 16  ;;  %v5761_v38 = vor.u32 %v5760_v34, %v5757_v18  ;;  %v17261_v6 = vld [vmem:[#allocation3 + $0x4c] sm:$0xf]  ;;  %v17178_v18 = vld [vmem:[%s21518_s4 + $0x18] sm:$0xff]  }
 0x232   : > { %16006 = vmatprep.mubr.msk.bf16.mxu1 %vm5301_vm7, %v19618_v5  ;;  %v5790_v21 = vrot.slane %v5788_v63, 5  ;;  %v5792_v56 = vshrl.u32 %v5527_v27, 16  ;;  %v5771_v53 = vor.u32 %v5770_v51, %v5766_v45  ;;  %v5798_v55 = vshll.u32 %v5528_v28, 16  ;;  %v5533_v51 = vld [vmem:[#allocation2 + $0x58] sm:$0xf] }
 0x233   : > { %16307 = vmatmul.mubr.msk.bf16.gmra.mrb[20].mxu0 %vm5301_vm7, %v15244_v48  ;;  %v5753_v48 = vsel %vm19327_vm5, %v5748_v19, %v5752_v8  ;;  %v5762_v62 = vrot.slane %v5761_v38, 4  ;;  %v15270_v1 = vrot.slane %v10226_v39, 9  ;;  %v15271_v61 = vrot.slane %v10227_v44, 9  ;;  %v5529_v19 = vld [vmem:[#allocation2 + $0x48] sm:$0xf] }
 0x234   : > { %16310 = vmatprep.mubr.msk.bf16.mxu0 %vm5301_vm7, %v15245_v2  ;;  %v19755_v58 = vcombine.low %v5743_v54, %v5753_v48  ;;  %v5784_v2 = vrot.slane %v5782_v26, 5  ;;  %v5794_v8 = vrot.slane %v5792_v56, 4  ;;  %v10781_v10 = vrot.slane %v17261_v6, 5  ;;  %v19791_v48 = vld [vmem:[%s21517_s3 + $0x10] sm:$0xff]  }
 0x235   : > { %v5767_v27 = vsel %vm19327_vm5, %v5762_v62, %v5766_v45  ;;  %v5772_v54 = vrot.slane %v5771_v53, 4  ;;  %v5800_v52 = vrot.slane %v5798_v55, 5  ;;  %v19768_v34 = vsel %vm19360_vm6, %v15270_v1, %v10774_v41  ;;  %v10228_v1 = vld [vmem:[#allocation3 + $0x54] sm:$0xe] }
 0x236   : > { %v5785_v49 = vor.u32 %v5784_v2, %v5781_v7  ;;  %v15290_v13 = vcombine.low %v19768_v34, %v19686_v57  ;;  %v19779_v28 = vsel %vm19360_vm6, %v15271_v61, %v10781_v10  ;;  %v10783_v41 = vrot.slane %v10781_v10, 4 }
 0x237   : > { %v10784_v0 = vrot.slane %v17262_v29, 5  ;;  %v5803_v9 = vshrl.u32 %v5529_v19, 16  ;;  %v5812_v39 = vshll.u32 %v5530_v43, 16  ;;  %v5816_v38 = vshrl.u32 %v5530_v43, 16 }
 0x238   : > { %v5786_v31 = vrot.slane %v5785_v49, 4  ;;  %v5836_v6 = vshll.u32 %v5533_v51, 16 }
 0x239   : > { %16007 = vmatmul.mubr.msk.bf16.vlgmr.msra.gmra.mrb[0].mxu1 %vm5301_vm7, %v19718_v35  ;;  %v5795_v35 = vor.u32 %v5794_v8, %v5790_v21  ;;  %v19797_v26 = vsel %vm19360_vm6, %v10783_v41, %v10784_v0  ;;  %v5805_v63 = vrot.slane %v5803_v9, 4  ;;  %v5814_v62 = vrot.slane %v5812_v39, 5  ;;  %v17263_v0 = vld [vmem:[#allocation3 + $0x58] sm:$0xf]  ;;  %v17264_v9 = vld [vmem:[#allocation3 + $0x5c] sm:$0x1] }
 0x23a   : > { %16039 = vmatpush3.bf16.msra.mxu1 %v19479_v24  ;;  %16010 = vmatprep.mubr.msk.bf16.mxu1 %vm5301_vm7, %v14895_v25  ;;  %v5777_v24 = vsel %vm19327_vm5, %v5772_v54, %v5776_v12  ;;  %v5791_v47 = vsel %vm19327_vm5, %v5786_v31, %v5790_v21  ;;  %v5532_v25 = vld [vmem:[#allocation2 + $0x54] sm:$0xf]  ;;  %v15291_v44 = vcombine.low %v19779_v28, %v19797_v26  ;;  %v5534_v21 = vld [vmem:[#allocation2 + $0x5c] sm:$0x1]  ;;  %v5818_v53 = vrot.slane %v5816_v38, 4 }
 0x23b   : > { %16311 = vmatmul.mubr.msk.bf16.gmra.mrb[24].mxu0 %vm5301_vm7, %v15246_v50  ;;  %v5531_v50 = vld [vmem:[#allocation2 + $0x50] sm:$0x1]  ;;  %v14897_v45 = vcombine.low %v5767_v27, %v5777_v24  ;;  %v5796_v46 = vrot.slane %v5795_v35, 4  ;;  %16040 = vmatprep.subr.bf16.mxu1 %v17178_v18  ;;  %v5827_v55 = vshrl.u32 %v5532_v25, 16  ;;  %v5830_v61 = vshll.u32 %v5532_v25, 16 }
 0x23c   : > { %16314 = vmatprep.mubr.msk.bf16.mxu0 %vm5301_vm7, %v15247_v16  ;;  %v5806_v16 = vshll.u32 %v5529_v19, 16  ;;  %v5822_v2 = vshll.u32 %v5531_v50, 16  ;;  %v5819_v10 = vor.u32 %v5818_v53, %v5814_v62  ;;  %v5840_v27 = vshrl.u32 %v5533_v51, 16  ;;  %v17265_v39 = vld [vmem:[#allocation3 + $0x64] sm:$0xf] }
 0x23d   : > { %v5801_v12 = vsel %vm19327_vm5, %v5796_v46, %v5800_v52  ;;  %v5829_v19 = vrot.slane %v5827_v55, 4  ;;  %v5846_v54 = vshll.u32 %v5534_v21, 16  ;;  %v10229_v52 = vld [vmem:[#allocation3 + $0x60] sm:$0xe]  ;;  %v5832_v35 = vrot.slane %v5830_v61, 5 }
 0x23e   : > { %v5808_v7 = vrot.slane %v5806_v16, 5  ;;  %16041 = vmatpush3.bf16.msra.mxu1 %v17178_v18  ;;  %v14898_v56 = vcombine.low %v5791_v47, %v5801_v12  ;;  %v5824_v8 = vrot.slane %v5822_v2, 5  ;;  %v21705_v18 = vcombine.low %v19664_v23, %v19675_v3  ;;  %v5535_v46 = vld [vmem:[#allocation2 + $0x60] sm:$0xf] }
 0x23f   : > { %16074 = vmatprep.subr.bf16.mxu1 %v19791_v48  ;;  %v5838_v43 = vrot.slane %v5836_v6, 5  ;;  %v15272_v24 = vrot.slane %v10228_v1, 9  ;;  %v5842_v41 = vrot.slane %v5840_v27, 4  ;;  %v5848_v29 = vrot.slane %v5846_v54, 5  ;;  %v17266_v51 = vld [vmem:[#allocation3 + $0x68] sm:$0x1] }
 0x240   : > { %v5809_v49 = vor.u32 %v5808_v7, %v5805_v63  ;;  %v10788_v50 = vrot.slane %v17263_v0, 5  ;;  %v5833_v3 = vor.u32 %v5832_v35, %v5829_v19  ;;  %v15273_v47 = vrot.slane %v10229_v52, 9  ;;  %v5536_v7 = vld [vmem:[#allocation2 + $0x64] sm:$0xf]  ;;  %v5538_v6 = vld [vmem:[#allocation2 + $0x6c] sm:$0xf] }
 0x241   : > { %16011 = vmatmul.mubr.msk.bf16.gmra.mrb[4].mxu1 %vm5301_vm7, %v19755_v58  ;;  %v5820_v58 = vrot.slane %v5819_v10, 4  ;;  %v5843_v25 = vor.u32 %v5842_v41, %v5838_v43  ;;  %v10795_v38 = vrot.slane %v17265_v39, 5  ;;  %v10798_v12 = vrot.slane %v17266_v51, 5  ;;  %v19838_v10 = vld [vmem:[%s21518_s4 + $0x60] sm:$0xff]   ;;  %v17267_v39 = vld [vmem:[#allocation3 + $0x70] sm:$0xf] }
 0x242   : > { %16014 = vmatprep.mubr.msk.bf16.mxu1 %vm5301_vm7, %v14897_v45  ;;  %v5810_v31 = vrot.slane %v5809_v49, 4  ;;  %v10791_v45 = vrot.slane %v17264_v9, 5  ;;  %v19821_v32 = vsel %vm19360_vm6, %v15272_v24, %v10788_v50  ;;  %v10790_v17 = vrot.slane %v10788_v50, 4  ;;  %v10230_v0 = vld [vmem:[#allocation3 + $0x6c] sm:$0xe] }
 0x243   : > { %16315 = vmatmul.mubr.msk.bf16.gmra.mrb[28].mxu0 %vm5301_vm7, %v21705_v18  ;;  %v5825_v16 = vsel %vm19327_vm5, %v5820_v58, %v5824_v8  ;;  %v5834_v63 = vrot.slane %v5833_v3, 4  ;;  %v5844_v2 = vrot.slane %v5843_v25, 4  ;;  %v5851_v53 = vshrl.u32 %v5535_v46, 16  ;;  %v5539_v18 = vld [vmem:[#allocation2 + $0x70] sm:$0xf] }
 0x244   : > { %16322 = vmatprep.mubr.msk.bf16.mxu0 %vm5005_vm2, %v15286_v4  ;;  %v5815_v23 = vsel %vm19327_vm5, %v5810_v31, %v5814_v62  ;;  %v19825_v21 = vsel %vm19360_vm6, %v10790_v17, %v10791_v45  ;;  %v5537_v62 = vld [vmem:[#allocation2 + $0x68] sm:$0x1]  ;;  %v5854_v55 = vshll.u32 %v5535_v46, 16  ;;  %v19833_v8 = vsel %vm19360_vm6, %v15273_v47, %v10795_v38  ;;  %v5540_v58 = vld [vmem:[#allocation2 + $0x74] sm:$0x1] }
 0x245   : > { %v14899_v4 = vcombine.low %v5815_v23, %v5825_v16  ;;  %v5839_v1 = vsel %vm19327_vm5, %v5834_v63, %v5838_v43  ;;  %v15292_v49 = vcombine.low %v19821_v32, %v19825_v21  ;;  %v10797_v61 = vrot.slane %v10795_v38, 4  ;;  %v5541_v51 = vld [vmem:[#allocation2 + $0x78] sm:$0xf] }
 0x246   : > { %v5849_v19 = vsel %vm19327_vm5, %v5844_v2, %v5848_v29  ;;  %v5853_v27 = vrot.slane %v5851_v53, 4  ;;  %v5856_v54 = vrot.slane %v5854_v55, 5  ;;  %v5860_v52 = vshll.u32 %v5536_v7, 16  ;;  %v17268_v2 = vld [vmem:[#allocation3 + $0x74] sm:$0x1] }
 0x247   : > { %v21706_v31 = vcombine.low %v19700_v33, %v19370_v15  ;;  %v14900_v35 = vcombine.low %v5839_v1, %v5849_v19  ;;  %v19850_v43 = vsel %vm19360_vm6, %v10797_v61, %v10798_v12  ;;  %v5870_v24 = vshll.u32 %v5537_v62, 16  ;;  %v5542_v55 = vld [vmem:[#allocation2 + $0x7c] sm:$0xf]  ;;  %v17269_v19 = vld [vmem:[#allocation3 + $0x7c] sm:$0xf] }
 0x248   : > { %v15293_v15 = vcombine.low %v19833_v8, %v19850_v43  ;;  %v5857_v33 = vor.u32 %v5856_v54, %v5853_v27  ;;  %v5862_v41 = vrot.slane %v5860_v52, 5  ;;  %v5875_v29 = vshrl.u32 %v5538_v6, 16  ;;  %v5543_v54 = vld [vmem:[#allocation2 + $0x80] sm:$0x1]  ;;  %v5544_v52 = vld [vmem:[#allocation2 + $0x84] sm:$0xf] }
 0x249   : > { %16015 = vmatmul.mubr.msk.bf16.gmra.mrb[8].mxu1 %vm5301_vm7, %v14898_v56  ;;  %v5864_v56 = vshrl.u32 %v5536_v7, 16  ;;  %v5872_v23 = vrot.slane %v5870_v24, 5  ;;  %v5878_v3 = vshll.u32 %v5538_v6, 16  ;;  %v5884_v9 = vshll.u32 %v5539_v18, 16 }
 0x24a   : > { %16018 = vmatprep.mubr.msk.bf16.mxu1 %vm5301_vm7, %v14899_v4  ;;  %v5858_v45 = vrot.slane %v5857_v33, 4  ;;  %v5888_v47 = vshrl.u32 %v5539_v18, 16  ;;  %v5894_v46 = vshll.u32 %v5540_v58, 16  ;;  %v15274_v25 = vrot.slane %v10230_v0, 9 }
 0x24b   : > { %16323 = vmatmul.mubr.msk.bf16.vlgmr.msra.gmra.mrb[0].mxu0 %vm5005_vm2, %v21706_v31  ;;  %v5866_v50 = vrot.slane %v5864_v56, 4  ;;  %v5886_v16 = vrot.slane %v5884_v9, 5  ;;  %v10802_v38 = vrot.slane %v17267_v39, 5  ;;  %v10805_v62 = vrot.slane %v17268_v2, 5 }
 0x24c   : > { %16355 = vmatpush3.bf16.msra.mxu0 %v19518_v30  ;;  %16326 = vmatprep.mubr.msk.bf16.mxu0 %vm5005_vm2, %v15288_v37  ;;  %v5877_v30 = vrot.slane %v5875_v29, 4  ;;  %v5880_v37 = vrot.slane %v5878_v3, 5  ;;  %v5863_v17 = vsel %vm19327_vm5, %v5858_v45, %v5862_v41  ;;  %v5890_v4 = vrot.slane %v5888_v47, 4 }
 0x24d   : > { %16388 = vmatprep.subr.bf16.mxu0 %v19838_v10  ;;  %v5867_v20 = vor.u32 %v5866_v50, %v5862_v41  ;;  %v5896_v63 = vrot.slane %v5894_v46, 5  ;;  %v15275_v53 = vrot.slane %v10231_v42, 9  ;;  %v19865_v61 = vsel %vm19360_vm6, %v15274_v25, %v10802_v38 }
 0x24e   : > { %v5881_v7 = vor.u32 %v5880_v37, %v5877_v30  ;;  %v5891_v1 = vor.u32 %v5890_v4, %v5886_v16  ;;  %v10804_v6 = vrot.slane %v10802_v38, 4  ;;  %v10809_v27 = vrot.slane %v17269_v19, 5  ;;  %v5546_v30 = vld [vmem:[#allocation2 + $0x8c] sm:$0x1] }
 0x24f   : > { %v5868_v12 = vrot.slane %v5867_v20, 4  ;;  %v5899_v24 = vshrl.u32 %v5541_v51, 16  ;;  %v5902_v0 = vshll.u32 %v5541_v51, 16  ;;  %v5908_v50 = vshll.u32 %v5542_v55, 16 }
 0x250   : > { %v5882_v31 = vrot.slane %v5881_v7, 4  ;;  %v5892_v33 = vrot.slane %v5891_v1, 4  ;;  %v19879_v41 = vsel %vm19360_vm6, %v10804_v6, %v10805_v62  ;;  %v19883_v40 = vsel %vm19360_vm6, %v15275_v53, %v10809_v27  ;;  %v10233_v7 = vld [vmem:[#allocation3 + $0x90] sm:$0xe]  ;;  %v5547_v6 = vld [vmem:[#allocation2 + $0x90] sm:$0xf] }
 0x251   : > { %16019 = vmatmul.mubr.msk.bf16.gmra.mrb[12].mxu1 %vm5301_vm7, %v14900_v35  ;;  %v5873_v18 = vsel %vm19327_vm5, %v5868_v12, %v5872_v23  ;;  %v17270_v35 = vld [vmem:[#allocation3 + $0x80] sm:$0x1]  ;;  %v15294_v29 = vcombine.low %v19865_v61, %v19879_v41  ;;  %v10811_v57 = vrot.slane %v10809_v27, 4  ;;  %v5901_v34 = vrot.slane %v5899_v24, 4 }
 0x252   : > { %v10812_v56 = vrot.slane %v17270_v35, 5  ;;  %v14901_v58 = vcombine.low %v5863_v17, %v5873_v18  ;;  %v5912_v23 = vshrl.u32 %v5542_v55, 16  ;;  %v5918_v45 = vshll.u32 %v5543_v54, 16  ;;  %v17271_v55 = vld [vmem:[#allocation3 + $0x88] sm:$0xf] }
 0x253   : > { %16327 = vmatmul.mubr.msk.bf16.gmra.mrb[4].mxu0 %vm5005_vm2, %v15289_v14  ;;  %v5887_v14 = vsel %vm19327_vm5, %v5882_v31, %v5886_v16  ;;  %v5923_v47 = vshrl.u32 %v5544_v52, 16  ;;  %v5904_v42 = vrot.slane %v5902_v0, 5  ;;  %v5910_v20 = vrot.slane %v5908_v50, 5  ;;  %v10232_v16 = vld [vmem:[#allocation3 + $0x84] sm:$0xe] }
 0x254   : > { %16330 = vmatprep.mubr.msk.bf16.mxu0 %vm5005_vm2, %v15290_v13  ;;  %16022 = vmatprep.mubr.msk.bf16.mxu1 %vm5301_vm7, %v14901_v58  ;;  %v5897_v13 = vsel %vm19327_vm5, %v5892_v33, %v5896_v63  ;;  %v19894_v9 = vsel %vm19360_vm6, %v10811_v57, %v10812_v56  ;;  %v5914_v37 = vrot.slane %v5912_v23, 4  ;;  %v5920_v25 = vrot.slane %v5918_v45, 5  ;;  %v17273_v33 = vld [vmem:[#allocation3 + $0x94] sm:$0xf]  ;;  %v5549_v57 = vld [vmem:[#allocation2 + $0x98] sm:$0x1] }
 0x255   : > { %v14902_v3 = vcombine.low %v5887_v14, %v5897_v13  ;;  %v15295_v46 = vcombine.low %v19883_v40, %v19894_v9  ;;  %v5925_v17 = vrot.slane %v5923_v47, 4  ;;  %v5926_v4 = vshll.u32 %v5544_v52, 16  ;;  %v5548_v14 = vld [vmem:[#allocation2 + $0x94] sm:$0xf]  ;;  %v17274_v0 = vld [vmem:[#allocation3 + $0x98] sm:$0x1] }
 0x256   : > { %v5932_v63 = vshll.u32 %v5545_v36, 16  ;;  %v5905_v39 = vor.u32 %v5904_v42, %v5901_v34  ;;  %v5915_v38 = vor.u32 %v5914_v37, %v5910_v20  ;;  %v5936_v51 = vshrl.u32 %v5545_v36, 16  ;;  %v5552_v37 = vld [vmem:[#allocation2 + $0xa4] sm:$0x1] }
 0x257   : > { %v5942_v12 = vshll.u32 %v5546_v30, 16  ;;  %v5928_v2 = vrot.slane %v5926_v4, 5  ;;  %v15276_v53 = vrot.slane %v10232_v16, 9  ;;  %v10816_v1 = vrot.slane %v17271_v55, 5 }
 0x258   : > { %v5934_v62 = vrot.slane %v5932_v63, 5  ;;  %v5906_v19 = vrot.slane %v5905_v39, 4  ;;  %v5916_v27 = vrot.slane %v5915_v38, 4  ;;  %v5938_v54 = vrot.slane %v5936_v51, 4  ;;  %v10234_v63 = vld [vmem:[#allocation3 + $0x9c] sm:$0xe] }
 0x259   : > { %16023 = vmatmul.mubr.msk.bf16.gmra.mrb[16].mxu1 %vm5301_vm7, %v14902_v3  ;;  %v5944_v52 = vrot.slane %v5942_v12, 5  ;;  %v5929_v18 = vor.u32 %v5928_v2, %v5925_v17  ;;  %v19909_v28 = vsel %vm19360_vm6, %v15276_v53, %v10816_v1  ;;  %v10818_v26 = vrot.slane %v10816_v1, 4  ;;  %v5550_v3 = vld [vmem:[#allocation2 + $0x9c] sm:$0xf] }
 0x25a   : > { %v5911_v35 = vsel %vm19327_vm5, %v5906_v19, %v5910_v20  ;;  %v5921_v32 = vsel %vm19327_vm5, %v5916_v27, %v5920_v25  ;;  %v5939_v21 = vor.u32 %v5938_v54, %v5934_v62  ;;  %v10823_v36 = vrot.slane %v17273_v33, 5  ;;  %v5551_v20 = vld [vmem:[#allocation2 + $0xa0] sm:$0xf]  ;;  %v5553_v33 = vld [vmem:[#allocation2 + $0xa8] sm:$0xf] }
 0x25b   : > { %16331 = vmatmul.mubr.msk.bf16.gmra.mrb[8].mxu0 %vm5005_vm2, %v15291_v44  ;;  %v17272_v44 = vld [vmem:[#allocation3 + $0x8c] sm:$0x1]  ;;  %v14903_v56 = vcombine.low %v5911_v35, %v5921_v32  ;;  %v5930_v24 = vrot.slane %v5929_v18, 4  ;;  %v10826_v50 = vrot.slane %v17274_v0, 5  ;;  %v5947_v23 = vshrl.u32 %v5547_v6, 16 }
 0x25c   : > { %16334 = vmatprep.mubr.msk.bf16.mxu0 %vm5005_vm2, %v15292_v49  ;;  %v10819_v31 = vrot.slane %v17272_v44, 5  ;;  %v15277_v49 = vrot.slane %v10233_v7, 9  ;;  %v5940_v34 = vrot.slane %v5939_v21, 4  ;;  %v10825_v47 = vrot.slane %v10823_v36, 4  ;;  %v10235_v54 = vld [vmem:[#allocation3 + $0xa8] sm:$0xe] }
 0x25d   : > { %16026 = vmatprep.mubr.msk.bf16.mxu1 %vm5301_vm7, %v14903_v56  ;;  %v5935_v45 = vsel %vm19327_vm5, %v5930_v24, %v5934_v62  ;;  %v5950_v42 = vshll.u32 %v5547_v6, 16  ;;  %v5949_v25 = vrot.slane %v5947_v23, 4  ;;  %v5956_v17 = vshll.u32 %v5548_v14, 16 }
 0x25e   : > { %v19917_v58 = vsel %vm19360_vm6, %v10818_v26, %v10819_v31  ;;  %v19926_v30 = vsel %vm19360_vm6, %v15277_v49, %v10823_v36  ;;  %v5945_v16 = vsel %vm19327_vm5, %v5940_v34, %v5944_v52  ;;  %v5960_v4 = vshrl.u32 %v5548_v14, 16  ;;  %v17275_v31 = vld [vmem:[#allocation3 + $0xa0] sm:$0xf]  ;;  %v17276_v49 = vld [vmem:[#allocation3 + $0xa4] sm:$0x1] }
 0x25f   : > { %v15296_v13 = vcombine.low %v19909_v28, %v19917_v58  ;;  %v14904_v39 = vcombine.low %v5935_v45, %v5945_v16  ;;  %v19936_v38 = vsel %vm19360_vm6, %v10825_v47, %v10826_v50  ;;  %v5952_v51 = vrot.slane %v5950_v42, 5  ;;  %v5554_v36 = vld [vmem:[#allocation2 + $0xac] sm:$0xf]  ;;  %v5555_v50 = vld [vmem:[#allocation2 + $0xb0] sm:$0x1] }
 0x260   : > { %v5966_v12 = vshll.u32 %v5549_v57, 16  ;;  %v15297_v7 = vcombine.low %v19926_v30, %v19936_v38  ;;  %v5958_v2 = vrot.slane %v5956_v17, 5  ;;  %v5962_v62 = vrot.slane %v5960_v4, 4  ;;  %v17277_v45 = vld [vmem:[#allocation3 + $0xac] sm:$0xf] }
 0x261   : > { %v5971_v8 = vshrl.u32 %v5550_v3, 16  ;;  %16027 = vmatmul.mubr.msk.bf16.gmra.mrb[20].mxu1 %vm5301_vm7, %v14904_v39  ;;  %v5953_v43 = vor.u32 %v5952_v51, %v5949_v25  ;;  %v5974_v53 = vshll.u32 %v5550_v3, 16  ;;  %v5980_v55 = vshll.u32 %v5551_v20, 16  ;;  %v17278_v42 = vld [vmem:[#allocation3 + $0xb0] sm:$0x1] }
 0x262   : > { %v5963_v1 = vor.u32 %v5962_v62, %v5958_v2  ;;  %v5984_v19 = vshrl.u32 %v5551_v20, 16  ;;  %v5990_v27 = vshll.u32 %v5552_v37, 16  ;;  %v15278_v52 = vrot.slane %v10234_v63, 9  ;;  %v5556_v28 = vld [vmem:[#allocation2 + $0xb4] sm:$0xf] }
 0x263   : > { %16335 = vmatmul.mubr.msk.bf16.gmra.mrb[12].mxu0 %vm5005_vm2, %v15293_v15  ;;  %v5968_v15 = vrot.slane %v5966_v12, 5  ;;  %v5973_v6 = vrot.slane %v5971_v8, 4  ;;  %v5954_v61 = vrot.slane %v5953_v43, 4  ;;  %v5976_v41 = vrot.slane %v5974_v53, 5  ;;  %v5557_v51 = vld [vmem:[#allocation2 + $0xb8] sm:$0xf] }
 0x264   : > { %16338 = vmatprep.mubr.msk.bf16.mxu0 %vm5005_vm2, %v15294_v29  ;;  %v5982_v29 = vrot.slane %v5980_v55, 5  ;;  %v5964_v18 = vrot.slane %v5963_v1, 4  ;;  %v5986_v26 = vrot.slane %v5984_v19, 4  ;;  %v5992_v44 = vrot.slane %v5990_v27, 5  ;;  %v5558_v43 = vld [vmem:[#allocation2 + $0xbc] sm:$0x1] }
 0x265   : > { %v10830_v35 = vrot.slane %v17275_v31, 5  ;;  %v5959_v32 = vsel %vm19327_vm5, %v5954_v61, %v5958_v2  ;;  %v5977_v21 = vor.u32 %v5976_v41, %v5973_v6  ;;  %v10833_v56 = vrot.slane %v17276_v49, 5  ;;  %v10237_v19 = vld [vmem:[#allocation3 + $0xc0] sm:$0xe] }
 0x266   : > { %v15279_v24 = vrot.slane %v10235_v54, 9  ;;  %v5969_v14 = vsel %vm19327_vm5, %v5964_v18, %v5968_v15  ;;  %v5987_v57 = vor.u32 %v5986_v26, %v5982_v29  ;;  %v10837_v47 = vrot.slane %v17277_v45, 5  ;;  %v10236_v15 = vld [vmem:[#allocation3 + $0xb4] sm:$0xe]  ;;  %v5608_v45 = vld [vmem:[#allocation3 + $0x4] sm:$0xf] }
 0x267   : > { %v10831_v34 = vsel %vm19360_vm6, %v15278_v52, %v10830_v35  ;;  %v10832_v0 = vrot.slane %v10830_v35, 4  ;;  %v14905_v23 = vcombine.low %v5959_v32, %v5969_v14  ;;  %v5978_v3 = vrot.slane %v5977_v21, 4 }
 0x268   : > { %v10840_v20 = vrot.slane %v17278_v42, 5  ;;  %v5988_v37 = vrot.slane %v5987_v57, 4  ;;  %v5995_v25 = vshrl.u32 %v5553_v33, 16  ;;  %v5998_v17 = vshll.u32 %v5553_v33, 16  ;;  %v17279_v33 = vld [vmem:[#allocation3 + $0xb8] sm:$0xf] }
 0x269   : > { %v10834_v16 = vsel %vm19360_vm6, %v10832_v0, %v10833_v56  ;;  %16030 = vmatprep.mubr.msk.bf16.mxu1 %vm5301_vm7, %v14905_v23  ;;  %v5983_v40 = vsel %vm19327_vm5, %v5978_v3, %v5982_v29  ;;  %v10839_v4 = vrot.slane %v10837_v47, 4  ;;  %v6004_v39 = vshll.u32 %v5554_v36, 16  ;;  %v17281_v23 = vld [vmem:[#allocation3 + $0xc4] sm:$0xf] }
 0x26a   : > { %v15298_v9 = vcombine.low %v10831_v34, %v10834_v16  ;;  %v5993_v58 = vsel %vm19327_vm5, %v5988_v37, %v5992_v44  ;;  %v6000_v63 = vrot.slane %v5998_v17, 5  ;;  %v6008_v62 = vshrl.u32 %v5554_v36, 16  ;;  %v5607_v44 = vld [vmem:[#allocation3] sm:$0xf]  ;;  %v17280_v34 = vld [vmem:[#allocation3 + $0xbc] sm:$0x1] }
 0x26b   : > { %16339 = vmatmul.mubr.msk.bf16.gmra.mrb[16].mxu0 %vm5005_vm2, %v15295_v46  ;;  %v19966_v46 = vsel %vm19360_vm6, %v15279_v24, %v10837_v47  ;;  %v14906_v12 = vcombine.low %v5983_v40, %v5993_v58  ;;  %v19972_v2 = vsel %vm19360_vm6, %v10839_v4, %v10840_v20  ;;  %v6014_v8 = vshll.u32 %v5555_v50, 16  ;;  %v17282_v20 = vld [vmem:[#allocation3 + $0xc8] sm:$0x1]  ;;  %v5610_v4 = vld [vmem:[#allocation3 + $0xc] sm:$0xf] }
 0x26c   : > { %16342 = vmatprep.mubr.msk.bf16.mxu0 %vm5005_vm2, %v15296_v13  ;;  %v5997_v13 = vrot.slane %v5995_v25, 4  ;;  %v15299_v53 = vcombine.low %v19966_v46, %v19972_v2  ;;  %v6006_v1 = vrot.slane %v6004_v39, 5  ;;  %v6019_v6 = vshrl.u32 %v5556_v28, 16  ;;  %v5609_v16 = vld [vmem:[#allocation3 + $0x8] sm:$0x1] }
 0x26d   : > { %16031 = vmatmul.mubr.msk.bf16.gmra.mrb[24].mxu1 %vm5301_vm7, %v14906_v12  ;;  %v6010_v27 = vrot.slane %v6008_v62, 4  ;;  %v6016_v54 = vrot.slane %v6014_v8, 5  ;;  %v6022_v61 = vshll.u32 %v5556_v28, 16  ;;  %v6028_v41 = vshll.u32 %v5557_v51, 16  ;;  %v5611_v28 = vld [vmem:[#allocation3 + $0x10] sm:$0xf] }
 0x26e   : > { %v6001_v55 = vor.u32 %v6000_v63, %v5997_v13  ;;  %v6021_v52 = vrot.slane %v6019_v6, 4  ;;  %v6032_v18 = vshrl.u32 %v5557_v51, 16  ;;  %v6038_v26 = vshll.u32 %v5558_v43, 16  ;;  %v5612_v51 = vld [vmem:[#allocation3 + $0x14] sm:$0x1] }
 0x26f   : > { %v6011_v31 = vor.u32 %v6010_v27, %v6006_v1  ;;  %v6024_v35 = vrot.slane %v6022_v61, 5  ;;  %v6030_v32 = vrot.slane %v6028_v41, 5  ;;  %v15280_v21 = vrot.slane %v10236_v15, 9  ;;  %v5613_v61 = vld [vmem:[#allocation3 + $0x18] sm:$0xf] }
 0x270   : > { %v6002_v29 = vrot.slane %v6001_v55, 4  ;;  %v6034_v56 = vrot.slane %v6032_v18, 4  ;;  %v6040_v24 = vrot.slane %v6038_v26, 5  ;;  %v10844_v36 = vrot.slane %v17279_v33, 5 }
 0x271   : > { %v6012_v14 = vrot.slane %v6011_v31, 4  ;;  %v6025_v57 = vor.u32 %v6024_v35, %v6021_v52  ;;  %v10847_v0 = vrot.slane %v17280_v34, 5  ;;  %v15281_v30 = vrot.slane %v10237_v19, 9  ;;  %v17180_v35 = vld [vmem:[#allocation2 + $0x18] sm:$0xff]  }
 0x272   : > { %v6007_v49 = vsel %vm19327_vm5, %v6002_v29, %v6006_v1  ;;  %v6035_v38 = vor.u32 %v6034_v56, %v6030_v32  ;;  %v10846_v50 = vrot.slane %v10844_v36, 4  ;;  %v10851_v3 = vrot.slane %v17281_v23, 5  ;;  %v5615_v56 = vld [vmem:[#allocation3 + $0x20] sm:$0x1] }
 0x273   : > { %16343 = vmatmul.mubr.msk.bf16.gmra.mrb[20].mxu0 %vm5005_vm2, %v15297_v7  ;;  %v10845_v7 = vsel %vm19360_vm6, %v15280_v21, %v10844_v36  ;;  %v6017_v47 = vsel %vm19327_vm5, %v6012_v14, %v6016_v54  ;;  %v6026_v42 = vrot.slane %v6025_v57, 4  ;;  %v10854_v37 = vrot.slane %v17282_v20, 5  ;;  %v5616_v36 = vld [vmem:[#allocation3 + $0x24] sm:$0xf] }
 0x274   : > { %16346 = vmatprep.mubr.msk.bf16.mxu0 %vm5005_vm2, %v15298_v9  ;;  %v6341_v25 = vshrl.u32 %v5607_v44, 16  ;;  %v14907_v17 = vcombine.low %v6007_v49, %v6017_v47  ;;  %v6036_v40 = vrot.slane %v6035_v38, 4  ;;  %v10848_v9 = vsel %vm19360_vm6, %v10846_v50, %v10847_v0 }
 0x275   : > { %v10852_v46 = vsel %vm19360_vm6, %v15281_v30, %v10851_v3  ;;  %v6031_v58 = vsel %vm19327_vm5, %v6026_v42, %v6030_v32  ;;  %v15300_v13 = vcombine.low %v10845_v7, %v10848_v9  ;;  %v10853_v63 = vrot.slane %v10851_v3, 4  ;;  %v5614_v32 = vld [vmem:[#allocation3 + $0x1c] sm:$0xf]  ;;  %v5617_v30 = vld [vmem:[#allocation3 + $0x28] sm:$0xf] }
 0x276   : > { %v6343_v39 = vrot.slane %v6341_v25, 4  ;;  %16034 = vmatprep.mubr.msk.bf16.mxu1 %vm5301_vm7, %v14907_v17  ;;  %v6041_v12 = vsel %vm19327_vm5, %v6036_v40, %v6040_v24  ;;  %v6344_v2 = vshll.u32 %v5607_v44, 16  ;;  %v6350_v62 = vshll.u32 %v5608_v45, 16 }
 0x277   : > { %v6354_v8 = vshrl.u32 %v5608_v45, 16  ;;  %v14908_v43 = vcombine.low %v6031_v58, %v6041_v12  ;;  %v10855_v15 = vsel %vm19360_vm6, %v10853_v63, %v10854_v37  ;;  %v6360_v55 = vshll.u32 %v5609_v16, 16  ;;  %v17182_v58 = vld [vmem:[#allocation2 + $0x24] sm:$0xff]  }
 0x278   : > { %v6365_v1 = vshrl.u32 %v5610_v4, 16  ;;  %v15301_v6 = vcombine.low %v10852_v46, %v10855_v15  ;;  %v6346_v19 = vrot.slane %v6344_v2, 5  ;;  %v6352_v27 = vrot.slane %v6350_v62, 5  ;;  %v5618_v46 = vld [vmem:[#allocation3 + $0x2c] sm:$0x1] }
 0x279   : > { %v6356_v54 = vrot.slane %v6354_v8, 4  ;;  %16035 = vmatmul.mubr.msk.bf16.gmra.mrb[28].mxu1 %vm5301_vm7, %v14908_v43  ;;  %v6362_v41 = vrot.slane %v6360_v55, 5  ;;  %v6368_v52 = vshll.u32 %v5610_v4, 16  ;;  %v6374_v18 = vshll.u32 %v5611_v28, 16  ;;  %v17183_v43 = vld [vmem:[#allocation2 + $0x30] sm:$0xff]   ;;  %v20016_v55 = vld [vmem:[%s21518_s4 + $0x20] sm:$0xff]  }
 0x27a   : > { %v6367_v29 = vrot.slane %v6365_v1, 4  ;;  %v6378_v44 = vshrl.u32 %v5611_v28, 16  ;;  %v6384_v31 = vshll.u32 %v5612_v51, 16  ;;  %v6389_v24 = vshrl.u32 %v5613_v61, 16  ;;  %v5619_v51 = vld [vmem:[#allocation3 + $0x30] sm:$0xf] }
 0x27b   : > { %16347 = vmatmul.mubr.msk.bf16.gmra.mrb[24].mxu0 %vm5005_vm2, %v15299_v53  ;;  %v6347_v53 = vor.u32 %v6346_v19, %v6343_v39  ;;  %v6357_v26 = vor.u32 %v6356_v54, %v6352_v27  ;;  %v6370_v21 = vrot.slane %v6368_v52, 5  ;;  %v6376_v49 = vrot.slane %v6374_v18, 5  ;;  %v5620_v15 = vld [vmem:[#allocation3 + $0x34] sm:$0xf]  ;;  %v5621_v54 = vld [vmem:[#allocation3 + $0x38] sm:$0x1] }
 0x27c   : > { %16350 = vmatprep.mubr.msk.bf16.mxu0 %vm5005_vm2, %v15300_v13  ;;  %v6392_v33 = vshll.u32 %v5613_v61, 16  ;;  %v6380_v34 = vrot.slane %v6378_v44, 4  ;;  %v6386_v0 = vrot.slane %v6384_v31, 5  ;;  %v6391_v7 = vrot.slane %v6389_v24, 4  ;;  %v5622_v61 = vld [vmem:[#allocation3 + $0x3c] sm:$0xf] }
 0x27d   : > { %v6348_v14 = vrot.slane %v6347_v53, 4  ;;  %v6358_v57 = vrot.slane %v6357_v26, 4  ;;  %v6371_v38 = vor.u32 %v6370_v21, %v6367_v29  ;;  %v6398_v23 = vshll.u32 %v5614_v32, 16 }
 0x27e   : > { %v6394_v50 = vrot.slane %v6392_v33, 5  ;;  %v6381_v47 = vor.u32 %v6380_v34, %v6376_v49  ;;  %v6402_v42 = vshrl.u32 %v5614_v32, 16  ;;  %v6408_v9 = vshll.u32 %v5615_v56, 16  ;;  %v17190_v32 = vld [vmem:[%s21518_s4 + $0x68] sm:$0xff]   ;;  %v5624_v34 = vld [vmem:[#allocation3 + $0x44] sm:$0x1] }
 0x27f   : > { %v6353_v3 = vsel %vm19327_vm5, %v6348_v14, %v6352_v27  ;;  %v6363_v45 = vsel %vm19327_vm5, %v6358_v57, %v6362_v41  ;;  %v6372_v37 = vrot.slane %v6371_v38, 4  ;;  %v6400_v25 = vrot.slane %v6398_v23, 5 }
 0x280   : > { %v14930_v20 = vcombine.low %v6353_v3, %v6363_v45  ;;  %v6395_v16 = vor.u32 %v6394_v50, %v6391_v7  ;;  %v6382_v17 = vrot.slane %v6381_v47, 4  ;;  %v6404_v40 = vrot.slane %v6402_v42, 4  ;;  %v20034_v50 = vld [vmem:[%s21517_s3 + $0x38] sm:$0xff]  }
 0x281   : > { %v6413_v4 = vshrl.u32 %v5616_v36, 16  ;;  %v6377_v28 = vsel %vm19327_vm5, %v6372_v37, %v6376_v49  ;;  %v6416_v63 = vshll.u32 %v5616_v36, 16  ;;  %v6422_v39 = vshll.u32 %v5617_v30, 16  ;;  %v17184_v42 = vld [vmem:[#allocation2 + $0x3c] sm:$0xff]  }
 0x282   : > { %16042 = vmatprep.mubr.msk.bf16.mxu1 %vm5005_vm2, %v14930_v20  ;;  %v6396_v13 = vrot.slane %v6395_v16, 4  ;;  %v6387_v12 = vsel %vm19327_vm5, %v6382_v17, %v6386_v0  ;;  %v6405_v2 = vor.u32 %v6404_v40, %v6400_v25  ;;  %v6410_v62 = vrot.slane %v6408_v9, 5  ;;  %v5625_v0 = vld [vmem:[#allocation3 + $0x48] sm:$0xf] }
 0x283   : > { %16351 = vmatmul.mubr.msk.bf16.gmra.mrb[28].mxu0 %vm5005_vm2, %v15301_v6  ;;  %v6415_v8 = vrot.slane %v6413_v4, 4  ;;  %v14931_v1 = vcombine.low %v6377_v28, %v6387_v12  ;;  %v6418_v19 = vrot.slane %v6416_v63, 5  ;;  %v6424_v27 = vrot.slane %v6422_v39, 5 }
 0x284   : > { %16356 = vmatprep.mubr.msk.bf16.mxu0 %vm5301_vm7, %v17180_v35  ;;  %v6401_v6 = vsel %vm19327_vm5, %v6396_v13, %v6400_v25  ;;  %v6406_v41 = vrot.slane %v6405_v2, 4  ;;  %v6426_v29 = vshrl.u32 %v5617_v30, 16  ;;  %v6432_v52 = vshll.u32 %v5618_v46, 16  ;;  %v5623_v35 = vld [vmem:[#allocation3 + $0x40] sm:$0xf]  ;;  %v17185_v13 = vld [vmem:[#allocation2 + $0x48] sm:$0xff]  }
 0x285   : > { %v6437_v18 = vshrl.u32 %v5619_v51, 16  ;;  %16043 = vmatmul.mubr.msk.bf16.vlgmr.msra.gmra.mrb[0].mxu1 %vm5005_vm2, %v14931_v1  ;;  %v6419_v53 = vor.u32 %v6418_v19, %v6415_v8  ;;  %v6440_v26 = vshll.u32 %v5619_v51, 16  ;;  %v6446_v44 = vshll.u32 %v5620_v15, 16  ;;  %v5626_v25 = vld [vmem:[#allocation3 + $0x4c] sm:$0xf] }
 0x286   : > { %v6450_v31 = vshrl.u32 %v5620_v15, 16  ;;  %16075 = vmatpush3.bf16.msra.mxu1 %v19791_v48  ;;  %v6411_v21 = vsel %vm19327_vm5, %v6406_v41, %v6410_v62  ;;  %v6428_v49 = vrot.slane %v6426_v29, 4  ;;  %v6434_v56 = vrot.slane %v6432_v52, 5  ;;  %v5627_v62 = vld [vmem:[#allocation3 + $0x50] sm:$0x1] }
 0x287   : > { %v6439_v24 = vrot.slane %v6437_v18, 4  ;;  %v14932_v33 = vcombine.low %v6401_v6, %v6411_v21  ;;  %v6420_v36 = vrot.slane %v6419_v53, 4  ;;  %v6442_v14 = vrot.slane %v6440_v26, 5  ;;  %16108 = vmatprep.subr.bf16.mxu1 %v20016_v55  ;;  %v5628_v8 = vld [vmem:[#allocation3 + $0x54] sm:$0xf] }
 0x288   : > { %v6448_v57 = vrot.slane %v6446_v44, 5  ;;  %v6429_v30 = vor.u32 %v6428_v49, %v6424_v27  ;;  %v6452_v48 = vrot.slane %v6450_v31, 4  ;;  %v6456_v38 = vshll.u32 %v5621_v54, 16  ;;  %v5629_v19 = vld [vmem:[#allocation3 + $0x58] sm:$0xf]  ;;  %v17186_v49 = vld [vmem:[#allocation2 + $0x54] sm:$0xff]  }
 0x289   : > { %v6461_v7 = vshrl.u32 %v5622_v61, 16  ;;  %16046 = vmatprep.mubr.msk.bf16.mxu1 %vm5005_vm2, %v14932_v33  ;;  %v6425_v23 = vsel %vm19327_vm5, %v6420_v36, %v6424_v27  ;;  %v6443_v3 = vor.u32 %v6442_v14, %v6439_v24  ;;  %v6464_v45 = vshll.u32 %v5622_v61, 16  ;;  %v5630_v29 = vld [vmem:[#allocation3 + $0x5c] sm:$0x1]  ;;  %v5631_v21 = vld [vmem:[#allocation3 + $0x60] sm:$0xf] }
 0x28a   : > { %v6470_v47 = vshll.u32 %v5623_v35, 16  ;;  %v6453_v20 = vor.u32 %v6452_v48, %v6448_v57  ;;  %v6458_v37 = vrot.slane %v6456_v38, 5  ;;  %v6474_v46 = vshrl.u32 %v5623_v35, 16  ;;  %v5632_v14 = vld [vmem:[#allocation3 + $0x64] sm:$0xf]  ;;  %v17187_v48 = vld [vmem:[#allocation2 + $0x60] sm:$0xff]  }
 0x28b   : > { %16357 = vmatmul.mubr.msk.bf16.vlgmr.msra.gmra.mrb[0].mxu0 %vm5301_vm7, %v17182_v58  ;;  %v6463_v16 = vrot.slane %v6461_v7, 4  ;;  %v6444_v17 = vrot.slane %v6443_v3, 4  ;;  %v6466_v40 = vrot.slane %v6464_v45, 5  ;;  %v6480_v58 = vshll.u32 %v5624_v34, 16  ;;  %v5633_v38 = vld [vmem:[#allocation3 + $0x68] sm:$0x1] }
 0x28c   : > { %16389 = vmatpush3.bf16.msra.mxu0 %v19838_v10  ;;  %16360 = vmatprep.mubr.msk.bf16.mxu0 %vm5301_vm7, %v17183_v43  ;;  %v6430_v10 = vrot.slane %v6429_v30, 4  ;;  %v6472_v9 = vrot.slane %v6470_v47, 5  ;;  %v6454_v28 = vrot.slane %v6453_v20, 4  ;;  %v6485_v63 = vshrl.u32 %v5625_v0, 16 }
 0x28d   : > { %16390 = vmatprep.subr.bf16.mxu0 %v17190_v32  ;;  %v6449_v51 = vsel %vm19327_vm5, %v6444_v17, %v6448_v57  ;;  %v6467_v12 = vor.u32 %v6466_v40, %v6463_v16  ;;  %v6476_v2 = vrot.slane %v6474_v46, 4  ;;  %v6482_v15 = vrot.slane %v6480_v58, 5  ;;  %v5634_v40 = vld [vmem:[#allocation3 + $0x6c] sm:$0xf]  ;;  %v5635_v58 = vld [vmem:[#allocation3 + $0x70] sm:$0xf] }
 0x28e   : > { %v6435_v4 = vsel %vm19327_vm5, %v6430_v10, %v6434_v56  ;;  %v6459_v43 = vsel %vm19327_vm5, %v6454_v28, %v6458_v37  ;;  %v6487_v1 = vrot.slane %v6485_v63, 4  ;;  %v6488_v6 = vshll.u32 %v5625_v0, 16 }
 0x28f   : > { %v14933_v39 = vcombine.low %v6425_v23, %v6435_v4  ;;  %v14934_v27 = vcombine.low %v6449_v51, %v6459_v43  ;;  %v6468_v54 = vrot.slane %v6467_v12, 4  ;;  %v6477_v61 = vor.u32 %v6476_v2, %v6472_v9  ;;  %v5636_v12 = vld [vmem:[#allocation3 + $0x74] sm:$0x1] }
 0x290   : > { %16391 = vmatpush3.bf16.msra.mxu0 %v17190_v32  ;;  %v6494_v41 = vshll.u32 %v5626_v25, 16  ;;  %v6490_v52 = vrot.slane %v6488_v6, 5  ;;  %v6498_v18 = vshrl.u32 %v5626_v25, 16  ;;  %v6504_v53 = vshll.u32 %v5627_v62, 16 }
 0x291   : > { %16424 = vmatprep.subr.bf16.mxu0 %v20034_v50  ;;  %16047 = vmatmul.mubr.msk.bf16.gmra.mrb[4].mxu1 %vm5005_vm2, %v14933_v39  ;;  %v6509_v26 = vshrl.u32 %v5628_v8, 16  ;;  %v6473_v44 = vsel %vm19327_vm5, %v6468_v54, %v6472_v9  ;;  %v6478_v31 = vrot.slane %v6477_v61, 4  ;;  %v6512_v32 = vshll.u32 %v5628_v8, 16 }
 0x292   : > { %16050 = vmatprep.mubr.msk.bf16.mxu1 %vm5005_vm2, %v14934_v27  ;;  %v6496_v35 = vrot.slane %v6494_v41, 5  ;;  %v6491_v56 = vor.u32 %v6490_v52, %v6487_v1  ;;  %v6500_v24 = vrot.slane %v6498_v18, 4  ;;  %v6506_v33 = vrot.slane %v6504_v53, 5  ;;  %v17189_v52 = vld [vmem:[#allocation2 + $0x78] sm:$0xff]   ;;  %v5637_v18 = vld [vmem:[#allocation3 + $0x78] sm:$0xf] }
 0x293   : > { %16361 = vmatmul.mubr.msk.bf16.gmra.mrb[4].mxu0 %vm5301_vm7, %v17184_v42  ;;  %v6511_v36 = vrot.slane %v6509_v26, 4  ;;  %v6483_v57 = vsel %vm19327_vm5, %v6478_v31, %v6482_v15  ;;  %v6514_v34 = vrot.slane %v6512_v32, 5  ;;  %v6518_v0 = vshll.u32 %v5629_v19, 16  ;;  %v17188_v15 = vld [vmem:[#allocation2 + $0x6c] sm:$0xff]  }
 0x294   : > { %16364 = vmatprep.mubr.msk.bf16.mxu0 %vm5301_vm7, %v17185_v13  ;;  %v6522_v30 = vshrl.u32 %v5629_v19, 16  ;;  %v14935_v7 = vcombine.low %v6473_v44, %v6483_v57  ;;  %v6492_v23 = vrot.slane %v6491_v56, 4  ;;  %v6501_v3 = vor.u32 %v6500_v24, %v6496_v35  ;;  %v5639_v24 = vld [vmem:[#allocation3 + $0x80] sm:$0x1] }
 0x295   : > { %v6528_v45 = vshll.u32 %v5630_v29, 16  ;;  %v6515_v47 = vor.u32 %v6514_v34, %v6511_v36  ;;  %v6520_v10 = vrot.slane %v6518_v0, 5  ;;  %v6533_v20 = vshrl.u32 %v5631_v21, 16  ;;  %v5641_v0 = vld [vmem:[#allocation3 + $0x88] sm:$0xf] }
 0x296   : > { %v6524_v42 = vrot.slane %v6522_v30, 4  ;;  %v6497_v37 = vsel %vm19327_vm5, %v6492_v23, %v6496_v35  ;;  %v6502_v16 = vrot.slane %v6501_v3, 4  ;;  %v6536_v17 = vshll.u32 %v5631_v21, 16  ;;  %v5638_v35 = vld [vmem:[#allocation3 + $0x7c] sm:$0xf] }
 0x297   : > { %v6530_v25 = vrot.slane %v6528_v45, 5  ;;  %v6516_v9 = vrot.slane %v6515_v47, 4  ;;  %v6535_v4 = vrot.slane %v6533_v20, 4  ;;  %v6542_v28 = vshll.u32 %v5632_v14, 16 }
 0x298   : > { %v6525_v46 = vor.u32 %v6524_v42, %v6520_v10  ;;  %v6507_v13 = vsel %vm19327_vm5, %v6502_v16, %v6506_v33  ;;  %v6538_v63 = vrot.slane %v6536_v17, 5  ;;  %v6546_v39 = vshrl.u32 %v5632_v14, 16  ;;  %v5640_v33 = vld [vmem:[#allocation3 + $0x84] sm:$0xf]  ;;  %v5643_v17 = vld [vmem:[#allocation3 + $0x90] sm:$0xf] }
 0x299   : > { %16051 = vmatmul.mubr.msk.bf16.gmra.mrb[8].mxu1 %vm5005_vm2, %v14935_v7  ;;  %v6552_v51 = vshll.u32 %v5633_v38, 16  ;;  %v14936_v2 = vcombine.low %v6497_v37, %v6507_v13  ;;  %v6521_v62 = vsel %vm19327_vm5, %v6516_v9, %v6520_v10  ;;  %v6544_v43 = vrot.slane %v6542_v28, 5  ;;  %v17191_v37 = vld [vmem:[#allocation2 + $0x84] sm:$0xff]   ;;  %v17192_v28 = vld [vmem:[#allocation2 + $0x90] sm:$0xff]  }
 0x29a   : > { %v6526_v8 = vrot.slane %v6525_v46, 4  ;;  %v6539_v1 = vor.u32 %v6538_v63, %v6535_v4  ;;  %v6548_v6 = vrot.slane %v6546_v39, 4  ;;  %v6557_v27 = vshrl.u32 %v5634_v40, 16 }
 0x29b   : > { %16365 = vmatmul.mubr.msk.bf16.gmra.mrb[8].mxu0 %vm5301_vm7, %v17186_v49  ;;  %v6554_v19 = vrot.slane %v6552_v51, 5  ;;  %16054 = vmatprep.mubr.msk.bf16.mxu1 %vm5005_vm2, %v14936_v2  ;;  %v6560_v61 = vshll.u32 %v5634_v40, 16  ;;  %v6566_v41 = vshll.u32 %v5635_v58, 16  ;;  %v6570_v29 = vshrl.u32 %v5635_v58, 16  ;;  %v5644_v58 = vld [vmem:[#allocation3 + $0x94] sm:$0xf] }
 0x29c   : > { %16368 = vmatprep.mubr.msk.bf16.mxu0 %vm5301_vm7, %v17187_v48  ;;  %v6531_v54 = vsel %vm19327_vm5, %v6526_v8, %v6530_v25  ;;  %v6540_v26 = vrot.slane %v6539_v1, 4  ;;  %v6549_v44 = vor.u32 %v6548_v6, %v6544_v43  ;;  %v6559_v31 = vrot.slane %v6557_v27, 4  ;;  %v5642_v25 = vld [vmem:[#allocation3 + $0x8c] sm:$0x1] }
 0x29d   : > { %v14937_v53 = vcombine.low %v6521_v62, %v6531_v54  ;;  %v6562_v32 = vrot.slane %v6560_v61, 5  ;;  %v6568_v21 = vrot.slane %v6566_v41, 5  ;;  %v6572_v49 = vrot.slane %v6570_v29, 4  ;;  %v5646_v29 = vld [vmem:[#allocation3 + $0x9c] sm:$0xf] }
 0x29e   : > { %v6576_v56 = vshll.u32 %v5636_v12, 16  ;;  %v6545_v36 = vsel %vm19327_vm5, %v6540_v26, %v6544_v43  ;;  %v6550_v14 = vrot.slane %v6549_v44, 4  ;;  %v6581_v57 = vshrl.u32 %v5637_v18, 16  ;;  %v5647_v44 = vld [vmem:[#allocation3 + $0xa0] sm:$0xf] }
 0x29f   : > { %v6584_v34 = vshll.u32 %v5637_v18, 16  ;;  %v6563_v30 = vor.u32 %v6562_v32, %v6559_v31  ;;  %v6573_v48 = vor.u32 %v6572_v49, %v6568_v21  ;;  %v6590_v7 = vshll.u32 %v5638_v35, 16 }
 0x2a0   : > { %v6578_v38 = vrot.slane %v6576_v56, 5  ;;  %v6555_v23 = vsel %vm19327_vm5, %v6550_v14, %v6554_v19  ;;  %v6583_v3 = vrot.slane %v6581_v57, 4  ;;  %v6594_v47 = vshrl.u32 %v5638_v35, 16  ;;  %v5645_v19 = vld [vmem:[#allocation3 + $0x98] sm:$0x1] }
 0x2a1   : > { %16055 = vmatmul.mubr.msk.bf16.gmra.mrb[12].mxu1 %vm5005_vm2, %v14937_v53  ;;  %v6586_v45 = vrot.slane %v6584_v34, 5  ;;  %v14938_v10 = vcombine.low %v6545_v36, %v6555_v23  ;;  %v6564_v42 = vrot.slane %v6563_v30, 4  ;;  %v6574_v20 = vrot.slane %v6573_v48, 4  ;;  %v5648_v14 = vld [vmem:[#allocation3 + $0xa4] sm:$0x1] }
 0x2a2   : > { %v6592_v16 = vrot.slane %v6590_v7, 5  ;;  %v6596_v9 = vrot.slane %v6594_v47, 4  ;;  %v6600_v46 = vshll.u32 %v5639_v24, 16  ;;  %v6605_v4 = vshrl.u32 %v5640_v33, 16  ;;  %v5649_v48 = vld [vmem:[#allocation3 + $0xa8] sm:$0xf] }
 0x2a3   : > { %16369 = vmatmul.mubr.msk.bf16.gmra.mrb[12].mxu0 %vm5301_vm7, %v17188_v15  ;;  %v6587_v40 = vor.u32 %v6586_v45, %v6583_v3  ;;  %16058 = vmatprep.mubr.msk.bf16.mxu1 %vm5005_vm2, %v14938_v10  ;;  %v6569_v13 = vsel %vm19327_vm5, %v6564_v42, %v6568_v21  ;;  %v6579_v63 = vsel %vm19327_vm5, %v6574_v20, %v6578_v38  ;;  %v6608_v39 = vshll.u32 %v5640_v33, 16  ;;  %v17193_v33 = vld [vmem:[#allocation2 + $0x9c] sm:$0xff]   ;;  %v5650_v45 = vld [vmem:[#allocation3 + $0xac] sm:$0xf] }
 0x2a4   : > { %16372 = vmatprep.mubr.msk.bf16.mxu0 %vm5301_vm7, %v17189_v52  ;;  %v6614_v51 = vshll.u32 %v5641_v0, 16  ;;  %v14939_v12 = vcombine.low %v6569_v13, %v6579_v63  ;;  %v6597_v62 = vor.u32 %v6596_v9, %v6592_v16  ;;  %v6602_v8 = vrot.slane %v6600_v46, 5 }
 0x2a5   : > { %v6588_v2 = vrot.slane %v6587_v40, 4  ;;  %v6607_v43 = vrot.slane %v6605_v4, 4  ;;  %v6610_v15 = vrot.slane %v6608_v39, 5  ;;  %v6618_v6 = vshrl.u32 %v5641_v0, 16  ;;  %v5651_v39 = vld [vmem:[#allocation3 + $0xb0] sm:$0x1] }
 0x2a6   : > { %v6616_v1 = vrot.slane %v6614_v51, 5  ;;  %v6598_v54 = vrot.slane %v6597_v62, 4  ;;  %v6624_v61 = vshll.u32 %v5642_v25, 16  ;;  %v6629_v41 = vshrl.u32 %v5643_v17, 16 }
 0x2a7   : > { %v6593_v27 = vsel %vm19327_vm5, %v6588_v2, %v6592_v16  ;;  %v6611_v52 = vor.u32 %v6610_v15, %v6607_v43  ;;  %v6620_v18 = vrot.slane %v6618_v6, 4  ;;  %v6632_v53 = vshll.u32 %v5643_v17, 16 }
 0x2a8   : > { %v6638_v26 = vshll.u32 %v5644_v58, 16  ;;  %v6603_v31 = vsel %vm19327_vm5, %v6598_v54, %v6602_v8  ;;  %v6626_v35 = vrot.slane %v6624_v61, 5  ;;  %v6631_v32 = vrot.slane %v6629_v41, 4 }
 0x2a9   : > { %16059 = vmatmul.mubr.msk.bf16.gmra.mrb[16].mxu1 %vm5005_vm2, %v14939_v12  ;;  %v6642_v21 = vshrl.u32 %v5644_v58, 16  ;;  %v14940_v49 = vcombine.low %v6593_v27, %v6603_v31  ;;  %v6612_v56 = vrot.slane %v6611_v52, 4  ;;  %v6621_v24 = vor.u32 %v6620_v18, %v6616_v1  ;;  %v5652_v12 = vld [vmem:[#allocation3 + $0xb4] sm:$0xf]  ;;  %v5653_v27 = vld [vmem:[#allocation3 + $0xb8] sm:$0xf] }
 0x2aa   : > { %v6634_v36 = vrot.slane %v6632_v53, 5  ;;  %v6640_v57 = vrot.slane %v6638_v26, 5  ;;  %v6648_v0 = vshll.u32 %v5645_v19, 16  ;;  %v6653_v30 = vshrl.u32 %v5646_v29, 16  ;;  %v5654_v52 = vld [vmem:[#allocation3 + $0xbc] sm:$0x1] }
 0x2ab   : > { %16373 = vmatmul.mubr.msk.bf16.gmra.mrb[16].mxu0 %vm5301_vm7, %v17191_v37  ;;  %v6644_v34 = vrot.slane %v6642_v21, 4  ;;  %16062 = vmatprep.mubr.msk.bf16.mxu1 %vm5005_vm2, %v14940_v49  ;;  %v6617_v38 = vsel %vm19327_vm5, %v6612_v56, %v6616_v1  ;;  %v6622_v7 = vrot.slane %v6621_v24, 4  ;;  %v6656_v3 = vshll.u32 %v5646_v29, 16  ;;  %v17194_v37 = vld [vmem:[#allocation2 + $0xa8] sm:$0xff]   ;;  %v17195_v26 = vld [vmem:[#allocation2 + $0xb4] sm:$0xff]   ;;  %v17196_v24 = vld [vmem:[#allocation2 + $0xc0] sm:$0xff]  }
 0x2ac   : > { %16376 = vmatprep.mubr.msk.bf16.mxu0 %vm5301_vm7, %v17192_v28  ;;  %v6635_v23 = vor.u32 %v6634_v36, %v6631_v32  ;;  %v6650_v10 = vrot.slane %v6648_v0, 5  ;;  %v6655_v42 = vrot.slane %v6653_v30, 4  ;;  %v6662_v20 = vshll.u32 %v5647_v44, 16 }
 0x2ad   : > { %v6645_v47 = vor.u32 %v6644_v34, %v6640_v57  ;;  %v6627_v16 = vsel %vm19327_vm5, %v6622_v7, %v6626_v35  ;;  %v6658_v17 = vrot.slane %v6656_v3, 5  ;;  %v6666_v40 = vshrl.u32 %v5647_v44, 16  ;;  %v7031_v35 = vld [vmem:[#allocation2 + $0xc] sm:$0xe] }
 0x2ae   : > { %v6636_v25 = vrot.slane %v6635_v23, 4  ;;  %v14941_v9 = vcombine.low %v6617_v38, %v6627_v16  ;;  %v6664_v4 = vrot.slane %v6662_v20, 5  ;;  %v6672_v28 = vshll.u32 %v5648_v14, 16 }
 0x2af   : > { %v6646_v46 = vrot.slane %v6645_v47, 4  ;;  %v6659_v13 = vor.u32 %v6658_v17, %v6655_v42  ;;  %v6668_v63 = vrot.slane %v6666_v40, 4  ;;  %v6677_v51 = vshrl.u32 %v5649_v48, 16  ;;  %v7032_v40 = vld [vmem:[#allocation2 + $0x18] sm:$0xe] }
 0x2b0   : > { %v6641_v58 = vsel %vm19327_vm5, %v6636_v25, %v6640_v57  ;;  %v6674_v62 = vrot.slane %v6672_v28, 5  ;;  %v6680_v8 = vshll.u32 %v5649_v48, 16  ;;  %v6686_v43 = vshll.u32 %v5650_v45, 16 }
 0x2b1   : > { %16063 = vmatmul.mubr.msk.bf16.gmra.mrb[20].mxu1 %vm5005_vm2, %v14941_v9  ;;  %v6651_v2 = vsel %vm19327_vm5, %v6646_v46, %v6650_v10  ;;  %v6660_v1 = vrot.slane %v6659_v13, 4  ;;  %v6669_v6 = vor.u32 %v6668_v63, %v6664_v4  ;;  %v6679_v19 = vrot.slane %v6677_v51, 4  ;;  %v7033_v63 = vld [vmem:[#allocation2 + $0x24] sm:$0xe] }
 0x2b2   : > { %v14942_v15 = vcombine.low %v6641_v58, %v6651_v2  ;;  %v6682_v54 = vrot.slane %v6680_v8, 5  ;;  %v6688_v61 = vrot.slane %v6686_v43, 5  ;;  %v6690_v41 = vshrl.u32 %v5650_v45, 16  ;;  %v17284_v58 = vld [vmem:[#allocation2 + $0x14] sm:$0x1] }
 0x2b3   : > { %16377 = vmatmul.mubr.msk.bf16.gmra.mrb[20].mxu0 %vm5301_vm7, %v17193_v33  ;;  %v6696_v29 = vshll.u32 %v5651_v39, 16  ;;  %v6665_v18 = vsel %vm19327_vm5, %v6660_v1, %v6664_v4  ;;  %v6670_v53 = vrot.slane %v6669_v6, 4  ;;  %v6701_v44 = vshrl.u32 %v5652_v12, 16  ;;  %v17283_v4 = vld [vmem:[#allocation2 + $0x10] sm:$0xf] }
 0x2b4   : > { %16380 = vmatprep.mubr.msk.bf16.mxu0 %vm5301_vm7, %v17194_v37  ;;  %16066 = vmatprep.mubr.msk.bf16.mxu1 %vm5005_vm2, %v14942_v15  ;;  %v6704_v31 = vshll.u32 %v5652_v12, 16  ;;  %v6683_v32 = vor.u32 %v6682_v54, %v6679_v19  ;;  %v6692_v21 = vrot.slane %v6690_v41, 4  ;;  %v6710_v56 = vshll.u32 %v5653_v27, 16  ;;  %v17198_v43 = vld [vmem:[#allocation3 + $0x18] sm:$0xff]   ;;  %v17286_v19 = vld [vmem:[#allocation2 + $0x20] sm:$0x1] }
 0x2b5   : > { %v6698_v49 = vrot.slane %v6696_v29, 5  ;;  %v6675_v33 = vsel %vm19327_vm5, %v6670_v53, %v6674_v62  ;;  %v6703_v36 = vrot.slane %v6701_v44, 4  ;;  %v6714_v57 = vshrl.u32 %v5653_v27, 16  ;;  %v7034_v29 = vld [vmem:[#allocation2 + $0x30] sm:$0xe] }
 0x2b6   : > { %v6706_v14 = vrot.slane %v6704_v31, 5  ;;  %v14943_v34 = vcombine.low %v6665_v18, %v6675_v33  ;;  %v6684_v0 = vrot.slane %v6683_v32, 4  ;;  %v6693_v30 = vor.u32 %v6692_v21, %v6688_v61  ;;  %v7035_v44 = vld [vmem:[#allocation2 + $0x3c] sm:$0xe]  ;;  %v17288_v21 = vld [vmem:[#allocation2 + $0x2c] sm:$0x1] }
 0x2b7   : > { %v6712_v48 = vrot.slane %v6710_v56, 5  ;;  %v6716_v7 = vrot.slane %v6714_v57, 4  ;;  %v6720_v23 = vshll.u32 %v5654_v52, 16  ;;  %v21707_v3 = vmov 0   ;;  %v7036_v57 = vld [vmem:[#allocation2 + $0x48] sm:$0xe] }
 0x2b8   : > { %v6707_v38 = vor.u32 %v6706_v14, %v6703_v36  ;;  %v14964_v45 = vrot.slane %v21707_v3, 9  ;;  %v6689_v47 = vsel %vm19327_vm5, %v6684_v0, %v6688_v61  ;;  %v6694_v10 = vrot.slane %v6693_v30, 4  ;;  %v17287_v61 = vld [vmem:[#allocation2 + $0x28] sm:$0xf]  ;;  %v17290_v36 = vld [vmem:[#allocation2 + $0x38] sm:$0x1] }
 0x2b9   : > { %16067 = vmatmul.mubr.msk.bf16.gmra.mrb[24].mxu1 %vm5005_vm2, %v14943_v34  ;;  %v7133_v42 = vrot.slane %v19366_v11, 4  ;;  %v14965_v20 = vrot.slane %v7031_v35, 9  ;;  %v6717_v16 = vor.u32 %v6716_v7, %v6712_v48  ;;  %v6722_v25 = vrot.slane %v6720_v23, 5  ;;  %v7037_v7 = vld [vmem:[#allocation2 + $0x54] sm:$0xe] }
 0x2ba   : > { %v6708_v37 = vrot.slane %v6707_v38, 4  ;;  %v7132_v17 = vsel %vm19360_vm6, %v14964_v45, %v19366_v11  ;;  %v6699_v9 = vsel %vm19327_vm5, %v6694_v10, %v6698_v49  ;;  %v7138_v28 = vrot.slane %v17283_v4, 5 }
 0x2bb   : > { %16381 = vmatmul.mubr.msk.bf16.gmra.mrb[24].mxu0 %vm5301_vm7, %v17195_v26  ;;  %v7135_v46 = vsel %vm19360_vm6, %v7133_v42, %v19366_v11  ;;  %v7141_v13 = vrot.slane %v17284_v58, 5  ;;  %v14944_v39 = vcombine.low %v6689_v47, %v6699_v9  ;;  %v6718_v12 = vrot.slane %v6717_v16, 4  ;;  %v17285_v11 = vld [vmem:[#allocation2 + $0x1c] sm:$0xf]  ;;  %v17292_v47 = vld [vmem:[#allocation2 + $0x44] sm:$0x1] }
 0x2bc   : > { %16384 = vmatprep.mubr.msk.bf16.mxu0 %vm5301_vm7, %v17196_v24  ;;  %v6713_v51 = vsel %vm19327_vm5, %v6708_v37, %v6712_v48  ;;  %v20119_v2 = vcombine.low %v7132_v17, %v7135_v46  ;;  %v20123_v62 = vsel %vm19360_vm6, %v14965_v20, %v7138_v28  ;;  %v7140_v8 = vrot.slane %v7138_v28, 4  ;;  %v17291_v48 = vld [vmem:[#allocation2 + $0x40] sm:$0xf]  ;;  %v17294_v9 = vld [vmem:[#allocation2 + $0x50] sm:$0x1] }
 0x2bd   : > { %v14966_v15 = vrot.slane %v7032_v40, 9  ;;  %v7145_v1 = vrot.slane %v17285_v11, 5  ;;  %16070 = vmatprep.mubr.msk.bf16.mxu1 %vm5005_vm2, %v14944_v39  ;;  %v6723_v6 = vsel %vm19327_vm5, %v6718_v12, %v6722_v25  ;;  %v7148_v27 = vrot.slane %v17286_v19, 5  ;;  %v17200_v42 = vld [vmem:[#allocation3 + $0x24] sm:$0xff]   ;;  %v17293_v25 = vld [vmem:[#allocation2 + $0x4c] sm:$0xf] }
 0x2be   : > { %v14967_v54 = vrot.slane %v7033_v63, 9  ;;  %v7152_v41 = vrot.slane %v17287_v61, 5  ;;  %v14945_v52 = vcombine.low %v6713_v51, %v6723_v6  ;;  %v20130_v18 = vsel %vm19360_vm6, %v7140_v8, %v7141_v13  ;;  %v17295_v28 = vld [vmem:[#allocation2 + $0x58] sm:$0xf]  ;;  %v7038_v13 = vld [vmem:[#allocation2 + $0x60] sm:$0xe] }
 0x2bf   : > { %v20134_v53 = vsel %vm19360_vm6, %v14966_v15, %v7145_v1  ;;  %v7147_v26 = vrot.slane %v7145_v1, 4  ;;  %v14983_v31 = vcombine.low %v20123_v62, %v20130_v18  ;;  %v7155_v49 = vrot.slane %v17288_v21, 5  ;;  %v7039_v62 = vld [vmem:[#allocation2 + $0x6c] sm:$0xe]  ;;  %v17296_v1 = vld [vmem:[#allocation2 + $0x5c] sm:$0x1] }
 0x2c0   : > { %v20142_v35 = vsel %vm19360_vm6, %v14967_v54, %v7152_v41  ;;  %v7154_v32 = vrot.slane %v7152_v41, 4  ;;  %v14968_v24 = vrot.slane %v7034_v29, 9  ;;  %v7162_v14 = vrot.slane %v17290_v36, 5  ;;  %v17201_v8 = vld [vmem:[#allocation3 + $0x30] sm:$0xff]   ;;  %v17297_v61 = vld [vmem:[#allocation2 + $0x64] sm:$0xf] }
 0x2c1   : > { %16071 = vmatmul.mubr.msk.bf16.gmra.mrb[28].mxu1 %vm5005_vm2, %v14945_v52  ;;  %v20148_v56 = vsel %vm19360_vm6, %v7147_v26, %v7148_v27  ;;  %v14969_v30 = vrot.slane %v7035_v44, 9  ;;  %v7166_v38 = vrot.slane %v17291_v48, 5  ;;  %v7169_v10 = vrot.slane %v17292_v47, 5  ;;  %v17207_v19 = vld [vmem:[%s21518_s4 + $0x28] sm:$0xff]   ;;  %v7040_v18 = vld [vmem:[#allocation2 + $0x78] sm:$0xe] }
 0x2c2   : > { %16076 = vmatprep.mubr.msk.bf16.mxu1 %vm5301_vm7, %v20119_v2  ;;  %v14984_v34 = vcombine.low %v20134_v53, %v20148_v56  ;;  %v20156_v0 = vsel %vm19360_vm6, %v7154_v32, %v7155_v49  ;;  %v14970_v16 = vrot.slane %v7036_v57, 9  ;;  %v7173_v17 = vrot.slane %v17293_v25, 5  ;;  %v17298_v29 = vld [vmem:[#allocation2 + $0x68] sm:$0x1]  ;;  %v20199_v53 = vld [vmem:[%s21518_s4 + $0x70] sm:$0xff]   ;;  %v20225_v48 = vld [vmem:[%s21517_s3 + $0x18] sm:$0xff]  }
 0x2c3   : > { %16385 = vmatmul.mubr.msk.bf16.gmra.mrb[28].mxu0 %vm5301_vm7, %v19323_v59  ;;  %v17289_v59 = vld [vmem:[#allocation2 + $0x34] sm:$0xf]  ;;  %v14985_v23 = vcombine.low %v20142_v35, %v20156_v0  ;;  %v20166_v20 = vsel %vm19360_vm6, %v14969_v30, %v7166_v38  ;;  %v7168_v37 = vrot.slane %v7166_v38, 4  ;;  %v7176_v46 = vrot.slane %v17294_v9, 5  ;;  %v17299_v21 = vld [vmem:[#allocation2 + $0x70] sm:$0xf] }
 0x2c4   : > { %16392 = vmatprep.mubr.msk.bf16.mxu0 %vm5005_vm2, %v17198_v43  ;;  %v7159_v33 = vrot.slane %v17289_v59, 5  ;;  %v14971_v4 = vrot.slane %v7037_v7, 9  ;;  %v7180_v58 = vrot.slane %v17295_v28, 5  ;;  %v20180_v51 = vsel %vm19360_vm6, %v14970_v16, %v7173_v17  ;;  %v7041_v56 = vld [vmem:[#allocation2 + $0x84] sm:$0xe]  ;;  %v17202_v38 = vld [vmem:[#allocation3 + $0x3c] sm:$0xff]  }
 0x2c5   : > { %v20176_v39 = vsel %vm19360_vm6, %v7168_v37, %v7169_v10  ;;  %v7175_v12 = vrot.slane %v7173_v17, 4  ;;  %v7183_v6 = vrot.slane %v17296_v1, 5  ;;  %v14972_v54 = vrot.slane %v7038_v13, 9  ;;  %v17300_v59 = vld [vmem:[#allocation2 + $0x74] sm:$0x1]  ;;  %v17203_v16 = vld [vmem:[#allocation3 + $0x48] sm:$0xff]  }
 0x2c6   : > { %v20162_v3 = vsel %vm19360_vm6, %v14968_v24, %v7159_v33  ;;  %v7161_v45 = vrot.slane %v7159_v33, 4  ;;  %v14987_v43 = vcombine.low %v20166_v20, %v20176_v39  ;;  %v20186_v15 = vsel %vm19360_vm6, %v14971_v4, %v7180_v58  ;;  %v7042_v36 = vld [vmem:[#allocation2 + $0x90] sm:$0xe]  ;;  %v7043_v4 = vld [vmem:[#allocation2 + $0x9c] sm:$0xe] }
 0x2c7   : > { %v7182_v11 = vrot.slane %v7180_v58, 4  ;;  %v20194_v27 = vsel %vm19360_vm6, %v7175_v12, %v7176_v46  ;;  %v7187_v41 = vrot.slane %v17297_v61, 5  ;;  %v7190_v52 = vrot.slane %v17298_v29, 5  ;;  %v17304_v12 = vld [vmem:[#allocation2 + $0x8c] sm:$0x1] }
 0x2c8   : > { %v20170_v40 = vsel %vm19360_vm6, %v7161_v45, %v7162_v14  ;;  %v14988_v26 = vcombine.low %v20180_v51, %v20194_v27  ;;  %v14973_v32 = vrot.slane %v7039_v62, 9  ;;  %v7194_v49 = vrot.slane %v17299_v21, 5  ;;  %v17302_v45 = vld [vmem:[#allocation2 + $0x80] sm:$0x1]  ;;  %v17305_v1 = vld [vmem:[#allocation2 + $0x94] sm:$0xf] }
 0x2c9   : > { %v14986_v63 = vcombine.low %v20162_v3, %v20170_v40  ;;  %16077 = vmatmul.mubr.msk.bf16.vlgmr.msra.gmra.mrb[0].mxu1 %vm5301_vm7, %v14983_v31  ;;  %v20207_v44 = vsel %vm19360_vm6, %v7182_v11, %v7183_v6  ;;  %v7189_v24 = vrot.slane %v7187_v41, 4  ;;  %v7197_v33 = vrot.slane %v17300_v59, 5  ;;  %v7045_v21 = vld [vmem:[#allocation2 + $0xb4] sm:$0xe]  ;;  %v17308_v59 = vld [vmem:[#allocation2 + $0xa4] sm:$0x1] }
 0x2ca   : > { %16109 = vmatpush3.bf16.msra.mxu1 %v20016_v55  ;;  %16080 = vmatprep.mubr.msk.bf16.mxu1 %vm5301_vm7, %v14984_v34  ;;  %v14989_v31 = vcombine.low %v20186_v15, %v20207_v44  ;;  %v20220_v14 = vsel %vm19360_vm6, %v14973_v32, %v7194_v49  ;;  %v7196_v55 = vrot.slane %v7194_v49, 4  ;;  %v14974_v57 = vrot.slane %v7040_v18, 9  ;;  %v17301_v34 = vld [vmem:[#allocation2 + $0x7c] sm:$0xf]  ;;  %v17307_v18 = vld [vmem:[#allocation2 + $0xa0] sm:$0xf] }
 0x2cb   : > { %16393 = vmatmul.mubr.msk.bf16.vlgmr.msra.gmra.mrb[0].mxu0 %vm5005_vm2, %v17200_v42  ;;  %16110 = vmatprep.subr.bf16.mxu1 %v17207_v19  ;;  %v7201_v30 = vrot.slane %v17301_v34, 5  ;;  %v20229_v7 = vsel %vm19360_vm6, %v7189_v24, %v7190_v52  ;;  %v7204_v47 = vrot.slane %v17302_v45, 5  ;;  %v14975_v10 = vrot.slane %v7041_v56, 9  ;;  %v17303_v42 = vld [vmem:[#allocation2 + $0x88] sm:$0xf]  ;;  %v17204_v40 = vld [vmem:[#allocation3 + $0x54] sm:$0xff]  }
 0x2cc   : > { %16425 = vmatpush3.bf16.msra.mxu0 %v20034_v50  ;;  %v20215_v50 = vsel %vm19360_vm6, %v14972_v54, %v7187_v41  ;;  %16396 = vmatprep.mubr.msk.bf16.mxu0 %vm5005_vm2, %v17201_v8  ;;  %v7208_v37 = vrot.slane %v17303_v42, 5  ;;  %v20236_v17 = vsel %vm19360_vm6, %v7196_v55, %v7197_v33  ;;  %v7211_v62 = vrot.slane %v17304_v12, 5  ;;  %v17306_v54 = vld [vmem:[#allocation2 + $0x98] sm:$0x1]  ;;  %v7044_v41 = vld [vmem:[#allocation2 + $0xa8] sm:$0xe] }
 0x2cd   : > { %16458 = vmatprep.subr.bf16.mxu0 %v20199_v53  ;;  %v14990_v25 = vcombine.low %v20215_v50, %v20229_v7  ;;  %v20240_v9 = vsel %vm19360_vm6, %v14974_v57, %v7201_v30  ;;  %v7203_v46 = vrot.slane %v7201_v30, 4  ;;  %v14991_v28 = vcombine.low %v20220_v14, %v20236_v17  ;;  %v17310_v34 = vld [vmem:[#allocation2 + $0xb0] sm:$0x1]  ;;  %v17311_v45 = vld [vmem:[#allocation2 + $0xb8] sm:$0xf] }
 0x2ce   : > { %16111 = vmatpush3.bf16.msra.mxu1 %v17207_v19  ;;  %v20246_v58 = vsel %vm19360_vm6, %v14975_v10, %v7208_v37  ;;  %v7210_v13 = vrot.slane %v7208_v37, 4  ;;  %v14976_v11 = vrot.slane %v7042_v36, 9  ;;  %v7215_v6 = vrot.slane %v17305_v1, 5  ;;  %v17309_v36 = vld [vmem:[#allocation2 + $0xac] sm:$0xf] }
 0x2cf   : > { %v20250_v8 = vsel %vm19360_vm6, %v7203_v46, %v7204_v47  ;;  %v7218_v61 = vrot.slane %v17306_v54, 5  ;;  %16144 = vmatprep.subr.bf16.mxu1 %v20225_v48  ;;  %v14977_v52 = vrot.slane %v7043_v4, 9  ;;  %v7222_v32 = vrot.slane %v17307_v18, 5  ;;  %v7062_v3 = vld [vmem:[#allocation3] sm:$0xe] }
 0x2d0   : > { %v14992_v19 = vcombine.low %v20240_v9, %v20250_v8  ;;  %v20258_v29 = vsel %vm19360_vm6, %v7210_v13, %v7211_v62  ;;  %v20269_v56 = vsel %vm19360_vm6, %v14976_v11, %v7215_v6  ;;  %v7217_v24 = vrot.slane %v7215_v6, 4  ;;  %v17205_v46 = vld [vmem:[#allocation3 + $0x60] sm:$0xff]   ;;  %v12030_v51 = vld [vmem:[#allocation2 + $0x2c] sm:$0x1]  ;;  %v7064_v27 = vld [vmem:[#allocation3 + $0x18] sm:$0xe] }
 0x2d1   : > { %16081 = vmatmul.mubr.msk.bf16.gmra.mrb[4].mxu1 %vm5301_vm7, %v14985_v23  ;;  %v14993_v49 = vcombine.low %v20246_v58, %v20258_v29  ;;  %v7225_v33 = vrot.slane %v17308_v59, 5  ;;  %v20277_v35 = vsel %vm19360_vm6, %v14977_v52, %v7222_v32  ;;  %v7224_v0 = vrot.slane %v7222_v32, 4  ;;  %v17312_v62 = vld [vmem:[#allocation2 + $0xbc] sm:$0x1]  ;;  %v12025_v18 = vld [vmem:[#allocation2 + $0x18] sm:$0xf] }
 0x2d2   : > { %16084 = vmatprep.mubr.msk.bf16.mxu1 %vm5301_vm7, %v14986_v63  ;;  %v14978_v23 = vrot.slane %v7044_v41, 9  ;;  %v7229_v55 = vrot.slane %v17309_v36, 5  ;;  %v20281_v57 = vsel %vm19360_vm6, %v7217_v24, %v7218_v61  ;;  %v7232_v30 = vrot.slane %v17310_v34, 5  ;;  %v17313_v54 = vld [vmem:[#allocation3 + $0x4] sm:$0xf]  ;;  %v17212_v8 = vld [vmem:[#allocation3 + $0xa8] sm:$0xff]  }
 0x2d3   : > { %16397 = vmatmul.mubr.msk.bf16.gmra.mrb[4].mxu0 %vm5005_vm2, %v17202_v38  ;;  %v14979_v38 = vrot.slane %v7045_v21, 9  ;;  %v7236_v47 = vrot.slane %v17311_v45, 5  ;;  %v14994_v63 = vcombine.low %v20269_v56, %v20281_v57  ;;  %v20287_v10 = vsel %vm19360_vm6, %v7224_v0, %v7225_v33  ;;  %v17314_v41 = vld [vmem:[#allocation3 + $0x8] sm:$0x1]  ;;  %v17315_v59 = vld [vmem:[#allocation3 + $0x10] sm:$0xf] }
 0x2d4   : > { %16400 = vmatprep.mubr.msk.bf16.mxu0 %vm5005_vm2, %v17203_v16  ;;  %v20291_v42 = vsel %vm19360_vm6, %v14978_v23, %v7229_v55  ;;  %v7231_v37 = vrot.slane %v7229_v55, 4  ;;  %v7063_v16 = vld [vmem:[#allocation3 + $0xc] sm:$0xe]  ;;  %v14995_v4 = vcombine.low %v20277_v35, %v20287_v10  ;;  %v7239_v11 = vrot.slane %v17312_v62, 5  ;;  %v12026_v0 = vld [vmem:[#allocation2 + $0x1c] sm:$0xf] }
 0x2d5   : > { %v20297_v13 = vsel %vm19360_vm6, %v14979_v38, %v7236_v47  ;;  %v7238_v12 = vrot.slane %v7236_v47, 4  ;;  %v15015_v6 = vrot.slane %v7062_v3, 9  ;;  %v7589_v61 = vrot.slane %v17313_v54, 5  ;;  %v12027_v23 = vld [vmem:[#allocation2 + $0x20] sm:$0x1]  ;;  %v17214_v56 = vld [vmem:[#allocation3 + $0xc0] sm:$0xff]  }
 0x2d6   : > { %v20301_v1 = vsel %vm19360_vm6, %v7231_v37, %v7232_v30  ;;  %v7592_v52 = vrot.slane %v17314_v41, 5  ;;  %v15016_v24 = vrot.slane %v7063_v16, 9  ;;  %v7596_v33 = vrot.slane %v17315_v59, 5  ;;  %v17316_v30 = vld [vmem:[#allocation3 + $0x14] sm:$0x1] }
 0x2d7   : > { %v20307_v21 = vsel %vm19360_vm6, %v7238_v12, %v7239_v11  ;;  %v20314_v55 = vsel %vm19360_vm6, %v15015_v6, %v7589_v61  ;;  %v7591_v34 = vrot.slane %v7589_v61, 4  ;;  %v7599_v38 = vrot.slane %v17316_v30, 5  ;;  %v12028_v37 = vld [vmem:[#allocation2 + $0x24] sm:$0xf]  ;;  %v12034_v7 = vld [vmem:[#allocation2 + $0x3c] sm:$0xf] }
 0x2d8   : > { %v20323_v45 = vsel %vm19360_vm6, %v15016_v24, %v7596_v33  ;;  %v7598_v47 = vrot.slane %v7596_v33, 4  ;;  %v12170_v3 = vshrl.u32 %v12025_v18, 16  ;;  %v12179_v39 = vshll.u32 %v12026_v0, 16  ;;  %v17208_v24 = vld [vmem:[#allocation3 + $0x78] sm:$0xff]   ;;  %v12037_v9 = vld [vmem:[#allocation2 + $0x48] sm:$0xf] }
 0x2d9   : > { %16085 = vmatmul.mubr.msk.bf16.gmra.mrb[8].mxu1 %vm5301_vm7, %v14987_v43  ;;  %v20331_v20 = vsel %vm19360_vm6, %v7591_v34, %v7592_v52  ;;  %v12183_v43 = vshrl.u32 %v12026_v0, 16  ;;  %v12189_v16 = vshll.u32 %v12027_v23, 16  ;;  %v12194_v33 = vshrl.u32 %v12028_v37, 16 }
 0x2da   : > { %16088 = vmatprep.mubr.msk.bf16.mxu1 %vm5301_vm7, %v14988_v26  ;;  %v20337_v62 = vsel %vm19360_vm6, %v7598_v47, %v7599_v38  ;;  %v12172_v11 = vrot.slane %v12170_v3, 4  ;;  %v17206_v26 = vld [vmem:[#allocation3 + $0x6c] sm:$0xff]   ;;  %v12181_v61 = vrot.slane %v12179_v39, 5  ;;  %v12197_v0 = vshll.u32 %v12028_v37, 16 }
 0x2db   : > { %16401 = vmatmul.mubr.msk.bf16.gmra.mrb[8].mxu0 %vm5005_vm2, %v17204_v40  ;;  %v12173_v40 = vshll.u32 %v12025_v18, 16  ;;  %v12185_v41 = vrot.slane %v12183_v43, 4  ;;  %v12191_v52 = vrot.slane %v12189_v16, 5  ;;  %v7065_v18 = vld [vmem:[#allocation3 + $0x24] sm:$0xe]  ;;  %v12213_v38 = vshll.u32 %v12030_v51, 16 }
 0x2dc   : > { %16404 = vmatprep.mubr.msk.bf16.mxu0 %vm5005_vm2, %v17205_v46  ;;  %v12029_v46 = vld [vmem:[#allocation2 + $0x28] sm:$0xf]  ;;  %v15017_v47 = vrot.slane %v7064_v27, 9  ;;  %v12199_v12 = vrot.slane %v12197_v0, 5  ;;  %v17317_v16 = vld [vmem:[#allocation3 + $0x1c] sm:$0xf] }
 0x2dd   : > { %v12175_v6 = vrot.slane %v12173_v40, 5  ;;  %v12203_v23 = vshll.u32 %v12029_v46, 16  ;;  %v12186_v34 = vor.u32 %v12185_v41, %v12181_v61  ;;  %v12207_v30 = vshrl.u32 %v12029_v46, 16  ;;  %v12031_v27 = vld [vmem:[#allocation2 + $0x30] sm:$0xf] }
 0x2de   : > { %v12196_v40 = vrot.slane %v12194_v33, 4  ;;  %v12215_v43 = vrot.slane %v12213_v38, 5  ;;  %v7603_v32 = vrot.slane %v17317_v16, 5  ;;  %v15018_v51 = vrot.slane %v7065_v18, 9  ;;  %v17320_v33 = vld [vmem:[#allocation3 + $0x2c] sm:$0x1] }
 0x2df   : > { %v12176_v59 = vor.u32 %v12175_v6, %v12172_v11  ;;  %v12205_v36 = vrot.slane %v12203_v23, 5  ;;  %v12187_v54 = vrot.slane %v12186_v34, 4  ;;  %v12209_v39 = vrot.slane %v12207_v30, 4  ;;  %v17318_v11 = vld [vmem:[#allocation3 + $0x20] sm:$0x1]  ;;  %v17210_v34 = vld [vmem:[#allocation3 + $0x90] sm:$0xff]  }
 0x2e0   : > { %v12200_v46 = vor.u32 %v12199_v12, %v12196_v40  ;;  %v7606_v6 = vrot.slane %v17318_v11, 5  ;;  %v12033_v12 = vld [vmem:[#allocation2 + $0x38] sm:$0x1]  ;;  %v7613_v50 = vrot.slane %v17320_v33, 5  ;;  %v12221_v23 = vshll.u32 %v12031_v27, 16 }
 0x2e1   : > { %v12177_v3 = vrot.slane %v12176_v59, 4  ;;  %16089 = vmatmul.mubr.msk.bf16.gmra.mrb[12].mxu1 %vm5301_vm7, %v14989_v31  ;;  %v12192_v15 = vsel %vm19327_vm5, %v12187_v54, %v12191_v52  ;;  %v12210_v44 = vor.u32 %v12209_v39, %v12205_v36  ;;  %v20357_v31 = vsel %vm19360_vm6, %v15017_v47, %v7603_v32  ;;  %v12036_v40 = vld [vmem:[#allocation2 + $0x44] sm:$0x1]  ;;  %v7066_v11 = vld [vmem:[#allocation3 + $0x30] sm:$0xe] }
 0x2e2   : > { %16092 = vmatprep.mubr.msk.bf16.mxu1 %vm5301_vm7, %v14990_v25  ;;  %v12201_v18 = vrot.slane %v12200_v46, 4  ;;  %v17209_v25 = vld [vmem:[#allocation3 + $0x84] sm:$0xff]   ;;  %v12218_v52 = vshrl.u32 %v12031_v27, 16  ;;  %v12269_v29 = vshll.u32 %v12037_v9, 16 }
 0x2e3   : > { %16405 = vmatmul.mubr.msk.bf16.gmra.mrb[12].mxu0 %vm5005_vm2, %v17206_v26  ;;  %v12182_v37 = vsel %vm19327_vm5, %v12177_v3, %v12181_v61  ;;  %v7605_v26 = vrot.slane %v7603_v32, 4  ;;  %v12032_v61 = vld [vmem:[#allocation2 + $0x34] sm:$0xf]  ;;  %v12211_v0 = vrot.slane %v12210_v44, 4  ;;  %v12035_v3 = vld [vmem:[#allocation2 + $0x40] sm:$0xf] }
 0x2e4   : > { %16408 = vmatprep.mubr.msk.bf16.mxu0 %vm5005_vm2, %v17208_v24  ;;  %v20359_v41 = vcombine.low %v12182_v37, %v12192_v15  ;;  %v17319_v24 = vld [vmem:[#allocation3 + $0x28] sm:$0xf]  ;;  %v12206_v32 = vsel %vm19327_vm5, %v12201_v18, %v12205_v36  ;;  %v12220_v16 = vrot.slane %v12218_v52, 4  ;;  %v12223_v37 = vrot.slane %v12221_v23, 5  ;;  %v17211_v23 = vld [vmem:[#allocation3 + $0x9c] sm:$0xff]  }
 0x2e5   : > { %v7610_v59 = vrot.slane %v17319_v24, 5  ;;  %v20363_v54 = vsel %vm19360_vm6, %v7605_v26, %v7606_v6  ;;  %v12216_v39 = vsel %vm19327_vm5, %v12211_v0, %v12215_v43  ;;  %v12227_v46 = vshll.u32 %v12032_v61, 16  ;;  %v7067_v0 = vld [vmem:[#allocation3 + $0x3c] sm:$0xe] }
 0x2e6   : > { %v15037_v30 = vcombine.low %v20357_v31, %v20363_v54  ;;  %v20375_v6 = vcombine.low %v12206_v32, %v12216_v39  ;;  %v12231_v27 = vshrl.u32 %v12032_v61, 16  ;;  %v12237_v15 = vshll.u32 %v12033_v12, 16 }
 0x2e7   : > { %v20371_v38 = vsel %vm19360_vm6, %v15018_v51, %v7610_v59  ;;  %v7612_v47 = vrot.slane %v7610_v59, 4  ;;  %v12224_v44 = vor.u32 %v12223_v37, %v12220_v16  ;;  %v12229_v26 = vrot.slane %v12227_v46, 5  ;;  %v17322_v37 = vld [vmem:[#allocation3 + $0x38] sm:$0x1]  ;;  %v12038_v46 = vld [vmem:[#allocation2 + $0x4c] sm:$0xf] }
 0x2e8   : > { %v12242_v43 = vshrl.u32 %v12034_v7, 16  ;;  %v12233_v18 = vrot.slane %v12231_v27, 4  ;;  %v12239_v24 = vrot.slane %v12237_v15, 5  ;;  %v12245_v59 = vshll.u32 %v12034_v7, 16 }
 0x2e9   : > { %v20379_v36 = vsel %vm19360_vm6, %v7612_v47, %v7613_v50  ;;  %16093 = vmatmul.mubr.msk.bf16.gmra.mrb[16].mxu1 %vm5301_vm7, %v14991_v28  ;;  %v12251_v61 = vshll.u32 %v12035_v3, 16  ;;  %v12225_v12 = vrot.slane %v12224_v44, 4  ;;  %v12255_v50 = vshrl.u32 %v12035_v3, 16  ;;  %v17321_v47 = vld [vmem:[#allocation3 + $0x34] sm:$0xf] }
 0x2ea   : > { %v15038_v51 = vcombine.low %v20371_v38, %v20379_v36  ;;  %16096 = vmatprep.mubr.msk.bf16.mxu1 %vm5301_vm7, %v14992_v19  ;;  %v12244_v33 = vrot.slane %v12242_v43, 4  ;;  %v12234_v52 = vor.u32 %v12233_v18, %v12229_v26  ;;  %v12247_v14 = vrot.slane %v12245_v59, 5  ;;  %v17323_v44 = vld [vmem:[#allocation3 + $0x40] sm:$0xf]  ;;  %v12039_v43 = vld [vmem:[#allocation2 + $0x50] sm:$0x1] }
 0x2eb   : > { %16409 = vmatmul.mubr.msk.bf16.gmra.mrb[16].mxu0 %vm5005_vm2, %v17209_v25  ;;  %v12261_v25 = vshll.u32 %v12036_v40, 16  ;;  %v12253_v17 = vrot.slane %v12251_v61, 5  ;;  %v15019_v28 = vrot.slane %v7066_v11, 9  ;;  %v12257_v7 = vrot.slane %v12255_v50, 4  ;;  %v12040_v18 = vld [vmem:[#allocation2 + $0x54] sm:$0xf] }
 0x2ec   : > { %16412 = vmatprep.mubr.msk.bf16.mxu0 %vm5005_vm2, %v17210_v34  ;;  %v12230_v34 = vsel %vm19327_vm5, %v12225_v12, %v12229_v26  ;;  %v7617_v39 = vrot.slane %v17321_v47, 5  ;;  %v12235_v19 = vrot.slane %v12234_v52, 4  ;;  %v12248_v16 = vor.u32 %v12247_v14, %v12244_v33  ;;  %v17324_v12 = vld [vmem:[#allocation3 + $0x44] sm:$0x1]  ;;  %v12041_v47 = vld [vmem:[#allocation2 + $0x58] sm:$0xf] }
 0x2ed   : > { %v12263_v32 = vrot.slane %v12261_v25, 5  ;;  %v7620_v3 = vrot.slane %v17322_v37, 5  ;;  %v15020_v40 = vrot.slane %v7067_v0, 9  ;;  %v12258_v27 = vor.u32 %v12257_v7, %v12253_v17 }
 0x2ee   : > { %v20397_v11 = vsel %vm19360_vm6, %v15019_v28, %v7617_v39  ;;  %v7619_v15 = vrot.slane %v7617_v39, 4  ;;  %v7624_v26 = vrot.slane %v17323_v44, 5  ;;  %v12240_v59 = vsel %vm19327_vm5, %v12235_v19, %v12239_v24  ;;  %v17213_v39 = vld [vmem:[#allocation3 + $0xb4] sm:$0xff]  }
 0x2ef   : > { %v12249_v61 = vrot.slane %v12248_v16, 4  ;;  %v7627_v33 = vrot.slane %v17324_v12, 5  ;;  %v12266_v50 = vshrl.u32 %v12037_v9, 16  ;;  %v20402_v25 = vcombine.low %v12230_v34, %v12240_v59  ;;  %v12042_v16 = vld [vmem:[#allocation2 + $0x5c] sm:$0x1] }
 0x2f0   : > { %v12259_v0 = vrot.slane %v12258_v27, 4  ;;  %v20406_v52 = vsel %vm19360_vm6, %v7619_v15, %v7620_v3  ;;  %v20410_v14 = vsel %vm19360_vm6, %v15020_v40, %v7624_v26  ;;  %v12279_v7 = vshrl.u32 %v12038_v46, 16  ;;  %v7068_v3 = vld [vmem:[#allocation3 + $0x48] sm:$0xe]  ;;  %v7069_v44 = vld [vmem:[#allocation3 + $0x54] sm:$0xe] }
 0x2f1   : > { %16097 = vmatmul.mubr.msk.bf16.gmra.mrb[20].mxu1 %vm5301_vm7, %v14993_v49  ;;  %v12254_v24 = vsel %vm19327_vm5, %v12249_v61, %v12253_v17  ;;  %v15039_v28 = vcombine.low %v20397_v11, %v20406_v52  ;;  %v12268_v34 = vrot.slane %v12266_v50, 4  ;;  %v12275_v49 = vshll.u32 %v12038_v46, 16 }
 0x2f2   : > { %16100 = vmatprep.mubr.msk.bf16.mxu1 %vm5301_vm7, %v14994_v63  ;;  %v12264_v58 = vsel %vm19327_vm5, %v12259_v0, %v12263_v32  ;;  %v12285_v19 = vshll.u32 %v12039_v43, 16  ;;  %v12290_v37 = vshrl.u32 %v12040_v18, 16  ;;  %v12271_v63 = vrot.slane %v12269_v29, 5  ;;  %v17325_v0 = vld [vmem:[#allocation3 + $0x4c] sm:$0xf] }
 0x2f3   : > { %16413 = vmatmul.mubr.msk.bf16.gmra.mrb[20].mxu0 %vm5005_vm2, %v17211_v23  ;;  %v7626_v23 = vrot.slane %v7624_v26, 4  ;;  %v12277_v32 = vrot.slane %v12275_v49, 5  ;;  %v12281_v9 = vrot.slane %v12279_v7, 4  ;;  %v12293_v27 = vshll.u32 %v12040_v18, 16 }
 0x2f4   : > { %16416 = vmatprep.mubr.msk.bf16.mxu0 %vm5005_vm2, %v17212_v8  ;;  %v20427_v8 = vcombine.low %v12254_v24, %v12264_v58  ;;  %v12287_v40 = vrot.slane %v12285_v19, 5  ;;  %v12292_v46 = vrot.slane %v12290_v37, 4  ;;  %v12299_v15 = vshll.u32 %v12041_v47, 16 }
 0x2f5   : > { %v20431_v17 = vsel %vm19360_vm6, %v7626_v23, %v7627_v33  ;;  %v12272_v26 = vor.u32 %v12271_v63, %v12268_v34  ;;  %v12282_v59 = vor.u32 %v12281_v9, %v12277_v32  ;;  %v12303_v61 = vshrl.u32 %v12041_v47, 16  ;;  %v17326_v47 = vld [vmem:[#allocation3 + $0x50] sm:$0x1] }
 0x2f6   : > { %v15040_v57 = vcombine.low %v20410_v14, %v20431_v17  ;;  %v12309_v12 = vshll.u32 %v12042_v16, 16  ;;  %v12295_v43 = vrot.slane %v12293_v27, 5  ;;  %v12301_v33 = vrot.slane %v12299_v15, 5  ;;  %v12045_v63 = vld [vmem:[#allocation2 + $0x68] sm:$0x1] }
 0x2f7   : > { %v15021_v50 = vrot.slane %v7068_v3, 9  ;;  %v7631_v24 = vrot.slane %v17325_v0, 5  ;;  %v12273_v23 = vrot.slane %v12272_v26, 4  ;;  %v12283_v58 = vrot.slane %v12282_v59, 4  ;;  %v12046_v27 = vld [vmem:[#allocation2 + $0x6c] sm:$0xf] }
 0x2f8   : > { %v12305_v29 = vrot.slane %v12303_v61, 4  ;;  %v12311_v49 = vrot.slane %v12309_v12, 5  ;;  %v12296_v18 = vor.u32 %v12295_v43, %v12292_v46  ;;  %v7634_v19 = vrot.slane %v17326_v47, 5  ;;  %v17215_v15 = vld [vmem:[#allocation3 + $0xcc] sm:$0xff]   ;;  %v12047_v61 = vld [vmem:[#allocation2 + $0x70] sm:$0xf] }
 0x2f9   : > { %16101 = vmatmul.mubr.msk.bf16.gmra.mrb[24].mxu1 %vm5301_vm7, %v14995_v4  ;;  %v20443_v34 = vsel %vm19360_vm6, %v15021_v50, %v7631_v24  ;;  %v7633_v7 = vrot.slane %v7631_v24, 4  ;;  %v21708_v16 = vcombine.low %v20291_v42, %v20301_v1  ;;  %v12278_v35 = vsel %vm19327_vm5, %v12273_v23, %v12277_v32  ;;  %v17327_v42 = vld [vmem:[#allocation3 + $0x58] sm:$0xf] }
 0x2fa   : > { %v12288_v10 = vsel %vm19327_vm5, %v12283_v58, %v12287_v40  ;;  %v12306_v4 = vor.u32 %v12305_v29, %v12301_v33  ;;  %v15022_v37 = vrot.slane %v7069_v44, 9  ;;  %v12297_v3 = vrot.slane %v12296_v18, 4  ;;  %v17328_v40 = vld [vmem:[#allocation3 + $0x5c] sm:$0x1] }
 0x2fb   : > { %16417 = vmatmul.mubr.msk.bf16.gmra.mrb[24].mxu0 %vm5005_vm2, %v17213_v39  ;;  %v12043_v39 = vld [vmem:[#allocation2 + $0x60] sm:$0xf]  ;;  %16104 = vmatprep.mubr.msk.bf16.mxu1 %vm5301_vm7, %v21708_v16  ;;  %v20453_v9 = vcombine.low %v12278_v35, %v12288_v10  ;;  %v20457_v46 = vsel %vm19360_vm6, %v7633_v7, %v7634_v19  ;;  %v7638_v1 = vrot.slane %v17327_v42, 5  ;;  %v7641_v59 = vrot.slane %v17328_v40, 5  ;;  %v12048_v19 = vld [vmem:[#allocation2 + $0x74] sm:$0x1] }
 0x2fc   : > { %16420 = vmatprep.mubr.msk.bf16.mxu0 %vm5005_vm2, %v17214_v56  ;;  %v12044_v56 = vld [vmem:[#allocation2 + $0x64] sm:$0xf]  ;;  %v12307_v26 = vrot.slane %v12306_v4, 4  ;;  %v15041_v32 = vcombine.low %v20443_v34, %v20457_v46  ;;  %v12314_v44 = vshrl.u32 %v12043_v39, 16  ;;  %v12302_v12 = vsel %vm19327_vm5, %v12297_v3, %v12301_v33  ;;  %v7070_v10 = vld [vmem:[#allocation3 + $0x60] sm:$0xe] }
 0x2fd   : > { %v20465_v43 = vsel %vm19360_vm6, %v15022_v37, %v7638_v1  ;;  %v7640_v50 = vrot.slane %v7638_v1, 4  ;;  %v12317_v0 = vshll.u32 %v12043_v39, 16  ;;  %v12323_v58 = vshll.u32 %v12044_v56, 16 }
 0x2fe   : > { %v12312_v24 = vsel %vm19327_vm5, %v12307_v26, %v12311_v49  ;;  %v12316_v23 = vrot.slane %v12314_v44, 4  ;;  %v12327_v29 = vshrl.u32 %v12044_v56, 16  ;;  %v12333_v33 = vshll.u32 %v12045_v63, 16 }
 0x2ff   : > { %v20469_v18 = vcombine.low %v12302_v12, %v12312_v24  ;;  %v20473_v7 = vsel %vm19360_vm6, %v7640_v50, %v7641_v59  ;;  %v12319_v47 = vrot.slane %v12317_v0, 5  ;;  %v12325_v16 = vrot.slane %v12323_v58, 5  ;;  %v7071_v59 = vld [vmem:[#allocation3 + $0x6c] sm:$0xe]  ;;  %v17329_v24 = vld [vmem:[#allocation3 + $0x64] sm:$0xf] }
 0x300   : > { %v15042_v39 = vcombine.low %v20465_v43, %v20473_v7  ;;  %v12329_v35 = vrot.slane %v12327_v29, 4  ;;  %v12338_v49 = vshrl.u32 %v12046_v27, 16  ;;  %v21709_v4 = vcombine.low %v20297_v13, %v20307_v21  ;;  %v17330_v58 = vld [vmem:[#allocation3 + $0x68] sm:$0x1] }
 0x301   : > { %v12320_v37 = vor.u32 %v12319_v47, %v12316_v23  ;;  %v12335_v56 = vrot.slane %v12333_v33, 5  ;;  %v12341_v63 = vshll.u32 %v12046_v27, 16  ;;  %v12347_v3 = vshll.u32 %v12047_v61, 16  ;;  %v12049_v23 = vld [vmem:[#allocation2 + $0x78] sm:$0xf] }
 0x302   : > { %16105 = vmatmul.mubr.msk.bf16.gmra.mrb[28].mxu1 %vm5301_vm7, %v21709_v4  ;;  %v21710_v42 = vcombine.low %v20314_v55, %v20331_v20  ;;  %v12330_v1 = vor.u32 %v12329_v35, %v12325_v16  ;;  %v12351_v26 = vshrl.u32 %v12047_v61, 16  ;;  %v12357_v40 = vshll.u32 %v12048_v19, 16  ;;  %v17331_v4 = vld [vmem:[#allocation3 + $0x70] sm:$0xf] }
 0x303   : > { %16421 = vmatmul.mubr.msk.bf16.gmra.mrb[28].mxu0 %vm5005_vm2, %v17215_v15  ;;  %v12340_v15 = vrot.slane %v12338_v49, 4  ;;  %v12321_v13 = vrot.slane %v12320_v37, 4  ;;  %v12343_v21 = vrot.slane %v12341_v63, 5  ;;  %v12349_v44 = vrot.slane %v12347_v3, 5  ;;  %v17332_v63 = vld [vmem:[#allocation3 + $0x74] sm:$0x1] }
 0x304   : > { %16426 = vmatprep.mubr.msk.bf16.mxu0 %vm5301_vm7, %v20359_v41  ;;  %16112 = vmatprep.mubr.msk.bf16.mxu1 %vm5005_vm2, %v21710_v42  ;;  %v15023_v12 = vrot.slane %v7070_v10, 9  ;;  %v12331_v50 = vrot.slane %v12330_v1, 4  ;;  %v12353_v41 = vrot.slane %v12351_v26, 4  ;;  %v12359_v0 = vrot.slane %v12357_v40, 5  ;;  %v12050_v3 = vld [vmem:[#allocation2 + $0x7c] sm:$0xf] }
 0x305   : > { %v7645_v27 = vrot.slane %v17329_v24, 5  ;;  %v12326_v55 = vsel %vm19327_vm5, %v12321_v13, %v12325_v16  ;;  %v12344_v20 = vor.u32 %v12343_v21, %v12340_v15  ;;  %v7648_v29 = vrot.slane %v17330_v58, 5  ;;  %v17218_v42 = vld [vmem:[%s21518_s4 + $0x78] sm:$0xff]   ;;  %v12051_v15 = vld [vmem:[#allocation2 + $0x80] sm:$0x1] }
 0x306   : > { %v15024_v47 = vrot.slane %v7071_v59, 9  ;;  %v12336_v61 = vsel %vm19327_vm5, %v12331_v50, %v12335_v56  ;;  %v12354_v33 = vor.u32 %v12353_v41, %v12349_v44  ;;  %v7652_v37 = vrot.slane %v17331_v4, 5  ;;  %v20510_v59 = vld [vmem:[%s21518_s4 + $0x30] sm:$0xff]   ;;  %v12052_v41 = vld [vmem:[#allocation2 + $0x84] sm:$0xf] }
 0x307   : > { %v20494_v19 = vsel %vm19360_vm6, %v15023_v12, %v7645_v27  ;;  %v7647_v35 = vrot.slane %v7645_v27, 4  ;;  %v20496_v49 = vcombine.low %v12326_v55, %v12336_v61  ;;  %v12345_v10 = vrot.slane %v12344_v20, 4  ;;  %v12053_v24 = vld [vmem:[#allocation2 + $0x88] sm:$0xf]  ;;  %v12054_v27 = vld [vmem:[#allocation2 + $0x8c] sm:$0x1] }
 0x308   : > { %v7655_v16 = vrot.slane %v17332_v63, 5  ;;  %v12355_v56 = vrot.slane %v12354_v33, 4  ;;  %v12362_v26 = vshrl.u32 %v12049_v23, 16  ;;  %v12365_v40 = vshll.u32 %v12049_v23, 16  ;;  %v20535_v23 = vld [vmem:[%s21517_s3 + $0x40] sm:$0xff]  }
 0x309   : > { %v20505_v1 = vsel %vm19360_vm6, %v7647_v35, %v7648_v29  ;;  %v21711_v13 = vcombine.low %v20323_v45, %v20337_v62  ;;  %v20523_v12 = vsel %vm19360_vm6, %v15024_v47, %v7652_v37  ;;  %v7654_v50 = vrot.slane %v7652_v37, 4  ;;  %v7073_v63 = vld [vmem:[#allocation3 + $0x84] sm:$0xe] }
 0x30a   : > { %v15043_v21 = vcombine.low %v20494_v19, %v20505_v1  ;;  %v12364_v45 = vrot.slane %v12362_v26, 4  ;;  %v12367_v62 = vrot.slane %v12365_v40, 5  ;;  %v12375_v54 = vshrl.u32 %v12050_v3, 16 }
 0x30b   : > { %16427 = vmatmul.mubr.msk.bf16.vlgmr.msra.gmra.mrb[0].mxu0 %vm5301_vm7, %v20375_v6  ;;  %16113 = vmatmul.mubr.msk.bf16.vlgmr.msra.gmra.mrb[0].mxu1 %vm5005_vm2, %v21711_v13  ;;  %v12350_v6 = vsel %vm19327_vm5, %v12345_v10, %v12349_v44  ;;  %v12371_v44 = vshll.u32 %v12050_v3, 16  ;;  %v20543_v31 = vsel %vm19360_vm6, %v7654_v50, %v7655_v16  ;;  %v12386_v29 = vshrl.u32 %v12052_v41, 16  ;;  %v12055_v50 = vld [vmem:[#allocation2 + $0x90] sm:$0xf] }
 0x30c   : > { %16459 = vmatpush3.bf16.msra.mxu0 %v20199_v53  ;;  %16145 = vmatpush3.bf16.msra.mxu1 %v20225_v48  ;;  %v12360_v53 = vsel %vm19327_vm5, %v12355_v56, %v12359_v0  ;;  %v7072_v0 = vld [vmem:[#allocation3 + $0x78] sm:$0xe]  ;;  %v15044_v55 = vcombine.low %v20523_v12, %v20543_v31  ;;  %v12368_v20 = vor.u32 %v12367_v62, %v12364_v45  ;;  %v12377_v47 = vrot.slane %v12375_v54, 4  ;;  %v12056_v62 = vld [vmem:[#allocation2 + $0x94] sm:$0xf] }
 0x30d   : > { %16116 = vmatprep.mubr.msk.bf16.mxu1 %vm5005_vm2, %v15037_v30  ;;  %16430 = vmatprep.mubr.msk.bf16.mxu0 %vm5301_vm7, %v20402_v25  ;;  %v20539_v48 = vcombine.low %v12350_v6, %v12360_v53  ;;  %v12381_v30 = vshll.u32 %v12051_v15, 16  ;;  %v12373_v58 = vrot.slane %v12371_v44, 5  ;;  %v12389_v61 = vshll.u32 %v12052_v41, 16  ;;  %v17334_v53 = vld [vmem:[#allocation3 + $0x80] sm:$0x1] }
 0x30e   : > { %16460 = vmatprep.subr.bf16.mxu0 %v17218_v42  ;;  %16178 = vmatprep.subr.bf16.mxu1 %v20510_v59  ;;  %v12395_v33 = vshll.u32 %v12053_v24, 16  ;;  %v12369_v35 = vrot.slane %v12368_v20, 4  ;;  %v12388_v10 = vrot.slane %v12386_v29, 4  ;;  %v12399_v4 = vshrl.u32 %v12053_v24, 16  ;;  %v12058_v54 = vld [vmem:[#allocation2 + $0x9c] sm:$0xf] }
 0x30f   : > { %v12383_v25 = vrot.slane %v12381_v30, 5  ;;  %v12405_v37 = vshll.u32 %v12054_v27, 16  ;;  %v12378_v16 = vor.u32 %v12377_v47, %v12373_v58  ;;  %v12391_v3 = vrot.slane %v12389_v61, 5  ;;  %v17336_v20 = vld [vmem:[#allocation3 + $0x8c] sm:$0x1] }
 0x310   : > { %16461 = vmatpush3.bf16.msra.mxu0 %v17218_v42  ;;  %v12397_v56 = vrot.slane %v12395_v33, 5  ;;  %v15025_v15 = vrot.slane %v7072_v0, 9  ;;  %v12374_v26 = vsel %vm19327_vm5, %v12369_v35, %v12373_v58  ;;  %v12401_v40 = vrot.slane %v12399_v4, 4  ;;  %v17333_v42 = vld [vmem:[#allocation3 + $0x7c] sm:$0xf] }
 0x311   : > { %16494 = vmatprep.subr.bf16.mxu0 %v20535_v23  ;;  %v12407_v13 = vrot.slane %v12405_v37, 5  ;;  %v7659_v6 = vrot.slane %v17333_v42, 5  ;;  %v12379_v41 = vrot.slane %v12378_v16, 4  ;;  %v12392_v24 = vor.u32 %v12391_v3, %v12388_v10  ;;  %v12059_v16 = vld [vmem:[#allocation2 + $0xa0] sm:$0xf] }
 0x312   : > { %v15026_v45 = vrot.slane %v7073_v63, 9  ;;  %v12402_v44 = vor.u32 %v12401_v40, %v12397_v56  ;;  %v7669_v58 = vrot.slane %v17336_v20, 5  ;;  %v12410_v29 = vshrl.u32 %v12055_v50, 16 }
 0x313   : > { %16431 = vmatmul.mubr.msk.bf16.gmra.mrb[4].mxu0 %vm5301_vm7, %v20427_v8  ;;  %16117 = vmatmul.mubr.msk.bf16.gmra.mrb[4].mxu1 %vm5005_vm2, %v15038_v51  ;;  %v7662_v8 = vrot.slane %v17334_v53, 5  ;;  %v20565_v38 = vsel %vm19360_vm6, %v15025_v15, %v7659_v6  ;;  %v7661_v36 = vrot.slane %v7659_v6, 4  ;;  %v17335_v51 = vld [vmem:[#allocation3 + $0x88] sm:$0xf]  ;;  %v12384_v30 = vsel %vm19327_vm5, %v12379_v41, %v12383_v25  ;;  %v7074_v41 = vld [vmem:[#allocation3 + $0x90] sm:$0xe] }
 0x314   : > { %16434 = vmatprep.mubr.msk.bf16.mxu0 %vm5301_vm7, %v20453_v9  ;;  %16120 = vmatprep.mubr.msk.bf16.mxu1 %vm5005_vm2, %v15039_v28  ;;  %v7666_v27 = vrot.slane %v17335_v51, 5  ;;  %v12057_v9 = vld [vmem:[#allocation2 + $0x98] sm:$0x1]  ;;  %v12393_v0 = vrot.slane %v12392_v24, 4  ;;  %v20569_v11 = vcombine.low %v12374_v26, %v12384_v30  ;;  %v12403_v52 = vrot.slane %v12402_v44, 4 }
 0x315   : > { %v20573_v28 = vsel %vm19360_vm6, %v7661_v36, %v7662_v8  ;;  %v12412_v35 = vrot.slane %v12410_v29, 4  ;;  %v12413_v4 = vshll.u32 %v12055_v50, 16  ;;  %v12419_v37 = vshll.u32 %v12056_v62, 16 }
 0x316   : > { %v20577_v47 = vsel %vm19360_vm6, %v15026_v45, %v7666_v27  ;;  %v12398_v61 = vsel %vm19327_vm5, %v12393_v0, %v12397_v56  ;;  %v15045_v25 = vcombine.low %v20565_v38, %v20573_v28  ;;  %v7668_v33 = vrot.slane %v7666_v27, 4  ;;  %v12060_v56 = vld [vmem:[#allocation2 + $0xa4] sm:$0x1]  ;;  %v17337_v27 = vld [vmem:[#allocation3 + $0x94] sm:$0xf] }
 0x317   : > { %v12408_v10 = vsel %vm19327_vm5, %v12403_v52, %v12407_v13  ;;  %v12423_v63 = vshrl.u32 %v12056_v62, 16  ;;  %v12429_v26 = vshll.u32 %v12057_v9, 16  ;;  %v12434_v40 = vshrl.u32 %v12058_v54, 16  ;;  %v12062_v52 = vld [vmem:[#allocation2 + $0xac] sm:$0xf] }
 0x318   : > { %v20585_v3 = vcombine.low %v12398_v61, %v12408_v10  ;;  %v20589_v15 = vsel %vm19360_vm6, %v7668_v33, %v7669_v58  ;;  %v12415_v13 = vrot.slane %v12413_v4, 5  ;;  %v12421_v6 = vrot.slane %v12419_v37, 5  ;;  %v12063_v4 = vld [vmem:[#allocation2 + $0xb0] sm:$0x1] }
 0x319   : > { %v15046_v42 = vcombine.low %v20577_v47, %v20589_v15  ;;  %v12425_v50 = vrot.slane %v12423_v63, 4  ;;  %v12431_v24 = vrot.slane %v12429_v26, 5  ;;  %v12436_v53 = vrot.slane %v12434_v40, 4  ;;  %v17339_v26 = vld [vmem:[#allocation3 + $0xa0] sm:$0xf] }
 0x31a   : > { %v12437_v8 = vshll.u32 %v12058_v54, 16  ;;  %v12443_v45 = vshll.u32 %v12059_v16, 16  ;;  %v12416_v62 = vor.u32 %v12415_v13, %v12412_v35  ;;  %v12447_v36 = vshrl.u32 %v12059_v16, 16  ;;  %v12064_v40 = vld [vmem:[#allocation2 + $0xb4] sm:$0xf] }
 0x31b   : > { %16435 = vmatmul.mubr.msk.bf16.gmra.mrb[8].mxu0 %vm5301_vm7, %v20469_v18  ;;  %16121 = vmatmul.mubr.msk.bf16.gmra.mrb[8].mxu1 %vm5005_vm2, %v15040_v57  ;;  %v7075_v18 = vld [vmem:[#allocation3 + $0x9c] sm:$0xe]  ;;  %v12426_v44 = vor.u32 %v12425_v50, %v12421_v6  ;;  %v12453_v51 = vshll.u32 %v12060_v56, 16  ;;  %v15027_v57 = vrot.slane %v7074_v41, 9  ;;  %v7673_v9 = vrot.slane %v17337_v27, 5 }
 0x31c   : > { %16438 = vmatprep.mubr.msk.bf16.mxu0 %vm5301_vm7, %v20496_v49  ;;  %16124 = vmatprep.mubr.msk.bf16.mxu1 %vm5005_vm2, %v15041_v32  ;;  %v12439_v14 = vrot.slane %v12437_v8, 5  ;;  %v12445_v17 = vrot.slane %v12443_v45, 5  ;;  %v12061_v49 = vld [vmem:[#allocation2 + $0xa8] sm:$0xf]  ;;  %v12417_v30 = vrot.slane %v12416_v62, 4  ;;  %v12449_v54 = vrot.slane %v12447_v36, 4 }
 0x31d   : > { %v12427_v0 = vrot.slane %v12426_v44, 4  ;;  %v12455_v20 = vrot.slane %v12453_v51, 5  ;;  %v20607_v34 = vsel %vm19360_vm6, %v15027_v57, %v7673_v9  ;;  %v7675_v46 = vrot.slane %v7673_v9, 4  ;;  %v17338_v32 = vld [vmem:[#allocation3 + $0x98] sm:$0x1] }
 0x31e   : > { %v12440_v58 = vor.u32 %v12439_v14, %v12436_v53  ;;  %v7676_v29 = vrot.slane %v17338_v32, 5  ;;  %v12422_v61 = vsel %vm19327_vm5, %v12417_v30, %v12421_v6  ;;  %v12450_v35 = vor.u32 %v12449_v54, %v12445_v17  ;;  %v17340_v50 = vld [vmem:[#allocation3 + $0xa4] sm:$0x1]  ;;  %v12065_v53 = vld [vmem:[#allocation2 + $0xb8] sm:$0xf] }
 0x31f   : > { %v12432_v33 = vsel %vm19327_vm5, %v12427_v0, %v12431_v24  ;;  %v15028_v10 = vrot.slane %v7075_v18, 9  ;;  %v7680_v56 = vrot.slane %v17339_v26, 5  ;;  %v7683_v41 = vrot.slane %v17340_v50, 5  ;;  %v12066_v14 = vld [vmem:[#allocation2 + $0xbc] sm:$0x1] }
 0x320   : > { %v15405_v37 = vcombine.low %v12422_v61, %v12432_v33  ;;  %v12441_v63 = vrot.slane %v12440_v58, 4  ;;  %v20615_v16 = vsel %vm19360_vm6, %v7675_v46, %v7676_v29  ;;  %v12451_v13 = vrot.slane %v12450_v35, 4  ;;  %v7077_v27 = vld [vmem:[#allocation3 + $0xb4] sm:$0xe]  ;;  %v12067_v26 = vld [vmem:[#allocation2 + $0xc0] sm:$0xf] }
 0x321   : > { %v15047_v6 = vcombine.low %v20607_v34, %v20615_v16  ;;  %v12458_v24 = vshrl.u32 %v12061_v49, 16  ;;  %v7682_v45 = vrot.slane %v7680_v56, 4  ;;  %v12461_v18 = vshll.u32 %v12061_v49, 16 }
 0x322   : > { %v12446_v8 = vsel %vm19327_vm5, %v12441_v63, %v12445_v17  ;;  %v12456_v43 = vsel %vm19327_vm5, %v12451_v13, %v12455_v20  ;;  %v12477_v51 = vshll.u32 %v12063_v4, 16  ;;  %v7076_v17 = vld [vmem:[#allocation3 + $0xa8] sm:$0xe]  ;;  %v12482_v57 = vshrl.u32 %v12064_v40, 16  ;;  %v17341_v4 = vld [vmem:[#allocation3 + $0xac] sm:$0xf] }
 0x323   : > { %16439 = vmatmul.mubr.msk.bf16.gmra.mrb[12].mxu0 %vm5301_vm7, %v20539_v48  ;;  %16125 = vmatmul.mubr.msk.bf16.gmra.mrb[12].mxu1 %vm5005_vm2, %v15042_v39  ;;  %v20631_v48 = vsel %vm19360_vm6, %v15028_v10, %v7680_v56  ;;  %v12460_v7 = vrot.slane %v12458_v24, 4  ;;  %v12467_v39 = vshll.u32 %v12062_v52, 16  ;;  %v20639_v62 = vcombine.low %v12446_v8, %v12456_v43  ;;  %v17342_v13 = vld [vmem:[#allocation3 + $0xb0] sm:$0x1]  ;;  %v17344_v43 = vld [vmem:[#allocation3 + $0xbc] sm:$0x1] }
 0x324   : > { %16442 = vmatprep.mubr.msk.bf16.mxu0 %vm5301_vm7, %v20569_v11  ;;  %16128 = vmatprep.mubr.msk.bf16.mxu1 %vm5005_vm2, %v15043_v21  ;;  %v12471_v11 = vshrl.u32 %v12062_v52, 16  ;;  %v20643_v44 = vsel %vm19360_vm6, %v7682_v45, %v7683_v41  ;;  %v12463_v36 = vrot.slane %v12461_v18, 5  ;;  %v12479_v49 = vrot.slane %v12477_v51, 5  ;;  %v12068_v41 = vld [vmem:[#allocation2 + $0xc4] sm:$0xf] }
 0x325   : > { %v15048_v19 = vcombine.low %v20631_v48, %v20643_v44  ;;  %v12469_v1 = vrot.slane %v12467_v39, 5  ;;  %v12485_v30 = vshll.u32 %v12064_v40, 16  ;;  %v12491_v0 = vshll.u32 %v12065_v53, 16  ;;  %v12069_v24 = vld [vmem:[#allocation2 + $0xc8] sm:$0x1] }
 0x326   : > { %v12473_v21 = vrot.slane %v12471_v11, 4  ;;  %v12464_v9 = vor.u32 %v12463_v36, %v12460_v7  ;;  %v12484_v20 = vrot.slane %v12482_v57, 4  ;;  %v12495_v58 = vshrl.u32 %v12065_v53, 16  ;;  %v17343_v45 = vld [vmem:[#allocation3 + $0xb8] sm:$0xf] }
 0x327   : > { %v12501_v46 = vshll.u32 %v12066_v14, 16  ;;  %v12487_v29 = vrot.slane %v12485_v30, 5  ;;  %v12493_v52 = vrot.slane %v12491_v0, 5  ;;  %v15029_v61 = vrot.slane %v7076_v17, 9  ;;  %v12121_v39 = vld [vmem:[#allocation3 + $0x18] sm:$0xf] }
 0x328   : > { %v12474_v54 = vor.u32 %v12473_v21, %v12469_v1  ;;  %v12465_v32 = vrot.slane %v12464_v9, 4  ;;  %v12497_v35 = vrot.slane %v12495_v58, 4  ;;  %v7687_v63 = vrot.slane %v17341_v4, 5  ;;  %v12122_v36 = vld [vmem:[#allocation3 + $0x1c] sm:$0xf] }
 0x329   : > { %v12503_v10 = vrot.slane %v12501_v46, 5  ;;  %v12488_v40 = vor.u32 %v12487_v29, %v12484_v20  ;;  %v7690_v50 = vrot.slane %v17342_v13, 5  ;;  %v7694_v18 = vrot.slane %v17343_v45, 5  ;;  %v12123_v21 = vld [vmem:[#allocation3 + $0x20] sm:$0x1] }
 0x32a   : > { %v12475_v33 = vrot.slane %v12474_v54, 4  ;;  %v12470_v56 = vsel %vm19327_vm5, %v12465_v32, %v12469_v1  ;;  %v12498_v31 = vor.u32 %v12497_v35, %v12493_v52  ;;  %v7697_v7 = vrot.slane %v17344_v43, 5  ;;  %v12124_v30 = vld [vmem:[#allocation3 + $0x24] sm:$0xf]  ;;  %v12127_v13 = vld [vmem:[#allocation3 + $0x30] sm:$0xf] }
 0x32b   : > { %16443 = vmatmul.mubr.msk.bf16.gmra.mrb[16].mxu0 %vm5301_vm7, %v20585_v3  ;;  %16129 = vmatmul.mubr.msk.bf16.gmra.mrb[16].mxu1 %vm5005_vm2, %v15044_v55  ;;  %v15030_v3 = vrot.slane %v7077_v27, 9  ;;  %v20664_v55 = vsel %vm19360_vm6, %v15029_v61, %v7687_v63  ;;  %v12489_v8 = vrot.slane %v12488_v40, 4  ;;  %v12509_v11 = vshll.u32 %v12067_v26, 16  ;;  %v12125_v61 = vld [vmem:[#allocation3 + $0x28] sm:$0xf] }
 0x32c   : > { %16446 = vmatprep.mubr.msk.bf16.mxu0 %vm5301_vm7, %v15405_v37  ;;  %16132 = vmatprep.mubr.msk.bf16.mxu1 %vm5005_vm2, %v15045_v25  ;;  %v12480_v12 = vsel %vm19327_vm5, %v12475_v33, %v12479_v49  ;;  %v7689_v37 = vrot.slane %v7687_v63, 4  ;;  %v12499_v38 = vrot.slane %v12498_v31, 4  ;;  %v12506_v25 = vshrl.u32 %v12067_v26, 16  ;;  %v12126_v63 = vld [vmem:[#allocation3 + $0x2c] sm:$0x1] }
 0x32d   : > { %v15407_v53 = vcombine.low %v12470_v56, %v12480_v12  ;;  %v12494_v51 = vsel %vm19327_vm5, %v12489_v8, %v12493_v52  ;;  %v20676_v17 = vsel %vm19360_vm6, %v15030_v3, %v7694_v18  ;;  %v7696_v1 = vrot.slane %v7694_v18, 4 }
 0x32e   : > { %v20668_v28 = vsel %vm19360_vm6, %v7689_v37, %v7690_v50  ;;  %v12504_v57 = vsel %vm19327_vm5, %v12499_v38, %v12503_v10  ;;  %v12508_v27 = vrot.slane %v12506_v25, 4  ;;  %v12511_v9 = vrot.slane %v12509_v11, 5  ;;  %v12129_v38 = vld [vmem:[#allocation3 + $0x38] sm:$0x1] }
 0x32f   : > { %v15049_v14 = vcombine.low %v20664_v55, %v20668_v28  ;;  %v12515_v49 = vshll.u32 %v12068_v41, 16  ;;  %v15408_v0 = vcombine.low %v12494_v51, %v12504_v57  ;;  %v20682_v54 = vsel %vm19360_vm6, %v7696_v1, %v7697_v7 }
 0x330   : > { %v12519_v20 = vshrl.u32 %v12068_v41, 16  ;;  %v12525_v58 = vshll.u32 %v12069_v24, 16  ;;  %v15050_v46 = vcombine.low %v20676_v17, %v20682_v54  ;;  %v12512_v32 = vor.u32 %v12511_v9, %v12508_v27 }
 0x331   : > { %v12517_v29 = vrot.slane %v12515_v49, 5  ;;  %v12852_v52 = vshrl.u32 %v12121_v39, 16  ;;  %v12855_v10 = vshll.u32 %v12121_v39, 16  ;;  %v12861_v4 = vshll.u32 %v12122_v36, 16 }
 0x332   : > { %v12521_v33 = vrot.slane %v12519_v20, 4  ;;  %v12527_v35 = vrot.slane %v12525_v58, 5  ;;  %v12865_v56 = vshrl.u32 %v12122_v36, 16  ;;  %v12871_v40 = vshll.u32 %v12123_v21, 16  ;;  %v12130_v21 = vld [vmem:[#allocation3 + $0x3c] sm:$0xf] }
 0x333   : > { %16447 = vmatmul.mubr.msk.bf16.gmra.mrb[20].mxu0 %vm5301_vm7, %v20639_v62  ;;  %16133 = vmatmul.mubr.msk.bf16.gmra.mrb[20].mxu1 %vm5005_vm2, %v15046_v42  ;;  %v12513_v62 = vrot.slane %v12512_v32, 4  ;;  %v12854_v26 = vrot.slane %v12852_v52, 4  ;;  %v12857_v15 = vrot.slane %v12855_v10, 5  ;;  %v12863_v42 = vrot.slane %v12861_v4, 5  ;;  %v12132_v52 = vld [vmem:[#allocation3 + $0x44] sm:$0x1] }
 0x334   : > { %16450 = vmatprep.mubr.msk.bf16.mxu0 %vm5301_vm7, %v15407_v53  ;;  %16136 = vmatprep.mubr.msk.bf16.mxu1 %vm5005_vm2, %v15047_v6  ;;  %v12522_v47 = vor.u32 %v12521_v33, %v12517_v29  ;;  %v12876_v50 = vshrl.u32 %v12124_v30, 16  ;;  %v12867_v41 = vrot.slane %v12865_v56, 4  ;;  %v12873_v12 = vrot.slane %v12871_v40, 5  ;;  %v12128_v6 = vld [vmem:[#allocation3 + $0x34] sm:$0xf] }
 0x335   : > { %v12518_v3 = vsel %vm19327_vm5, %v12513_v62, %v12517_v29  ;;  %v12879_v31 = vshll.u32 %v12124_v30, 16  ;;  %v12858_v24 = vor.u32 %v12857_v15, %v12854_v26  ;;  %v12885_v16 = vshll.u32 %v12125_v61, 16  ;;  %v12131_v30 = vld [vmem:[#allocation3 + $0x40] sm:$0xf]  ;;  %v12134_v62 = vld [vmem:[#allocation3 + $0x4c] sm:$0xf] }
 0x336   : > { %v12523_v37 = vrot.slane %v12522_v47, 4  ;;  %v12878_v34 = vrot.slane %v12876_v50, 4  ;;  %v12868_v53 = vor.u32 %v12867_v41, %v12863_v42  ;;  %v12889_v45 = vshrl.u32 %v12125_v61, 16  ;;  %v17219_v26 = vld [vmem:[#allocation2 + $0xc] sm:$0xff]  }
 0x337   : > { %v12881_v8 = vrot.slane %v12879_v31, 5  ;;  %v12895_v18 = vshll.u32 %v12126_v63, 16  ;;  %v12859_v7 = vrot.slane %v12858_v24, 4  ;;  %v12887_v39 = vrot.slane %v12885_v16, 5 }
 0x338   : > { %v12528_v43 = vsel %vm19327_vm5, %v12523_v37, %v12527_v35  ;;  %v12900_v25 = vshrl.u32 %v12127_v13, 16  ;;  %v12869_v36 = vrot.slane %v12868_v53, 4  ;;  %v12891_v1 = vrot.slane %v12889_v45, 4 }
 0x339   : > { %v15409_v11 = vcombine.low %v12518_v3, %v12528_v43  ;;  %v12882_v51 = vor.u32 %v12881_v8, %v12878_v34  ;;  %v12864_v57 = vsel %vm19327_vm5, %v12859_v7, %v12863_v42  ;;  %v12897_v27 = vrot.slane %v12895_v18, 5  ;;  %v12136_v43 = vld [vmem:[#allocation3 + $0x54] sm:$0xf] }
 0x33a   : > { %v12902_v9 = vrot.slane %v12900_v25, 4  ;;  %v12903_v49 = vshll.u32 %v12127_v13, 16  ;;  %v12892_v44 = vor.u32 %v12891_v1, %v12887_v39  ;;  %v12913_v32 = vshrl.u32 %v12128_v6, 16 }
 0x33b   : > { %16451 = vmatmul.mubr.msk.bf16.gmra.mrb[24].mxu0 %vm5301_vm7, %v15408_v0  ;;  %16137 = vmatmul.mubr.msk.bf16.gmra.mrb[24].mxu1 %vm5005_vm2, %v15048_v19  ;;  %v12874_v0 = vsel %vm19327_vm5, %v12869_v36, %v12873_v12  ;;  %v12883_v48 = vrot.slane %v12882_v51, 4  ;;  %v12909_v19 = vshll.u32 %v12128_v6, 16  ;;  %v12919_v29 = vshll.u32 %v12129_v38, 16  ;;  %v12135_v6 = vld [vmem:[#allocation3 + $0x50] sm:$0x1]  ;;  %v17220_v51 = vld [vmem:[#allocation2 + $0x18] sm:$0xff]  }
 0x33c   : > { %16140 = vmatprep.mubr.msk.bf16.mxu1 %vm5005_vm2, %v15049_v14  ;;  %16454 = vmatprep.mubr.msk.bf16.mxu0 %vm5301_vm7, %v15409_v11  ;;  %v15432_v20 = vcombine.low %v12864_v57, %v12874_v0  ;;  %v12905_v58 = vrot.slane %v12903_v49, 5  ;;  %v12893_v33 = vrot.slane %v12892_v44, 4  ;;  %v12924_v28 = vshrl.u32 %v12130_v21, 16  ;;  %v12133_v14 = vld [vmem:[#allocation3 + $0x48] sm:$0xf]  ;;  %v17223_v49 = vld [vmem:[#allocation2 + $0x24] sm:$0xff]  }
 0x33d   : > { %v12888_v61 = vsel %vm19327_vm5, %v12883_v48, %v12887_v39  ;;  %v12911_v55 = vrot.slane %v12909_v19, 5  ;;  %v12915_v10 = vrot.slane %v12913_v32, 4  ;;  %v12921_v4 = vrot.slane %v12919_v29, 5  ;;  %v12137_v39 = vld [vmem:[#allocation3 + $0x58] sm:$0xf] }
 0x33e   : > { %v12906_v35 = vor.u32 %v12905_v58, %v12902_v9  ;;  %v12927_v63 = vshll.u32 %v12130_v21, 16  ;;  %v12898_v56 = vsel %vm19327_vm5, %v12893_v33, %v12897_v27  ;;  %v12926_v40 = vrot.slane %v12924_v28, 4  ;;  %v12138_v27 = vld [vmem:[#allocation3 + $0x5c] sm:$0x1]  ;;  %v12139_v19 = vld [vmem:[#allocation3 + $0x60] sm:$0xf] }
 0x33f   : > { %v12933_v13 = vshll.u32 %v12131_v30, 16  ;;  %v12937_v47 = vshrl.u32 %v12131_v30, 16  ;;  %v15433_v15 = vcombine.low %v12888_v61, %v12898_v56  ;;  %v12916_v50 = vor.u32 %v12915_v10, %v12911_v55  ;;  %v17231_v61 = vld [vmem:[%s21518_s4 + $0x38] sm:$0xff]  }
 0x340   : > { %v12907_v42 = vrot.slane %v12906_v35, 4  ;;  %v12929_v3 = vrot.slane %v12927_v63, 5  ;;  %v12943_v31 = vshll.u32 %v12132_v52, 16  ;;  %v12948_v37 = vshrl.u32 %v12133_v14, 16  ;;  %v12140_v52 = vld [vmem:[#allocation3 + $0x64] sm:$0xf] }
 0x341   : > { %v12935_v41 = vrot.slane %v12933_v13, 5  ;;  %v12939_v12 = vrot.slane %v12937_v47, 4  ;;  %v12917_v34 = vrot.slane %v12916_v50, 4  ;;  %v12951_v53 = vshll.u32 %v12133_v14, 16  ;;  %v20742_v35 = vld [vmem:[%s21518_s4 + $0x80] sm:$0xff]  }
 0x342   : > { %v12912_v24 = vsel %vm19327_vm5, %v12907_v42, %v12911_v55  ;;  %v12930_v16 = vor.u32 %v12929_v3, %v12926_v40  ;;  %v12945_v8 = vrot.slane %v12943_v31, 5  ;;  %v12950_v45 = vrot.slane %v12948_v37, 4  ;;  %v12141_v63 = vld [vmem:[#allocation3 + $0x68] sm:$0x1] }
 0x343   : > { %16455 = vmatmul.mubr.msk.bf16.gmra.mrb[28].mxu0 %vm5301_vm7, %v19618_v5  ;;  %16141 = vmatmul.mubr.msk.bf16.gmra.mrb[28].mxu1 %vm5005_vm2, %v15050_v46  ;;  %v12940_v5 = vor.u32 %v12939_v12, %v12935_v41  ;;  %v12957_v18 = vshll.u32 %v12134_v62, 16  ;;  %v12922_v17 = vsel %vm19327_vm5, %v12917_v34, %v12921_v4  ;;  %v12953_v46 = vrot.slane %v12951_v53, 5  ;;  %v17224_v34 = vld [vmem:[#allocation2 + $0x30] sm:$0xff]  }
 0x344   : > { %16462 = vmatprep.mubr.msk.bf16.mxu0 %vm5005_vm2, %v15432_v20  ;;  %16146 = vmatprep.mubr.msk.bf16.mxu1 %vm5301_vm7, %v17219_v26  ;;  %v12931_v54 = vrot.slane %v12930_v16, 4  ;;  %v12961_v7 = vshrl.u32 %v12134_v62, 16  ;;  %v15434_v38 = vcombine.low %v12912_v24, %v12922_v17  ;;  %v12967_v36 = vshll.u32 %v12135_v6, 16 }
 0x345   : > { %v12941_v25 = vrot.slane %v12940_v5, 4  ;;  %v12959_v11 = vrot.slane %v12957_v18, 5  ;;  %v12954_v21 = vor.u32 %v12953_v46, %v12950_v45  ;;  %v12972_v9 = vshrl.u32 %v12136_v43, 16 }
 0x346   : > { %v12936_v1 = vsel %vm19327_vm5, %v12931_v54, %v12935_v41  ;;  %v12963_v57 = vrot.slane %v12961_v7, 4  ;;  %v12969_v0 = vrot.slane %v12967_v36, 5  ;;  %v12975_v48 = vshll.u32 %v12136_v43, 16  ;;  %v12143_v41 = vld [vmem:[#allocation3 + $0x70] sm:$0xf] }
 0x347   : > { %v12946_v30 = vsel %vm19327_vm5, %v12941_v25, %v12945_v8  ;;  %v12981_v44 = vshll.u32 %v12137_v39, 16  ;;  %v12955_v58 = vrot.slane %v12954_v21, 4  ;;  %v12974_v29 = vrot.slane %v12972_v9, 4  ;;  %v17225_v8 = vld [vmem:[#allocation2 + $0x3c] sm:$0xff]   ;;  %v12144_v43 = vld [vmem:[#allocation3 + $0x74] sm:$0x1] }
 0x348   : > { %v15435_v20 = vcombine.low %v12936_v1, %v12946_v30  ;;  %v12964_v32 = vor.u32 %v12963_v57, %v12959_v11  ;;  %v12977_v33 = vrot.slane %v12975_v48, 5  ;;  %v12985_v28 = vshrl.u32 %v12137_v39, 16  ;;  %v12145_v25 = vld [vmem:[#allocation3 + $0x78] sm:$0xf]  ;;  %v12146_v21 = vld [vmem:[#allocation3 + $0x7c] sm:$0xf] }
 0x349   : > { %v12983_v55 = vrot.slane %v12981_v44, 5  ;;  %v12991_v14 = vshll.u32 %v12138_v27, 16  ;;  %v12960_v10 = vsel %vm19327_vm5, %v12955_v58, %v12959_v11  ;;  %v12996_v62 = vshrl.u32 %v12139_v19, 16  ;;  %v12147_v48 = vld [vmem:[#allocation3 + $0x80] sm:$0x1] }
 0x34a   : > { %v12965_v4 = vrot.slane %v12964_v32, 4  ;;  %v12999_v26 = vshll.u32 %v12139_v19, 16  ;;  %v12978_v56 = vor.u32 %v12977_v33, %v12974_v29  ;;  %v12987_v40 = vrot.slane %v12985_v28, 4 }
 0x34b   : > { %16463 = vmatmul.mubr.msk.bf16.vlgmr.msra.gmra.mrb[0].mxu0 %vm5005_vm2, %v15433_v15  ;;  %16147 = vmatmul.mubr.msk.bf16.vlgmr.msra.gmra.mrb[0].mxu1 %vm5301_vm7, %v17220_v51  ;;  %v12993_v13 = vrot.slane %v12991_v14, 5  ;;  %v13005_v47 = vshll.u32 %v12140_v52, 16  ;;  %v12142_v15 = vld [vmem:[#allocation3 + $0x6c] sm:$0xf]  ;;  %v12998_v42 = vrot.slane %v12996_v62, 4  ;;  %v13009_v3 = vshrl.u32 %v12140_v52, 16 }
 0x34c   : > { %16495 = vmatpush3.bf16.msra.mxu0 %v20535_v23  ;;  %16179 = vmatpush3.bf16.msra.mxu1 %v20510_v59  ;;  %v12970_v23 = vsel %vm19327_vm5, %v12965_v4, %v12969_v0  ;;  %v13001_v50 = vrot.slane %v12999_v26, 5  ;;  %v20756_v59 = vld [vmem:[%s21517_s3 + $0x20] sm:$0xff]   ;;  %v12979_v31 = vrot.slane %v12978_v56, 4  ;;  %v12988_v37 = vor.u32 %v12987_v40, %v12983_v55  ;;  %v12148_v52 = vld [vmem:[#allocation3 + $0x84] sm:$0xf]  ;;  %v17227_v56 = vld [vmem:[#allocation2 + $0x54] sm:$0xff]  }
 0x34d   : > { %16150 = vmatprep.mubr.msk.bf16.mxu1 %vm5301_vm7, %v17223_v49  ;;  %16466 = vmatprep.mubr.msk.bf16.mxu0 %vm5005_vm2, %v15434_v38  ;;  %v15436_v12 = vcombine.low %v12960_v10, %v12970_v23  ;;  %v13007_v24 = vrot.slane %v13005_v47, 5  ;;  %v13011_v6 = vrot.slane %v13009_v3, 4  ;;  %v13015_v53 = vshll.u32 %v12141_v63, 16  ;;  %v12149_v14 = vld [vmem:[#allocation3 + $0x88] sm:$0xf]  ;;  %v17226_v10 = vld [vmem:[#allocation2 + $0x48] sm:$0xff]  }
 0x34e   : > { %16180 = vmatprep.subr.bf16.mxu1 %v17231_v61  ;;  %16528 = vmatprep.subr.bf16.mxu0 %v20742_v35  ;;  %v13002_v16 = vor.u32 %v13001_v50, %v12998_v42  ;;  %v13020_v5 = vshrl.u32 %v12142_v15, 16  ;;  %v12984_v45 = vsel %vm19327_vm5, %v12979_v31, %v12983_v55  ;;  %v12989_v18 = vrot.slane %v12988_v37, 4  ;;  %v12150_v3 = vld [vmem:[#allocation3 + $0x8c] sm:$0x1] }
 0x34f   : > { %v13023_v17 = vshll.u32 %v12142_v15, 16  ;;  %v13029_v54 = vshll.u32 %v12143_v41, 16  ;;  %v13012_v7 = vor.u32 %v13011_v6, %v13007_v24  ;;  %v13017_v39 = vrot.slane %v13015_v53, 5 }
 0x350   : > { %16181 = vmatpush3.bf16.msra.mxu1 %v17231_v61  ;;  %v13003_v46 = vrot.slane %v13002_v16, 4  ;;  %v13022_v38 = vrot.slane %v13020_v5, 4  ;;  %v12994_v11 = vsel %vm19327_vm5, %v12989_v18, %v12993_v13  ;;  %v13033_v1 = vshrl.u32 %v12143_v41, 16  ;;  %v12152_v16 = vld [vmem:[#allocation3 + $0x94] sm:$0xf] }
 0x351   : > { %16214 = vmatprep.subr.bf16.mxu1 %v20756_v59  ;;  %v13025_v36 = vrot.slane %v13023_v17, 5  ;;  %v13031_v51 = vrot.slane %v13029_v54, 5  ;;  %v15437_v57 = vcombine.low %v12984_v45, %v12994_v11  ;;  %v13013_v9 = vrot.slane %v13012_v7, 4  ;;  %v12153_v7 = vld [vmem:[#allocation3 + $0x98] sm:$0x1] }
 0x352   : > { %v13008_v27 = vsel %vm19327_vm5, %v13003_v46, %v13007_v24  ;;  %v13039_v49 = vshll.u32 %v12144_v43, 16  ;;  %v13035_v0 = vrot.slane %v13033_v1, 4  ;;  %v13044_v44 = vshrl.u32 %v12145_v25, 16 }
 0x353   : > { %16467 = vmatmul.mubr.msk.bf16.gmra.mrb[4].mxu0 %vm5005_vm2, %v15435_v20  ;;  %16151 = vmatmul.mubr.msk.bf16.gmra.mrb[4].mxu1 %vm5301_vm7, %v17224_v34  ;;  %v13026_v30 = vor.u32 %v13025_v36, %v13022_v38  ;;  %v13047_v19 = vshll.u32 %v12145_v25, 16  ;;  %v13018_v20 = vsel %vm19327_vm5, %v13013_v9, %v13017_v39  ;;  %v13053_v32 = vshll.u32 %v12146_v21, 16  ;;  %v12154_v25 = vld [vmem:[#allocation3 + $0x9c] sm:$0xf] }
 0x354   : > { %16470 = vmatprep.mubr.msk.bf16.mxu0 %vm5005_vm2, %v15436_v12  ;;  %16154 = vmatprep.mubr.msk.bf16.mxu1 %vm5301_vm7, %v17225_v8  ;;  %v13041_v58 = vrot.slane %v13039_v49, 5  ;;  %v13057_v29 = vshrl.u32 %v12146_v21, 16  ;;  %v15438_v61 = vcombine.low %v13008_v27, %v13018_v20  ;;  %v13036_v55 = vor.u32 %v13035_v0, %v13031_v51  ;;  %v12151_v12 = vld [vmem:[#allocation3 + $0x90] sm:$0xf]  ;;  %v12155_v21 = vld [vmem:[#allocation3 + $0xa0] sm:$0xf] }
 0x355   : > { %v13027_v33 = vrot.slane %v13026_v30, 4  ;;  %v13046_v28 = vrot.slane %v13044_v44, 4  ;;  %v13049_v4 = vrot.slane %v13047_v19, 5  ;;  %v13055_v63 = vrot.slane %v13053_v32, 5  ;;  %v17229_v0 = vld [vmem:[#allocation2 + $0x6c] sm:$0xff]  }
 0x356   : > { %v13059_v62 = vrot.slane %v13057_v29, 4  ;;  %v13063_v26 = vshll.u32 %v12147_v48, 16  ;;  %v13037_v13 = vrot.slane %v13036_v55, 4  ;;  %v13068_v47 = vshrl.u32 %v12148_v52, 16  ;;  %v12156_v20 = vld [vmem:[#allocation3 + $0xa4] sm:$0x1] }
 0x357   : > { %v13032_v40 = vsel %vm19327_vm5, %v13027_v33, %v13031_v51  ;;  %v13071_v15 = vshll.u32 %v12148_v52, 16  ;;  %v13050_v23 = vor.u32 %v13049_v4, %v13046_v28  ;;  %v13077_v41 = vshll.u32 %v12149_v14, 16  ;;  %v12157_v33 = vld [vmem:[#allocation3 + $0xa8] sm:$0xf] }
 0x358   : > { %v13060_v42 = vor.u32 %v13059_v62, %v13055_v63  ;;  %v13065_v50 = vrot.slane %v13063_v26, 5  ;;  %v13042_v31 = vsel %vm19327_vm5, %v13037_v13, %v13041_v58  ;;  %v13070_v37 = vrot.slane %v13068_v47, 4 }
 0x359   : > { %v13073_v24 = vrot.slane %v13071_v15, 5  ;;  %v13081_v34 = vshrl.u32 %v12149_v14, 16  ;;  %v15439_v6 = vcombine.low %v13032_v40, %v13042_v31  ;;  %v13051_v53 = vrot.slane %v13050_v23, 4 }
 0x35a   : > { %v13061_v5 = vrot.slane %v13060_v42, 4  ;;  %v13079_v8 = vrot.slane %v13077_v41, 5  ;;  %v13087_v43 = vshll.u32 %v12150_v3, 16  ;;  %v13092_v17 = vshrl.u32 %v12151_v12, 16  ;;  %v12159_v3 = vld [vmem:[#allocation3 + $0xb0] sm:$0x1] }
 0x35b   : > { %16471 = vmatmul.mubr.msk.bf16.gmra.mrb[8].mxu0 %vm5005_vm2, %v15437_v57  ;;  %16155 = vmatmul.mubr.msk.bf16.gmra.mrb[8].mxu1 %vm5301_vm7, %v17226_v10  ;;  %v13074_v45 = vor.u32 %v13073_v24, %v13070_v37  ;;  %v13083_v18 = vrot.slane %v13081_v34, 4  ;;  %v13056_v54 = vsel %vm19327_vm5, %v13051_v53, %v13055_v63  ;;  %v13095_v39 = vshll.u32 %v12151_v12, 16  ;;  %v17228_v57 = vld [vmem:[#allocation2 + $0x60] sm:$0xff]   ;;  %v12160_v34 = vld [vmem:[#allocation3 + $0xb4] sm:$0xf] }
 0x35c   : > { %16474 = vmatprep.mubr.msk.bf16.mxu0 %vm5005_vm2, %v15438_v61  ;;  %16158 = vmatprep.mubr.msk.bf16.mxu1 %vm5301_vm7, %v17227_v56  ;;  %v13066_v46 = vsel %vm19327_vm5, %v13061_v5, %v13065_v50  ;;  %v13101_v38 = vshll.u32 %v12152_v16, 16  ;;  %v13089_v1 = vrot.slane %v13087_v43, 5  ;;  %v13094_v27 = vrot.slane %v13092_v17, 4  ;;  %v12158_v56 = vld [vmem:[#allocation3 + $0xac] sm:$0xf] }
 0x35d   : > { %v15440_v11 = vcombine.low %v13056_v54, %v13066_v46  ;;  %v13075_v36 = vrot.slane %v13074_v45, 4  ;;  %v13084_v51 = vor.u32 %v13083_v18, %v13079_v8  ;;  %v13097_v9 = vrot.slane %v13095_v39, 5  ;;  %v12161_v45 = vld [vmem:[#allocation3 + $0xb8] sm:$0xf]  ;;  %v17232_v18 = vld [vmem:[#allocation2 + $0x84] sm:$0xff]  }
 0x35e   : > { %v13103_v49 = vrot.slane %v13101_v38, 5  ;;  %v13105_v30 = vshrl.u32 %v12152_v16, 16  ;;  %v13111_v19 = vshll.u32 %v12153_v7, 16  ;;  %v13116_v58 = vshrl.u32 %v12154_v25, 16  ;;  %v17230_v16 = vld [vmem:[#allocation2 + $0x78] sm:$0xff]  }
 0x35f   : > { %v13080_v48 = vsel %vm19327_vm5, %v13075_v36, %v13079_v8  ;;  %v13085_v44 = vrot.slane %v13084_v51, 4  ;;  %v13098_v32 = vor.u32 %v13097_v9, %v13094_v27  ;;  %v13119_v52 = vshll.u32 %v12154_v25, 16  ;;  %v12162_v25 = vld [vmem:[#allocation3 + $0xbc] sm:$0x1] }
 0x360   : > { %v13107_v29 = vrot.slane %v13105_v30, 4  ;;  %v13125_v61 = vshll.u32 %v12155_v21, 16  ;;  %v13113_v28 = vrot.slane %v13111_v19, 5  ;;  %v13118_v14 = vrot.slane %v13116_v58, 4 }
 0x361   : > { %v13090_v55 = vsel %vm19327_vm5, %v13085_v44, %v13089_v1  ;;  %v13129_v10 = vshrl.u32 %v12155_v21, 16  ;;  %v13099_v63 = vrot.slane %v13098_v32, 4  ;;  %v13121_v26 = vrot.slane %v13119_v52, 5 }
 0x362   : > { %v15441_v4 = vcombine.low %v13080_v48, %v13090_v55  ;;  %v13108_v62 = vor.u32 %v13107_v29, %v13103_v49  ;;  %v13127_v40 = vrot.slane %v13125_v61, 5  ;;  %v13135_v47 = vshll.u32 %v12156_v20, 16  ;;  %v12165_v29 = vld [vmem:[#allocation3 + $0xc8] sm:$0x1] }
 0x363   : > { %16475 = vmatmul.mubr.msk.bf16.gmra.mrb[12].mxu0 %vm5005_vm2, %v15439_v6  ;;  %16159 = vmatmul.mubr.msk.bf16.gmra.mrb[12].mxu1 %vm5301_vm7, %v17228_v57  ;;  %v13131_v13 = vrot.slane %v13129_v10, 4  ;;  %v13140_v15 = vshrl.u32 %v12157_v33, 16  ;;  %v13104_v23 = vsel %vm19327_vm5, %v13099_v63, %v13103_v49  ;;  %v13122_v50 = vor.u32 %v13121_v26, %v13118_v14  ;;  %v12163_v57 = vld [vmem:[#allocation3 + $0xc0] sm:$0xf]  ;;  %v12166_v10 = vld [vmem:[#allocation3 + $0xcc] sm:$0xf] }
 0x364   : > { %16478 = vmatprep.mubr.msk.bf16.mxu0 %vm5005_vm2, %v15440_v11  ;;  %16162 = vmatprep.mubr.msk.bf16.mxu1 %vm5301_vm7, %v17229_v0  ;;  %v13109_v42 = vrot.slane %v13108_v62, 4  ;;  %v13143_v41 = vshll.u32 %v12157_v33, 16  ;;  %v13137_v31 = vrot.slane %v13135_v47, 5  ;;  %v13149_v24 = vshll.u32 %v12158_v56, 16  ;;  %v12164_v0 = vld [vmem:[#allocation3 + $0xc4] sm:$0xf] }
 0x365   : > { %v13132_v12 = vor.u32 %v13131_v13, %v13127_v40  ;;  %v13142_v37 = vrot.slane %v13140_v15, 4  ;;  %v13123_v53 = vrot.slane %v13122_v50, 4  ;;  %v13153_v8 = vshrl.u32 %v12158_v56, 16  ;;  %v17234_v13 = vld [vmem:[#allocation2 + $0x9c] sm:$0xff]  }
 0x366   : > { %v13114_v6 = vsel %vm19327_vm5, %v13109_v42, %v13113_v28  ;;  %v13145_v5 = vrot.slane %v13143_v41, 5  ;;  %v13151_v54 = vrot.slane %v13149_v24, 5  ;;  %v13159_v46 = vshll.u32 %v12159_v3, 16  ;;  %v12168_v24 = vld [vmem:[#allocation3 + $0xd4] sm:$0x1] }
 0x367   : > { %v15442_v43 = vcombine.low %v13104_v23, %v13114_v6  ;;  %v13133_v17 = vrot.slane %v13132_v12, 4  ;;  %v13128_v7 = vsel %vm19327_vm5, %v13123_v53, %v13127_v40  ;;  %v13155_v38 = vrot.slane %v13153_v8, 4  ;;  %v12167_v40 = vld [vmem:[#allocation3 + $0xd0] sm:$0xf] }
 0x368   : > { %v13146_v39 = vor.u32 %v13145_v5, %v13142_v37  ;;  %v13164_v11 = vshrl.u32 %v12160_v34, 16  ;;  %v13161_v51 = vrot.slane %v13159_v46, 5  ;;  %v13167_v1 = vshll.u32 %v12160_v34, 16 }
 0x369   : > { %v13138_v36 = vsel %vm19327_vm5, %v13133_v17, %v13137_v31  ;;  %v13173_v21 = vshll.u32 %v12161_v45, 16  ;;  %v13156_v49 = vor.u32 %v13155_v38, %v13151_v54  ;;  %v13177_v19 = vshrl.u32 %v12161_v45, 16 }
 0x36a   : > { %v15443_v27 = vcombine.low %v13128_v7, %v13138_v36  ;;  %v13147_v9 = vrot.slane %v13146_v39, 4  ;;  %v13166_v30 = vrot.slane %v13164_v11, 4  ;;  %v13169_v48 = vrot.slane %v13167_v1, 5  ;;  %v17345_v36 = vld [vmem:[#allocation2 + $0x1c] sm:$0xf]  ;;  %v17235_v1 = vld [vmem:[#allocation2 + $0xa8] sm:$0xff]  }
 0x36b   : > { %16479 = vmatmul.mubr.msk.bf16.gmra.mrb[16].mxu0 %vm5005_vm2, %v15441_v4  ;;  %16163 = vmatmul.mubr.msk.bf16.gmra.mrb[16].mxu1 %vm5301_vm7, %v17230_v16  ;;  %v13175_v44 = vrot.slane %v13173_v21, 5  ;;  %v13183_v20 = vshll.u32 %v12162_v25, 16  ;;  %v13157_v32 = vrot.slane %v13156_v49, 4  ;;  %v13188_v52 = vshrl.u32 %v12163_v57, 16  ;;  %v17233_v4 = vld [vmem:[#allocation2 + $0x90] sm:$0xff]  }
 0x36c   : > { %16482 = vmatprep.mubr.msk.bf16.mxu0 %vm5005_vm2, %v15442_v43  ;;  %16166 = vmatprep.mubr.msk.bf16.mxu1 %vm5301_vm7, %v17232_v18  ;;  %v13152_v58 = vsel %vm19327_vm5, %v13147_v9, %v13151_v54  ;;  %v13191_v61 = vshll.u32 %v12163_v57, 16  ;;  %v13170_v33 = vor.u32 %v13169_v48, %v13166_v30  ;;  %v13179_v55 = vrot.slane %v13177_v19, 4  ;;  %v13541_v54 = vld [vmem:[#allocation2 + $0x18] sm:$0xe]  ;;  %v17346_v48 = vld [vmem:[#allocation2 + $0x20] sm:$0x1] }
 0x36d   : > { %v13185_v28 = vrot.slane %v13183_v20, 5  ;;  %v13197_v14 = vshll.u32 %v12164_v0, 16  ;;  %v13162_v63 = vsel %vm19327_vm5, %v13157_v32, %v13161_v51  ;;  %v13190_v62 = vrot.slane %v13188_v52, 4  ;;  %v17236_v9 = vld [vmem:[#allocation2 + $0xb4] sm:$0xff]   ;;  %v13542_v19 = vld [vmem:[#allocation2 + $0x24] sm:$0xe] }
 0x36e   : > { %v13193_v26 = vrot.slane %v13191_v61, 5  ;;  %v13201_v56 = vshrl.u32 %v12164_v0, 16  ;;  %v15444_v47 = vcombine.low %v13152_v58, %v13162_v63  ;;  %v13171_v15 = vrot.slane %v13170_v33, 4  ;;  %v17347_v58 = vld [vmem:[#allocation2 + $0x28] sm:$0xf] }
 0x36f   : > { %v13180_v23 = vor.u32 %v13179_v55, %v13175_v44  ;;  %v13199_v42 = vrot.slane %v13197_v14, 5  ;;  %v13207_v41 = vshll.u32 %v12165_v29, 16  ;;  %v13212_v12 = vshrl.u32 %v12166_v10, 16  ;;  %v13543_v52 = vld [vmem:[#allocation2 + $0x30] sm:$0xe] }
 0x370   : > { %v13194_v50 = vor.u32 %v13193_v26, %v13190_v62  ;;  %v13203_v3 = vrot.slane %v13201_v56, 4  ;;  %v13176_v31 = vsel %vm19327_vm5, %v13171_v15, %v13175_v44  ;;  %v13215_v34 = vshll.u32 %v12166_v10, 16  ;;  %v17348_v61 = vld [vmem:[#allocation2 + $0x34] sm:$0xf]  ;;  %v17349_v63 = vld [vmem:[#allocation2 + $0x2c] sm:$0x1] }
 0x371   : > { %v13181_v37 = vrot.slane %v13180_v23, 4  ;;  %v13221_v16 = vshll.u32 %v12167_v40, 16  ;;  %v13209_v5 = vrot.slane %v13207_v41, 5  ;;  %v13214_v8 = vrot.slane %v13212_v12, 4  ;;  %v13544_v15 = vld [vmem:[#allocation2 + $0x3c] sm:$0xe] }
 0x372   : > { %v13195_v6 = vrot.slane %v13194_v50, 4  ;;  %v13204_v53 = vor.u32 %v13203_v3, %v13199_v42  ;;  %v13217_v18 = vrot.slane %v13215_v34, 5  ;;  %v13225_v17 = vshrl.u32 %v12167_v40, 16  ;;  %v13545_v3 = vld [vmem:[#allocation2 + $0x48] sm:$0xe] }
 0x373   : > { %16483 = vmatmul.mubr.msk.bf16.gmra.mrb[20].mxu0 %vm5005_vm2, %v15443_v27  ;;  %16167 = vmatmul.mubr.msk.bf16.gmra.mrb[20].mxu1 %vm5301_vm7, %v17233_v4  ;;  %v13186_v45 = vsel %vm19327_vm5, %v13181_v37, %v13185_v28  ;;  %v13223_v43 = vrot.slane %v13221_v16, 5  ;;  %v13231_v39 = vshll.u32 %v12168_v24, 16  ;;  %v13639_v51 = vrot.slane %v17345_v36, 5  ;;  %v17238_v41 = vld [vmem:[#allocation3 + $0xc] sm:$0xff]   ;;  %v17351_v16 = vld [vmem:[#allocation2 + $0x40] sm:$0xf] }
 0x374   : > { %16486 = vmatprep.mubr.msk.bf16.mxu0 %vm5005_vm2, %v15444_v47  ;;  %16170 = vmatprep.mubr.msk.bf16.mxu1 %vm5301_vm7, %v17234_v13  ;;  %v13200_v46 = vsel %vm19327_vm5, %v13195_v6, %v13199_v42  ;;  %v13205_v7 = vrot.slane %v13204_v53, 4  ;;  %v15445_v38 = vcombine.low %v13176_v31, %v13186_v45  ;;  %v13218_v25 = vor.u32 %v13217_v18, %v13214_v8  ;;  %v17350_v13 = vld [vmem:[#allocation2 + $0x38] sm:$0x1]  ;;  %v17237_v42 = vld [vmem:[#allocation2 + $0xc0] sm:$0xff]   ;;  %v13546_v45 = vld [vmem:[#allocation2 + $0x54] sm:$0xe] }
 0x375   : > { %v13227_v11 = vrot.slane %v13225_v17, 4  ;;  %v13233_v57 = vrot.slane %v13231_v39, 5  ;;  %v15466_v27 = vrot.slane %v13541_v54, 9  ;;  %v13642_v44 = vrot.slane %v17346_v48, 5  ;;  %v17353_v18 = vld [vmem:[#allocation2 + $0x58] sm:$0xf] }
 0x376   : > { %v13210_v21 = vsel %vm19327_vm5, %v13205_v7, %v13209_v5  ;;  %v13219_v30 = vrot.slane %v13218_v25, 4  ;;  %v13641_v20 = vrot.slane %v13639_v51, 4  ;;  %v13646_v32 = vrot.slane %v17347_v58, 5  ;;  %v17352_v5 = vld [vmem:[#allocation2 + $0x4c] sm:$0xf] }
 0x377   : > { %v15446_v49 = vcombine.low %v13200_v46, %v13210_v21  ;;  %v13228_v0 = vor.u32 %v13227_v11, %v13223_v43  ;;  %v13653_v33 = vrot.slane %v17348_v61, 5  ;;  %v15467_v28 = vrot.slane %v13542_v19, 9  ;;  %v17354_v46 = vld [vmem:[#allocation2 + $0x44] sm:$0x1]  ;;  %v13547_v39 = vld [vmem:[#allocation2 + $0x60] sm:$0xe] }
 0x378   : > { %v13224_v55 = vsel %vm19327_vm5, %v13219_v30, %v13223_v43  ;;  %v13640_v10 = vsel %vm19360_vm6, %v15466_v27, %v13639_v51  ;;  %v13643_v4 = vsel %vm19360_vm6, %v13641_v20, %v13642_v44  ;;  %v13649_v62 = vrot.slane %v17349_v63, 5  ;;  %v13548_v51 = vld [vmem:[#allocation2 + $0x6c] sm:$0xe]  ;;  %v13549_v19 = vld [vmem:[#allocation2 + $0x78] sm:$0xe] }
 0x379   : > { %v13229_v29 = vrot.slane %v13228_v0, 4  ;;  %v13648_v26 = vrot.slane %v13646_v32, 4  ;;  %v15468_v56 = vrot.slane %v13543_v52, 9  ;;  %v13655_v40 = vrot.slane %v13653_v33, 4  ;;  %v17358_v0 = vld [vmem:[#allocation2 + $0x50] sm:$0x1] }
 0x37a   : > { %v13656_v47 = vrot.slane %v17350_v13, 5  ;;  %v15484_v50 = vcombine.low %v13640_v10, %v13643_v4  ;;  %v13647_v12 = vsel %vm19360_vm6, %v15467_v28, %v13646_v32  ;;  %v15469_v31 = vrot.slane %v13544_v15, 9  ;;  %v17359_v58 = vld [vmem:[#allocation2 + $0x5c] sm:$0x1]  ;;  %v13550_v52 = vld [vmem:[#allocation2 + $0x84] sm:$0xe] }
 0x37b   : > { %16487 = vmatmul.mubr.msk.bf16.gmra.mrb[24].mxu0 %vm5005_vm2, %v15445_v38  ;;  %16171 = vmatmul.mubr.msk.bf16.gmra.mrb[24].mxu1 %vm5301_vm7, %v17235_v1  ;;  %v13234_v14 = vsel %vm19327_vm5, %v13229_v29, %v13233_v57  ;;  %v13650_v37 = vsel %vm19360_vm6, %v13648_v26, %v13649_v62  ;;  %v20838_v24 = vsel %vm19360_vm6, %v15468_v56, %v13653_v33  ;;  %v13660_v6 = vrot.slane %v17351_v16, 5  ;;  %v17355_v38 = vld [vmem:[#allocation2 + $0x64] sm:$0xf]  ;;  %v17356_v1 = vld [vmem:[#allocation2 + $0x70] sm:$0xf]  ;;  %v17250_v15 = vld [vmem:[%s21518_s4 + $0x88] sm:$0xff]  }
 0x37c   : > { %16490 = vmatprep.mubr.msk.bf16.mxu0 %vm5005_vm2, %v15446_v49  ;;  %16174 = vmatprep.mubr.msk.bf16.mxu1 %vm5301_vm7, %v17236_v9  ;;  %v15447_v23 = vcombine.low %v13224_v55, %v13234_v14  ;;  %v20842_v34 = vsel %vm19360_vm6, %v13655_v40, %v13656_v47  ;;  %v15470_v53 = vrot.slane %v13545_v3, 9  ;;  %v13667_v8 = vrot.slane %v17352_v5, 5  ;;  %v17357_v57 = vld [vmem:[#allocation2 + $0x7c] sm:$0xf]  ;;  %v17239_v9 = vld [vmem:[#allocation3 + $0x18] sm:$0xff]  }
 0x37d   : > { %v13674_v43 = vrot.slane %v17353_v18, 5  ;;  %v15485_v17 = vcombine.low %v13647_v12, %v13650_v37  ;;  %v15486_v54 = vcombine.low %v20838_v24, %v20842_v34  ;;  %v13663_v7 = vrot.slane %v17354_v46, 5  ;;  %v17360_v61 = vld [vmem:[#allocation2 + $0x88] sm:$0xf]  ;;  %v17242_v55 = vld [vmem:[#allocation3 + $0x24] sm:$0xff]  }
 0x37e   : > { %v13681_v25 = vrot.slane %v17355_v38, 5  ;;  %v20852_v11 = vsel %vm19360_vm6, %v15469_v31, %v13660_v6  ;;  %v13662_v36 = vrot.slane %v13660_v6, 4  ;;  %v13688_v21 = vrot.slane %v17356_v1, 5  ;;  %v17361_v14 = vld [vmem:[#allocation2 + $0x68] sm:$0x1]  ;;  %v17244_v1 = vld [vmem:[#allocation3 + $0x3c] sm:$0xff]  }
 0x37f   : > { %v13695_v27 = vrot.slane %v17357_v57, 5  ;;  %v20856_v49 = vsel %vm19360_vm6, %v15470_v53, %v13667_v8  ;;  %v13669_v30 = vrot.slane %v13667_v8, 4  ;;  %v13670_v48 = vrot.slane %v17358_v0, 5  ;;  %v17362_v63 = vld [vmem:[#allocation2 + $0x74] sm:$0x1] }
 0x380   : > { %v15471_v44 = vrot.slane %v13546_v45, 9  ;;  %v13676_v20 = vrot.slane %v13674_v43, 4  ;;  %v13677_v32 = vrot.slane %v17359_v58, 5  ;;  %v15472_v29 = vrot.slane %v13547_v39, 9  ;;  %v17363_v13 = vld [vmem:[#allocation2 + $0x80] sm:$0x1] }
 0x381   : > { %v13702_v33 = vrot.slane %v17360_v61, 5  ;;  %v13683_v28 = vrot.slane %v13681_v25, 4  ;;  %v13684_v10 = vrot.slane %v17361_v14, 5  ;;  %v15473_v4 = vrot.slane %v13548_v51, 9  ;;  %v17364_v3 = vld [vmem:[#allocation2 + $0x8c] sm:$0x1] }
 0x382   : > { %v13691_v62 = vrot.slane %v17362_v63, 5  ;;  %v13690_v26 = vrot.slane %v13688_v21, 4  ;;  %v15474_v56 = vrot.slane %v13549_v19, 9  ;;  %v13697_v40 = vrot.slane %v13695_v27, 4  ;;  %v13551_v12 = vld [vmem:[#allocation2 + $0x90] sm:$0xe] }
 0x383   : > { %16491 = vmatmul.mubr.msk.bf16.gmra.mrb[28].mxu0 %vm5005_vm2, %v15447_v23  ;;  %16175 = vmatmul.mubr.msk.bf16.gmra.mrb[28].mxu1 %vm5301_vm7, %v17237_v42  ;;  %v13698_v47 = vrot.slane %v17363_v13, 5  ;;  %v13664_v23 = vsel %vm19360_vm6, %v13662_v36, %v13663_v7  ;;  %v15475_v42 = vrot.slane %v13550_v52, 9  ;;  %v13671_v31 = vsel %vm19360_vm6, %v13669_v30, %v13670_v48  ;;  %v17365_v34 = vld [vmem:[#allocation2 + $0x94] sm:$0xf]  ;;  %v13552_v18 = vld [vmem:[#allocation2 + $0x9c] sm:$0xe] }
 0x384   : > { %16496 = vmatprep.mubr.msk.bf16.mxu0 %vm5301_vm7, %v15484_v50  ;;  %16182 = vmatprep.mubr.msk.bf16.mxu1 %vm5005_vm2, %v17238_v41  ;;  %v13704_v50 = vrot.slane %v13702_v33, 4  ;;  %v13705_v41 = vrot.slane %v17364_v3, 5  ;;  %v20870_v37 = vsel %vm19360_vm6, %v15471_v44, %v13674_v43  ;;  %v20874_v24 = vsel %vm19360_vm6, %v15472_v29, %v13681_v25  ;;  %v17243_v7 = vld [vmem:[#allocation3 + $0x30] sm:$0xff]   ;;  %v17368_v44 = vld [vmem:[#allocation2 + $0xa4] sm:$0x1] }
 0x385   : > { %v13709_v16 = vrot.slane %v17365_v34, 5  ;;  %v20884_v6 = vsel %vm19360_vm6, %v13683_v28, %v13684_v10  ;;  %v20888_v53 = vsel %vm19360_vm6, %v15473_v4, %v13688_v21  ;;  %v20893_v5 = vsel %vm19360_vm6, %v13690_v26, %v13691_v62  ;;  %v8738_v51 = vld [vmem:[#allocation2 + $0xc] sm:$0xf]  ;;  %v13553_v30 = vld [vmem:[#allocation2 + $0xa8] sm:$0xe] }
 0x386   : > { %v20901_v8 = vsel %vm19360_vm6, %v13697_v40, %v13698_v47  ;;  %v15476_v45 = vrot.slane %v13551_v12, 9  ;;  %v15487_v43 = vcombine.low %v20852_v11, %v13664_v23  ;;  %v20911_v46 = vsel %vm19360_vm6, %v13704_v50, %v13705_v41  ;;  %v17366_v11 = vld [vmem:[#allocation2 + $0x98] sm:$0x1]  ;;  %v17371_v61 = vld [vmem:[#allocation2 + $0xc4] sm:$0xf] }
 0x387   : > { %v15490_v38 = vcombine.low %v20874_v24, %v20884_v6  ;;  %v13711_v25 = vrot.slane %v13709_v16, 4  ;;  %v13712_v36 = vrot.slane %v17366_v11, 5  ;;  %v15491_v21 = vcombine.low %v20888_v53, %v20893_v5  ;;  %v17370_v29 = vld [vmem:[#allocation2 + $0xb8] sm:$0xf]  ;;  %v13555_v4 = vld [vmem:[#allocation2 + $0xc0] sm:$0xe] }
 0x388   : > { %v20925_v48 = vsel %vm19360_vm6, %v15476_v45, %v13709_v16  ;;  %v13719_v19 = vrot.slane %v17368_v44, 5  ;;  %v13730_v52 = vrot.slane %v17370_v29, 5  ;;  %v8838_v28 = vshll.u32 %v8738_v51, 16  ;;  %v17372_v63 = vld [vmem:[#allocation2 + $0x10] sm:$0xf] }
 0x389   : > { %v20932_v14 = vsel %vm19360_vm6, %v13711_v25, %v13712_v36  ;;  %v15478_v10 = vrot.slane %v13553_v30, 9  ;;  %v8844_v62 = vshll.u32 %v17372_v63, 16  ;;  %v8848_v26 = vshrl.u32 %v17372_v63, 16  ;;  %v17374_v41 = vld [vmem:[#allocation2 + $0xbc] sm:$0x1]  ;;  %v17246_v36 = vld [vmem:[#allocation3 + $0x54] sm:$0xff]  }
 0x38a   : > { %v8840_v47 = vrot.slane %v8838_v28, 5  ;;  %v13733_v12 = vrot.slane %v17374_v41, 5  ;;  %v15480_v34 = vrot.slane %v13555_v4, 9  ;;  %v17375_v45 = vld [vmem:[#allocation2 + $0xc8] sm:$0x1]  ;;  %v15494_v30 = vcombine.low %v20925_v48, %v20932_v14  ;;  %v17247_v41 = vld [vmem:[#allocation3 + $0x60] sm:$0xff]  }
 0x38b   : > { %16497 = vmatmul.mubr.msk.bf16.vlgmr.msra.gmra.mrb[0].mxu0 %vm5301_vm7, %v15485_v17  ;;  %16183 = vmatmul.mubr.msk.bf16.vlgmr.msra.gmra.mrb[0].mxu1 %vm5005_vm2, %v17239_v9  ;;  %v15488_v17 = vcombine.low %v20856_v49, %v13671_v31  ;;  %v17367_v9 = vld [vmem:[#allocation2 + $0xa0] sm:$0xf]  ;;  %v13732_v31 = vrot.slane %v13730_v52, 4  ;;  %v8744_v28 = vld [vmem:[#allocation2 + $0x24] sm:$0xf] }
 0x38c   : > { %16529 = vmatpush3.bf16.msra.mxu0 %v20742_v35  ;;  %16215 = vmatpush3.bf16.msra.mxu1 %v20756_v59  ;;  %v20880_v35 = vsel %vm19360_vm6, %v13676_v20, %v13677_v32  ;;  %v20897_v59 = vsel %vm19360_vm6, %v15474_v56, %v13695_v27  ;;  %v15477_v27 = vrot.slane %v13552_v18, 9  ;;  %v13716_v49 = vrot.slane %v17367_v9, 5  ;;  %v17369_v20 = vld [vmem:[#allocation2 + $0xac] sm:$0xf]  ;;  %v13554_v32 = vld [vmem:[#allocation2 + $0xb4] sm:$0xe] }
 0x38d   : > { %16186 = vmatprep.mubr.msk.bf16.mxu1 %vm5005_vm2, %v17242_v55  ;;  %16500 = vmatprep.mubr.msk.bf16.mxu0 %vm5301_vm7, %v15486_v54  ;;  %v20907_v54 = vsel %vm19360_vm6, %v15475_v42, %v13702_v33  ;;  %v15489_v39 = vcombine.low %v20870_v37, %v20880_v35  ;;  %v15492_v57 = vcombine.low %v20897_v59, %v20901_v8  ;;  %v13723_v58 = vrot.slane %v17369_v20, 5  ;;  %v17373_v42 = vld [vmem:[#allocation2 + $0xb0] sm:$0x1]  ;;  %v17383_v5 = vld [vmem:[#allocation3 + $0x28] sm:$0xf] }
 0x38e   : > { %16530 = vmatprep.subr.bf16.mxu0 %v17250_v15  ;;  %v15493_v0 = vcombine.low %v20907_v54, %v20911_v46  ;;  %v13737_v33 = vrot.slane %v17371_v61, 5  ;;  %v8835_v55 = vshrl.u32 %v8738_v51, 16  ;;  %v20937_v56 = vsel %vm19360_vm6, %v15477_v27, %v13716_v49  ;;  %v17376_v27 = vld [vmem:[#allocation2 + $0x1c] sm:$0xf]  ;;  %v13576_v54 = vld [vmem:[#allocation3 + $0x3c] sm:$0xe] }
 0x38f   : > { %v13718_v40 = vrot.slane %v13716_v49, 4  ;;  %v13725_v23 = vrot.slane %v13723_v58, 4  ;;  %v13726_v50 = vrot.slane %v17373_v42, 5  ;;  %v15479_v3 = vrot.slane %v13554_v32, 9  ;;  %v17377_v32 = vld [vmem:[#allocation2 + $0x14] sm:$0x1] }
 0x390   : > { %16531 = vmatpush3.bf16.msra.mxu0 %v17250_v15  ;;  %v8837_v13 = vrot.slane %v8835_v55, 4  ;;  %v8741_v15 = vld [vmem:[#allocation2 + $0x18] sm:$0xf]  ;;  %v13739_v16 = vrot.slane %v13737_v33, 4  ;;  %v13740_v18 = vrot.slane %v17375_v45, 5  ;;  %v8868_v9 = vshll.u32 %v17376_v27, 16 }
 0x391   : > { %v8859_v25 = vshrl.u32 %v8741_v15, 16  ;;  %v8862_v11 = vshll.u32 %v8741_v15, 16  ;;  %v20943_v51 = vsel %vm19360_vm6, %v13718_v40, %v13719_v19  ;;  %v8872_v49 = vshrl.u32 %v17376_v27, 16  ;;  %v17378_v40 = vld [vmem:[#allocation2 + $0x20] sm:$0x1]  ;;  %v17248_v45 = vld [vmem:[#allocation3 + $0x6c] sm:$0xff]  }
 0x392   : > { %v20949_v44 = vsel %vm19360_vm6, %v15478_v10, %v13723_v58  ;;  %v20953_v20 = vsel %vm19360_vm6, %v13725_v23, %v13726_v50  ;;  %v8854_v29 = vshll.u32 %v17377_v32, 16  ;;  %v20961_v19 = vsel %vm19360_vm6, %v15479_v3, %v13730_v52  ;;  %v17380_v42 = vld [vmem:[#allocation2 + $0x28] sm:$0xf]  ;;  %v8747_v3 = vld [vmem:[#allocation2 + $0x30] sm:$0xf] }
 0x393   : > { %16501 = vmatmul.mubr.msk.bf16.gmra.mrb[4].mxu0 %vm5301_vm7, %v15487_v43  ;;  %16187 = vmatmul.mubr.msk.bf16.gmra.mrb[4].mxu1 %vm5005_vm2, %v17243_v7  ;;  %v17245_v43 = vld [vmem:[#allocation3 + $0x48] sm:$0xff]   ;;  %v8850_v7 = vrot.slane %v8848_v26, 4  ;;  %v20965_v61 = vsel %vm19360_vm6, %v13732_v31, %v13733_v12  ;;  %v20969_v58 = vsel %vm19360_vm6, %v15480_v34, %v13737_v33  ;;  %v20973_v55 = vsel %vm19360_vm6, %v13739_v16, %v13740_v18  ;;  %v17389_v46 = vld [vmem:[#allocation3 + $0x40] sm:$0xf] }
 0x394   : > { %16504 = vmatprep.mubr.msk.bf16.mxu0 %vm5301_vm7, %v15488_v17  ;;  %16190 = vmatprep.mubr.msk.bf16.mxu1 %vm5005_vm2, %v17244_v1  ;;  %v20939_v17 = vrot.slane %v8844_v62, 5  ;;  %v8841_v1 = vor.u32 %v8840_v47, %v8837_v13  ;;  %v15495_v37 = vcombine.low %v20937_v56, %v20943_v51  ;;  %v8864_v52 = vrot.slane %v8862_v11, 5  ;;  %v13573_v62 = vld [vmem:[#allocation3 + $0x18] sm:$0xe]  ;;  %v17379_v47 = vld [vmem:[#allocation3 + $0x1c] sm:$0xf] }
 0x395   : > { %v15496_v33 = vcombine.low %v20949_v44, %v20953_v20  ;;  %v20986_v4 = vrot.slane %v8868_v9, 5  ;;  %v8874_v63 = vrot.slane %v8872_v49, 4  ;;  %v15497_v24 = vcombine.low %v20961_v19, %v20965_v61  ;;  %v13574_v11 = vld [vmem:[#allocation3 + $0x24] sm:$0xe]  ;;  %v17382_v49 = vld [vmem:[#allocation2 + $0x34] sm:$0xf] }
 0x396   : > { %v8851_v35 = vor.u32 %v8850_v7, %v20939_v17  ;;  %v8842_v10 = vrot.slane %v8841_v1, 4  ;;  %v15498_v6 = vcombine.low %v20969_v58, %v20973_v55  ;;  %v8883_v26 = vshrl.u32 %v8744_v28, 16  ;;  %v17381_v7 = vld [vmem:[#allocation3 + $0x20] sm:$0x1] }
 0x397   : > { %v8878_v13 = vshll.u32 %v17378_v40, 16  ;;  %v14097_v15 = vrot.slane %v17379_v47, 5  ;;  %v8886_v23 = vshll.u32 %v8744_v28, 16  ;;  %v8892_v50 = vshll.u32 %v17380_v42, 16 }
 0x398   : > { %v8852_v12 = vrot.slane %v8851_v35, 4  ;;  %v15517_v34 = vrot.slane %v13573_v62, 9  ;;  %v8896_v16 = vshrl.u32 %v17380_v42, 16  ;;  %v8847_v18 = vsel %vm19327_vm5, %v8842_v10, %v20939_v17 }
 0x399   : > { %v8888_v1 = vrot.slane %v8886_v23, 5  ;;  %v8907_v27 = vshrl.u32 %v8747_v3, 16  ;;  %v8910_v9 = vshll.u32 %v8747_v3, 16  ;;  %v8916_v32 = vshll.u32 %v17382_v49, 16  ;;  %v17249_v3 = vld [vmem:[#allocation3 + $0x78] sm:$0xff]  }
 0x39a   : > { %v21000_v28 = vrot.slane %v8892_v50, 5  ;;  %v8898_v17 = vrot.slane %v8896_v16, 4  ;;  %v8920_v35 = vshrl.u32 %v17382_v49, 16  ;;  %v15518_v53 = vrot.slane %v13574_v11, 9  ;;  %v8750_v50 = vld [vmem:[#allocation2 + $0x3c] sm:$0xf] }
 0x39b   : > { %16505 = vmatmul.mubr.msk.bf16.gmra.mrb[8].mxu0 %vm5301_vm7, %v15489_v39  ;;  %16191 = vmatmul.mubr.msk.bf16.gmra.mrb[8].mxu1 %vm5005_vm2, %v17245_v43  ;;  %v8861_v39 = vrot.slane %v8859_v25, 4  ;;  %v8875_v43 = vor.u32 %v8874_v63, %v20986_v4  ;;  %v14100_v25 = vrot.slane %v17381_v7, 5  ;;  %v21014_v63 = vrot.slane %v8878_v13, 5  ;;  %v17384_v13 = vld [vmem:[#allocation2 + $0x2c] sm:$0x1]  ;;  %v17251_v16 = vld [vmem:[#allocation3 + $0x84] sm:$0xff]  }
 0x39c   : > { %16508 = vmatprep.mubr.msk.bf16.mxu0 %vm5301_vm7, %v15490_v38  ;;  %16194 = vmatprep.mubr.msk.bf16.mxu1 %vm5005_vm2, %v17246_v36  ;;  %v8856_v38 = vrot.slane %v8854_v29, 5  ;;  %v8885_v36 = vrot.slane %v8883_v26, 4  ;;  %v14099_v29 = vrot.slane %v14097_v15, 4  ;;  %v8909_v62 = vrot.slane %v8907_v27, 4  ;;  %v17387_v11 = vld [vmem:[#allocation3 + $0x34] sm:$0xf] }
 0x39d   : > { %v8865_v31 = vor.u32 %v8864_v52, %v8861_v39  ;;  %v21012_v10 = vrot.slane %v8875_v43, 4  ;;  %v8912_v26 = vrot.slane %v8910_v9, 5  ;;  %v21018_v59 = vsel %vm19360_vm6, %v15517_v34, %v14097_v15  ;;  %v17386_v43 = vld [vmem:[#allocation2 + $0x38] sm:$0x1] }
 0x39e   : > { %v8857_v39 = vsel %vm19327_vm5, %v8852_v12, %v8856_v38  ;;  %v8889_v8 = vor.u32 %v8888_v1, %v8885_v36  ;;  %v8922_v38 = vrot.slane %v8920_v35, 4  ;;  %v21026_v47 = vsel %vm19360_vm6, %v14099_v29, %v14100_v25  ;;  %v13575_v25 = vld [vmem:[#allocation3 + $0x30] sm:$0xe]  ;;  %v17388_v35 = vld [vmem:[#allocation2 + $0x40] sm:$0xf] }
 0x39f   : > { %v21009_v52 = vrot.slane %v8865_v31, 4  ;;  %v21022_v40 = vcombine.low %v8847_v18, %v8857_v39  ;;  %v8899_v23 = vor.u32 %v8898_v17, %v21000_v28  ;;  %v8902_v42 = vshll.u32 %v17384_v13, 16  ;;  %v17385_v31 = vld [vmem:[#allocation3 + $0x2c] sm:$0x1] }
 0x3a0   : > { %v14107_v34 = vrot.slane %v17385_v31, 5  ;;  %v8913_v18 = vor.u32 %v8912_v26, %v8909_v62  ;;  %v8926_v7 = vshll.u32 %v17386_v43, 16  ;;  %v14111_v36 = vrot.slane %v17387_v11, 5  ;;  %v17390_v26 = vld [vmem:[#allocation3 + $0x38] sm:$0x1]  ;;  %v17253_v43 = vld [vmem:[#allocation3 + $0x9c] sm:$0xff]  }
 0x3a1   : > { %v8871_v15 = vsel %vm19327_vm5, %v21009_v52, %v20986_v4  ;;  %v15537_v1 = vcombine.low %v21018_v59, %v21026_v47  ;;  %v8890_v27 = vrot.slane %v8889_v8, 4  ;;  %v8931_v49 = vshrl.u32 %v8750_v50, 16  ;;  %v13577_v52 = vld [vmem:[#allocation3 + $0x48] sm:$0xe]  ;;  %v17406_v59 = vld [vmem:[#allocation3 + $0x70] sm:$0xf] }
 0x3a2   : > { %v8904_v29 = vrot.slane %v8902_v42, 5  ;;  %v8934_v17 = vshll.u32 %v8750_v50, 16  ;;  %v8940_v39 = vshll.u32 %v17388_v35, 16  ;;  %v14113_v62 = vrot.slane %v14111_v36, 4 }
 0x3a3   : > { %16509 = vmatmul.mubr.msk.bf16.gmra.mrb[12].mxu0 %vm5301_vm7, %v15491_v21  ;;  %16195 = vmatmul.mubr.msk.bf16.gmra.mrb[12].mxu1 %vm5005_vm2, %v17247_v41  ;;  %v14104_v21 = vrot.slane %v17383_v5, 5  ;;  %v15519_v5 = vrot.slane %v13575_v25, 9  ;;  %v14114_v8 = vrot.slane %v17390_v26, 5  ;;  %v8895_v48 = vsel %vm19327_vm5, %v8890_v27, %v21000_v28  ;;  %v17391_v25 = vld [vmem:[#allocation2 + $0x4c] sm:$0xf] }
 0x3a4   : > { %16512 = vmatprep.mubr.msk.bf16.mxu0 %vm5301_vm7, %v15492_v57  ;;  %16198 = vmatprep.mubr.msk.bf16.mxu1 %vm5005_vm2, %v17248_v45  ;;  %v21020_v57 = vrot.slane %v8916_v32, 5  ;;  %v8881_v45 = vsel %vm19327_vm5, %v21012_v10, %v21014_v63  ;;  %v8900_v32 = vrot.slane %v8899_v23, 4  ;;  %v8914_v10 = vrot.slane %v8913_v18, 4 }
 0x3a5   : > { %v21035_v41 = vsel %vm19360_vm6, %v15518_v53, %v14104_v21  ;;  %v14106_v12 = vrot.slane %v14104_v21, 4  ;;  %v8944_v21 = vshrl.u32 %v17388_v35, 16  ;;  %v8928_v63 = vrot.slane %v8926_v7, 5 }
 0x3a6   : > { %v8923_v9 = vor.u32 %v8922_v38, %v21020_v57  ;;  %v8753_v38 = vld [vmem:[#allocation2 + $0x48] sm:$0xf]  ;;  %v8936_v23 = vrot.slane %v8934_v17, 5  ;;  %v8905_v13 = vsel %vm19327_vm5, %v8900_v32, %v8904_v29  ;;  %v15520_v42 = vrot.slane %v13576_v54, 9  ;;  %v17393_v29 = vld [vmem:[#allocation2 + $0x44] sm:$0x1] }
 0x3a7   : > { %v21055_v53 = vsel %vm19360_vm6, %v14106_v12, %v14107_v34  ;;  %v21063_v50 = vrot.slane %v8940_v39, 5  ;;  %v17252_v12 = vld [vmem:[#allocation3 + $0x90] sm:$0xff]   ;;  %v21067_v31 = vsel %vm19360_vm6, %v15519_v5, %v14111_v36  ;;  %v8958_v18 = vshll.u32 %v8753_v38, 16  ;;  %v17392_v36 = vld [vmem:[#allocation3 + $0x44] sm:$0x1] }
 0x3a8   : > { %v8924_v14 = vrot.slane %v8923_v9, 4  ;;  %v8919_v28 = vsel %vm19327_vm5, %v8914_v10, %v21020_v57  ;;  %v21074_v7 = vsel %vm19360_vm6, %v14113_v62, %v14114_v8  ;;  %v8964_v11 = vshll.u32 %v17391_v25, 16  ;;  %v17394_v5 = vld [vmem:[#allocation2 + $0x50] sm:$0x1] }
 0x3a9   : > { %v8968_v27 = vshrl.u32 %v17391_v25, 16  ;;  %v8950_v17 = vshll.u32 %v17393_v29, 16  ;;  %v21087_v57 = vcombine.low %v8871_v15, %v8881_v45  ;;  %v15538_v35 = vcombine.low %v21035_v41, %v21055_v53 }
 0x3aa   : > { %v8929_v9 = vsel %vm19327_vm5, %v8924_v14, %v8928_v63  ;;  %v8974_v54 = vshll.u32 %v17394_v5, 16  ;;  %v21097_v56 = vcombine.low %v8895_v48, %v8905_v13  ;;  %v8960_v4 = vrot.slane %v8958_v18, 5  ;;  %v17254_v48 = vld [vmem:[#allocation3 + $0xa8] sm:$0xff]   ;;  %v13578_v13 = vld [vmem:[#allocation3 + $0x54] sm:$0xe] }
 0x3ab   : > { %16513 = vmatmul.mubr.msk.bf16.gmra.mrb[16].mxu0 %vm5301_vm7, %v15493_v0  ;;  %16199 = vmatmul.mubr.msk.bf16.gmra.mrb[16].mxu1 %vm5005_vm2, %v17249_v3  ;;  %v14118_v0 = vrot.slane %v17389_v46, 5  ;;  %v8946_v3 = vrot.slane %v8944_v21, 4  ;;  %v8756_v46 = vld [vmem:[#allocation2 + $0x54] sm:$0xf]  ;;  %v21104_v15 = vcombine.low %v8919_v28, %v8929_v9  ;;  %v15539_v45 = vcombine.low %v21067_v31, %v21074_v7  ;;  %v17397_v18 = vld [vmem:[#allocation3 + $0x50] sm:$0x1] }
 0x3ac   : > { %16516 = vmatprep.mubr.msk.bf16.mxu0 %vm5301_vm7, %v15494_v30  ;;  %16202 = vmatprep.mubr.msk.bf16.mxu1 %vm5005_vm2, %v17251_v16  ;;  %v8933_v30 = vrot.slane %v8931_v49, 4  ;;  %v8955_v16 = vshrl.u32 %v8753_v38, 16  ;;  %v14121_v49 = vrot.slane %v17392_v36, 5  ;;  %v21108_v21 = vrot.slane %v8964_v11, 5  ;;  %v8759_v38 = vld [vmem:[#allocation2 + $0x60] sm:$0xf] }
 0x3ad   : > { %v14120_v34 = vrot.slane %v14118_v0, 4  ;;  %v8947_v39 = vor.u32 %v8946_v3, %v21063_v50  ;;  %v21101_v51 = vsel %vm19360_vm6, %v15520_v42, %v14118_v0  ;;  %v8970_v44 = vrot.slane %v8968_v27, 4  ;;  %v17396_v42 = vld [vmem:[#allocation2 + $0x58] sm:$0xf]  ;;  %v17398_v11 = vld [vmem:[#allocation3 + $0x58] sm:$0xf] }
 0x3ae   : > { %v8937_v32 = vor.u32 %v8936_v23, %v8933_v30  ;;  %v8952_v0 = vrot.slane %v8950_v17, 5  ;;  %v8979_v10 = vshrl.u32 %v8756_v46, 16  ;;  %v21114_v62 = vrot.slane %v8974_v54, 5  ;;  %v17395_v30 = vld [vmem:[#allocation3 + $0x4c] sm:$0xf] }
 0x3af   : > { %v21112_v20 = vsel %vm19360_vm6, %v14120_v34, %v14121_v49  ;;  %v8948_v63 = vrot.slane %v8947_v39, 4  ;;  %v15521_v26 = vrot.slane %v13577_v52, 9  ;;  %v8982_v8 = vshll.u32 %v8756_v46, 16  ;;  %v17399_v49 = vld [vmem:[#allocation2 + $0x64] sm:$0xf] }
 0x3b0   : > { %v14125_v23 = vrot.slane %v17395_v30, 5  ;;  %v8988_v3 = vshll.u32 %v17396_v42, 16  ;;  %v8971_v34 = vor.u32 %v8970_v44, %v21108_v21  ;;  %v8981_v28 = vrot.slane %v8979_v10, 4  ;;  %v17400_v44 = vld [vmem:[#allocation3 + $0x5c] sm:$0x1] }
 0x3b1   : > { %v8984_v25 = vrot.slane %v8982_v8, 5  ;;  %v14132_v27 = vrot.slane %v17398_v11, 5  ;;  %v9003_v9 = vshrl.u32 %v8759_v38, 16  ;;  %v9006_v36 = vshll.u32 %v8759_v38, 16  ;;  %v17401_v10 = vld [vmem:[#allocation2 + $0x5c] sm:$0x1] }
 0x3b2   : > { %v8953_v17 = vsel %vm19327_vm5, %v8948_v63, %v8952_v0  ;;  %v15522_v39 = vrot.slane %v13578_v13, 9  ;;  %v9016_v5 = vshrl.u32 %v17399_v49, 16  ;;  %v14127_v19 = vrot.slane %v14125_v23, 4  ;;  %v17402_v8 = vld [vmem:[#allocation2 + $0x68] sm:$0x1] }
 0x3b3   : > { %16517 = vmatmul.mubr.msk.bf16.gmra.mrb[20].mxu0 %vm5301_vm7, %v15495_v37  ;;  %16203 = vmatmul.mubr.msk.bf16.gmra.mrb[20].mxu1 %vm5005_vm2, %v17252_v12  ;;  %v8957_v37 = vrot.slane %v8955_v16, 4  ;;  %v8992_v12 = vshrl.u32 %v17396_v42, 16  ;;  %v17255_v16 = vld [vmem:[#allocation3 + $0xb4] sm:$0xff]   ;;  %v21133_v61 = vrot.slane %v8988_v3, 5  ;;  %v8985_v46 = vor.u32 %v8984_v25, %v8981_v28 }
 0x3b4   : > { %16520 = vmatprep.mubr.msk.bf16.mxu0 %vm5301_vm7, %v15496_v33  ;;  %16206 = vmatprep.mubr.msk.bf16.mxu1 %vm5005_vm2, %v17253_v43  ;;  %v8938_v33 = vrot.slane %v8937_v32, 4  ;;  %v14128_v43 = vrot.slane %v17397_v18, 5  ;;  %v9012_v32 = vshll.u32 %v17399_v49, 16  ;;  %v14134_v52 = vrot.slane %v14132_v27, 4  ;;  %v13580_v49 = vld [vmem:[#allocation3 + $0x6c] sm:$0xe] }
 0x3b5   : > { %v8961_v14 = vor.u32 %v8960_v4, %v8957_v37  ;;  %v9005_v37 = vrot.slane %v9003_v9, 4  ;;  %v9008_v4 = vrot.slane %v9006_v36, 5  ;;  %v9018_v58 = vrot.slane %v9016_v5, 4 }
 0x3b6   : > { %v8943_v29 = vsel %vm19327_vm5, %v8938_v33, %v21063_v50  ;;  %v21136_v50 = vrot.slane %v8971_v34, 4  ;;  %v14135_v33 = vrot.slane %v17400_v44, 5  ;;  %v21138_v0 = vrot.slane %v9012_v32, 5  ;;  %v17403_v34 = vld [vmem:[#allocation3 + $0x64] sm:$0xf] }
 0x3b7   : > { %v21131_v54 = vrot.slane %v8961_v14, 4  ;;  %v15540_v55 = vcombine.low %v21101_v51, %v21112_v20  ;;  %v8998_v63 = vshll.u32 %v17401_v10, 16  ;;  %v9022_v38 = vshll.u32 %v17402_v8, 16  ;;  %v17256_v14 = vld [vmem:[#allocation3 + $0xc0] sm:$0xff]  }
 0x3b8   : > { %v21146_v30 = vcombine.low %v8943_v29, %v8953_v17  ;;  %v21154_v42 = vsel %vm19360_vm6, %v15522_v39, %v14132_v27  ;;  %v21159_v3 = vsel %vm19360_vm6, %v14127_v19, %v14128_v43  ;;  %v14139_v18 = vrot.slane %v17403_v34, 5  ;;  %v17404_v29 = vld [vmem:[#allocation3 + $0x68] sm:$0x1]  ;;  %v17405_v39 = vld [vmem:[#allocation2 + $0x70] sm:$0xf] }
 0x3b9   : > { %v8967_v13 = vsel %vm19327_vm5, %v21131_v54, %v21108_v21  ;;  %v8977_v28 = vsel %vm19327_vm5, %v21136_v50, %v21114_v62  ;;  %v21169_v25 = vsel %vm19360_vm6, %v14134_v52, %v14135_v33  ;;  %v9019_v11 = vor.u32 %v9018_v58, %v21138_v0  ;;  %v17407_v58 = vld [vmem:[#allocation2 + $0x7c] sm:$0xf]  ;;  %v17411_v21 = vld [vmem:[#allocation3 + $0x7c] sm:$0xf] }
 0x3ba   : > { %v9000_v43 = vrot.slane %v8998_v63, 5  ;;  %v9024_v9 = vrot.slane %v9022_v38, 5  ;;  %v14142_v17 = vrot.slane %v17404_v29, 5  ;;  %v9036_v5 = vshll.u32 %v17405_v39, 16 }
 0x3bb   : > { %16521 = vmatmul.mubr.msk.bf16.gmra.mrb[24].mxu0 %vm5301_vm7, %v15497_v24  ;;  %16207 = vmatmul.mubr.msk.bf16.gmra.mrb[24].mxu1 %vm5005_vm2, %v17254_v48  ;;  %v8994_v24 = vrot.slane %v8992_v12, 4  ;;  %v8762_v48 = vld [vmem:[#allocation2 + $0x6c] sm:$0xf]  ;;  %v21161_v12 = vrot.slane %v8985_v46, 4  ;;  %v9040_v19 = vshrl.u32 %v17405_v39, 16  ;;  %v14141_v46 = vrot.slane %v14139_v18, 4 }
 0x3bc   : > { %16524 = vmatprep.mubr.msk.bf16.mxu0 %vm5301_vm7, %v15498_v6  ;;  %16210 = vmatprep.mubr.msk.bf16.mxu1 %vm5005_vm2, %v17255_v16  ;;  %v21144_v6 = vsel %vm19360_vm6, %v15521_v26, %v14125_v23  ;;  %v13579_v23 = vld [vmem:[#allocation3 + $0x60] sm:$0xe]  ;;  %v9009_v16 = vor.u32 %v9008_v4, %v9005_v37  ;;  %v9027_v27 = vshrl.u32 %v8762_v48, 16  ;;  %v9030_v32 = vshll.u32 %v8762_v48, 16  ;;  %v8771_v39 = vld [vmem:[#allocation2 + $0x90] sm:$0xf] }
 0x3bd   : > { %v8995_v26 = vor.u32 %v8994_v24, %v21133_v61  ;;  %v15523_v36 = vrot.slane %v13579_v23, 9  ;;  %v8765_v24 = vld [vmem:[#allocation2 + $0x78] sm:$0xf]  ;;  %v14146_v47 = vrot.slane %v17406_v59, 5  ;;  %v15524_v37 = vrot.slane %v13580_v49, 9 }
 0x3be   : > { %v9010_v50 = vrot.slane %v9009_v16, 4  ;;  %v9029_v4 = vrot.slane %v9027_v27, 4  ;;  %v9032_v52 = vrot.slane %v9030_v32, 5  ;;  %v9051_v44 = vshrl.u32 %v8765_v24, 16  ;;  %v17408_v23 = vld [vmem:[#allocation3 + $0x74] sm:$0x1] }
 0x3bf   : > { %v8996_v62 = vrot.slane %v8995_v26, 4  ;;  %v9054_v33 = vshll.u32 %v8765_v24, 16  ;;  %v9060_v10 = vshll.u32 %v17407_v58, 16  ;;  %v9064_v63 = vshrl.u32 %v17407_v58, 16  ;;  %v17410_v27 = vld [vmem:[#allocation2 + $0x80] sm:$0x1] }
 0x3c0   : > { %v21189_v8 = vsel %vm19360_vm6, %v15523_v36, %v14139_v18  ;;  %v9042_v38 = vrot.slane %v9040_v19, 4  ;;  %v9015_v48 = vsel %vm19327_vm5, %v9010_v50, %v21138_v0  ;;  %v14148_v26 = vrot.slane %v14146_v47, 4  ;;  %v17409_v18 = vld [vmem:[#allocation2 + $0x74] sm:$0x1] }
 0x3c1   : > { %v9033_v34 = vor.u32 %v9032_v52, %v9029_v4  ;;  %v9053_v0 = vrot.slane %v9051_v44, 4  ;;  %v9056_v36 = vrot.slane %v9054_v33, 5  ;;  %v21206_v49 = vrot.slane %v9060_v10, 5  ;;  %v17414_v58 = vld [vmem:[#allocation2 + $0x94] sm:$0xf] }
 0x3c2   : > { %v9066_v32 = vrot.slane %v9064_v63, 4  ;;  %v21219_v41 = vcombine.low %v8967_v13, %v8977_v28  ;;  %v15541_v53 = vcombine.low %v21144_v6, %v21159_v3  ;;  %v15542_v31 = vcombine.low %v21154_v42, %v21169_v25  ;;  %v8768_v13 = vld [vmem:[#allocation2 + $0x84] sm:$0xf] }
 0x3c3   : > { %16525 = vmatmul.mubr.msk.bf16.gmra.mrb[28].mxu0 %vm5301_vm7, %v20119_v2  ;;  %16211 = vmatmul.mubr.msk.bf16.gmra.mrb[28].mxu1 %vm5005_vm2, %v17256_v14  ;;  %v8991_v2 = vsel %vm19327_vm5, %v21161_v12, %v21133_v61  ;;  %v21191_v61 = vrot.slane %v9036_v5, 5  ;;  %v21198_v14 = vsel %vm19360_vm6, %v14141_v46, %v14142_v17  ;;  %v14149_v12 = vrot.slane %v17408_v23, 5  ;;  %v17412_v46 = vld [vmem:[#allocation3 + $0x80] sm:$0x1] }
 0x3c4   : > { %16532 = vmatprep.mubr.msk.bf16.mxu0 %vm5005_vm2, %v15537_v1  ;;  %16216 = vmatprep.mubr.msk.bf16.mxu1 %vm5301_vm7, %v21022_v40  ;;  %v9020_v1 = vrot.slane %v9019_v11, 4  ;;  %v9001_v40 = vsel %vm19327_vm5, %v8996_v62, %v9000_v43  ;;  %v9046_v11 = vshll.u32 %v17409_v18, 16  ;;  %v9070_v43 = vshll.u32 %v17410_v27, 16 }
 0x3c5   : > { %v21228_v7 = vcombine.low %v8991_v2, %v9001_v40  ;;  %v14153_v54 = vrot.slane %v17411_v21, 5  ;;  %v15543_v6 = vcombine.low %v21189_v8, %v21198_v14  ;;  %v9034_v3 = vrot.slane %v9033_v34, 4  ;;  %v17417_v21 = vld [vmem:[#allocation2 + $0x8c] sm:$0x1]  ;;  %v8777_v8 = vld [vmem:[#allocation2 + $0xa8] sm:$0xf] }
 0x3c6   : > { %v9025_v16 = vsel %vm19327_vm5, %v9020_v1, %v9024_v9  ;;  %v9048_v9 = vrot.slane %v9046_v11, 5  ;;  %v9057_v62 = vor.u32 %v9056_v36, %v9053_v0  ;;  %v9067_v29 = vor.u32 %v9066_v32, %v21206_v49  ;;  %v17413_v1 = vld [vmem:[#allocation2 + $0x88] sm:$0xf]  ;;  %v17416_v36 = vld [vmem:[#allocation3 + $0x8c] sm:$0x1] }
 0x3c7   : > { %v21234_v28 = vcombine.low %v9015_v48, %v9025_v16  ;;  %v9072_v17 = vrot.slane %v9070_v43, 5  ;;  %v9075_v24 = vshrl.u32 %v8768_v13, 16  ;;  %v9078_v2 = vshll.u32 %v8768_v13, 16  ;;  %v8774_v13 = vld [vmem:[#allocation2 + $0x9c] sm:$0xf] }
 0x3c8   : > { %v14155_v50 = vrot.slane %v14153_v54, 4  ;;  %v14156_v59 = vrot.slane %v17412_v46, 5  ;;  %v9088_v4 = vshrl.u32 %v17413_v1, 16  ;;  %v9039_v52 = vsel %vm19327_vm5, %v9034_v3, %v21191_v61 }
 0x3c9   : > { %v9099_v44 = vshrl.u32 %v8771_v39, 16  ;;  %v9102_v33 = vshll.u32 %v8771_v39, 16  ;;  %v9108_v10 = vshll.u32 %v17414_v58, 16  ;;  %v9058_v63 = vrot.slane %v9057_v62, 4  ;;  %v17418_v62 = vld [vmem:[#allocation2 + $0x98] sm:$0x1] }
 0x3ca   : > { %v9068_v40 = vrot.slane %v9067_v29, 4  ;;  %v9080_v16 = vrot.slane %v9078_v2, 5  ;;  %v21263_v20 = vsel %vm19360_vm6, %v14155_v50, %v14156_v59  ;;  %v14163_v32 = vrot.slane %v17416_v36, 5  ;;  %v13583_v39 = vld [vmem:[#allocation3 + $0x90] sm:$0xe] }
 0x3cb   : > { %16533 = vmatmul.mubr.msk.bf16.vlgmr.msra.gmra.mrb[0].mxu0 %vm5005_vm2, %v15538_v35  ;;  %16217 = vmatmul.mubr.msk.bf16.vlgmr.msra.gmra.mrb[0].mxu1 %vm5301_vm7, %v21087_v57  ;;  %v9043_v35 = vor.u32 %v9042_v38, %v21191_v61  ;;  %v21232_v57 = vsel %vm19360_vm6, %v15524_v37, %v14146_v47  ;;  %v13582_v47 = vld [vmem:[#allocation3 + $0x84] sm:$0xe]  ;;  %v9084_v37 = vshll.u32 %v17413_v1, 16  ;;  %v17415_v38 = vld [vmem:[#allocation3 + $0x88] sm:$0xf]  ;;  %v9101_v34 = vrot.slane %v9099_v44, 4 }
 0x3cc   : > { %16536 = vmatprep.mubr.msk.bf16.mxu0 %vm5005_vm2, %v15539_v45  ;;  %16220 = vmatprep.mubr.msk.bf16.mxu1 %vm5301_vm7, %v21097_v56  ;;  %v13581_v45 = vld [vmem:[#allocation3 + $0x78] sm:$0xe]  ;;  %v21240_v56 = vsel %vm19360_vm6, %v14148_v26, %v14149_v12  ;;  %v14160_v48 = vrot.slane %v17415_v38, 5  ;;  %v9112_v26 = vshrl.u32 %v17414_v58, 16  ;;  %v15526_v23 = vrot.slane %v13582_v47, 9 }
 0x3cd   : > { %v9044_v5 = vrot.slane %v9043_v35, 4  ;;  %v15525_v19 = vrot.slane %v13581_v45, 9  ;;  %v9077_v12 = vrot.slane %v9075_v24, 4  ;;  %v9104_v18 = vrot.slane %v9102_v33, 5  ;;  %v13584_v2 = vld [vmem:[#allocation3 + $0x9c] sm:$0xe] }
 0x3ce   : > { %v21267_v11 = vrot.slane %v9108_v10, 5  ;;  %v9114_v27 = vrot.slane %v9112_v26, 4  ;;  %v9073_v43 = vsel %vm19327_vm5, %v9068_v40, %v9072_v17  ;;  %v14162_v0 = vrot.slane %v14160_v48, 4  ;;  %v17420_v50 = vld [vmem:[#allocation3 + $0xa0] sm:$0xf] }
 0x3cf   : > { %v9049_v61 = vsel %vm19327_vm5, %v9044_v5, %v9048_v9  ;;  %v21259_v51 = vsel %vm19360_vm6, %v15525_v19, %v14153_v54  ;;  %v9081_v45 = vor.u32 %v9080_v16, %v9077_v12  ;;  %v9094_v54 = vshll.u32 %v17417_v21, 16  ;;  %v17419_v5 = vld [vmem:[#allocation3 + $0x94] sm:$0xf]  ;;  %v17422_v33 = vld [vmem:[#allocation3 + $0x98] sm:$0x1] }
 0x3d0   : > { %v21276_v35 = vcombine.low %v9039_v52, %v9049_v61  ;;  %v15545_v3 = vcombine.low %v21259_v51, %v21263_v20  ;;  %v9118_v29 = vshll.u32 %v17418_v62, 16  ;;  %v14167_v19 = vrot.slane %v17419_v5, 5  ;;  %v13585_v5 = vld [vmem:[#allocation3 + $0xa8] sm:$0xe] }
 0x3d1   : > { %v21294_v24 = vsel %vm19360_vm6, %v14162_v0, %v14163_v32  ;;  %v14174_v46 = vrot.slane %v17420_v50, 5  ;;  %v9123_v59 = vshrl.u32 %v8774_v13, 16  ;;  %v9126_v47 = vshll.u32 %v8774_v13, 16  ;;  %v8780_v32 = vld [vmem:[#allocation2 + $0xb4] sm:$0xf] }
 0x3d2   : > { %v9082_v42 = vrot.slane %v9081_v45, 4  ;;  %v9096_v25 = vrot.slane %v9094_v54, 5  ;;  %v9120_v52 = vrot.slane %v9118_v29, 5  ;;  %v15527_v44 = vrot.slane %v13583_v39, 9  ;;  %v17425_v54 = vld [vmem:[#allocation2 + $0xa4] sm:$0x1] }
 0x3d3   : > { %16537 = vmatmul.mubr.msk.bf16.gmra.mrb[4].mxu0 %vm5005_vm2, %v15540_v55  ;;  %16221 = vmatmul.mubr.msk.bf16.gmra.mrb[4].mxu1 %vm5301_vm7, %v21104_v15  ;;  %v21265_v15 = vrot.slane %v9084_v37, 5  ;;  %v9090_v55 = vrot.slane %v9088_v4, 4  ;;  %v14170_v58 = vrot.slane %v17422_v33, 5  ;;  %v15528_v40 = vrot.slane %v13584_v2, 9  ;;  %v17426_v13 = vld [vmem:[#allocation2 + $0xb0] sm:$0x1] }
 0x3d4   : > { %16540 = vmatprep.mubr.msk.bf16.mxu0 %vm5005_vm2, %v15541_v53  ;;  %16224 = vmatprep.mubr.msk.bf16.mxu1 %vm5301_vm7, %v21146_v30  ;;  %v9063_v30 = vsel %vm19327_vm5, %v9058_v63, %v21206_v49  ;;  %v15544_v53 = vcombine.low %v21232_v57, %v21240_v56  ;;  %v21282_v49 = vsel %vm19360_vm6, %v15526_v23, %v14160_v48  ;;  %v14169_v63 = vrot.slane %v14167_v19, 4  ;;  %v8783_v33 = vld [vmem:[#allocation2 + $0xc0] sm:$0xf] }
 0x3d5   : > { %v9091_v9 = vor.u32 %v9090_v55, %v21265_v15  ;;  %v21285_v17 = vcombine.low %v9063_v30, %v9073_v43  ;;  %v9105_v57 = vor.u32 %v9104_v18, %v9101_v34  ;;  %v9115_v56 = vor.u32 %v9114_v27, %v21267_v11  ;;  %v17424_v27 = vld [vmem:[#allocation2 + $0xac] sm:$0xf] }
 0x3d6   : > { %v14176_v14 = vrot.slane %v14174_v46, 4  ;;  %v9125_v48 = vrot.slane %v9123_v59, 4  ;;  %v9128_v26 = vrot.slane %v9126_v47, 5  ;;  %v15546_v61 = vcombine.low %v21282_v49, %v21294_v24 }
 0x3d7   : > { %v9092_v4 = vrot.slane %v9091_v9, 4  ;;  %v9106_v10 = vrot.slane %v9105_v57, 4  ;;  %v14168_v51 = vsel %vm19360_vm6, %v15527_v44, %v14167_v19  ;;  %v9147_v20 = vshrl.u32 %v8777_v8, 16  ;;  %v17427_v57 = vld [vmem:[#allocation3 + $0xac] sm:$0xf] }
 0x3d8   : > { %v9150_v55 = vshll.u32 %v8777_v8, 16  ;;  %v14171_v18 = vsel %vm19360_vm6, %v14169_v63, %v14170_v58  ;;  %v9156_v30 = vshll.u32 %v17424_v27, 16  ;;  %v9129_v36 = vor.u32 %v9128_v26, %v9125_v48 }
 0x3d9   : > { %v9097_v16 = vsel %vm19327_vm5, %v9092_v4, %v9096_v25  ;;  %v9111_v34 = vsel %vm19327_vm5, %v9106_v10, %v21267_v11  ;;  %v9160_v11 = vshrl.u32 %v17424_v27, 16  ;;  %v9166_v49 = vshll.u32 %v17426_v13, 16  ;;  %v13586_v25 = vld [vmem:[#allocation3 + $0xb4] sm:$0xe]  ;;  %v13587_v27 = vld [vmem:[#allocation3 + $0xc0] sm:$0xe] }
 0x3da   : > { %v15547_v9 = vcombine.low %v14168_v51, %v14171_v18  ;;  %v9149_v62 = vrot.slane %v9147_v20, 4  ;;  %v9152_v29 = vrot.slane %v9150_v55, 5  ;;  %v9171_v19 = vshrl.u32 %v8780_v32, 16 }
 0x3db   : > { %16541 = vmatmul.mubr.msk.bf16.gmra.mrb[8].mxu0 %vm5005_vm2, %v15542_v31  ;;  %16225 = vmatmul.mubr.msk.bf16.gmra.mrb[8].mxu1 %vm5301_vm7, %v21219_v41  ;;  %v17421_v31 = vld [vmem:[#allocation2 + $0xa0] sm:$0xf]  ;;  %v9116_v41 = vrot.slane %v9115_v56, 4  ;;  %v14181_v56 = vrot.slane %v17427_v57, 5  ;;  %v9130_v24 = vrot.slane %v9129_v36, 4  ;;  %v9162_v2 = vrot.slane %v9160_v11, 4 }
 0x3dc   : > { %16544 = vmatprep.mubr.msk.bf16.mxu0 %vm5005_vm2, %v15543_v6  ;;  %v9132_v1 = vshll.u32 %v17421_v31, 16  ;;  %v9136_v37 = vshrl.u32 %v17421_v31, 16  ;;  %16228 = vmatprep.mubr.msk.bf16.mxu1 %vm5301_vm7, %v21228_v7  ;;  %v17423_v6 = vld [vmem:[#allocation3 + $0xa4] sm:$0x1]  ;;  %v9087_v7 = vsel %vm19327_vm5, %v9082_v42, %v21265_v15  ;;  %v21322_v15 = vsel %vm19360_vm6, %v15528_v40, %v14174_v46  ;;  %v17428_v46 = vld [vmem:[#allocation2 + $0xb8] sm:$0xf] }
 0x3dd   : > { %v14177_v38 = vrot.slane %v17423_v6, 5  ;;  %v9121_v43 = vsel %vm19327_vm5, %v9116_v41, %v9120_v52  ;;  %v15154_v45 = vcombine.low %v9087_v7, %v9097_v16  ;;  %v9174_v50 = vshll.u32 %v8780_v32, 16  ;;  %v17429_v52 = vld [vmem:[#allocation3 + $0xb0] sm:$0x1]  ;;  %v17430_v6 = vld [vmem:[#allocation3 + $0xb8] sm:$0xf] }
 0x3de   : > { %v21309_v23 = vrot.slane %v9132_v1, 5  ;;  %v9138_v12 = vrot.slane %v9136_v37, 4  ;;  %v21337_v39 = vcombine.low %v9111_v34, %v9121_v43  ;;  %v9180_v59 = vshll.u32 %v17428_v46, 16  ;;  %v17432_v34 = vld [vmem:[#allocation2 + $0xbc] sm:$0x1] }
 0x3df   : > { %v21329_v0 = vsel %vm19360_vm6, %v14176_v14, %v14177_v38  ;;  %v21343_v42 = vrot.slane %v9166_v49, 5  ;;  %v9184_v31 = vshrl.u32 %v17428_v46, 16  ;;  %v9153_v1 = vor.u32 %v9152_v29, %v9149_v62  ;;  %v17435_v57 = vld [vmem:[#allocation3 + $0xc8] sm:$0x1] }
 0x3e0   : > { %v9139_v21 = vor.u32 %v9138_v12, %v21309_v23  ;;  %v15529_v37 = vrot.slane %v13585_v5, 9  ;;  %v14183_v4 = vrot.slane %v14181_v56, 4  ;;  %v14184_v44 = vrot.slane %v17429_v52, 5 }
 0x3e1   : > { %v9173_v58 = vrot.slane %v9171_v19, 4  ;;  %v9176_v10 = vrot.slane %v9174_v50, 5  ;;  %v21345_v41 = vrot.slane %v9180_v59, 5  ;;  %v9186_v63 = vrot.slane %v9184_v31, 4  ;;  %v17437_v59 = vld [vmem:[#allocation3 + $0xd0] sm:$0xf] }
 0x3e2   : > { %v9135_v40 = vsel %vm19327_vm5, %v9130_v24, %v21309_v23  ;;  %v15530_v14 = vrot.slane %v13586_v25, 9  ;;  %v14188_v38 = vrot.slane %v17430_v6, 5  ;;  %v9195_v26 = vshrl.u32 %v8783_v33, 16 }
 0x3e3   : > { %16545 = vmatmul.mubr.msk.bf16.gmra.mrb[12].mxu0 %vm5005_vm2, %v15544_v53  ;;  %16229 = vmatmul.mubr.msk.bf16.gmra.mrb[12].mxu1 %vm5301_vm7, %v21234_v28  ;;  %v9142_v53 = vshll.u32 %v17425_v54, 16  ;;  %v15548_v28 = vcombine.low %v21322_v15, %v21329_v0  ;;  %v9198_v7 = vshll.u32 %v8783_v33, 16  ;;  %v9154_v23 = vrot.slane %v9153_v1, 4  ;;  %v17436_v0 = vld [vmem:[#allocation2 + $0xc8] sm:$0x1] }
 0x3e4   : > { %16548 = vmatprep.mubr.msk.bf16.mxu0 %vm5005_vm2, %v15545_v3  ;;  %16232 = vmatprep.mubr.msk.bf16.mxu1 %vm5301_vm7, %v21276_v35  ;;  %v21341_v3 = vrot.slane %v9156_v30, 5  ;;  %v9140_v35 = vrot.slane %v9139_v21, 4  ;;  %v14182_v16 = vsel %vm19360_vm6, %v15529_v37, %v14181_v56  ;;  %v14185_v51 = vsel %vm19360_vm6, %v14183_v4, %v14184_v44  ;;  %v17433_v30 = vld [vmem:[#allocation3 + $0xc4] sm:$0xf] }
 0x3e5   : > { %v9144_v47 = vrot.slane %v9142_v53, 5  ;;  %v9187_v55 = vor.u32 %v9186_v63, %v21345_v41  ;;  %v9190_v18 = vshll.u32 %v17432_v34, 16  ;;  %v14195_v43 = vrot.slane %v17433_v30, 5 }
 0x3e6   : > { %v9163_v8 = vor.u32 %v9162_v2, %v21341_v3  ;;  %v14190_v32 = vrot.slane %v14188_v38, 4  ;;  %v15549_v54 = vcombine.low %v14182_v16, %v14185_v51  ;;  %v9197_v53 = vrot.slane %v9195_v26, 4 }
 0x3e7   : > { %v9145_v48 = vsel %vm19327_vm5, %v9140_v35, %v9144_v47  ;;  %v9200_v13 = vrot.slane %v9198_v7, 5  ;;  %v15531_v62 = vrot.slane %v13587_v27, 9  ;;  %v14197_v29 = vrot.slane %v14195_v43, 4 }
 0x3e8   : > { %v15156_v36 = vcombine.low %v9135_v40, %v9145_v48  ;;  %v9164_v11 = vrot.slane %v9163_v8, 4  ;;  %v14198_v56 = vrot.slane %v17435_v57, 5  ;;  %v9188_v19 = vrot.slane %v9187_v55, 4 }
 0x3e9   : > { %v9192_v24 = vrot.slane %v9190_v18, 5  ;;  %v9159_v2 = vsel %vm19327_vm5, %v9154_v23, %v21341_v3  ;;  %v14189_v50 = vsel %vm19360_vm6, %v15530_v14, %v14188_v38  ;;  %v14202_v35 = vrot.slane %v17437_v59, 5 }
 0x3ea   : > { %v9169_v46 = vsel %vm19327_vm5, %v9164_v11, %v21343_v42  ;;  %v9201_v3 = vor.u32 %v9200_v13, %v9197_v53  ;;  %v14199_v25 = vsel %vm19360_vm6, %v14197_v29, %v14198_v56  ;;  %v13588_v42 = vld [vmem:[#allocation3 + $0xcc] sm:$0xe] }
 0x3eb   : > { %16549 = vmatmul.mubr.msk.bf16.gmra.mrb[16].mxu0 %vm5005_vm2, %v15546_v61  ;;  %16233 = vmatmul.mubr.msk.bf16.gmra.mrb[16].mxu1 %vm5301_vm7, %v21285_v17  ;;  %v17431_v61 = vld [vmem:[#allocation2 + $0xc4] sm:$0xf]  ;;  %v9177_v17 = vor.u32 %v9176_v10, %v9173_v58  ;;  %v9193_v1 = vsel %vm19327_vm5, %v9188_v19, %v9192_v24  ;;  %v15157_v37 = vcombine.low %v9159_v2, %v9169_v46  ;;  %v15532_v44 = vrot.slane %v13588_v42, 9  ;;  %v17438_v58 = vld [vmem:[#allocation3 + $0xd4] sm:$0x1] }
 0x3ec   : > { %16552 = vmatprep.mubr.msk.bf16.mxu0 %vm5005_vm2, %v15547_v9  ;;  %v9204_v12 = vshll.u32 %v17431_v61, 16  ;;  %16236 = vmatprep.mubr.msk.bf16.mxu1 %vm5301_vm7, %v15154_v45  ;;  %v9208_v20 = vshrl.u32 %v17431_v61, 16  ;;  %v17434_v45 = vld [vmem:[#allocation3 + $0xbc] sm:$0x1]  ;;  %v14204_v33 = vrot.slane %v14202_v35, 4  ;;  %v14205_v10 = vrot.slane %v17438_v58, 5 }
 0x3ed   : > { %v14191_v21 = vrot.slane %v17434_v45, 5  ;;  %v9178_v5 = vrot.slane %v9177_v17, 4  ;;  %v9202_v40 = vrot.slane %v9201_v3, 4 }
 0x3ee   : > { %v9206_v49 = vrot.slane %v9204_v12, 5  ;;  %v9210_v9 = vrot.slane %v9208_v20, 4  ;;  %v14206_v6 = vsel %vm19360_vm6, %v14204_v33, %v14205_v10 }
 0x3ef   : > { %v14192_v15 = vsel %vm19360_vm6, %v14190_v32, %v14191_v21  ;;  %v9183_v31 = vsel %vm19327_vm5, %v9178_v5, %v21345_v41  ;;  %v14203_v41 = vsel %vm19360_vm6, %v15532_v44, %v14202_v35 }
 0x3f0   : > { %v9211_v47 = vor.u32 %v9210_v9, %v9206_v49  ;;  %v15550_v4 = vcombine.low %v14189_v50, %v14192_v15  ;;  %v15158_v63 = vcombine.low %v9183_v31, %v9193_v1  ;;  %v9207_v38 = vsel %vm19327_vm5, %v9202_v40, %v9206_v49 }
 0x3f1   : > { %v15552_v26 = vcombine.low %v14203_v41, %v14206_v6 }
 0x3f2   : > { %v9212_v8 = vrot.slane %v9211_v47, 4 }
 0x3f3   : > { %16553 = vmatmul.mubr.msk.bf16.gmra.mrb[20].mxu0 %vm5005_vm2, %v15548_v28  ;;  %16237 = vmatmul.mubr.msk.bf16.gmra.mrb[20].mxu1 %vm5301_vm7, %v21337_v39  ;;  %v9214_v28 = vshll.u32 %v17436_v0, 16  ;;  %v14196_v39 = vsel %vm19360_vm6, %v15531_v62, %v14195_v43 }
 0x3f4   : > { %16556 = vmatprep.mubr.msk.bf16.mxu0 %vm5005_vm2, %v15549_v54  ;;  %16240 = vmatprep.mubr.msk.bf16.mxu1 %vm5301_vm7, %v15156_v36  ;;  %v15551_v52 = vcombine.low %v14196_v39, %v14199_v25 }
 0x3f5   : > { %v9216_v14 = vrot.slane %v9214_v28, 5 }
 0x3f7   : > { %v9217_v48 = vsel %vm19327_vm5, %v9212_v8, %v9216_v14 }
 0x3f8   : > { %v15159_v7 = vcombine.low %v9207_v38, %v9217_v48 }
 0x3fb   : > { %16557 = vmatmul.mubr.msk.bf16.gmra.mrb[24].mxu0 %vm5005_vm2, %v15550_v4  ;;  %16241 = vmatmul.mubr.msk.bf16.gmra.mrb[24].mxu1 %vm5301_vm7, %v15157_v37 }
 0x3fc   : > { %16560 = vmatprep.mubr.msk.bf16.mxu0 %vm5005_vm2, %v15551_v52  ;;  %16244 = vmatprep.mubr.msk.bf16.mxu1 %vm5301_vm7, %v15158_v63 }
 0x403   : > { %16561 = vmatmul.mubr.msk.bf16.gmra.mrb[28].mxu0 %vm5005_vm2, %v15552_v26  ;;  %16245 = vmatmul.mubr.msk.bf16.gmra.mrb[28].mxu1 %vm5301_vm7, %v15159_v7 }
 0x49e   : > { %v16534_v61 = vpop.f32.mrb[0].mxu0  ;;  %v16218_v12 = vpop.f32.mrb[0].mxu1 }
 0x49f   : > { %v14354_v23 = vpop.f32.mrb[1].mxu0  ;;  %v9357_v16 = vpop.f32.mrb[1].mxu1  ;;  %v16564_v51 = vadd.f32 %v16534_v61, %v16218_v12 }
 0x4a0   : > { %v16535_v20 = vpop.f32.mrb[2].mxu0  ;;  %v16219_v60 = vpop.f32.mrb[2].mxu1  ;;  %v16565_v17 = vadd.f32 %v14354_v23, %v9357_v16 }
 0x4a1   : > { %v14357_v55 = vpop.f32.mrb[3].mxu0  ;;  %v14522_v34 = vadd.f32 %v16564_v51, %v21407_v22  ;;  %v9360_v18 = vpop.f32.mrb[3].mxu1  ;;  %v16566_v27 = vadd.f32 %v16535_v20, %v16219_v60 }
 0x4a2   : > { %v14520_v30 = vadd.f32 %v16565_v17, %v21407_v22  ;;  %v16567_v43 = vadd.f32 %v14357_v55, %v9360_v18 }
 0x4a3   : > { %v14554_v36 = vmax.f32 %v14522_v34, 0.0  ;;  %v14523_v11 = vadd.f32 %v16566_v27, %v21407_v22 }
 0x4a4   : > { %v14552_v32 = vmax.f32 %v14520_v30, 0.0  ;;  %v14521_v45 = vadd.f32 %v16567_v43, %v21407_v22 }
 0x4a5   : > { %14586 = vst.msk [vmem:[%s17542_s16 + $0x10] sm:$0xff] %vm5301_vm7, %v14554_v36  ;;  %v14555_v21 = vmax.f32 %v14523_v11, 0.0 }
 0x4a6   : > { %v16538_v54 = vpop.f32.mrb[4].mxu0  ;;  %14584 = vst.msk [vmem:[%s17542_s16] sm:$0xff] %vm5301_vm7, %v14552_v32  ;;  %v14553_v53 = vmax.f32 %v14521_v45, 0.0  ;;  %v16222_v13 = vpop.f32.mrb[4].mxu1 }
 0x4a7   : > { %v14370_v49 = vpop.f32.mrb[5].mxu0  ;;  %14587 = vst.msk [vmem:[%s17542_s16 + $0x18] sm:$0xff] %vm5301_vm7, %v14555_v21  ;;  %v9373_v9 = vpop.f32.mrb[5].mxu1  ;;  %v16568_v62 = vadd.f32 %v16538_v54, %v16222_v13 }
 0x4a8   : > { %v16539_v29 = vpop.f32.mrb[6].mxu0  ;;  %14585 = vst.msk [vmem:[%s17542_s16 + $0x8] sm:$0xff] %vm5301_vm7, %v14553_v53  ;;  %v16223_v57 = vpop.f32.mrb[6].mxu1  ;;  %v16569_v56 = vadd.f32 %v14370_v49, %v9373_v9 }
 0x4a9   : > { %v14373_v5 = vpop.f32.mrb[7].mxu0  ;;  %v14526_v19 = vadd.f32 %v16568_v62, %v21407_v22  ;;  %v9376_v24 = vpop.f32.mrb[7].mxu1  ;;  %v16570_v2 = vadd.f32 %v16539_v29, %v16223_v57 }
 0x4aa   : > { %v14524_v50 = vadd.f32 %v16569_v56, %v21407_v22  ;;  %v16571_v46 = vadd.f32 %v14373_v5, %v9376_v24 }
 0x4ab   : > { %v14558_v15 = vmax.f32 %v14526_v19, 0.0  ;;  %v14527_v0 = vadd.f32 %v16570_v2, %v21407_v22 }
 0x4ac   : > { %v14556_v28 = vmax.f32 %v14524_v50, 0.0  ;;  %v14525_v59 = vadd.f32 %v16571_v46, %v21407_v22 }
 0x4ad   : > { %14590 = vst.msk [vmem:[%s17542_s16 + $0x30] sm:$0xff] %vm5301_vm7, %v14558_v15  ;;  %v14559_v35 = vmax.f32 %v14527_v0, 0.0 }
 0x4ae   : > { %v16542_v3 = vpop.f32.mrb[8].mxu0  ;;  %14588 = vst.msk [vmem:[%s17542_s16 + $0x20] sm:$0xff] %vm5301_vm7, %v14556_v28  ;;  %v14557_v47 = vmax.f32 %v14525_v59, 0.0  ;;  %v16226_v39 = vpop.f32.mrb[8].mxu1 }
 0x4af   : > { %v14386_v25 = vpop.f32.mrb[9].mxu0  ;;  %14591 = vst.msk [vmem:[%s17542_s16 + $0x38] sm:$0xff] %vm5301_vm7, %v14559_v35  ;;  %v9389_v42 = vpop.f32.mrb[9].mxu1  ;;  %v16572_v31 = vadd.f32 %v16542_v3, %v16226_v39 }
 0x4b0   : > { %v16543_v1 = vpop.f32.mrb[10].mxu0  ;;  %14589 = vst.msk [vmem:[%s17542_s16 + $0x28] sm:$0xff] %vm5301_vm7, %v14557_v47  ;;  %v16227_v37 = vpop.f32.mrb[10].mxu1  ;;  %v16573_v4 = vadd.f32 %v14386_v25, %v9389_v42 }
 0x4b1   : > { %v14389_v52 = vpop.f32.mrb[11].mxu0  ;;  %v14530_v44 = vadd.f32 %v16572_v31, %v21407_v22  ;;  %v9392_v33 = vpop.f32.mrb[11].mxu1  ;;  %v16574_v58 = vadd.f32 %v16543_v1, %v16227_v37 }
 0x4b2   : > { %v14528_v10 = vadd.f32 %v16573_v4, %v21407_v22  ;;  %v16575_v63 = vadd.f32 %v14389_v52, %v9392_v33 }
 0x4b3   : > { %v14562_v40 = vmax.f32 %v14530_v44, 0.0  ;;  %v14531_v8 = vadd.f32 %v16574_v58, %v21407_v22 }
 0x4b4   : > { %v14560_v14 = vmax.f32 %v14528_v10, 0.0  ;;  %v14529_v41 = vadd.f32 %v16575_v63, %v21407_v22 }
 0x4b5   : > { %14594 = vst.msk [vmem:[%s17542_s16 + $0x50] sm:$0xff] %vm5301_vm7, %v14562_v40  ;;  %v14563_v6 = vmax.f32 %v14531_v8, 0.0 }
 0x4b6   : > { %v16546_v38 = vpop.f32.mrb[12].mxu0  ;;  %14592 = vst.msk [vmem:[%s17542_s16 + $0x40] sm:$0xff] %vm5301_vm7, %v14560_v14  ;;  %v14561_v48 = vmax.f32 %v14529_v41, 0.0  ;;  %v16230_v26 = vpop.f32.mrb[12].mxu1 }
 0x4b7   : > { %v14402_v7 = vpop.f32.mrb[13].mxu0  ;;  %14595 = vst.msk [vmem:[%s17542_s16 + $0x58] sm:$0xff] %vm5301_vm7, %v14563_v6  ;;  %v9405_v61 = vpop.f32.mrb[13].mxu1  ;;  %v16576_v12 = vadd.f32 %v16546_v38, %v16230_v26 }
 0x4b8   : > { %v16547_v23 = vpop.f32.mrb[14].mxu0  ;;  %14593 = vst.msk [vmem:[%s17542_s16 + $0x48] sm:$0xff] %vm5301_vm7, %v14561_v48  ;;  %v16231_v16 = vpop.f32.mrb[14].mxu1  ;;  %v16577_v51 = vadd.f32 %v14402_v7, %v9405_v61 }
 0x4b9   : > { %v14405_v20 = vpop.f32.mrb[15].mxu0  ;;  %v14534_v60 = vadd.f32 %v16576_v12, %v21407_v22  ;;  %v9408_v17 = vpop.f32.mrb[15].mxu1  ;;  %v16578_v55 = vadd.f32 %v16547_v23, %v16231_v16 }
 0x4ba   : > { %v14532_v34 = vadd.f32 %v16577_v51, %v21407_v22  ;;  %v16579_v18 = vadd.f32 %v14405_v20, %v9408_v17 }
 0x4bb   : > { %v14566_v27 = vmax.f32 %v14534_v60, 0.0  ;;  %v14535_v30 = vadd.f32 %v16578_v55, %v21407_v22 }
 0x4bc   : > { %v14564_v43 = vmax.f32 %v14532_v34, 0.0  ;;  %v14533_v36 = vadd.f32 %v16579_v18, %v21407_v22 }
 0x4bd   : > { %14598 = vst.msk [vmem:[%s17542_s16 + $0x70] sm:$0xff] %vm5301_vm7, %v14566_v27  ;;  %v14567_v11 = vmax.f32 %v14535_v30, 0.0 }
 0x4be   : > { %v16550_v32 = vpop.f32.mrb[16].mxu0  ;;  %14596 = vst.msk [vmem:[%s17542_s16 + $0x60] sm:$0xff] %vm5301_vm7, %v14564_v43  ;;  %v14565_v45 = vmax.f32 %v14533_v36, 0.0  ;;  %v16234_v21 = vpop.f32.mrb[16].mxu1 }
 0x4bf   : > { %v14418_v54 = vpop.f32.mrb[17].mxu0  ;;  %14599 = vst.msk [vmem:[%s17542_s16 + $0x78] sm:$0xff] %vm5301_vm7, %v14567_v11  ;;  %v9421_v53 = vpop.f32.mrb[17].mxu1  ;;  %v16580_v13 = vadd.f32 %v16550_v32, %v16234_v21 }
 0x4c0   : > { %v16551_v49 = vpop.f32.mrb[18].mxu0  ;;  %14597 = vst.msk [vmem:[%s17542_s16 + $0x68] sm:$0xff] %vm5301_vm7, %v14565_v45  ;;  %v16235_v9 = vpop.f32.mrb[18].mxu1  ;;  %v16581_v62 = vadd.f32 %v14418_v54, %v9421_v53 }
 0x4c1   : > { %v14421_v29 = vpop.f32.mrb[19].mxu0  ;;  %v14538_v57 = vadd.f32 %v16580_v13, %v21407_v22  ;;  %v9424_v56 = vpop.f32.mrb[19].mxu1  ;;  %v16582_v5 = vadd.f32 %v16551_v49, %v16235_v9 }
 0x4c2   : > { %v14536_v19 = vadd.f32 %v16581_v62, %v21407_v22  ;;  %v16583_v24 = vadd.f32 %v14421_v29, %v9424_v56 }
 0x4c3   : > { %v14570_v2 = vmax.f32 %v14538_v57, 0.0  ;;  %v14539_v50 = vadd.f32 %v16582_v5, %v21407_v22 }
 0x4c4   : > { %v14568_v46 = vmax.f32 %v14536_v19, 0.0  ;;  %v14537_v15 = vadd.f32 %v16583_v24, %v21407_v22 }
 0x4c5   : > { %14602 = vst.msk [vmem:[%s17542_s16 + $0x90] sm:$0xff] %vm5301_vm7, %v14570_v2  ;;  %v14571_v0 = vmax.f32 %v14539_v50, 0.0 }
 0x4c6   : > { %v16554_v28 = vpop.f32.mrb[20].mxu0  ;;  %14600 = vst.msk [vmem:[%s17542_s16 + $0x80] sm:$0xff] %vm5301_vm7, %v14568_v46  ;;  %v14569_v59 = vmax.f32 %v14537_v15, 0.0  ;;  %v16238_v35 = vpop.f32.mrb[20].mxu1 }
 0x4c7   : > { %v14434_v3 = vpop.f32.mrb[21].mxu0  ;;  %14603 = vst.msk [vmem:[%s17542_s16 + $0x98] sm:$0xff] %vm5301_vm7, %v14571_v0  ;;  %v9437_v47 = vpop.f32.mrb[21].mxu1  ;;  %v16584_v39 = vadd.f32 %v16554_v28, %v16238_v35 }
 0x4c8   : > { %v16555_v25 = vpop.f32.mrb[22].mxu0  ;;  %14601 = vst.msk [vmem:[%s17542_s16 + $0x88] sm:$0xff] %vm5301_vm7, %v14569_v59  ;;  %v16239_v42 = vpop.f32.mrb[22].mxu1  ;;  %v16585_v31 = vadd.f32 %v14434_v3, %v9437_v47 }
 0x4c9   : > { %v14437_v1 = vpop.f32.mrb[23].mxu0  ;;  %v14542_v37 = vadd.f32 %v16584_v39, %v21407_v22  ;;  %v9440_v4 = vpop.f32.mrb[23].mxu1  ;;  %v16586_v52 = vadd.f32 %v16555_v25, %v16239_v42 }
 0x4ca   : > { %v14540_v44 = vadd.f32 %v16585_v31, %v21407_v22  ;;  %v16587_v33 = vadd.f32 %v14437_v1, %v9440_v4 }
 0x4cb   : > { %v14574_v58 = vmax.f32 %v14542_v37, 0.0  ;;  %v14543_v10 = vadd.f32 %v16586_v52, %v21407_v22 }
 0x4cc   : > { %v14572_v63 = vmax.f32 %v14540_v44, 0.0  ;;  %v14541_v40 = vadd.f32 %v16587_v33, %v21407_v22 }
 0x4cd   : > { %14606 = vst.msk [vmem:[%s17542_s16 + $0xb0] sm:$0xff] %vm5301_vm7, %v14574_v58  ;;  %v14575_v8 = vmax.f32 %v14543_v10, 0.0 }
 0x4ce   : > { %v16558_v14 = vpop.f32.mrb[24].mxu0  ;;  %14604 = vst.msk [vmem:[%s17542_s16 + $0xa0] sm:$0xff] %vm5301_vm7, %v14572_v63  ;;  %v14573_v41 = vmax.f32 %v14541_v40, 0.0  ;;  %v16242_v6 = vpop.f32.mrb[24].mxu1 }
 0x4cf   : > { %v14450_v38 = vpop.f32.mrb[25].mxu0  ;;  %14607 = vst.msk [vmem:[%s17542_s16 + $0xb8] sm:$0xff] %vm5301_vm7, %v14575_v8  ;;  %v9453_v48 = vpop.f32.mrb[25].mxu1  ;;  %v16588_v26 = vadd.f32 %v16558_v14, %v16242_v6 }
 0x4d0   : > { %v16559_v7 = vpop.f32.mrb[26].mxu0  ;;  %14605 = vst.msk [vmem:[%s17542_s16 + $0xa8] sm:$0xff] %vm5301_vm7, %v14573_v41  ;;  %v16243_v61 = vpop.f32.mrb[26].mxu1  ;;  %v16589_v12 = vadd.f32 %v14450_v38, %v9453_v48 }
 0x4d1   : > { %v14453_v23 = vpop.f32.mrb[27].mxu0  ;;  %v14546_v16 = vadd.f32 %v16588_v26, %v21407_v22  ;;  %v9456_v51 = vpop.f32.mrb[27].mxu1  ;;  %v16590_v20 = vadd.f32 %v16559_v7, %v16243_v61 }
 0x4d2   : > { %v14544_v60 = vadd.f32 %v16589_v12, %v21407_v22  ;;  %v16591_v17 = vadd.f32 %v14453_v23, %v9456_v51 }
 0x4d3   : > { %v14578_v55 = vmax.f32 %v14546_v16, 0.0  ;;  %v14547_v34 = vadd.f32 %v16590_v20, %v21407_v22 }
 0x4d4   : > { %v14576_v18 = vmax.f32 %v14544_v60, 0.0  ;;  %v14545_v27 = vadd.f32 %v16591_v17, %v21407_v22 }
 0x4d5   : > { %14610 = vst.msk [vmem:[%s17542_s16 + $0xd0] sm:$0xff] %vm5301_vm7, %v14578_v55  ;;  %v14579_v30 = vmax.f32 %v14547_v34, 0.0 }
 0x4d6   : > { %v16562_v43 = vpop.f32.mrb[28].mxu0  ;;  %14608 = vst.msk [vmem:[%s17542_s16 + $0xc0] sm:$0xff] %vm5301_vm7, %v14576_v18  ;;  %v14577_v36 = vmax.f32 %v14545_v27, 0.0  ;;  %v16246_v11 = vpop.f32.mrb[28].mxu1 }
 0x4d7   : > { %v14466_v32 = vpop.f32.mrb[29].mxu0  ;;  %14611 = vst.msk [vmem:[%s17542_s16 + $0xd8] sm:$0xff] %vm5301_vm7, %v14579_v30  ;;  %v9469_v45 = vpop.f32.mrb[29].mxu1  ;;  %v16592_v21 = vadd.f32 %v16562_v43, %v16246_v11 }
 0x4d8   : > { %v16563_v54 = vpop.f32.mrb[30].mxu0  ;;  %14609 = vst.msk [vmem:[%s17542_s16 + $0xc8] sm:$0xff] %vm5301_vm7, %v14577_v36  ;;  %v16247_v53 = vpop.f32.mrb[30].mxu1  ;;  %v16593_v13 = vadd.f32 %v14466_v32, %v9469_v45 }
 0x4d9   : > { %v14469_v49 = vpop.f32.mrb[31].mxu0  ;;  %v14550_v9 = vadd.f32 %v16592_v21, %v21407_v22  ;;  %v9472_v62 = vpop.f32.mrb[31].mxu1  ;;  %v16594_v29 = vadd.f32 %v16563_v54, %v16247_v53 }
 0x4da   : > { %v14548_v57 = vadd.f32 %v16593_v13, %v21407_v22  ;;  %v16595_v56 = vadd.f32 %v14469_v49, %v9472_v62 }
 0x4db   : > { %v14582_v5 = vmax.f32 %v14550_v9, 0.0  ;;  %v14551_v19 = vadd.f32 %v16594_v29, %v21407_v22 }
 0x4dc   : > { %v14580_v24 = vmax.f32 %v14548_v57, 0.0  ;;  %v14549_v2 = vadd.f32 %v16595_v56, %v21407_v22 }
 0x4dd   : > { %14614 = vst.msk [vmem:[%s17542_s16 + $0xf0] sm:$0xff] %vm5301_vm7, %v14582_v5  ;;  %v14583_v50 = vmax.f32 %v14551_v19, 0.0 }
 0x4de   : > { %14612 = vst.msk [vmem:[%s17542_s16 + $0xe0] sm:$0xff] %vm5301_vm7, %v14580_v24  ;;  %v14581_v46 = vmax.f32 %v14549_v2, 0.0 }
 0x4df   : > { %14615 = vst.msk [vmem:[%s17542_s16 + $0xf8] sm:$0xff] %vm5301_vm7, %v14583_v50 }
 0x4e0   : > { %14613 = vst.msk [vmem:[%s17542_s16 + $0xe8] sm:$0xff] %vm5301_vm7, %v14581_v46 }
 0x4e1 PF: > { %s16_s23 = sadd.s32 1, %s17465_s23   ;;  %s21712_s21 = smov %s17461_s22 }
 0x4e2   : > { %p13_p5 = scmp.ge.s32.totalorder %s16_s23, 4   ;;  %s21713_s22 = smov %s21715_s24 }
 0x4e4   :  { %15 = sbr.rel (!%p13_p5) target bundleno = 2 (0x2), region = 186 }
 0x4eb   :  { %14648 = vsyncmov [#allocation5] }
 0x4ee   :  { %s14649_s17 = vpop.sfrf %14648 }
 0x4ef   :  { %p15574_p6 = scmp.ne.s32.totalorder %s14649_s17, 0 }
 0x4f1   :  { %14653 = shalt.err (%p15574_p6)  }
 0x4f2   :  { %14655 = vsyncmov [#allocation5 + $0x1] }
 0x4f5   :  { %s14656_s18 = vpop.sfrf %14655 }
 0x4f6   :  { %p15575_p7 = scmp.ne.s32.totalorder %s14656_s18, 0 }
 0x4f8   :  { %14660 = shalt.err (%p15575_p7)  }

</bundles_post_ra>
